<compile_context>
chip_gen: v6e
topology: v6e:2x2x1
jax: 0.10.0
libtpu: 0.0.40
codegen_flags: <defaults>
</compile_context>

<pallas_src>
import jax
import jax.numpy as jnp
from jax.experimental import pallas as pl
from jax.experimental.pallas import tpu as pltpu

# (kernel_size, stride, padding) for conv1..conv5 -- static metadata.
CONV_CFG = ((5, 2, 2), (5, 2, 2), (5, 2, 2), (3, 2, 1), (3, 2, 1))
BN_EPS = 1e-5


# ----------------------------------------------------------------------------
# Pallas kernels
# ----------------------------------------------------------------------------
def _elu(x):
    # ELU(alpha=1).  Negative branch: expm1(x) = tanh(x/2) * (exp(x) + 1),
    # exact and accurate near 0 (review: avoid exp(x)-1), using only exp/tanh
    # which are guaranteed Mosaic lowerings (EUP slot, essentially free here).
    xm = jnp.minimum(x, 0.0)
    expm1 = jnp.tanh(0.5 * xm) * (jnp.exp(xm) + 1.0)
    return jnp.where(x > 0, x, expm1)


def _conv_gemm_kernel(x_ref, w_ref, b_ref, s_ref, t_ref, o_ref):
    """o = post_scale * ELU(x @ w + b) + post_shift   (f32 accumulation)."""
    acc = jnp.dot(x_ref[...], w_ref[...], preferred_element_type=jnp.float32)
    acc = _elu(acc + b_ref[...])
    acc = acc * s_ref[...] + t_ref[...]      # next layer's BatchNorm (eval) affine
    o_ref[...] = acc.astype(o_ref.dtype)


def _mlp_head_kernel(x_ref, w1_ref, b1_ref, w2_ref, b2_ref, o_ref):
    """o = ELU(x @ w1 + b1) @ w2 + b2    (fused fc1 + fc2)."""
    h = jnp.dot(x_ref[...], w1_ref[...], preferred_element_type=jnp.float32)
    h = _elu(h + b1_ref[...])
    y = jnp.dot(h.astype(jnp.bfloat16), w2_ref[...],
                preferred_element_type=jnp.float32)
    o_ref[...] = (y + b2_ref[...]).astype(o_ref.dtype)


# ----------------------------------------------------------------------------
# Kernel wrappers
# ----------------------------------------------------------------------------
def _pick_tm(m):
    if m <= 1024:
        return m                       # single block, no M padding
    for tm in (512, 256, 128):
        if m % tm == 0:
            return tm
    return 128                         # generic fallback (pads M)


def fused_gemm_bn_elu(rows, w, b, post_scale, post_shift):
    """post_scale * ELU(rows @ w + b) + post_shift, tiled over rows (MXU)."""
    m, k = rows.shape
    n = w.shape[1]
    tm = _pick_tm(m)
    m_pad = ((m + tm - 1) // tm) * tm
    if m_pad != m:                     # never hit for this model at batch 2
        rows = jnp.zeros((m_pad, k), rows.dtype).at[:m].set(rows)
    out = pl.pallas_call(
        _conv_gemm_kernel,
        out_shape=jax.ShapeDtypeStruct((m_pad, n), jnp.bfloat16),
        grid_spec=pltpu.PrefetchScalarGridSpec(
            num_scalar_prefetch=0,
            grid=(m_pad // tm,),
            in_specs=[
                pl.BlockSpec((tm, k), lambda i: (i, 0)),   # im2col rows tile
                pl.BlockSpec((k, n), lambda i: (0, 0)),    # GEMM weights (bf16)
                pl.BlockSpec((1, n), lambda i: (0, 0)),    # conv bias (f32)
                pl.BlockSpec((1, n), lambda i: (0, 0)),    # next-BN scale
                pl.BlockSpec((1, n), lambda i: (0, 0)),    # next-BN shift
            ],
            out_specs=pl.BlockSpec((tm, n), lambda i: (i, 0)),
        ),
        compiler_params=pltpu.CompilerParams(
            dimension_semantics=("parallel",)),
    )(rows, w, b, post_scale, post_shift)
    return out[:m] if m_pad != m else out


def mlp_head(x, w1, b1, w2, b2):
    m, k = x.shape
    n1 = w1.shape[1]
    n2 = w2.shape[1]
    return pl.pallas_call(
        _mlp_head_kernel,
        out_shape=jax.ShapeDtypeStruct((m, n2), jnp.float32),
        grid_spec=pltpu.PrefetchScalarGridSpec(
            num_scalar_prefetch=0,
            grid=(1,),
            in_specs=[
                pl.BlockSpec((m, k), lambda i: (0, 0)),
                pl.BlockSpec((k, n1), lambda i: (0, 0)),
                pl.BlockSpec((1, n1), lambda i: (0, 0)),
                pl.BlockSpec((n1, n2), lambda i: (0, 0)),
                pl.BlockSpec((1, n2), lambda i: (0, 0)),
            ],
            out_specs=pl.BlockSpec((m, n2), lambda i: (0, 0)),
        ),
    )(x, w1, b1, w2, b2)


# ----------------------------------------------------------------------------
# im2col glue (NHWC, bf16) -- no NCHW<->NHWC transposes between layers
# ----------------------------------------------------------------------------
def _im2col_nhwc(x, k, stride, pad):
    """x: (N, H, W, C) -> rows (N*OH*OW, K*K*C), tap-major to match weights."""
    n, h, w, c = x.shape
    xp = jnp.pad(x, ((0, 0), (pad, pad), (pad, pad), (0, 0)))
    oh = (h + 2 * pad - k) // stride + 1
    ow = (w + 2 * pad - k) // stride + 1
    taps = []
    for i in range(k):
        for j in range(k):
            taps.append(xp[:, i:i + stride * oh:stride,
                              j:j + stride * ow:stride, :])
    col = jnp.concatenate(taps, axis=-1)           # (N, OH, OW, K*K*C)
    return col.reshape(n * oh * ow, k * k * c), oh, ow
    # TODO(synk): moving this tap gather into the Pallas kernel (strided pl.ds
    # reads of the padded NHWC tile) would remove the remaining XLA glue /
    # HBM round trip for conv1 & conv2.


# ----------------------------------------------------------------------------
# Parameters: raw (PyTorch-like) init + one-time prep (hoisted out of forward)
# ----------------------------------------------------------------------------
def _conv_init(key, oc, ic, k):
    k1, k2 = jax.random.split(key)
    bound = 1.0 / jnp.sqrt(ic * k * k)
    w = jax.random.uniform(k1, (oc, ic, k, k), jnp.float32, -bound, bound)
    b = jax.random.uniform(k2, (oc,), jnp.float32, -bound, bound)
    return w, b


def _linear_init(key, out_f, in_f):
    k1, k2 = jax.random.split(key)
    bound = 1.0 / jnp.sqrt(in_f)
    w = jax.random.uniform(k1, (out_f, in_f), jnp.float32, -bound, bound)
    b = jax.random.uniform(k2, (out_f,), jnp.float32, -bound, bound)
    return w, b


def _bn_init(key, c):
    k1, k2, k3, k4 = jax.random.split(key, 4)
    gamma = 1.0 + 0.1 * jax.random.normal(k1, (c,), jnp.float32)
    beta = 0.1 * jax.random.normal(k2, (c,), jnp.float32)
    rmean = 0.1 * jax.random.normal(k3, (c,), jnp.float32)
    rvar = jax.random.uniform(k4, (c,), jnp.float32, 0.5, 1.5)
    return gamma, beta, rmean, rvar


def init_raw_params(key):
    ks = jax.random.split(key, 12)
    return {
        "bn1": _bn_init(ks[0], 3),
        "conv1": _conv_init(ks[1], 24, 3, 5),
        "bn2": _bn_init(ks[2], 24),
        "conv2": _conv_init(ks[3], 32, 24, 5),
        "bn3": _bn_init(ks[4], 32),
        "conv3": _conv_init(ks[5], 40, 32, 5),
        "bn4": _bn_init(ks[6], 40),
        "conv4": _conv_init(ks[7], 48, 40, 3),
        "bn5": _bn_init(ks[8], 48),
        "conv5": _conv_init(ks[9], 48, 48, 3),
        "fc1": _linear_init(ks[10], 100, 48 * 3 * 4),
        "fc2": _linear_init(ks[11], 3, 100),
    }


def _bn_affine(bn):
    gamma, beta, mean, var = bn
    scale = gamma / jnp.sqrt(var + BN_EPS)
    return scale, beta - mean * scale


def prepare_params(raw):
    """One-time prep: GEMM-layout bf16 weights, fused BN affines, fc1 permute."""
    in_scale, in_shift = _bn_affine(raw["bn1"])
    post_bns = ["bn2", "bn3", "bn4", "bn5", None]
    convs = []
    for idx, post in enumerate(post_bns):
        w, b = raw["conv%d" % (idx + 1)]
        oc, ic, kh, kw = w.shape
        # (OC, IC, KH, KW) -> (KH*KW*IC, OC): matches NHWC tap-major im2col.
        w2d = jnp.transpose(w, (2, 3, 1, 0)).reshape(kh * kw * ic, oc)
        if post is None:
            ps = jnp.ones((1, oc), jnp.float32)
            pt = jnp.zeros((1, oc), jnp.float32)
        else:
            s, t = _bn_affine(raw[post])
            ps, pt = s.reshape(1, oc), t.reshape(1, oc)
        convs.append({
            "w": w2d.astype(jnp.bfloat16),
            "b": b.reshape(1, oc).astype(jnp.float32),
            "post_scale": ps.astype(jnp.float32),
            "post_shift": pt.astype(jnp.float32),
        })
    # fc1 rows permuted from torch (C,H,W)-flatten order to NHWC flatten order.
    w1, b1 = raw["fc1"]
    w1p = (w1.T.reshape(48, 3, 4, 100).transpose(1, 2, 0, 3)
           .reshape(48 * 3 * 4, 100))
    w2, b2 = raw["fc2"]
    head = {
        "w1": w1p.astype(jnp.bfloat16),
        "b1": b1.reshape(1, -1).astype(jnp.float32),
        "w2": w2.T.astype(jnp.bfloat16),
        "b2": b2.reshape(1, -1).astype(jnp.float32),
    }
    return {"in_scale": in_scale, "in_shift": in_shift,
            "convs": convs, "head": head}


# ----------------------------------------------------------------------------
# Forward pass (eval mode: dropout = identity, BN uses running stats)
# ----------------------------------------------------------------------------
def net_forward(prep, x_nchw):
    x = jnp.transpose(x_nchw, (0, 2, 3, 1))              # NCHW -> NHWC (once)
    x = x * prep["in_scale"] + prep["in_shift"]          # norm1 (eval), pre-pad
    x = x.astype(jnp.bfloat16)
    n = x.shape[0]
    for layer, (k, stride, pad) in zip(prep["convs"], CONV_CFG):
        rows, oh, ow = _im2col_nhwc(x, k, stride, pad)
        out = fused_gemm_bn_elu(rows, layer["w"], layer["b"],
                                layer["post_scale"], layer["post_shift"])
        x = out.reshape(n, oh, ow, layer["w"].shape[1])  # stay NHWC
    # Dropout2d / Dropout are identity in eval mode.
    flat = x.reshape(n, -1)          # NHWC flatten; fc1 rows are pre-permuted
    h = prep["head"]
    return mlp_head(flat, h["w1"], h["b1"], h["w2"], h["b2"])


# ----------------------------------------------------------------------------
# Pure-JAX f32 reference (PyTorch semantics, eval mode) for validation
# ----------------------------------------------------------------------------
def reference_forward(raw, x):
    def elu(v):
        return jnp.where(v > 0, v, jnp.expm1(jnp.minimum(v, 0.0)))
    for idx, (k, stride, pad) in enumerate(CONV_CFG):
        scale, shift = _bn_affine(raw["bn%d" % (idx + 1)])
        x = x * scale[None, :, None, None] + shift[None, :, None, None]
        w, b = raw["conv%d" % (idx + 1)]
        x = jax.lax.conv_general_dilated(
            x, w, window_strides=(stride, stride),
            padding=((pad, pad), (pad, pad)),
            dimension_numbers=("NCHW", "OIHW", "NCHW"))
        x = elu(x + b[None, :, None, None])
    x = x.reshape(x.shape[0], -1)                         # (C,H,W) flatten
    w1, b1 = raw["fc1"]
    w2, b2 = raw["fc2"]
    x = elu(x @ w1.T + b1)
    return x @ w2.T + b2


if __name__ == "__main__":
    key = jax.random.PRNGKey(0)
    pkey, xkey = jax.random.split(key)
    raw = init_raw_params(pkey)
    prep = prepare_params(raw)          # one-time weight prep (hoisted)

    # fc1 expects 48*3*4 features after five stride-2 convs => 96x128 input.
    x = jax.random.normal(xkey, (2, 3, 96, 128), jnp.float32)

    fwd = jax.jit(net_forward)
    out = jax.block_until_ready(fwd(prep, x))

    assert out.shape == (2, 3), out.shape
    assert bool(jnp.all(jnp.isfinite(out)))

    # Validate vs. pure-JAX f32 reference (bf16 MXU operands => loose tolerance).
    ref = jax.block_until_ready(reference_forward(raw, x))
    rel_err = float(jnp.max(jnp.abs(out - ref)) / (jnp.max(jnp.abs(ref)) + 1e-6))
    assert rel_err < 0.15, rel_err

    print("KERNEL_OK")
</pallas_src>

<mosaic_0001>
module attributes {stable_mosaic.version = 11 : i64} {
  func.func @_conv_gemm_kernel(%arg0: i32, %arg1: memref<512x75xbf16, #tpu.memory_space<vmem>>, %arg2: memref<75x24xbf16, #tpu.memory_space<vmem>>, %arg3: memref<1x24xf32, #tpu.memory_space<vmem>>, %arg4: memref<1x24xf32, #tpu.memory_space<vmem>>, %arg5: memref<1x24xf32, #tpu.memory_space<vmem>>, %arg6: memref<512x24xbf16, #tpu.memory_space<vmem>>) attributes {dimension_semantics = [#tpu.dimension_semantics<parallel>], iteration_bounds = array<i64: 12>, scalar_prefetch = 0 : i64, scratch_operands = 0 : i64, tpu.core_type = #tpu.core_type<tc>, window_params = [{transform_indices = @transform_0, window_bounds = array<i64: 512, 75>}, {pipeline_mode = #tpu.pipeline_mode<synchronous>, transform_indices = @transform_1, window_bounds = array<i64: 75, 24>}, {pipeline_mode = #tpu.pipeline_mode<synchronous>, transform_indices = @transform_2, window_bounds = array<i64: 1, 24>}, {pipeline_mode = #tpu.pipeline_mode<synchronous>, transform_indices = @transform_3, window_bounds = array<i64: 1, 24>}, {pipeline_mode = #tpu.pipeline_mode<synchronous>, transform_indices = @transform_4, window_bounds = array<i64: 1, 24>}, {transform_indices = @transform_5, window_bounds = array<i64: 512, 24>}]} {
    %c0 = arith.constant 0 : index
    %c0_0 = arith.constant 0 : index
    %0 = vector.load %arg1[%c0, %c0_0] : memref<512x75xbf16, #tpu.memory_space<vmem>>, vector<512x75xbf16>
    %c0_1 = arith.constant 0 : index
    %c0_2 = arith.constant 0 : index
    %1 = vector.load %arg2[%c0_1, %c0_2] : memref<75x24xbf16, #tpu.memory_space<vmem>>, vector<75x24xbf16>
    %cst = arith.constant dense<0.000000e+00> : vector<512x24xf32>
    %2 = tpu.matmul %0, %1, %cst {dimension_numbers = #tpu.dot_dimension_numbers<[1], [0], [0], [1], [0, 0, 1, 1], [], []>} : vector<512x75xbf16>, vector<75x24xbf16>, vector<512x24xf32> -> vector<512x24xf32>
    %c0_3 = arith.constant 0 : index
    %c0_4 = arith.constant 0 : index
    %3 = vector.load %arg3[%c0_3, %c0_4] : memref<1x24xf32, #tpu.memory_space<vmem>>, vector<1x24xf32>
    %4 = vector.broadcast %3 : vector<1x24xf32> to vector<512x24xf32>
    %5 = arith.addf %2, %4 : vector<512x24xf32>
    %cst_5 = arith.constant 0.000000e+00 : f32
    %6 = vector.broadcast %cst_5 : f32 to vector<512x24xf32>
    %7 = arith.minimumf %5, %6 : vector<512x24xf32>
    %cst_6 = arith.constant 5.000000e-01 : f32
    %8 = vector.broadcast %cst_6 : f32 to vector<512x24xf32>
    %9 = arith.mulf %8, %7 : vector<512x24xf32>
    %10 = math.tanh %9 : vector<512x24xf32>
    %11 = math.exp %7 : vector<512x24xf32>
    %cst_7 = arith.constant 1.000000e+00 : f32
    %12 = vector.broadcast %cst_7 : f32 to vector<512x24xf32>
    %13 = arith.addf %11, %12 : vector<512x24xf32>
    %14 = arith.mulf %10, %13 : vector<512x24xf32>
    %cst_8 = arith.constant 0.000000e+00 : f32
    %15 = vector.broadcast %cst_8 : f32 to vector<512x24xf32>
    %16 = arith.cmpf ogt, %5, %15 : vector<512x24xf32>
    %17 = arith.select %16, %5, %14 : vector<512x24xi1>, vector<512x24xf32>
    %c0_9 = arith.constant 0 : index
    %c0_10 = arith.constant 0 : index
    %18 = vector.load %arg4[%c0_9, %c0_10] : memref<1x24xf32, #tpu.memory_space<vmem>>, vector<1x24xf32>
    %19 = vector.broadcast %18 : vector<1x24xf32> to vector<512x24xf32>
    %20 = arith.mulf %17, %19 : vector<512x24xf32>
    %c0_11 = arith.constant 0 : index
    %c0_12 = arith.constant 0 : index
    %21 = vector.load %arg5[%c0_11, %c0_12] : memref<1x24xf32, #tpu.memory_space<vmem>>, vector<1x24xf32>
    %22 = vector.broadcast %21 : vector<1x24xf32> to vector<512x24xf32>
    %23 = arith.addf %20, %22 : vector<512x24xf32>
    %24 = arith.truncf %23 : vector<512x24xf32> to vector<512x24xbf16>
    %c0_13 = arith.constant 0 : index
    %c0_14 = arith.constant 0 : index
    %25 = vector.load %arg6[%c0_13, %c0_14] : memref<512x24xbf16, #tpu.memory_space<vmem>>, vector<512x24xbf16>
    tpu.vector_store %arg6[%c0_13, %c0_14], %24 {strides = array<i32>} : memref<512x24xbf16, #tpu.memory_space<vmem>>, vector<512x24xbf16>,
    return
  }
  func.func @transform_0(%arg0: i32) -> (i32, i32) {
    %c0_i32 = arith.constant 0 : i32
    %c0_i32_0 = arith.constant 0 : i32
    return %arg0, %c0_i32 : i32, i32
  }
  func.func @transform_1(%arg0: i32) -> (i32, i32) {
    %c0_i32 = arith.constant 0 : i32
    %c0_i32_0 = arith.constant 0 : i32
    %c0_i32_1 = arith.constant 0 : i32
    return %c0_i32, %c0_i32_0 : i32, i32
  }
  func.func @transform_2(%arg0: i32) -> (i32, i32) {
    %c0_i32 = arith.constant 0 : i32
    %c0_i32_0 = arith.constant 0 : i32
    %c0_i32_1 = arith.constant 0 : i32
    return %c0_i32, %c0_i32_0 : i32, i32
  }
  func.func @transform_3(%arg0: i32) -> (i32, i32) {
    %c0_i32 = arith.constant 0 : i32
    %c0_i32_0 = arith.constant 0 : i32
    %c0_i32_1 = arith.constant 0 : i32
    return %c0_i32, %c0_i32_0 : i32, i32
  }
  func.func @transform_4(%arg0: i32) -> (i32, i32) {
    %c0_i32 = arith.constant 0 : i32
    %c0_i32_0 = arith.constant 0 : i32
    %c0_i32_1 = arith.constant 0 : i32
    return %c0_i32, %c0_i32_0 : i32, i32
  }
  func.func @transform_5(%arg0: i32) -> (i32, i32) {
    %c0_i32 = arith.constant 0 : i32
    %c0_i32_0 = arith.constant 0 : i32
    return %arg0, %c0_i32 : i32, i32
  }
}

module attributes {stable_mosaic.version = 11 : i64} {
  func.func @_conv_gemm_kernel(%arg0: i32, %arg1: memref<512x600xbf16, #tpu.memory_space<vmem>>, %arg2: memref<600x32xbf16, #tpu.memory_space<vmem>>, %arg3: memref<1x32xf32, #tpu.memory_space<vmem>>, %arg4: memref<1x32xf32, #tpu.memory_space<vmem>>, %arg5: memref<1x32xf32, #tpu.memory_space<vmem>>, %arg6: memref<512x32xbf16, #tpu.memory_space<vmem>>) attributes {dimension_semantics = [#tpu.dimension_semantics<parallel>], iteration_bounds = array<i64: 3>, scalar_prefetch = 0 : i64, scratch_operands = 0 : i64, tpu.core_type = #tpu.core_type<tc>, window_params = [{transform_indices = @transform_0, window_bounds = array<i64: 512, 600>}, {pipeline_mode = #tpu.pipeline_mode<synchronous>, transform_indices = @transform_1, window_bounds = array<i64: 600, 32>}, {pipeline_mode = #tpu.pipeline_mode<synchronous>, transform_indices = @transform_2, window_bounds = array<i64: 1, 32>}, {pipeline_mode = #tpu.pipeline_mode<synchronous>, transform_indices = @transform_3, window_bounds = array<i64: 1, 32>}, {pipeline_mode = #tpu.pipeline_mode<synchronous>, transform_indices = @transform_4, window_bounds = array<i64: 1, 32>}, {transform_indices = @transform_5, window_bounds = array<i64: 512, 32>}]} {
    %c0 = arith.constant 0 : index
    %c0_0 = arith.constant 0 : index
    %0 = vector.load %arg1[%c0, %c0_0] : memref<512x600xbf16, #tpu.memory_space<vmem>>, vector<512x600xbf16>
    %c0_1 = arith.constant 0 : index
    %c0_2 = arith.constant 0 : index
    %1 = vector.load %arg2[%c0_1, %c0_2] : memref<600x32xbf16, #tpu.memory_space<vmem>>, vector<600x32xbf16>
    %cst = arith.constant dense<0.000000e+00> : vector<512x32xf32>
    %2 = tpu.matmul %0, %1, %cst {dimension_numbers = #tpu.dot_dimension_numbers<[1], [0], [0], [1], [0, 0, 1, 1], [], []>} : vector<512x600xbf16>, vector<600x32xbf16>, vector<512x32xf32> -> vector<512x32xf32>
    %c0_3 = arith.constant 0 : index
    %c0_4 = arith.constant 0 : index
    %3 = vector.load %arg3[%c0_3, %c0_4] : memref<1x32xf32, #tpu.memory_space<vmem>>, vector<1x32xf32>
    %4 = vector.broadcast %3 : vector<1x32xf32> to vector<512x32xf32>
    %5 = arith.addf %2, %4 : vector<512x32xf32>
    %cst_5 = arith.constant 0.000000e+00 : f32
    %6 = vector.broadcast %cst_5 : f32 to vector<512x32xf32>
    %7 = arith.minimumf %5, %6 : vector<512x32xf32>
    %cst_6 = arith.constant 5.000000e-01 : f32
    %8 = vector.broadcast %cst_6 : f32 to vector<512x32xf32>
    %9 = arith.mulf %8, %7 : vector<512x32xf32>
    %10 = math.tanh %9 : vector<512x32xf32>
    %11 = math.exp %7 : vector<512x32xf32>
    %cst_7 = arith.constant 1.000000e+00 : f32
    %12 = vector.broadcast %cst_7 : f32 to vector<512x32xf32>
    %13 = arith.addf %11, %12 : vector<512x32xf32>
    %14 = arith.mulf %10, %13 : vector<512x32xf32>
    %cst_8 = arith.constant 0.000000e+00 : f32
    %15 = vector.broadcast %cst_8 : f32 to vector<512x32xf32>
    %16 = arith.cmpf ogt, %5, %15 : vector<512x32xf32>
    %17 = arith.select %16, %5, %14 : vector<512x32xi1>, vector<512x32xf32>
    %c0_9 = arith.constant 0 : index
    %c0_10 = arith.constant 0 : index
    %18 = vector.load %arg4[%c0_9, %c0_10] : memref<1x32xf32, #tpu.memory_space<vmem>>, vector<1x32xf32>
    %19 = vector.broadcast %18 : vector<1x32xf32> to vector<512x32xf32>
    %20 = arith.mulf %17, %19 : vector<512x32xf32>
    %c0_11 = arith.constant 0 : index
    %c0_12 = arith.constant 0 : index
    %21 = vector.load %arg5[%c0_11, %c0_12] : memref<1x32xf32, #tpu.memory_space<vmem>>, vector<1x32xf32>
    %22 = vector.broadcast %21 : vector<1x32xf32> to vector<512x32xf32>
    %23 = arith.addf %20, %22 : vector<512x32xf32>
    %24 = arith.truncf %23 : vector<512x32xf32> to vector<512x32xbf16>
    %c0_13 = arith.constant 0 : index
    %c0_14 = arith.constant 0 : index
    %25 = vector.load %arg6[%c0_13, %c0_14] : memref<512x32xbf16, #tpu.memory_space<vmem>>, vector<512x32xbf16>
    tpu.vector_store %arg6[%c0_13, %c0_14], %24 {strides = array<i32>} : memref<512x32xbf16, #tpu.memory_space<vmem>>, vector<512x32xbf16>,
    return
  }
  func.func @transform_0(%arg0: i32) -> (i32, i32) {
    %c0_i32 = arith.constant 0 : i32
    %c0_i32_0 = arith.constant 0 : i32
    return %arg0, %c0_i32 : i32, i32
  }
  func.func @transform_1(%arg0: i32) -> (i32, i32) {
    %c0_i32 = arith.constant 0 : i32
    %c0_i32_0 = arith.constant 0 : i32
    %c0_i32_1 = arith.constant 0 : i32
    return %c0_i32, %c0_i32_0 : i32, i32
  }
  func.func @transform_2(%arg0: i32) -> (i32, i32) {
    %c0_i32 = arith.constant 0 : i32
    %c0_i32_0 = arith.constant 0 : i32
    %c0_i32_1 = arith.constant 0 : i32
    return %c0_i32, %c0_i32_0 : i32, i32
  }
  func.func @transform_3(%arg0: i32) -> (i32, i32) {
    %c0_i32 = arith.constant 0 : i32
    %c0_i32_0 = arith.constant 0 : i32
    %c0_i32_1 = arith.constant 0 : i32
    return %c0_i32, %c0_i32_0 : i32, i32
  }
  func.func @transform_4(%arg0: i32) -> (i32, i32) {
    %c0_i32 = arith.constant 0 : i32
    %c0_i32_0 = arith.constant 0 : i32
    %c0_i32_1 = arith.constant 0 : i32
    return %c0_i32, %c0_i32_0 : i32, i32
  }
  func.func @transform_5(%arg0: i32) -> (i32, i32) {
    %c0_i32 = arith.constant 0 : i32
    %c0_i32_0 = arith.constant 0 : i32
    return %arg0, %c0_i32 : i32, i32
  }
}

module attributes {stable_mosaic.version = 11 : i64} {
  func.func @_conv_gemm_kernel(%arg0: i32, %arg1: memref<384x800xbf16, #tpu.memory_space<vmem>>, %arg2: memref<800x40xbf16, #tpu.memory_space<vmem>>, %arg3: memref<1x40xf32, #tpu.memory_space<vmem>>, %arg4: memref<1x40xf32, #tpu.memory_space<vmem>>, %arg5: memref<1x40xf32, #tpu.memory_space<vmem>>, %arg6: memref<384x40xbf16, #tpu.memory_space<vmem>>) attributes {dimension_semantics = [#tpu.dimension_semantics<parallel>], iteration_bounds = array<i64: 1>, scalar_prefetch = 0 : i64, scratch_operands = 0 : i64, tpu.core_type = #tpu.core_type<tc>, window_params = [{transform_indices = @transform_0, window_bounds = array<i64: 384, 800>}, {pipeline_mode = #tpu.pipeline_mode<synchronous>, transform_indices = @transform_1, window_bounds = array<i64: 800, 40>}, {pipeline_mode = #tpu.pipeline_mode<synchronous>, transform_indices = @transform_2, window_bounds = array<i64: 1, 40>}, {pipeline_mode = #tpu.pipeline_mode<synchronous>, transform_indices = @transform_3, window_bounds = array<i64: 1, 40>}, {pipeline_mode = #tpu.pipeline_mode<synchronous>, transform_indices = @transform_4, window_bounds = array<i64: 1, 40>}, {transform_indices = @transform_5, window_bounds = array<i64: 384, 40>}]} {
    %c0 = arith.constant 0 : index
    %c0_0 = arith.constant 0 : index
    %0 = vector.load %arg1[%c0, %c0_0] : memref<384x800xbf16, #tpu.memory_space<vmem>>, vector<384x800xbf16>
    %c0_1 = arith.constant 0 : index
    %c0_2 = arith.constant 0 : index
    %1 = vector.load %arg2[%c0_1, %c0_2] : memref<800x40xbf16, #tpu.memory_space<vmem>>, vector<800x40xbf16>
    %cst = arith.constant dense<0.000000e+00> : vector<384x40xf32>
    %2 = tpu.matmul %0, %1, %cst {dimension_numbers = #tpu.dot_dimension_numbers<[1], [0], [0], [1], [0, 0, 1, 1], [], []>} : vector<384x800xbf16>, vector<800x40xbf16>, vector<384x40xf32> -> vector<384x40xf32>
    %c0_3 = arith.constant 0 : index
    %c0_4 = arith.constant 0 : index
    %3 = vector.load %arg3[%c0_3, %c0_4] : memref<1x40xf32, #tpu.memory_space<vmem>>, vector<1x40xf32>
    %4 = vector.broadcast %3 : vector<1x40xf32> to vector<384x40xf32>
    %5 = arith.addf %2, %4 : vector<384x40xf32>
    %cst_5 = arith.constant 0.000000e+00 : f32
    %6 = vector.broadcast %cst_5 : f32 to vector<384x40xf32>
    %7 = arith.minimumf %5, %6 : vector<384x40xf32>
    %cst_6 = arith.constant 5.000000e-01 : f32
    %8 = vector.broadcast %cst_6 : f32 to vector<384x40xf32>
    %9 = arith.mulf %8, %7 : vector<384x40xf32>
    %10 = math.tanh %9 : vector<384x40xf32>
    %11 = math.exp %7 : vector<384x40xf32>
    %cst_7 = arith.constant 1.000000e+00 : f32
    %12 = vector.broadcast %cst_7 : f32 to vector<384x40xf32>
    %13 = arith.addf %11, %12 : vector<384x40xf32>
    %14 = arith.mulf %10, %13 : vector<384x40xf32>
    %cst_8 = arith.constant 0.000000e+00 : f32
    %15 = vector.broadcast %cst_8 : f32 to vector<384x40xf32>
    %16 = arith.cmpf ogt, %5, %15 : vector<384x40xf32>
    %17 = arith.select %16, %5, %14 : vector<384x40xi1>, vector<384x40xf32>
    %c0_9 = arith.constant 0 : index
    %c0_10 = arith.constant 0 : index
    %18 = vector.load %arg4[%c0_9, %c0_10] : memref<1x40xf32, #tpu.memory_space<vmem>>, vector<1x40xf32>
    %19 = vector.broadcast %18 : vector<1x40xf32> to vector<384x40xf32>
    %20 = arith.mulf %17, %19 : vector<384x40xf32>
    %c0_11 = arith.constant 0 : index
    %c0_12 = arith.constant 0 : index
    %21 = vector.load %arg5[%c0_11, %c0_12] : memref<1x40xf32, #tpu.memory_space<vmem>>, vector<1x40xf32>
    %22 = vector.broadcast %21 : vector<1x40xf32> to vector<384x40xf32>
    %23 = arith.addf %20, %22 : vector<384x40xf32>
    %24 = arith.truncf %23 : vector<384x40xf32> to vector<384x40xbf16>
    %c0_13 = arith.constant 0 : index
    %c0_14 = arith.constant 0 : index
    %25 = vector.load %arg6[%c0_13, %c0_14] : memref<384x40xbf16, #tpu.memory_space<vmem>>, vector<384x40xbf16>
    tpu.vector_store %arg6[%c0_13, %c0_14], %24 {strides = array<i32>} : memref<384x40xbf16, #tpu.memory_space<vmem>>, vector<384x40xbf16>,
    return
  }
  func.func @transform_0(%arg0: i32) -> (i32, i32) {
    %c0_i32 = arith.constant 0 : i32
    %c0_i32_0 = arith.constant 0 : i32
    return %arg0, %c0_i32 : i32, i32
  }
  func.func @transform_1(%arg0: i32) -> (i32, i32) {
    %c0_i32 = arith.constant 0 : i32
    %c0_i32_0 = arith.constant 0 : i32
    %c0_i32_1 = arith.constant 0 : i32
    return %c0_i32, %c0_i32_0 : i32, i32
  }
  func.func @transform_2(%arg0: i32) -> (i32, i32) {
    %c0_i32 = arith.constant 0 : i32
    %c0_i32_0 = arith.constant 0 : i32
    %c0_i32_1 = arith.constant 0 : i32
    return %c0_i32, %c0_i32_0 : i32, i32
  }
  func.func @transform_3(%arg0: i32) -> (i32, i32) {
    %c0_i32 = arith.constant 0 : i32
    %c0_i32_0 = arith.constant 0 : i32
    %c0_i32_1 = arith.constant 0 : i32
    return %c0_i32, %c0_i32_0 : i32, i32
  }
  func.func @transform_4(%arg0: i32) -> (i32, i32) {
    %c0_i32 = arith.constant 0 : i32
    %c0_i32_0 = arith.constant 0 : i32
    %c0_i32_1 = arith.constant 0 : i32
    return %c0_i32, %c0_i32_0 : i32, i32
  }
  func.func @transform_5(%arg0: i32) -> (i32, i32) {
    %c0_i32 = arith.constant 0 : i32
    %c0_i32_0 = arith.constant 0 : i32
    return %arg0, %c0_i32 : i32, i32
  }
}

module attributes {stable_mosaic.version = 11 : i64} {
  func.func @_conv_gemm_kernel(%arg0: i32, %arg1: memref<96x360xbf16, #tpu.memory_space<vmem>>, %arg2: memref<360x48xbf16, #tpu.memory_space<vmem>>, %arg3: memref<1x48xf32, #tpu.memory_space<vmem>>, %arg4: memref<1x48xf32, #tpu.memory_space<vmem>>, %arg5: memref<1x48xf32, #tpu.memory_space<vmem>>, %arg6: memref<96x48xbf16, #tpu.memory_space<vmem>>) attributes {dimension_semantics = [#tpu.dimension_semantics<parallel>], iteration_bounds = array<i64: 1>, scalar_prefetch = 0 : i64, scratch_operands = 0 : i64, tpu.core_type = #tpu.core_type<tc>, window_params = [{transform_indices = @transform_0, window_bounds = array<i64: 96, 360>}, {pipeline_mode = #tpu.pipeline_mode<synchronous>, transform_indices = @transform_1, window_bounds = array<i64: 360, 48>}, {pipeline_mode = #tpu.pipeline_mode<synchronous>, transform_indices = @transform_2, window_bounds = array<i64: 1, 48>}, {pipeline_mode = #tpu.pipeline_mode<synchronous>, transform_indices = @transform_3, window_bounds = array<i64: 1, 48>}, {pipeline_mode = #tpu.pipeline_mode<synchronous>, transform_indices = @transform_4, window_bounds = array<i64: 1, 48>}, {transform_indices = @transform_5, window_bounds = array<i64: 96, 48>}]} {
    %c0 = arith.constant 0 : index
    %c0_0 = arith.constant 0 : index
    %0 = vector.load %arg1[%c0, %c0_0] : memref<96x360xbf16, #tpu.memory_space<vmem>>, vector<96x360xbf16>
    %c0_1 = arith.constant 0 : index
    %c0_2 = arith.constant 0 : index
    %1 = vector.load %arg2[%c0_1, %c0_2] : memref<360x48xbf16, #tpu.memory_space<vmem>>, vector<360x48xbf16>
    %cst = arith.constant dense<0.000000e+00> : vector<96x48xf32>
    %2 = tpu.matmul %0, %1, %cst {dimension_numbers = #tpu.dot_dimension_numbers<[1], [0], [0], [1], [0, 0, 1, 1], [], []>} : vector<96x360xbf16>, vector<360x48xbf16>, vector<96x48xf32> -> vector<96x48xf32>
    %c0_3 = arith.constant 0 : index
    %c0_4 = arith.constant 0 : index
    %3 = vector.load %arg3[%c0_3, %c0_4] : memref<1x48xf32, #tpu.memory_space<vmem>>, vector<1x48xf32>
    %4 = vector.broadcast %3 : vector<1x48xf32> to vector<96x48xf32>
    %5 = arith.addf %2, %4 : vector<96x48xf32>
    %cst_5 = arith.constant 0.000000e+00 : f32
    %6 = vector.broadcast %cst_5 : f32 to vector<96x48xf32>
    %7 = arith.minimumf %5, %6 : vector<96x48xf32>
    %cst_6 = arith.constant 5.000000e-01 : f32
    %8 = vector.broadcast %cst_6 : f32 to vector<96x48xf32>
    %9 = arith.mulf %8, %7 : vector<96x48xf32>
    %10 = math.tanh %9 : vector<96x48xf32>
    %11 = math.exp %7 : vector<96x48xf32>
    %cst_7 = arith.constant 1.000000e+00 : f32
    %12 = vector.broadcast %cst_7 : f32 to vector<96x48xf32>
    %13 = arith.addf %11, %12 : vector<96x48xf32>
    %14 = arith.mulf %10, %13 : vector<96x48xf32>
    %cst_8 = arith.constant 0.000000e+00 : f32
    %15 = vector.broadcast %cst_8 : f32 to vector<96x48xf32>
    %16 = arith.cmpf ogt, %5, %15 : vector<96x48xf32>
    %17 = arith.select %16, %5, %14 : vector<96x48xi1>, vector<96x48xf32>
    %c0_9 = arith.constant 0 : index
    %c0_10 = arith.constant 0 : index
    %18 = vector.load %arg4[%c0_9, %c0_10] : memref<1x48xf32, #tpu.memory_space<vmem>>, vector<1x48xf32>
    %19 = vector.broadcast %18 : vector<1x48xf32> to vector<96x48xf32>
    %20 = arith.mulf %17, %19 : vector<96x48xf32>
    %c0_11 = arith.constant 0 : index
    %c0_12 = arith.constant 0 : index
    %21 = vector.load %arg5[%c0_11, %c0_12] : memref<1x48xf32, #tpu.memory_space<vmem>>, vector<1x48xf32>
    %22 = vector.broadcast %21 : vector<1x48xf32> to vector<96x48xf32>
    %23 = arith.addf %20, %22 : vector<96x48xf32>
    %24 = arith.truncf %23 : vector<96x48xf32> to vector<96x48xbf16>
    %c0_13 = arith.constant 0 : index
    %c0_14 = arith.constant 0 : index
    %25 = vector.load %arg6[%c0_13, %c0_14] : memref<96x48xbf16, #tpu.memory_space<vmem>>, vector<96x48xbf16>
    tpu.vector_store %arg6[%c0_13, %c0_14], %24 {strides = array<i32>} : memref<96x48xbf16, #tpu.memory_space<vmem>>, vector<96x48xbf16>,
    return
  }
  func.func @transform_0(%arg0: i32) -> (i32, i32) {
    %c0_i32 = arith.constant 0 : i32
    %c0_i32_0 = arith.constant 0 : i32
    return %arg0, %c0_i32 : i32, i32
  }
  func.func @transform_1(%arg0: i32) -> (i32, i32) {
    %c0_i32 = arith.constant 0 : i32
    %c0_i32_0 = arith.constant 0 : i32
    %c0_i32_1 = arith.constant 0 : i32
    return %c0_i32, %c0_i32_0 : i32, i32
  }
  func.func @transform_2(%arg0: i32) -> (i32, i32) {
    %c0_i32 = arith.constant 0 : i32
    %c0_i32_0 = arith.constant 0 : i32
    %c0_i32_1 = arith.constant 0 : i32
    return %c0_i32, %c0_i32_0 : i32, i32
  }
  func.func @transform_3(%arg0: i32) -> (i32, i32) {
    %c0_i32 = arith.constant 0 : i32
    %c0_i32_0 = arith.constant 0 : i32
    %c0_i32_1 = arith.constant 0 : i32
    return %c0_i32, %c0_i32_0 : i32, i32
  }
  func.func @transform_4(%arg0: i32) -> (i32, i32) {
    %c0_i32 = arith.constant 0 : i32
    %c0_i32_0 = arith.constant 0 : i32
    %c0_i32_1 = arith.constant 0 : i32
    return %c0_i32, %c0_i32_0 : i32, i32
  }
  func.func @transform_5(%arg0: i32) -> (i32, i32) {
    %c0_i32 = arith.constant 0 : i32
    %c0_i32_0 = arith.constant 0 : i32
    return %arg0, %c0_i32 : i32, i32
  }
}

module attributes {stable_mosaic.version = 11 : i64} {
  func.func @_conv_gemm_kernel(%arg0: i32, %arg1: memref<24x432xbf16, #tpu.memory_space<vmem>>, %arg2: memref<432x48xbf16, #tpu.memory_space<vmem>>, %arg3: memref<1x48xf32, #tpu.memory_space<vmem>>, %arg4: memref<1x48xf32, #tpu.memory_space<vmem>>, %arg5: memref<1x48xf32, #tpu.memory_space<vmem>>, %arg6: memref<24x48xbf16, #tpu.memory_space<vmem>>) attributes {dimension_semantics = [#tpu.dimension_semantics<parallel>], iteration_bounds = array<i64: 1>, scalar_prefetch = 0 : i64, scratch_operands = 0 : i64, tpu.core_type = #tpu.core_type<tc>, window_params = [{transform_indices = @transform_0, window_bounds = array<i64: 24, 432>}, {pipeline_mode = #tpu.pipeline_mode<synchronous>, transform_indices = @transform_1, window_bounds = array<i64: 432, 48>}, {pipeline_mode = #tpu.pipeline_mode<synchronous>, transform_indices = @transform_2, window_bounds = array<i64: 1, 48>}, {pipeline_mode = #tpu.pipeline_mode<synchronous>, transform_indices = @transform_3, window_bounds = array<i64: 1, 48>}, {pipeline_mode = #tpu.pipeline_mode<synchronous>, transform_indices = @transform_4, window_bounds = array<i64: 1, 48>}, {transform_indices = @transform_5, window_bounds = array<i64: 24, 48>}]} {
    %c0 = arith.constant 0 : index
    %c0_0 = arith.constant 0 : index
    %0 = vector.load %arg1[%c0, %c0_0] : memref<24x432xbf16, #tpu.memory_space<vmem>>, vector<24x432xbf16>
    %c0_1 = arith.constant 0 : index
    %c0_2 = arith.constant 0 : index
    %1 = vector.load %arg2[%c0_1, %c0_2] : memref<432x48xbf16, #tpu.memory_space<vmem>>, vector<432x48xbf16>
    %cst = arith.constant dense<0.000000e+00> : vector<24x48xf32>
    %2 = tpu.matmul %0, %1, %cst {dimension_numbers = #tpu.dot_dimension_numbers<[1], [0], [0], [1], [0, 0, 1, 1], [], []>} : vector<24x432xbf16>, vector<432x48xbf16>, vector<24x48xf32> -> vector<24x48xf32>
    %c0_3 = arith.constant 0 : index
    %c0_4 = arith.constant 0 : index
    %3 = vector.load %arg3[%c0_3, %c0_4] : memref<1x48xf32, #tpu.memory_space<vmem>>, vector<1x48xf32>
    %4 = vector.broadcast %3 : vector<1x48xf32> to vector<24x48xf32>
    %5 = arith.addf %2, %4 : vector<24x48xf32>
    %cst_5 = arith.constant 0.000000e+00 : f32
    %6 = vector.broadcast %cst_5 : f32 to vector<24x48xf32>
    %7 = arith.minimumf %5, %6 : vector<24x48xf32>
    %cst_6 = arith.constant 5.000000e-01 : f32
    %8 = vector.broadcast %cst_6 : f32 to vector<24x48xf32>
    %9 = arith.mulf %8, %7 : vector<24x48xf32>
    %10 = math.tanh %9 : vector<24x48xf32>
    %11 = math.exp %7 : vector<24x48xf32>
    %cst_7 = arith.constant 1.000000e+00 : f32
    %12 = vector.broadcast %cst_7 : f32 to vector<24x48xf32>
    %13 = arith.addf %11, %12 : vector<24x48xf32>
    %14 = arith.mulf %10, %13 : vector<24x48xf32>
    %cst_8 = arith.constant 0.000000e+00 : f32
    %15 = vector.broadcast %cst_8 : f32 to vector<24x48xf32>
    %16 = arith.cmpf ogt, %5, %15 : vector<24x48xf32>
    %17 = arith.select %16, %5, %14 : vector<24x48xi1>, vector<24x48xf32>
    %c0_9 = arith.constant 0 : index
    %c0_10 = arith.constant 0 : index
    %18 = vector.load %arg4[%c0_9, %c0_10] : memref<1x48xf32, #tpu.memory_space<vmem>>, vector<1x48xf32>
    %19 = vector.broadcast %18 : vector<1x48xf32> to vector<24x48xf32>
    %20 = arith.mulf %17, %19 : vector<24x48xf32>
    %c0_11 = arith.constant 0 : index
    %c0_12 = arith.constant 0 : index
    %21 = vector.load %arg5[%c0_11, %c0_12] : memref<1x48xf32, #tpu.memory_space<vmem>>, vector<1x48xf32>
    %22 = vector.broadcast %21 : vector<1x48xf32> to vector<24x48xf32>
    %23 = arith.addf %20, %22 : vector<24x48xf32>
    %24 = arith.truncf %23 : vector<24x48xf32> to vector<24x48xbf16>
    %c0_13 = arith.constant 0 : index
    %c0_14 = arith.constant 0 : index
    %25 = vector.load %arg6[%c0_13, %c0_14] : memref<24x48xbf16, #tpu.memory_space<vmem>>, vector<24x48xbf16>
    tpu.vector_store %arg6[%c0_13, %c0_14], %24 {strides = array<i32>} : memref<24x48xbf16, #tpu.memory_space<vmem>>, vector<24x48xbf16>,
    return
  }
  func.func @transform_0(%arg0: i32) -> (i32, i32) {
    %c0_i32 = arith.constant 0 : i32
    %c0_i32_0 = arith.constant 0 : i32
    return %arg0, %c0_i32 : i32, i32
  }
  func.func @transform_1(%arg0: i32) -> (i32, i32) {
    %c0_i32 = arith.constant 0 : i32
    %c0_i32_0 = arith.constant 0 : i32
    %c0_i32_1 = arith.constant 0 : i32
    return %c0_i32, %c0_i32_0 : i32, i32
  }
  func.func @transform_2(%arg0: i32) -> (i32, i32) {
    %c0_i32 = arith.constant 0 : i32
    %c0_i32_0 = arith.constant 0 : i32
    %c0_i32_1 = arith.constant 0 : i32
    return %c0_i32, %c0_i32_0 : i32, i32
  }
  func.func @transform_3(%arg0: i32) -> (i32, i32) {
    %c0_i32 = arith.constant 0 : i32
    %c0_i32_0 = arith.constant 0 : i32
    %c0_i32_1 = arith.constant 0 : i32
    return %c0_i32, %c0_i32_0 : i32, i32
  }
  func.func @transform_4(%arg0: i32) -> (i32, i32) {
    %c0_i32 = arith.constant 0 : i32
    %c0_i32_0 = arith.constant 0 : i32
    %c0_i32_1 = arith.constant 0 : i32
    return %c0_i32, %c0_i32_0 : i32, i32
  }
  func.func @transform_5(%arg0: i32) -> (i32, i32) {
    %c0_i32 = arith.constant 0 : i32
    %c0_i32_0 = arith.constant 0 : i32
    return %arg0, %c0_i32 : i32, i32
  }
}

module attributes {stable_mosaic.version = 11 : i64} {
  func.func @_mlp_head_kernel(%arg0: i32, %arg1: memref<2x576xbf16, #tpu.memory_space<vmem>>, %arg2: memref<576x100xbf16, #tpu.memory_space<vmem>>, %arg3: memref<1x100xf32, #tpu.memory_space<vmem>>, %arg4: memref<100x3xbf16, #tpu.memory_space<vmem>>, %arg5: memref<1x3xf32, #tpu.memory_space<vmem>>, %arg6: memref<2x3xf32, #tpu.memory_space<vmem>>) attributes {dimension_semantics = [#tpu.dimension_semantics<arbitrary>], iteration_bounds = array<i64: 1>, scalar_prefetch = 0 : i64, scratch_operands = 0 : i64, tpu.core_type = #tpu.core_type<tc>, window_params = [{pipeline_mode = #tpu.pipeline_mode<synchronous>, transform_indices = @transform_0, window_bounds = array<i64: 2, 576>}, {pipeline_mode = #tpu.pipeline_mode<synchronous>, transform_indices = @transform_1, window_bounds = array<i64: 576, 100>}, {pipeline_mode = #tpu.pipeline_mode<synchronous>, transform_indices = @transform_2, window_bounds = array<i64: 1, 100>}, {pipeline_mode = #tpu.pipeline_mode<synchronous>, transform_indices = @transform_3, window_bounds = array<i64: 100, 3>}, {pipeline_mode = #tpu.pipeline_mode<synchronous>, transform_indices = @transform_4, window_bounds = array<i64: 1, 3>}, {pipeline_mode = #tpu.pipeline_mode<synchronous>, transform_indices = @transform_5, window_bounds = array<i64: 2, 3>}]} {
    %c0 = arith.constant 0 : index
    %c0_0 = arith.constant 0 : index
    %0 = vector.load %arg1[%c0, %c0_0] : memref<2x576xbf16, #tpu.memory_space<vmem>>, vector<2x576xbf16>
    %c0_1 = arith.constant 0 : index
    %c0_2 = arith.constant 0 : index
    %1 = vector.load %arg2[%c0_1, %c0_2] : memref<576x100xbf16, #tpu.memory_space<vmem>>, vector<576x100xbf16>
    %cst = arith.constant dense<0.000000e+00> : vector<2x100xf32>
    %2 = tpu.matmul %0, %1, %cst {dimension_numbers = #tpu.dot_dimension_numbers<[1], [0], [0], [1], [0, 0, 1, 1], [], []>} : vector<2x576xbf16>, vector<576x100xbf16>, vector<2x100xf32> -> vector<2x100xf32>
    %c0_3 = arith.constant 0 : index
    %c0_4 = arith.constant 0 : index
    %3 = vector.load %arg3[%c0_3, %c0_4] : memref<1x100xf32, #tpu.memory_space<vmem>>, vector<1x100xf32>
    %4 = vector.broadcast %3 : vector<1x100xf32> to vector<2x100xf32>
    %5 = arith.addf %2, %4 : vector<2x100xf32>
    %cst_5 = arith.constant 0.000000e+00 : f32
    %6 = vector.broadcast %cst_5 : f32 to vector<2x100xf32>
    %7 = arith.minimumf %5, %6 : vector<2x100xf32>
    %cst_6 = arith.constant 5.000000e-01 : f32
    %8 = vector.broadcast %cst_6 : f32 to vector<2x100xf32>
    %9 = arith.mulf %8, %7 : vector<2x100xf32>
    %10 = math.tanh %9 : vector<2x100xf32>
    %11 = math.exp %7 : vector<2x100xf32>
    %cst_7 = arith.constant 1.000000e+00 : f32
    %12 = vector.broadcast %cst_7 : f32 to vector<2x100xf32>
    %13 = arith.addf %11, %12 : vector<2x100xf32>
    %14 = arith.mulf %10, %13 : vector<2x100xf32>
    %cst_8 = arith.constant 0.000000e+00 : f32
    %15 = vector.broadcast %cst_8 : f32 to vector<2x100xf32>
    %16 = arith.cmpf ogt, %5, %15 : vector<2x100xf32>
    %17 = arith.select %16, %5, %14 : vector<2x100xi1>, vector<2x100xf32>
    %18 = arith.truncf %17 : vector<2x100xf32> to vector<2x100xbf16>
    %c0_9 = arith.constant 0 : index
    %c0_10 = arith.constant 0 : index
    %19 = vector.load %arg4[%c0_9, %c0_10] : memref<100x3xbf16, #tpu.memory_space<vmem>>, vector<100x3xbf16>
    %cst_11 = arith.constant dense<0.000000e+00> : vector<2x3xf32>
    %20 = tpu.matmul %18, %19, %cst_11 {dimension_numbers = #tpu.dot_dimension_numbers<[1], [0], [0], [1], [0, 0, 1, 1], [], []>} : vector<2x100xbf16>, vector<100x3xbf16>, vector<2x3xf32> -> vector<2x3xf32>
    %c0_12 = arith.constant 0 : index
    %c0_13 = arith.constant 0 : index
    %21 = vector.load %arg5[%c0_12, %c0_13] : memref<1x3xf32, #tpu.memory_space<vmem>>, vector<1x3xf32>
    %22 = vector.broadcast %21 : vector<1x3xf32> to vector<2x3xf32>
    %23 = arith.addf %20, %22 : vector<2x3xf32>
    %c0_14 = arith.constant 0 : index
    %c0_15 = arith.constant 0 : index
    %24 = vector.load %arg6[%c0_14, %c0_15] : memref<2x3xf32, #tpu.memory_space<vmem>>, vector<2x3xf32>
    tpu.vector_store %arg6[%c0_14, %c0_15], %23 {strides = array<i32>} : memref<2x3xf32, #tpu.memory_space<vmem>>, vector<2x3xf32>,
    return
  }
  func.func @transform_0(%arg0: i32) -> (i32, i32) {
    %c0_i32 = arith.constant 0 : i32
    %c0_i32_0 = arith.constant 0 : i32
    %c0_i32_1 = arith.constant 0 : i32
    return %c0_i32, %c0_i32_0 : i32, i32
  }
  func.func @transform_1(%arg0: i32) -> (i32, i32) {
    %c0_i32 = arith.constant 0 : i32
    %c0_i32_0 = arith.constant 0 : i32
    %c0_i32_1 = arith.constant 0 : i32
    return %c0_i32, %c0_i32_0 : i32, i32
  }
  func.func @transform_2(%arg0: i32) -> (i32, i32) {
    %c0_i32 = arith.constant 0 : i32
    %c0_i32_0 = arith.constant 0 : i32
    %c0_i32_1 = arith.constant 0 : i32
    return %c0_i32, %c0_i32_0 : i32, i32
  }
  func.func @transform_3(%arg0: i32) -> (i32, i32) {
    %c0_i32 = arith.constant 0 : i32
    %c0_i32_0 = arith.constant 0 : i32
    %c0_i32_1 = arith.constant 0 : i32
    return %c0_i32, %c0_i32_0 : i32, i32
  }
  func.func @transform_4(%arg0: i32) -> (i32, i32) {
    %c0_i32 = arith.constant 0 : i32
    %c0_i32_0 = arith.constant 0 : i32
    %c0_i32_1 = arith.constant 0 : i32
    return %c0_i32, %c0_i32_0 : i32, i32
  }
  func.func @transform_5(%arg0: i32) -> (i32, i32) {
    %c0_i32 = arith.constant 0 : i32
    %c0_i32_0 = arith.constant 0 : i32
    %c0_i32_1 = arith.constant 0 : i32
    return %c0_i32, %c0_i32_0 : i32, i32
  }
}

</mosaic_0001>

<bundles_post_ra>
// kernel: net_forward.6
= control target key start
LH: loop header
LB: loop body
LE: loop exit
PB: predicated region body
PF: predicated region fallthrough
CT: control target
= control target key end

     0   :  { %s2663_s18 = smov 0   ;;  %s3532_s0 = inlined_call_operand.vmem [shape: bf16[6144,75], index: 0, kind: input, shape index: {}]   ;;  %s3533_s1 = inlined_call_operand.vmem [shape: bf16[75,24], index: 1, kind: input, shape index: {}]   ;;  %s3534_s2 = inlined_call_operand.vmem [shape: f32[1,24], index: 2, kind: input, shape index: {}]   ;;  %s3535_s3 = inlined_call_operand.vmem [shape: f32[1,24], index: 3, kind: input, shape index: {}]   ;;  %s3536_s4 = inlined_call_operand.vmem [shape: f32[1,24], index: 4, kind: input, shape index: {}]   ;;  %s3537_s5 = inlined_call_operand.vmem [shape: bf16[6144,24], index: 5, kind: output, shape index: {}]  }
   0x1 LB: > { %s1987_s19 = sadd.s32 4294967295, %s2630_s18   ;;  %p1991_p0 = scmp.ge.s32.totalorder %s2630_s18, 1  ;;  %s2630_s18 = sphi %s2663_s18, %s15_s18  }
   0x2   : > { %p188_p1 = scmp.lt.s32.totalorder %s2630_s18, 13 }
   0x4   : > { %p189_p2 = pnand %p1991_p0, %p188_p1 }
   0x5   : > { %s1992_s24 = sshll.u32 (!%p189_p2), %s1987_s19, 6 }
   0x6   : > { %192 = sbr.rel (%p189_p2) target bundleno = 453 (0x1c5), region = 40  ;;  %p217_p3 = scmp.lt.s32.totalorder (!%p189_p2), %s1992_s24, 767 }
   0xb   : > { %v2328_v0 = vld [vmem:[%s3533_s1 + $0x20] sm:$0x3f]   ;;  %vm596_vm0 = vcmask 1044480   ;;  %vm597_vm1 = vcmask 1045504   ;;  %v2632_v1 = vmov 65535   ;;  %v2329_v4 = vld [vmem:[%s3533_s1 + $0x18] sm:$0xff]  }
   0xc   : > { %v598_v2 = vsel %vm596_vm0, 4294967295, %v2632_v1  ;;  %v2330_v6 = vld [vmem:[%s3533_s1 + $0x10] sm:$0xff]   ;;  %s3539_s24 = smov (!%p217_p3, %s1992_s24), 767  ;;  %v2331_v7 = vld [vmem:[%s3533_s1 + $0x8] sm:$0xff]   ;;  %vm499_vm2 = vcmask 613376   ;;  %v2332_v10 = vld [vmem:[%s3533_s1] sm:$0xff]  }
   0xd   : > { %v599_v3 = vsel %vm597_vm1, %v598_v2, 0  ;;  %s1993_s27 = sshll.u32 %s3539_s24, 2  ;;  %v2763_v41 = vld [vmem:[%s3534_s2] ss:$0 sm:$0xff]  ;;  %vm1866_vm6 = vcmask 191488  }
   0xe   : > { %v601_v5 = vand.u32 %v2328_v0, %v599_v3  ;;  %s2691_s7 = scalar_lea.vmem %s3532_s0, %s1993_s27  ;;  %s2859_s19 = scalar_lea.vmem %s3537_s5, %s1993_s27 }
   0xf   : > { %v2333_v8 = vld [vmem:[%s2691_s7] sm:$0xff]   ;;  %v2335_v11 = vld [vmem:[%s2691_s7 + $0x8] sm:$0xff]   ;;  %v2337_v13 = vld [vmem:[%s2691_s7 + $0x10] sm:$0xff]  }
  0x10   : > { %2235 = vmatprep.subr.bf16.mxu0 %v601_v5  ;;  %2309 = vmatprep.subr.bf16.mxu1 %v601_v5  ;;  %v2334_v9 = vld [vmem:[%s2691_s7 + $0x80] sm:$0xff]   ;;  %v2336_v12 = vld [vmem:[%s2691_s7 + $0x88] sm:$0xff]   ;;  %v2338_v14 = vld [vmem:[%s2691_s7 + $0x90] sm:$0xff]  }
  0x11   : > { %2236 = vmatpush3.bf16.msra.mxu0 %v601_v5  ;;  %2314 = vmatpush3.bf16.msra.mxu1 %v601_v5  ;;  %v2339_v15 = vld [vmem:[%s2691_s7 + $0x18] sm:$0xff]   ;;  %v2341_v17 = vld [vmem:[%s2691_s7 + $0x20] sm:$0xff]   ;;  %v2343_v19 = vld [vmem:[%s2691_s7 + $0x28] sm:$0xff]  }
  0x12   : > { %2237 = vmatprep.subr.bf16.mxu0 %v2329_v4  ;;  %2310 = vmatprep.subr.bf16.mxu1 %v2329_v4  ;;  %v2340_v16 = vld [vmem:[%s2691_s7 + $0x98] sm:$0xff]   ;;  %v2342_v18 = vld [vmem:[%s2691_s7 + $0xa0] sm:$0xff]   ;;  %v2344_v20 = vld [vmem:[%s2691_s7 + $0xa8] sm:$0xff]  }
  0x13   : > { %2245 = vmatprep.mubr.msk.bf16.mxu0 %vm499_vm2, %v2333_v8  ;;  %2277 = vmatprep.mubr.msk.bf16.mxu1 %vm499_vm2, %v2334_v9  ;;  %v2345_v21 = vld [vmem:[%s2691_s7 + $0x30] sm:$0xff]   ;;  %v2347_v23 = vld [vmem:[%s2691_s7 + $0x38] sm:$0xff]   ;;  %v2349_v25 = vld [vmem:[%s2691_s7 + $0x40] sm:$0xff]  }
  0x14   : > { %v2346_v22 = vld [vmem:[%s2691_s7 + $0xb0] sm:$0xff]   ;;  %v2348_v24 = vld [vmem:[%s2691_s7 + $0xb8] sm:$0xff]   ;;  %v2350_v26 = vld [vmem:[%s2691_s7 + $0xc0] sm:$0xff]  }
  0x15   : > { %2238 = vmatpush3.bf16.msra.mxu0 %v2329_v4  ;;  %2315 = vmatpush3.bf16.msra.mxu1 %v2329_v4  ;;  %v2351_v27 = vld [vmem:[%s2691_s7 + $0x48] sm:$0xff]   ;;  %v2353_v29 = vld [vmem:[%s2691_s7 + $0x50] sm:$0xff]   ;;  %v2355_v31 = vld [vmem:[%s2691_s7 + $0x58] sm:$0xff]  }
  0x16   : > { %2239 = vmatprep.subr.bf16.mxu0 %v2330_v6  ;;  %2311 = vmatprep.subr.bf16.mxu1 %v2330_v6  ;;  %v2352_v28 = vld [vmem:[%s2691_s7 + $0xc8] sm:$0xff]   ;;  %v2354_v30 = vld [vmem:[%s2691_s7 + $0xd0] sm:$0xff]   ;;  %v2356_v32 = vld [vmem:[%s2691_s7 + $0xd8] sm:$0xff]  }
  0x17   : > { %v2357_v33 = vld [vmem:[%s2691_s7 + $0x60] sm:$0xff]   ;;  %v2359_v35 = vld [vmem:[%s2691_s7 + $0x68] sm:$0xff]   ;;  %v2361_v37 = vld [vmem:[%s2691_s7 + $0x70] sm:$0xff]  }
  0x18   : > { %v2358_v34 = vld [vmem:[%s2691_s7 + $0xe0] sm:$0xff]   ;;  %v2360_v36 = vld [vmem:[%s2691_s7 + $0xe8] sm:$0xff]   ;;  %v2362_v38 = vld [vmem:[%s2691_s7 + $0xf0] sm:$0xff]  }
  0x19   : > { %2240 = vmatpush3.bf16.msra.mxu0 %v2330_v6  ;;  %2316 = vmatpush3.bf16.msra.mxu1 %v2330_v6  ;;  %v2363_v39 = vld [vmem:[%s2691_s7 + $0x78] sm:$0xff]  }
  0x1a   : > { %2241 = vmatprep.subr.bf16.mxu0 %v2331_v7  ;;  %2312 = vmatprep.subr.bf16.mxu1 %v2331_v7  ;;  %v2364_v40 = vld [vmem:[%s2691_s7 + $0xf8] sm:$0xff]  }
  0x1d   : > { %2242 = vmatpush3.bf16.msra.mxu0 %v2331_v7  ;;  %2317 = vmatpush3.bf16.msra.mxu1 %v2331_v7 }
  0x1e   : > { %2243 = vmatprep.subr.bf16.mxu0 %v2332_v10  ;;  %2313 = vmatprep.subr.bf16.mxu1 %v2332_v10 }
  0x21   : > { %2244 = vmatpush3.bf16.msra.mxu0 %v2332_v10  ;;  %2318 = vmatpush3.bf16.msra.mxu1 %v2332_v10 }
  0x24   : > { %2246 = vmatmul.mubr.msk.bf16.vlgmr.msra.gmra.mxu0 %vm499_vm2, %v2335_v11  ;;  %2278 = vmatmul.mubr.msk.bf16.vlgmr.msra.gmra.mxu1 %vm499_vm2, %v2336_v12 }
  0x25   : > { %2249 = vmatprep.mubr.msk.bf16.mxu0 %vm499_vm2, %v2337_v13  ;;  %2281 = vmatprep.mubr.msk.bf16.mxu1 %vm499_vm2, %v2338_v14 }
  0x2c   : > { %2250 = vmatmul.mubr.msk.bf16.gmra.mxu0 %vm499_vm2, %v2339_v15  ;;  %2282 = vmatmul.mubr.msk.bf16.gmra.mxu1 %vm499_vm2, %v2340_v16 }
  0x2d   : > { %2253 = vmatprep.mubr.msk.bf16.mxu0 %vm499_vm2, %v2341_v17  ;;  %2285 = vmatprep.mubr.msk.bf16.mxu1 %vm499_vm2, %v2342_v18 }
  0x34   : > { %2254 = vmatmul.mubr.msk.bf16.gmra.mxu0 %vm499_vm2, %v2343_v19  ;;  %2286 = vmatmul.mubr.msk.bf16.gmra.mxu1 %vm499_vm2, %v2344_v20 }
  0x35   : > { %2257 = vmatprep.mubr.msk.bf16.mxu0 %vm499_vm2, %v2345_v21  ;;  %2289 = vmatprep.mubr.msk.bf16.mxu1 %vm499_vm2, %v2346_v22 }
  0x3c   : > { %2258 = vmatmul.mubr.msk.bf16.gmra.mxu0 %vm499_vm2, %v2347_v23  ;;  %2290 = vmatmul.mubr.msk.bf16.gmra.mxu1 %vm499_vm2, %v2348_v24 }
  0x3d   : > { %2261 = vmatprep.mubr.msk.bf16.mxu0 %vm499_vm2, %v2349_v25  ;;  %2293 = vmatprep.mubr.msk.bf16.mxu1 %vm499_vm2, %v2350_v26 }
  0x44   : > { %2262 = vmatmul.mubr.msk.bf16.gmra.mxu0 %vm499_vm2, %v2351_v27  ;;  %2294 = vmatmul.mubr.msk.bf16.gmra.mxu1 %vm499_vm2, %v2352_v28 }
  0x45   : > { %2265 = vmatprep.mubr.msk.bf16.mxu0 %vm499_vm2, %v2353_v29  ;;  %2297 = vmatprep.mubr.msk.bf16.mxu1 %vm499_vm2, %v2354_v30 }
  0x4c   : > { %2266 = vmatmul.mubr.msk.bf16.gmra.mxu0 %vm499_vm2, %v2355_v31  ;;  %2298 = vmatmul.mubr.msk.bf16.gmra.mxu1 %vm499_vm2, %v2356_v32 }
  0x4d   : > { %2269 = vmatprep.mubr.msk.bf16.mxu0 %vm499_vm2, %v2357_v33  ;;  %2301 = vmatprep.mubr.msk.bf16.mxu1 %vm499_vm2, %v2358_v34 }
  0x54   : > { %2270 = vmatmul.mubr.msk.bf16.gmra.mxu0 %vm499_vm2, %v2359_v35  ;;  %2302 = vmatmul.mubr.msk.bf16.gmra.mxu1 %vm499_vm2, %v2360_v36 }
  0x55   : > { %2273 = vmatprep.mubr.msk.bf16.mxu0 %vm499_vm2, %v2361_v37  ;;  %2305 = vmatprep.mubr.msk.bf16.mxu1 %vm499_vm2, %v2362_v38 }
  0x5c   : > { %2274 = vmatmul.mubr.msk.bf16.gmra.mxu0 %vm499_vm2, %v2363_v39  ;;  %2306 = vmatmul.mubr.msk.bf16.gmra.mxu1 %vm499_vm2, %v2364_v40 }
  0xe4   : > { %v2247_v42 = vpop.f32.mrf.mxu0  ;;  %v2279_v43 = vpop.f32.mrf.mxu1 }
  0xe5   : > { %v2766_v44 = vadd.f32 %v2247_v42, %v2763_v41  ;;  %v2769_v45 = vadd.f32 %v2279_v43, %v2763_v41 }
  0xe6   : > { %v637_v46 = vpop.f32.mrf.mxu0  ;;  %v765_v47 = vpop.f32.mrf.mxu1 }
  0xe7   : > { %v894_v48 = vmin.f32 %v2766_v44, 0.0  ;;  %v926_v49 = vmin.f32 %v2769_v45, 0.0  ;;  %v2774_v50 = vadd.f32 %v2763_v41, %v637_v46  ;;  %v2777_v51 = vadd.f32 %v2763_v41, %v765_v47 }
  0xe8   : > { %v2248_v52 = vpop.f32.mrf.mxu0  ;;  %v2280_v53 = vpop.f32.mrf.mxu1  ;;  %vm1342_vm3 = vcmp.gt.f32.partialorder %v2766_v44, 0.0  ;;  %vm1374_vm4 = vcmp.gt.f32.partialorder %v2769_v45, 0.0 }
  0xe9   : > { %v958_v54 = vmul.f32 0.5, %v894_v48  ;;  %v1088_v55 = vmul.f32 1.442695, %v894_v48  ;;  %v990_v56 = vmul.f32 0.5, %v926_v49  ;;  %v1152_v57 = vmul.f32 1.442695, %v926_v49 }
  0xea   : > { %v892_v58 = vmin.f32 %v2774_v50, 0.0  ;;  %v924_v59 = vmin.f32 %v2777_v51, 0.0  ;;  %v640_v60 = vpop.f32.mrf.mxu0  ;;  %v768_v61 = vpop.f32.mrf.mxu1  ;;  %v2782_v62 = vadd.f32 %v2248_v52, %v2763_v41  ;;  %v2785_v63 = vadd.f32 %v2280_v53, %v2763_v41 }
  0xeb   : > { %2365 = vtanh.f32 %v958_v54  ;;  %v2788_v0 = vadd.f32 %v2763_v41, %v640_v60  ;;  %v2794_v16 = vadd.f32 %v2763_v41, %v768_v61  ;;  %vm1340_vm5 = vcmp.gt.f32.partialorder %v2774_v50, 0.0 }
  0xec   : > { %2367 = vpow2.f32 %v1088_v55  ;;  %v956_v1 = vmul.f32 0.5, %v892_v58  ;;  %v1084_v2 = vmul.f32 1.442695, %v892_v58  ;;  %v2251_v3 = vpop.f32.mrf.mxu0  ;;  %v2283_v4 = vpop.f32.mrf.mxu1  ;;  %v988_v5 = vmul.f32 0.5, %v924_v59 }
  0xed   : > { %2369 = vtanh.f32 %v990_v56  ;;  %v895_v6 = vmin.f32 %v2782_v62, 0.0  ;;  %v1148_v7 = vmul.f32 1.442695, %v924_v59  ;;  %v927_v8 = vmin.f32 %v2785_v63, 0.0  ;;  %v2828_v56 = vld [vmem:[%s3535_s3] ss:$0 sm:$0xff] }
  0xee   : > { %2371 = vpow2.f32 %v1152_v57  ;;  %v893_v9 = vmin.f32 %v2788_v0, 0.0  ;;  %v653_v11 = vpop.f32.mrf.mxu0  ;;  %v781_v14 = vpop.f32.mrf.mxu1  ;;  %v2797_v17 = vadd.f32 %v2251_v3, %v2763_v41  ;;  %v2800_v19 = vadd.f32 %v2283_v4, %v2763_v41 }
  0xef   : > { %2373 = vtanh.f32 %v956_v1  ;;  %v959_v10 = vmul.f32 0.5, %v895_v6  ;;  %v1090_v12 = vmul.f32 1.442695, %v895_v6  ;;  %v991_v13 = vmul.f32 0.5, %v927_v8  ;;  %v2837_v6 = vld [vmem:[%s3536_s4] ss:$0 sm:$0xff] }
  0xf0   : > { %2375 = vpow2.f32 %v1084_v2  ;;  %v1154_v15 = vmul.f32 1.442695, %v927_v8  ;;  %v957_v18 = vmul.f32 0.5, %v893_v9  ;;  %v2803_v20 = vadd.f32 %v2763_v41, %v653_v11  ;;  %v2252_v27 = vpop.f32.mrf.mxu0  ;;  %v2284_v28 = vpop.f32.mrf.mxu1 }
  0xf1   : > { %2377 = vtanh.f32 %v988_v5  ;;  %v925_v21 = vmin.f32 %v2794_v16, 0.0  ;;  %v898_v22 = vmin.f32 %v2797_v17, 0.0  ;;  %v2808_v23 = vadd.f32 %v2763_v41, %v781_v14 }
  0xf2   : > { %2379 = vpow2.f32 %v1148_v7  ;;  %v1086_v24 = vmul.f32 1.442695, %v893_v9  ;;  %v930_v26 = vmin.f32 %v2800_v19, 0.0  ;;  %v896_v31 = vmin.f32 %v2803_v20, 0.0  ;;  %v656_v59 = vpop.f32.mrf.mxu0  ;;  %v784_v60 = vpop.f32.mrf.mxu1 }
  0xf3   : > { %2381 = vtanh.f32 %v959_v10  ;;  %v989_v25 = vmul.f32 0.5, %v925_v21  ;;  %v1150_v29 = vmul.f32 1.442695, %v925_v21  ;;  %v962_v30 = vmul.f32 0.5, %v898_v22 }
  0xf4   : > { %2383 = vpow2.f32 %v1090_v12  ;;  %v928_v32 = vmin.f32 %v2808_v23, 0.0  ;;  %v1096_v34 = vmul.f32 1.442695, %v898_v22  ;;  %v2816_v35 = vadd.f32 %v2252_v27, %v2763_v41 }
  0xf5   : > { %2385 = vtanh.f32 %v991_v13  ;;  %v2819_v36 = vadd.f32 %v2284_v28, %v2763_v41  ;;  %v994_v38 = vmul.f32 0.5, %v930_v26  ;;  %v1160_v39 = vmul.f32 1.442695, %v930_v26 }
  0xf6   : > { %2387 = vpow2.f32 %v1154_v15  ;;  %v960_v40 = vmul.f32 0.5, %v896_v31  ;;  %v1092_v46 = vmul.f32 1.442695, %v896_v31  ;;  %v899_v47 = vmin.f32 %v2816_v35, 0.0 }
  0xf7   : > { %2389 = vtanh.f32 %v957_v18  ;;  %vm1372_vm7 = vcmp.gt.f32.partialorder %v2777_v51, 0.0  ;;  %v992_v49 = vmul.f32 0.5, %v928_v32  ;;  %v1156_v52 = vmul.f32 1.442695, %v928_v32 }
  0xf8   : > { %v2366_v33 = vpop.eup %2365  ;;  %2391 = vpow2.f32 %v1086_v24  ;;  %v931_v53 = vmin.f32 %v2819_v36, 0.0  ;;  %v963_v58 = vmul.f32 0.5, %v899_v47  ;;  %vm1343_vm8 = vcmp.gt.f32.partialorder %v2782_v62, 0.0 }
  0xf9   : > { %v2368_v37 = vpop.eup %2367  ;;  %2393 = vtanh.f32 %v989_v25  ;;  %v1098_v1 = vmul.f32 1.442695, %v899_v47  ;;  %vm1375_vm9 = vcmp.gt.f32.partialorder %v2785_v63, 0.0  ;;  %v2842_v11 = vadd.f32 %v2763_v41, %v656_v59 }
  0xfa   : > { %v2370_v42 = vpop.eup %2369  ;;  %v1214_v43 = vadd.f32 1.0, %v2368_v37  ;;  %2395 = vpow2.f32 %v1150_v29  ;;  %v995_v2 = vmul.f32 0.5, %v931_v53  ;;  %v1162_v3 = vmul.f32 1.442695, %v931_v53 }
  0xfb   : > { %v2372_v48 = vpop.eup %2371  ;;  %2397 = vtanh.f32 %v962_v30  ;;  %vm1341_vm10 = vcmp.gt.f32.partialorder %v2788_v0, 0.0  ;;  %v897_v24 = vmin.f32 %v2842_v11, 0.0  ;;  %vm1373_vm11 = vcmp.gt.f32.partialorder %v2794_v16, 0.0 }
  0xfc   : > { %v2374_v54 = vpop.eup %2373  ;;  %v1278_v55 = vmul.f32 %v2366_v33, %v1214_v43  ;;  %v1246_v57 = vadd.f32 1.0, %v2372_v48  ;;  %2399 = vpow2.f32 %v1096_v34  ;;  %vm1346_vm12 = vcmp.gt.f32.partialorder %v2797_v17, 0.0 }
  0xfd   : > { %v2376_v61 = vpop.eup %2375  ;;  %2401 = vtanh.f32 %v994_v38  ;;  %vm1378_vm13 = vcmp.gt.f32.partialorder %v2800_v19, 0.0  ;;  %v961_v53 = vmul.f32 0.5, %v897_v24  ;;  %vm1344_vm14 = vcmp.gt.f32.partialorder %v2803_v20, 0.0 }
  0xfe   : > { %v2378_v4 = vpop.eup %2377  ;;  %v1406_v5 = vsel %vm1342_vm3, %v2766_v44, %v1278_v55  ;;  %v1310_v7 = vmul.f32 %v2370_v42, %v1246_v57  ;;  %v1212_v8 = vadd.f32 1.0, %v2376_v61  ;;  %2403 = vpow2.f32 %v1160_v39 }
  0xff   : > { %v2380_v9 = vpop.eup %2379  ;;  %v1477_v10 = vmul.f32 %v2828_v56, %v1406_v5  ;;  %2405 = vtanh.f32 %v960_v40  ;;  %v2845_v44 = vadd.f32 %v2763_v41, %v784_v60  ;;  %vm1376_vm15 = vcmp.gt.f32.partialorder %v2808_v23, 0.0 }
 0x100   : > { %v2382_v12 = vpop.eup %2381  ;;  %v1438_v13 = vsel %vm1374_vm4, %v2769_v45, %v1310_v7  ;;  %v1276_v14 = vmul.f32 %v2374_v54, %v1212_v8  ;;  %v1244_v15 = vadd.f32 1.0, %v2380_v9  ;;  %2407 = vpow2.f32 %v1092_v46 }
 0x101   : > { %v2384_v18 = vpop.eup %2383  ;;  %v1548_v21 = vadd.f32 %v2837_v6, %v1477_v10  ;;  %v1509_v22 = vmul.f32 %v2828_v56, %v1438_v13  ;;  %2409 = vtanh.f32 %v992_v49  ;;  %vm1347_vm0 = vcmp.gt.f32.partialorder %v2816_v35, 0.0 }
 0x102   : > { %v2386_v25 = vpop.eup %2385  ;;  %v1404_v45 = vsel %vm1340_vm5, %v2774_v50, %v1276_v14  ;;  %v1308_v26 = vmul.f32 %v2378_v4, %v1244_v15  ;;  %v1215_v27 = vadd.f32 1.0, %v2384_v18  ;;  %2411 = vpow2.f32 %v1156_v52 }
 0x103   : > { %v2388_v28 = vpop.eup %2387  ;;  %v2136_v29 = vpack.c.bf16 %v1548_v21, %v1548_v21  ;;  %v1580_v30 = vadd.f32 %v2837_v6, %v1509_v22  ;;  %v1475_v31 = vmul.f32 %v2828_v56, %v1404_v45  ;;  %2413 = vtanh.f32 %v963_v58 }
 0x104   : > { %v2390_v32 = vpop.eup %2389  ;;  %v1436_v33 = vsel %vm1372_vm7, %v2777_v51, %v1308_v26  ;;  %v1279_v34 = vmul.f32 %v2382_v12, %v1215_v27  ;;  %v1247_v50 = vadd.f32 1.0, %v2388_v28  ;;  %2415 = vpow2.f32 %v1098_v1 }
 0x105   : > { %v2392_v37 = vpop.eup %2391  ;;  %1869 = vst.msk [vmem:[%s2859_s19 + $0x8] sm:$0xf] %vm1866_vm6, %v2136_v29  ;;  %v2168_v38 = vpack.c.bf16 %v1580_v30, %v1580_v30  ;;  %v1546_v39 = vadd.f32 %v2837_v6, %v1475_v31  ;;  %v1507_v40 = vmul.f32 %v2828_v56, %v1436_v33  ;;  %2417 = vtanh.f32 %v995_v2 }
 0x106   : > { %v2394_v42 = vpop.eup %2393  ;;  %v1407_v51 = vsel %vm1343_vm8, %v2782_v62, %v1279_v34  ;;  %v1311_v43 = vmul.f32 %v2386_v25, %v1247_v50  ;;  %v1213_v46 = vadd.f32 1.0, %v2392_v37  ;;  %2419 = vpow2.f32 %v1162_v3  ;;  %v2287_v37 = vpop.f32.mrf.mxu1 }
 0x107   : > { %v2396_v47 = vpop.eup %2395  ;;  %1901 = vst.msk [vmem:[%s2859_s19 + $0x88] sm:$0xf] %vm1866_vm6, %v2168_v38  ;;  %v2134_v48 = vpack.c.bf16 %v1546_v39, %v1546_v39  ;;  %v1578_v49 = vadd.f32 %v2837_v6, %v1507_v40  ;;  %v1478_v52 = vmul.f32 %v2828_v56, %v1407_v51  ;;  %v1094_v58 = vmul.f32 1.442695, %v897_v24 }
 0x108   : > { %v2398_v54 = vpop.eup %2397  ;;  %v1439_v62 = vsel %vm1375_vm9, %v2785_v63, %v1311_v43  ;;  %v1277_v55 = vmul.f32 %v2390_v32, %v1213_v46  ;;  %v1245_v57 = vadd.f32 1.0, %v2396_v47  ;;  %v929_v14 = vmin.f32 %v2845_v44, 0.0  ;;  %v2255_v32 = vpop.f32.mrf.mxu0 }
 0x109   : > { %v2400_v59 = vpop.eup %2399  ;;  %1867 = vst.msk [vmem:[%s2859_s19] sm:$0xf] %vm1866_vm6, %v2134_v48  ;;  %v2166_v60 = vpack.c.bf16 %v1578_v49, %v1578_v49  ;;  %v1549_v61 = vadd.f32 %v2837_v6, %v1478_v52  ;;  %v1510_v1 = vmul.f32 %v2828_v56, %v1439_v62  ;;  %2421 = vpow2.f32 %v1094_v58 }
 0x10a   : > { %v2402_v2 = vpop.eup %2401  ;;  %v1405_v3 = vsel %vm1341_vm10, %v2788_v0, %v1277_v55  ;;  %v1309_v63 = vmul.f32 %v2394_v42, %v1245_v57  ;;  %v1218_v4 = vadd.f32 1.0, %v2400_v59  ;;  %2423 = vtanh.f32 %v961_v53  ;;  %v669_v58 = vpop.f32.mrf.mxu0 }
 0x10b   : > { %v2404_v5 = vpop.eup %2403  ;;  %1899 = vst.msk [vmem:[%s2859_s19 + $0x80] sm:$0xf] %vm1866_vm6, %v2166_v60  ;;  %v2137_v7 = vpack.c.bf16 %v1549_v61, %v1549_v61  ;;  %v1581_v8 = vadd.f32 %v2837_v6, %v1510_v1  ;;  %v1476_v9 = vmul.f32 %v2828_v56, %v1405_v3  ;;  %v993_v26 = vmul.f32 0.5, %v929_v14 }
 0x10c   : > { %v2406_v10 = vpop.eup %2405  ;;  %v1437_v0 = vsel %vm1373_vm11, %v2794_v16, %v1309_v63  ;;  %v1282_v12 = vmul.f32 %v2398_v54, %v1218_v4  ;;  %v1250_v13 = vadd.f32 1.0, %v2404_v5  ;;  %v1158_v31 = vmul.f32 1.442695, %v929_v14 }
 0x10d   : > { %v2408_v15 = vpop.eup %2407  ;;  %1870 = vst.msk [vmem:[%s2859_s19 + $0xc] sm:$0xf] %vm1866_vm6, %v2137_v7  ;;  %v2169_v18 = vpack.c.bf16 %v1581_v8, %v1581_v8  ;;  %v1547_v21 = vadd.f32 %v2837_v6, %v1476_v9  ;;  %v1508_v22 = vmul.f32 %v2828_v56, %v1437_v0  ;;  %2425 = vtanh.f32 %v993_v26  ;;  %v797_v9 = vpop.f32.mrf.mxu1 }
 0x10e   : > { %v2410_v24 = vpop.eup %2409  ;;  %v1410_v16 = vsel %vm1346_vm12, %v2797_v17, %v1282_v12  ;;  %v1314_v25 = vmul.f32 %v2402_v2, %v1250_v13  ;;  %v1216_v45 = vadd.f32 1.0, %v2408_v15  ;;  %2427 = vpow2.f32 %v1158_v31  ;;  %v2256_v12 = vpop.f32.mrf.mxu0 }
 0x10f   : > { %v2412_v27 = vpop.eup %2411  ;;  %1902 = vst.msk [vmem:[%s2859_s19 + $0x8c] sm:$0xf] %vm1866_vm6, %v2169_v18  ;;  %v2135_v28 = vpack.c.bf16 %v1547_v21, %v1547_v21  ;;  %v1579_v29 = vadd.f32 %v2837_v6, %v1508_v22  ;;  %v1481_v30 = vmul.f32 %v2828_v56, %v1410_v16  ;;  %v2926_v47 = vadd.f32 %v2255_v32, %v2763_v41  ;;  %v2288_v26 = vpop.f32.mrf.mxu1 }
 0x110   : > { %v2414_v33 = vpop.eup %2413  ;;  %v1442_v34 = vsel %vm1378_vm13, %v2800_v19, %v1314_v25  ;;  %v1280_v17 = vmul.f32 %v2406_v10, %v1216_v45  ;;  %v1248_v50 = vadd.f32 1.0, %v2412_v27  ;;  %v2933_v54 = vadd.f32 %v2287_v37, %v2763_v41 }
 0x111   : > { %v2416_v38 = vpop.eup %2415  ;;  %1868 = vst.msk [vmem:[%s2859_s19 + $0x4] sm:$0xf] %vm1866_vm6, %v2135_v28  ;;  %v2167_v39 = vpack.c.bf16 %v1579_v29, %v1579_v29  ;;  %v1552_v40 = vadd.f32 %v2837_v6, %v1481_v30  ;;  %v1513_v42 = vmul.f32 %v2828_v56, %v1442_v34  ;;  %v902_v57 = vmin.f32 %v2926_v47, 0.0 }
 0x112   : > { %v2418_v51 = vpop.eup %2417  ;;  %v1408_v19 = vsel %vm1344_vm14, %v2803_v20, %v1280_v17  ;;  %v1312_v43 = vmul.f32 %v2410_v24, %v1248_v50  ;;  %v1219_v46 = vadd.f32 1.0, %v2416_v38  ;;  %vm1379_vm1 = vcmp.gt.f32.partialorder %v2819_v36, 0.0 }
 0x113   : > { %v2420_v48 = vpop.eup %2419  ;;  %1900 = vst.msk [vmem:[%s2859_s19 + $0x84] sm:$0xf] %vm1866_vm6, %v2167_v39  ;;  %v2140_v49 = vpack.c.bf16 %v1552_v40, %v1552_v40  ;;  %v1584_v52 = vadd.f32 %v2837_v6, %v1513_v42  ;;  %v1479_v53 = vmul.f32 %v2828_v56, %v1408_v19  ;;  %v1104_v3 = vmul.f32 1.442695, %v902_v57  ;;  %v800_v40 = vpop.f32.mrf.mxu1 }
 0x114   : > { %v1440_v20 = vsel %vm1376_vm15, %v2808_v23, %v1312_v43  ;;  %v1283_v62 = vmul.f32 %v2414_v33, %v1219_v46  ;;  %v1251_v55 = vadd.f32 1.0, %v2420_v48  ;;  %v966_v23 = vmul.f32 0.5, %v902_v57  ;;  %v672_v33 = vpop.f32.mrf.mxu0 }
 0x115   : > { %1873 = vst.msk [vmem:[%s2859_s19 + $0x18] sm:$0xf] %vm1866_vm6, %v2140_v49  ;;  %v2172_v59 = vpack.c.bf16 %v1584_v52, %v1584_v52  ;;  %v1550_v60 = vadd.f32 %v2837_v6, %v1479_v53  ;;  %v1511_v61 = vmul.f32 %v2828_v56, %v1440_v20  ;;  %v934_v8 = vmin.f32 %v2933_v54, 0.0 }
 0x116   : > { %v1411_v1 = vsel %vm1347_vm0, %v2816_v35, %v1283_v62  ;;  %v1315_v2 = vmul.f32 %v2418_v51, %v1251_v55  ;;  %v2422_v63 = vpop.eup %2421  ;;  %vm1345_vm2 = vcmp.gt.f32.partialorder %v2842_v11, 0.0  ;;  %2429 = vtanh.f32 %v966_v23  ;;  %v2259_v48 = vpop.f32.mrf.mxu0 }
 0x117   : > { %1905 = vst.msk [vmem:[%s2859_s19 + $0x98] sm:$0xf] %vm1866_vm6, %v2172_v59  ;;  %v2138_v4 = vpack.c.bf16 %v1550_v60, %v1550_v60  ;;  %v1582_v5 = vadd.f32 %v2837_v6, %v1511_v61  ;;  %v1482_v7 = vmul.f32 %v2828_v56, %v1411_v1  ;;  %v2424_v10 = vpop.eup %2423  ;;  %v1217_v35 = vadd.f32 1.0, %v2422_v63 }
 0x118   : > { %v1443_v0 = vsel %vm1379_vm1, %v2819_v36, %v1315_v2  ;;  %2431 = vpow2.f32 %v1104_v3  ;;  %v998_v21 = vmul.f32 0.5, %v934_v8  ;;  %v1168_v22 = vmul.f32 1.442695, %v934_v8  ;;  %v2291_v2 = vpop.f32.mrf.mxu1 }
 0x119   : > { %1871 = vst.msk [vmem:[%s2859_s19 + $0x10] sm:$0xf] %vm1866_vm6, %v2138_v4  ;;  %v2170_v13 = vpack.c.bf16 %v1582_v5, %v1582_v5  ;;  %v1553_v14 = vadd.f32 %v2837_v6, %v1482_v7  ;;  %v1514_v15 = vmul.f32 %v2828_v56, %v1443_v0  ;;  %v1281_v18 = vmul.f32 %v2424_v10, %v1217_v35  ;;  %v685_v4 = vpop.f32.mrf.mxu0 }
 0x11a   : > { %v2959_v24 = vadd.f32 %v2763_v41, %v669_v58  ;;  %v2965_v25 = vadd.f32 %v2763_v41, %v797_v9  ;;  %v2968_v45 = vadd.f32 %v2256_v12, %v2763_v41  ;;  %v2426_v29 = vpop.eup %2425  ;;  %2433 = vpow2.f32 %v1168_v22 }
 0x11b   : > { %1903 = vst.msk [vmem:[%s2859_s19 + $0x90] sm:$0xf] %vm1866_vm6, %v2170_v13  ;;  %v2141_v36 = vpack.c.bf16 %v1553_v14, %v1553_v14  ;;  %v1585_v16 = vadd.f32 %v2837_v6, %v1514_v15  ;;  %v1409_v27 = vsel %vm1345_vm2, %v2842_v11, %v1281_v18  ;;  %v2428_v34 = vpop.eup %2427  ;;  %2435 = vtanh.f32 %v998_v21  ;;  %v813_v13 = vpop.f32.mrf.mxu1 }
 0x11c   : > { %v900_v28 = vmin.f32 %v2959_v24, 0.0  ;;  %v1480_v31 = vmul.f32 %v2828_v56, %v1409_v27  ;;  %v932_v32 = vmin.f32 %v2965_v25, 0.0  ;;  %v903_v37 = vmin.f32 %v2968_v45, 0.0 }
 0x11d   : > { %1874 = vst.msk [vmem:[%s2859_s19 + $0x1c] sm:$0xf] %vm1866_vm6, %v2141_v36  ;;  %v2173_v30 = vpack.c.bf16 %v1585_v16, %v1585_v16  ;;  %v1249_v38 = vadd.f32 1.0, %v2428_v34  ;;  %vm1377_vm3 = vcmp.gt.f32.partialorder %v2845_v44, 0.0  ;;  %v2984_v46 = vadd.f32 %v2288_v26, %v2763_v41 }
 0x11e   : > { %v964_v17 = vmul.f32 0.5, %v900_v28  ;;  %v1100_v50 = vmul.f32 1.442695, %v900_v28  ;;  %v1551_v11 = vadd.f32 %v2837_v6, %v1480_v31  ;;  %v1164_v39 = vmul.f32 1.442695, %v932_v32 }
 0x11f   : > { %1906 = vst.msk [vmem:[%s2859_s19 + $0x9c] sm:$0xf] %vm1866_vm6, %v2173_v30  ;;  %v996_v42 = vmul.f32 0.5, %v932_v32  ;;  %v1106_v51 = vmul.f32 1.442695, %v903_v37  ;;  %v1313_v43 = vmul.f32 %v2426_v29, %v1249_v38  ;;  %v967_v49 = vmul.f32 0.5, %v903_v37 }
 0x120   : > { %v2139_v19 = vpack.c.bf16 %v1551_v11, %v1551_v11  ;;  %2437 = vpow2.f32 %v1100_v50  ;;  %v2987_v52 = vadd.f32 %v2763_v41, %v672_v33  ;;  %v2990_v53 = vadd.f32 %v2763_v41, %v800_v40 }
 0x121   : > { %2439 = vtanh.f32 %v964_v17  ;;  %v1441_v20 = vsel %vm1377_vm3, %v2845_v44, %v1313_v43  ;;  %v935_v62 = vmin.f32 %v2984_v46, 0.0  ;;  %v2999_v58 = vadd.f32 %v2259_v48, %v2763_v41  ;;  %v2292_v48 = vpop.f32.mrf.mxu1 }
 0x122   : > { %1872 = vst.msk [vmem:[%s2859_s19 + $0x14] sm:$0xf] %vm1866_vm6, %v2139_v19  ;;  %2441 = vpow2.f32 %v1164_v39  ;;  %v1512_v55 = vmul.f32 %v2828_v56, %v1441_v20  ;;  %v901_v57 = vmin.f32 %v2987_v52, 0.0  ;;  %v933_v1 = vmin.f32 %v2990_v53, 0.0 }
 0x123   : > { %2443 = vtanh.f32 %v996_v42  ;;  %v2430_v59 = vpop.eup %2429  ;;  %v999_v60 = vmul.f32 0.5, %v935_v62  ;;  %v1170_v61 = vmul.f32 1.442695, %v935_v62  ;;  %vm1350_vm4 = vcmp.gt.f32.partialorder %v2926_v47, 0.0  ;;  %v2260_v42 = vpop.f32.mrf.mxu0 }
 0x124   : > { %2445 = vpow2.f32 %v1106_v51  ;;  %v1583_v44 = vadd.f32 %v2837_v6, %v1512_v55  ;;  %v965_v3 = vmul.f32 0.5, %v901_v57  ;;  %v1102_v63 = vmul.f32 1.442695, %v901_v57 }
 0x125   : > { %v2432_v23 = vpop.eup %2431  ;;  %2447 = vtanh.f32 %v967_v49  ;;  %v997_v7 = vmul.f32 0.5, %v933_v1  ;;  %v1166_v9 = vmul.f32 1.442695, %v933_v1  ;;  %v906_v10 = vmin.f32 %v2999_v58, 0.0 }
 0x126   : > { %v1222_v5 = vadd.f32 1.0, %v2432_v23  ;;  %2449 = vtanh.f32 %v999_v60  ;;  %v2171_v8 = vpack.c.bf16 %v1583_v44, %v1583_v44  ;;  %v3006_v35 = vadd.f32 %v2291_v2, %v2763_v41 }
 0x127   : > { %2451 = vpow2.f32 %v1170_v61  ;;  %v3009_v12 = vadd.f32 %v2763_v41, %v685_v4  ;;  %v2434_v14 = vpop.eup %2433  ;;  %vm1382_vm5 = vcmp.gt.f32.partialorder %v2933_v54, 0.0  ;;  %vm1348_vm7 = vcmp.gt.f32.partialorder %v2959_v24, 0.0 }
 0x128   : > { %v1286_v0 = vmul.f32 %v2430_v59, %v1222_v5  ;;  %2453 = vtanh.f32 %v965_v3  ;;  %1904 = vst.msk [vmem:[%s2859_s19 + $0x94] sm:$0xf] %vm1866_vm6, %v2171_v8  ;;  %v1112_v15 = vmul.f32 1.442695, %v906_v10  ;;  %v1254_v21 = vadd.f32 1.0, %v2434_v14  ;;  %v2436_v16 = vpop.eup %2435 }
 0x129   : > { %2455 = vpow2.f32 %v1102_v63  ;;  %v970_v22 = vmul.f32 0.5, %v906_v10  ;;  %v938_v36 = vmin.f32 %v3006_v35, 0.0  ;;  %vm1380_vm8 = vcmp.gt.f32.partialorder %v2965_v25, 0.0 }
 0x12a   : > { %v1414_v18 = vsel %vm1350_vm4, %v2926_v47, %v1286_v0  ;;  %2457 = vpow2.f32 %v1166_v9  ;;  %v904_v27 = vmin.f32 %v3009_v12, 0.0  ;;  %v3023_v28 = vadd.f32 %v2763_v41, %v813_v13 }
 0x12b   : > { %v1485_v26 = vmul.f32 %v2828_v56, %v1414_v18  ;;  %v1318_v29 = vmul.f32 %v2436_v16, %v1254_v21  ;;  %2459 = vtanh.f32 %v997_v7  ;;  %v1002_v30 = vmul.f32 0.5, %v938_v36 }
 0x12c   : > { %v1176_v31 = vmul.f32 1.442695, %v938_v36  ;;  %vm1351_vm9 = vcmp.gt.f32.partialorder %v2968_v45, 0.0  ;;  %2461 = vpow2.f32 %v1112_v15  ;;  %v1108_v33 = vmul.f32 1.442695, %v904_v27 }
 0x12d   : > { %v2438_v47 = vpop.eup %2437  ;;  %v1556_v32 = vadd.f32 %v2837_v6, %v1485_v26  ;;  %v1446_v17 = vsel %vm1382_vm5, %v2933_v54, %v1318_v29  ;;  %2463 = vtanh.f32 %v970_v22  ;;  %v968_v37 = vmul.f32 0.5, %v904_v27 }
 0x12e   : > { %v2440_v34 = vpop.eup %2439  ;;  %v1220_v50 = vadd.f32 1.0, %v2438_v47  ;;  %v1517_v39 = vmul.f32 %v2828_v56, %v1446_v17  ;;  %2465 = vpow2.f32 %v1176_v31  ;;  %v936_v40 = vmin.f32 %v3023_v28, 0.0  ;;  %v688_v47 = vpop.f32.mrf.mxu0 }
 0x12f   : > { %v2442_v11 = vpop.eup %2441  ;;  %v2144_v38 = vpack.c.bf16 %v1556_v32, %v1556_v32  ;;  %vm1383_vm10 = vcmp.gt.f32.partialorder %v2984_v46, 0.0  ;;  %2467 = vtanh.f32 %v1002_v30  ;;  %v3040_v61 = vadd.f32 %v2260_v42, %v2763_v41 }
 0x130   : > { %v2444_v51 = vpop.eup %2443  ;;  %v1284_v19 = vmul.f32 %v2440_v34, %v1220_v50  ;;  %v1252_v43 = vadd.f32 1.0, %v2442_v11  ;;  %v1588_v49 = vadd.f32 %v2837_v6, %v1517_v39  ;;  %2469 = vpow2.f32 %v1108_v33 }
 0x131   : > { %v2446_v54 = vpop.eup %2445  ;;  %1877 = vst.msk [vmem:[%s2859_s19 + $0x28] sm:$0xf] %vm1866_vm6, %v2144_v38  ;;  %v1000_v20 = vmul.f32 0.5, %v936_v40  ;;  %v1172_v62 = vmul.f32 1.442695, %v936_v40  ;;  %vm1349_vm11 = vcmp.gt.f32.partialorder %v2987_v52, 0.0  ;;  %2471 = vtanh.f32 %v968_v37 }
 0x132   : > { %v2448_v55 = vpop.eup %2447  ;;  %v1412_v57 = vsel %vm1348_vm7, %v2959_v24, %v1284_v19  ;;  %v1316_v59 = vmul.f32 %v2444_v51, %v1252_v43  ;;  %v1223_v60 = vadd.f32 1.0, %v2446_v54  ;;  %v2176_v2 = vpack.c.bf16 %v1588_v49, %v1588_v49 }
 0x133   : > { %v2450_v1 = vpop.eup %2449  ;;  %v1483_v23 = vmul.f32 %v2828_v56, %v1412_v57  ;;  %v3045_v44 = vadd.f32 %v2292_v48, %v2763_v41  ;;  %vm1381_vm12 = vcmp.gt.f32.partialorder %v2990_v53, 0.0  ;;  %2473 = vpow2.f32 %v1172_v62 }
 0x134   : > { %v2452_v3 = vpop.eup %2451  ;;  %v1444_v24 = vsel %vm1380_vm8, %v2965_v25, %v1316_v59  ;;  %v1287_v63 = vmul.f32 %v2448_v55, %v1223_v60  ;;  %v907_v4 = vmin.f32 %v3040_v61, 0.0  ;;  %1909 = vst.msk [vmem:[%s2859_s19 + $0xa8] sm:$0xf] %vm1866_vm6, %v2176_v2  ;;  %2475 = vtanh.f32 %v1000_v20  ;;  %v816_v55 = vpop.f32.mrf.mxu1 }
 0x135   : > { %v2454_v5 = vpop.eup %2453  ;;  %v1554_v7 = vadd.f32 %v2837_v6, %v1483_v23  ;;  %v1515_v8 = vmul.f32 %v2828_v56, %v1444_v24  ;;  %v1255_v9 = vadd.f32 1.0, %v2452_v3  ;;  %v939_v14 = vmin.f32 %v3045_v44, 0.0 }
 0x136   : > { %v2456_v10 = vpop.eup %2455  ;;  %v1415_v25 = vsel %vm1351_vm9, %v2968_v45, %v1287_v63  ;;  %v971_v0 = vmul.f32 0.5, %v907_v4  ;;  %v1114_v13 = vmul.f32 1.442695, %v907_v4  ;;  %vm1354_vm13 = vcmp.gt.f32.partialorder %v2999_v58, 0.0 }
 0x137   : > { %v2142_v15 = vpack.c.bf16 %v1554_v7, %v1554_v7  ;;  %v1586_v18 = vadd.f32 %v2837_v6, %v1515_v8  ;;  %v1486_v21 = vmul.f32 %v2828_v56, %v1415_v25  ;;  %v1319_v22 = vmul.f32 %v2450_v1, %v1255_v9  ;;  %v2458_v36 = vpop.eup %2457  ;;  %v2263_v7 = vpop.f32.mrf.mxu0 }
 0x138   : > { %v1221_v16 = vadd.f32 1.0, %v2456_v10  ;;  %vm1386_vm14 = vcmp.gt.f32.partialorder %v3006_v35, 0.0  ;;  %v1178_v26 = vmul.f32 1.442695, %v939_v14  ;;  %v2460_v27 = vpop.eup %2459  ;;  %v1253_v31 = vadd.f32 1.0, %v2458_v36 }
 0x139   : > { %1875 = vst.msk [vmem:[%s2859_s19 + $0x20] sm:$0xf] %vm1866_vm6, %v2142_v15  ;;  %v2174_v45 = vpack.c.bf16 %v1586_v18, %v1586_v18  ;;  %v1557_v29 = vadd.f32 %v2837_v6, %v1486_v21  ;;  %v1447_v30 = vsel %vm1383_vm10, %v2984_v46, %v1319_v22  ;;  %v2462_v32 = vpop.eup %2461  ;;  %2477 = vpow2.f32 %v1114_v13  ;;  %v2295_v15 = vpop.f32.mrf.mxu1 }
 0x13a   : > { %v1518_v33 = vmul.f32 %v2828_v56, %v1447_v30  ;;  %v1285_v34 = vmul.f32 %v2454_v5, %v1221_v16  ;;  %v1003_v17 = vmul.f32 0.5, %v939_v14  ;;  %v2464_v50 = vpop.eup %2463  ;;  %v1317_v11 = vmul.f32 %v2460_v27, %v1253_v31  ;;  %v701_v27 = vpop.f32.mrf.mxu0 }
 0x13b   : > { %1907 = vst.msk [vmem:[%s2859_s19 + $0xa0] sm:$0xf] %vm1866_vm6, %v2174_v45  ;;  %v2145_v37 = vpack.c.bf16 %v1557_v29, %v1557_v29  ;;  %v1226_v38 = vadd.f32 1.0, %v2462_v32  ;;  %2479 = vtanh.f32 %v971_v0  ;;  %v2466_v39 = vpop.eup %2465  ;;  %v3078_v42 = vadd.f32 %v2763_v41, %v688_v47 }
 0x13c   : > { %v1589_v40 = vadd.f32 %v2837_v6, %v1518_v33  ;;  %v1413_v46 = vsel %vm1349_vm11, %v2987_v52, %v1285_v34  ;;  %2481 = vpow2.f32 %v1178_v26  ;;  %v2468_v51 = vpop.eup %2467  ;;  %v1445_v43 = vsel %vm1381_vm12, %v2990_v53, %v1317_v11  ;;  %v829_v11 = vpop.f32.mrf.mxu1 }
 0x13d   : > { %1878 = vst.msk [vmem:[%s2859_s19 + $0x2c] sm:$0xf] %vm1866_vm6, %v2145_v37  ;;  %v1484_v19 = vmul.f32 %v2828_v56, %v1413_v46  ;;  %v1290_v48 = vmul.f32 %v2464_v50, %v1226_v38  ;;  %v1258_v54 = vadd.f32 1.0, %v2466_v39  ;;  %v2470_v49 = vpop.eup %2469  ;;  %v1516_v52 = vmul.f32 %v2828_v56, %v1445_v43 }
 0x13e   : > { %v2177_v20 = vpack.c.bf16 %v1589_v40, %v1589_v40  ;;  %2483 = vtanh.f32 %v1003_v17  ;;  %v905_v62 = vmin.f32 %v3078_v42, 0.0  ;;  %v1224_v1 = vadd.f32 1.0, %v2470_v49  ;;  %v2472_v2 = vpop.eup %2471  ;;  %v2264_v40 = vpop.f32.mrf.mxu0  ;;  %v3138_v49 = vld [vmem:[%s3534_s2] ss:$0 sm:$0xff] }
 0x13f   : > { %v1555_v57 = vadd.f32 %v2837_v6, %v1484_v19  ;;  %v1418_v59 = vsel %vm1354_vm13, %v2999_v58, %v1290_v48  ;;  %v1322_v60 = vmul.f32 %v2468_v51, %v1258_v54  ;;  %v1587_v53 = vadd.f32 %v2837_v6, %v1516_v52 }
 0x140   : > { %1910 = vst.msk [vmem:[%s2859_s19 + $0xac] sm:$0xf] %vm1866_vm6, %v2177_v20  ;;  %v1489_v23 = vmul.f32 %v2828_v56, %v1418_v59  ;;  %vm1352_vm15 = vcmp.gt.f32.partialorder %v3009_v12, 0.0  ;;  %v1110_v3 = vmul.f32 1.442695, %v905_v62  ;;  %v2474_v24 = vpop.eup %2473  ;;  %v1288_v4 = vmul.f32 %v2472_v2, %v1224_v1 }
 0x141   : > { %v2143_v63 = vpack.c.bf16 %v1555_v57, %v1555_v57  ;;  %v1450_v58 = vsel %vm1386_vm14, %v3006_v35, %v1322_v60  ;;  %v3101_v5 = vadd.f32 %v2763_v41, %v816_v55  ;;  %v2476_v8 = vpop.eup %2475  ;;  %v2175_v9 = vpack.c.bf16 %v1587_v53, %v1587_v53 }
 0x142   : > { %v1560_v10 = vadd.f32 %v2837_v6, %v1489_v23  ;;  %v1521_v25 = vmul.f32 %v2828_v56, %v1450_v58  ;;  %v1256_v0 = vadd.f32 1.0, %v2474_v24  ;;  %v1416_v13 = vsel %vm1352_vm15, %v3009_v12, %v1288_v4 }
 0x143   : > { %1876 = vst.msk [vmem:[%s2859_s19 + $0x24] sm:$0xf] %vm1866_vm6, %v2143_v63  ;;  %vm1384_vm0 = vcmp.gt.f32.partialorder %v3023_v28, 0.0  ;;  %v969_v35 = vmul.f32 0.5, %v905_v62  ;;  %v937_v14 = vmin.f32 %v3101_v5, 0.0  ;;  %v1487_v22 = vmul.f32 %v2828_v56, %v1416_v13  ;;  %v704_v63 = vpop.f32.mrf.mxu0 }
 0x144   : > { %1908 = vst.msk [vmem:[%s2859_s19 + $0xa4] sm:$0xf] %vm1866_vm6, %v2175_v9  ;;  %v2148_v18 = vpack.c.bf16 %v1560_v10, %v1560_v10  ;;  %v1592_v21 = vadd.f32 %v2837_v6, %v1521_v25  ;;  %v1320_v36 = vmul.f32 %v2476_v8, %v1256_v0  ;;  %2485 = vpow2.f32 %v1110_v3 }
 0x145   : > { %v1001_v16 = vmul.f32 0.5, %v937_v14  ;;  %v1174_v26 = vmul.f32 1.442695, %v937_v14  ;;  %v3115_v12 = vadd.f32 %v2263_v7, %v2763_v41  ;;  %v1558_v29 = vadd.f32 %v2837_v6, %v1487_v22 }
 0x146   : > { %1881 = vst.msk [vmem:[%s2859_s19 + $0x38] sm:$0xf] %vm1866_vm6, %v2148_v18  ;;  %v2180_v45 = vpack.c.bf16 %v1592_v21, %v1592_v21  ;;  %v1448_v30 = vsel %vm1384_vm0, %v3023_v28, %v1320_v36  ;;  %v3124_v31 = vadd.f32 %v2295_v15, %v2763_v41  ;;  %v2478_v47 = vpop.eup %2477  ;;  %2487 = vtanh.f32 %v969_v35  ;;  %v2267_v36 = vpop.f32.mrf.mxu0 }
 0x147   : > { %v1519_v32 = vmul.f32 %v2828_v56, %v1448_v30  ;;  %v910_v33 = vmin.f32 %v3115_v12, 0.0  ;;  %v2146_v17 = vpack.c.bf16 %v1558_v29, %v1558_v29  ;;  %v1227_v50 = vadd.f32 1.0, %v2478_v47 }
 0x148   : > { %v2480_v34 = vpop.eup %2479  ;;  %1913 = vst.msk [vmem:[%s2859_s19 + $0xb8] sm:$0xf] %vm1866_vm6, %v2180_v45  ;;  %2489 = vpow2.f32 %v1174_v26  ;;  %v942_v37 = vmin.f32 %v3124_v31, 0.0  ;;  %vm1355_vm1 = vcmp.gt.f32.partialorder %v3040_v61, 0.0  ;;  %v3141_v20 = vadd.f32 %v3138_v49, %v701_v27 }
 0x149   : > { %v2482_v28 = vpop.eup %2481  ;;  %v1590_v41 = vadd.f32 %v2837_v6, %v1519_v32  ;;  %v974_v38 = vmul.f32 0.5, %v910_v33  ;;  %v1120_v39 = vmul.f32 1.442695, %v910_v33  ;;  %1879 = vst.msk [vmem:[%s2859_s19 + $0x30] sm:$0xf] %vm1866_vm6, %v2146_v17  ;;  %v1291_v46 = vmul.f32 %v2480_v34, %v1227_v50 }
 0x14a   : > { %v1259_v51 = vadd.f32 1.0, %v2482_v28  ;;  %2491 = vtanh.f32 %v1001_v16  ;;  %v1184_v19 = vmul.f32 1.442695, %v942_v37  ;;  %v1006_v54 = vmul.f32 0.5, %v942_v37 }
 0x14b   : > { %v2484_v43 = vpop.eup %2483  ;;  %v2178_v48 = vpack.c.bf16 %v1590_v41, %v1590_v41  ;;  %v3144_v52 = vadd.f32 %v3138_v49, %v829_v11  ;;  %v1419_v62 = vsel %vm1355_vm1, %v3040_v61, %v1291_v46  ;;  %2493 = vpow2.f32 %v1120_v39  ;;  %v2296_v61 = vpop.f32.mrf.mxu1 }
 0x14c   : > { %v1323_v55 = vmul.f32 %v2484_v43, %v1259_v51  ;;  %v3148_v57 = vadd.f32 %v3138_v49, %v2264_v40  ;;  %v1490_v59 = vmul.f32 %v2828_v56, %v1419_v62  ;;  %vm1387_vm2 = vcmp.gt.f32.partialorder %v3045_v44, 0.0 }
 0x14d   : > { %1911 = vst.msk [vmem:[%s2859_s19 + $0xb0] sm:$0xf] %vm1866_vm6, %v2178_v48  ;;  %2495 = vtanh.f32 %v974_v38  ;;  %v908_v60 = vmin.f32 %v3141_v20, 0.0  ;;  %v940_v2 = vmin.f32 %v3144_v52, 0.0  ;;  %v3162_v9 = vadd.f32 %v3138_v49, %v2296_v61  ;;  %v832_v35 = vpop.f32.mrf.mxu1 }
 0x14e   : > { %v1451_v1 = vsel %vm1387_vm2, %v3045_v44, %v1323_v55  ;;  %2497 = vpow2.f32 %v1184_v19  ;;  %v1561_v53 = vadd.f32 %v2837_v6, %v1490_v59  ;;  %v911_v7 = vmin.f32 %v3148_v57, 0.0 }
 0x14f   : > { %v1522_v23 = vmul.f32 %v2828_v56, %v1451_v1  ;;  %v972_v3 = vmul.f32 0.5, %v908_v60  ;;  %v1116_v24 = vmul.f32 1.442695, %v908_v60  ;;  %2499 = vtanh.f32 %v1006_v54  ;;  %v2299_v47 = vpop.f32.mrf.mxu1 }
 0x150   : > { %v1004_v58 = vmul.f32 0.5, %v940_v2  ;;  %v1180_v4 = vmul.f32 1.442695, %v940_v2  ;;  %v2149_v8 = vpack.c.bf16 %v1561_v53, %v1561_v53  ;;  %v975_v25 = vmul.f32 0.5, %v911_v7 }
 0x151   : > { %v1593_v44 = vadd.f32 %v2837_v6, %v1522_v23  ;;  %2501 = vtanh.f32 %v972_v3  ;;  %v2486_v10 = vpop.eup %2485  ;;  %v1122_v0 = vmul.f32 1.442695, %v911_v7  ;;  %v3165_v13 = vadd.f32 %v3138_v49, %v704_v63  ;;  %v717_v3 = vpop.f32.mrf.mxu0  ;;  %v3209_v63 = vld [vmem:[%s3535_s3] ss:$0 sm:$0xff] }
 0x152   : > { %2503 = vpow2.f32 %v1116_v24  ;;  %1882 = vst.msk [vmem:[%s2859_s19 + $0x3c] sm:$0xf] %vm1866_vm6, %v2149_v8  ;;  %v1225_v15 = vadd.f32 1.0, %v2486_v10  ;;  %v943_v18 = vmin.f32 %v3162_v9, 0.0  ;;  %vm1353_vm3 = vcmp.gt.f32.partialorder %v3078_v42, 0.0 }
 0x153   : > { %v2181_v14 = vpack.c.bf16 %v1593_v44, %v1593_v44  ;;  %2505 = vtanh.f32 %v1004_v58  ;;  %v2488_v21 = vpop.eup %2487  ;;  %vm1385_vm4 = vcmp.gt.f32.partialorder %v3101_v5, 0.0  ;;  %v909_v22 = vmin.f32 %v3165_v13, 0.0 }
 0x154   : > { %2507 = vpow2.f32 %v1180_v4  ;;  %v1289_v26 = vmul.f32 %v2488_v21, %v1225_v15  ;;  %v1007_v27 = vmul.f32 0.5, %v943_v18  ;;  %v1186_v45 = vmul.f32 1.442695, %v943_v18 }
 0x155   : > { %v2490_v16 = vpop.eup %2489  ;;  %1914 = vst.msk [vmem:[%s2859_s19 + $0xbc] sm:$0xf] %vm1866_vm6, %v2181_v14  ;;  %2509 = vtanh.f32 %v975_v25  ;;  %vm1358_vm5 = vcmp.gt.f32.partialorder %v3115_v12, 0.0  ;;  %v1118_v30 = vmul.f32 1.442695, %v909_v22  ;;  %v973_v34 = vmul.f32 0.5, %v909_v22 }
 0x156   : > { %v1257_v29 = vadd.f32 1.0, %v2490_v16  ;;  %2511 = vpow2.f32 %v1122_v0  ;;  %v1417_v33 = vsel %vm1353_vm3, %v3078_v42, %v1289_v26  ;;  %v3180_v17 = vadd.f32 %v3138_v49, %v832_v35  ;;  %v3221_v0 = vld [vmem:[%s3536_s4] ss:$0 sm:$0xff] }
 0x157   : > { %v2492_v32 = vpop.eup %2491  ;;  %v3183_v50 = vadd.f32 %v3138_v49, %v2267_v36  ;;  %v1488_v37 = vmul.f32 %v2828_v56, %v1417_v33  ;;  %vm1390_vm7 = vcmp.gt.f32.partialorder %v3124_v31, 0.0  ;;  %2513 = vpow2.f32 %v1186_v45 }
 0x158   : > { %v1321_v11 = vmul.f32 %v2492_v32, %v1257_v29  ;;  %v2494_v28 = vpop.eup %2493  ;;  %2515 = vtanh.f32 %v1007_v27  ;;  %v941_v41 = vmin.f32 %v3180_v17, 0.0  ;;  %v3190_v42 = vadd.f32 %v3138_v49, %v2299_v47 }
 0x159   : > { %v914_v38 = vmin.f32 %v3183_v50, 0.0  ;;  %v1559_v40 = vadd.f32 %v2837_v6, %v1488_v37  ;;  %v1230_v51 = vadd.f32 1.0, %v2494_v28  ;;  %2517 = vpow2.f32 %v1118_v30 }
 0x15a   : > { %v2496_v39 = vpop.eup %2495  ;;  %v1449_v46 = vsel %vm1385_vm4, %v3101_v5, %v1321_v11  ;;  %2519 = vtanh.f32 %v973_v34  ;;  %v1005_v48 = vmul.f32 0.5, %v941_v41  ;;  %v1182_v54 = vmul.f32 1.442695, %v941_v41 }
 0x15b   : > { %v2498_v19 = vpop.eup %2497  ;;  %v1520_v43 = vmul.f32 %v2828_v56, %v1449_v46  ;;  %v2147_v62 = vpack.c.bf16 %v1559_v40, %v1559_v40  ;;  %v1294_v55 = vmul.f32 %v2496_v39, %v1230_v51  ;;  %v1128_v60 = vmul.f32 1.442695, %v914_v38 }
 0x15c   : > { %v1262_v59 = vadd.f32 1.0, %v2498_v19  ;;  %v2500_v1 = vpop.eup %2499  ;;  %vm1356_vm8 = vcmp.gt.f32.partialorder %v3141_v20, 0.0  ;;  %v978_v61 = vmul.f32 0.5, %v914_v38  ;;  %v946_v5 = vmin.f32 %v3190_v42, 0.0 }
 0x15d   : > { %v1591_v2 = vadd.f32 %v2837_v6, %v1520_v43  ;;  %1880 = vst.msk [vmem:[%s2859_s19 + $0x34] sm:$0xf] %vm1866_vm6, %v2147_v62  ;;  %v1422_v56 = vsel %vm1358_vm5, %v3115_v12, %v1294_v55  ;;  %vm1388_vm9 = vcmp.gt.f32.partialorder %v3144_v52, 0.0  ;;  %2521 = vpow2.f32 %v1182_v54  ;;  %v845_v12 = vpop.f32.mrf.mxu1  ;;  %v2268_v43 = vpop.f32.mrf.mxu0 }
 0x15e   : > { %v2502_v53 = vpop.eup %2501  ;;  %v1326_v23 = vmul.f32 %v2500_v1, %v1262_v59  ;;  %v1493_v58 = vmul.f32 %v3209_v63, %v1422_v56  ;;  %vm1359_vm10 = vcmp.gt.f32.partialorder %v3148_v57, 0.0  ;;  %2523 = vtanh.f32 %v1005_v48 }
 0x15f   : > { %v2504_v24 = vpop.eup %2503  ;;  %v2179_v6 = vpack.c.bf16 %v1591_v2, %v1591_v2  ;;  %v1010_v4 = vmul.f32 0.5, %v946_v5  ;;  %2525 = vpow2.f32 %v1128_v60  ;;  %v1192_v10 = vmul.f32 1.442695, %v946_v5  ;;  %v2300_v1 = vpop.f32.mrf.mxu1 }
 0x160   : > { %v2506_v7 = vpop.eup %2505  ;;  %v1454_v8 = vsel %vm1390_vm7, %v3124_v31, %v1326_v23  ;;  %v1228_v44 = vadd.f32 1.0, %v2504_v24  ;;  %v1564_v35 = vadd.f32 %v3221_v0, %v1493_v58  ;;  %vm1391_vm11 = vcmp.gt.f32.partialorder %v3162_v9, 0.0 }
 0x161   : > { %v2508_v25 = vpop.eup %2507  ;;  %1912 = vst.msk [vmem:[%s2859_s19 + $0xb4] sm:$0xf] %vm1866_vm6, %v2179_v6  ;;  %v1525_v14 = vmul.f32 %v3209_v63, %v1454_v8  ;;  %2527 = vtanh.f32 %v978_v61  ;;  %v3227_v31 = vadd.f32 %v3138_v49, %v717_v3  ;;  %v3230_v22 = vadd.f32 %v3138_v49, %v845_v12  ;;  %v720_v3 = vpop.f32.mrf.mxu0 }
 0x162   : > { %v2510_v15 = vpop.eup %2509  ;;  %v1292_v18 = vmul.f32 %v2502_v53, %v1228_v44  ;;  %v1260_v21 = vadd.f32 1.0, %v2508_v25  ;;  %2529 = vpow2.f32 %v1192_v10  ;;  %v2152_v16 = vpack.c.bf16 %v1564_v35, %v1564_v35 }
 0x163   : > { %v2512_v36 = vpop.eup %2511  ;;  %v1596_v26 = vadd.f32 %v3221_v0, %v1525_v14  ;;  %2531 = vtanh.f32 %v1010_v4  ;;  %v912_v27 = vmin.f32 %v3227_v31, 0.0  ;;  %v944_v47 = vmin.f32 %v3230_v22, 0.0 }
 0x164   : > { %v1420_v45 = vsel %vm1356_vm8, %v3141_v20, %v1292_v18  ;;  %v1324_v29 = vmul.f32 %v2506_v7, %v1260_v21  ;;  %v1231_v30 = vadd.f32 1.0, %v2512_v36  ;;  %v2514_v32 = vpop.eup %2513  ;;  %1885 = vst.msk [vmem:[%s2859_s19 + $0x48] sm:$0xf] %vm1866_vm6, %v2152_v16  ;;  %vm1357_vm12 = vcmp.gt.f32.partialorder %v3165_v13, 0.0 }
 0x165   : > { %v2184_v33 = vpack.c.bf16 %v1596_v26, %v1596_v26  ;;  %v1491_v34 = vmul.f32 %v3209_v63, %v1420_v45  ;;  %v976_v37 = vmul.f32 0.5, %v912_v27  ;;  %v1124_v11 = vmul.f32 1.442695, %v912_v27  ;;  %v2516_v28 = vpop.eup %2515 }
 0x166   : > { %v1452_v41 = vsel %vm1388_vm9, %v3144_v52, %v1324_v29  ;;  %v1295_v38 = vmul.f32 %v2510_v15, %v1231_v30  ;;  %v1263_v20 = vadd.f32 1.0, %v2514_v32  ;;  %v2518_v39 = vpop.eup %2517  ;;  %v1008_v51 = vmul.f32 0.5, %v944_v47 }
 0x167   : > { %1917 = vst.msk [vmem:[%s2859_s19 + $0xc8] sm:$0xf] %vm1866_vm6, %v2184_v33  ;;  %v1562_v40 = vadd.f32 %v3221_v0, %v1491_v34  ;;  %v1523_v46 = vmul.f32 %v3209_v63, %v1452_v41  ;;  %v1188_v19 = vmul.f32 1.442695, %v944_v47  ;;  %v2520_v48 = vpop.eup %2519  ;;  %v1229_v62 = vadd.f32 1.0, %v2518_v39  ;;  %v848_v34 = vpop.f32.mrf.mxu1 }
 0x168   : > { %v1423_v52 = vsel %vm1359_vm10, %v3148_v57, %v1295_v38  ;;  %v1327_v54 = vmul.f32 %v2516_v28, %v1263_v20  ;;  %2533 = vpow2.f32 %v1124_v11  ;;  %vm1389_vm13 = vcmp.gt.f32.partialorder %v3180_v17, 0.0 }
 0x169   : > { %v2150_v55 = vpack.c.bf16 %v1562_v40, %v1562_v40  ;;  %v1594_v59 = vadd.f32 %v3221_v0, %v1523_v46  ;;  %v1494_v60 = vmul.f32 %v3209_v63, %v1423_v52  ;;  %2535 = vtanh.f32 %v976_v37 }
 0x16a   : > { %v1455_v2 = vsel %vm1391_vm11, %v3162_v9, %v1327_v54  ;;  %v1293_v61 = vmul.f32 %v2520_v48, %v1229_v62  ;;  %2537 = vpow2.f32 %v1188_v19  ;;  %v2522_v57 = vpop.eup %2521  ;;  %v3263_v23 = vadd.f32 %v3138_v49, %v2268_v43  ;;  %v2303_v54 = vpop.f32.mrf.mxu1 }
 0x16b   : > { %1883 = vst.msk [vmem:[%s2859_s19 + $0x40] sm:$0xf] %vm1866_vm6, %v2150_v55  ;;  %v2182_v5 = vpack.c.bf16 %v1594_v59, %v1594_v59  ;;  %v1565_v53 = vadd.f32 %v3221_v0, %v1494_v60  ;;  %v1526_v56 = vmul.f32 %v3209_v63, %v1455_v2  ;;  %v2524_v24 = vpop.eup %2523  ;;  %v1261_v6 = vadd.f32 1.0, %v2522_v57 }
 0x16c   : > { %v1421_v9 = vsel %vm1357_vm12, %v3165_v13, %v1293_v61  ;;  %2539 = vtanh.f32 %v1008_v51  ;;  %v3269_v58 = vadd.f32 %v3138_v49, %v2300_v1  ;;  %v2526_v4 = vpop.eup %2525  ;;  %v915_v44 = vmin.f32 %v3263_v23, 0.0 }
 0x16d   : > { %1915 = vst.msk [vmem:[%s2859_s19 + $0xc0] sm:$0xf] %vm1866_vm6, %v2182_v5  ;;  %v2153_v12 = vpack.c.bf16 %v1565_v53, %v1565_v53  ;;  %v1597_v7 = vadd.f32 %v3221_v0, %v1526_v56  ;;  %v1492_v8 = vmul.f32 %v3209_v63, %v1421_v9  ;;  %v1325_v25 = vmul.f32 %v2524_v24, %v1261_v6 }
 0x16e   : > { %v2528_v10 = vpop.eup %2527  ;;  %v1234_v13 = vadd.f32 1.0, %v2526_v4  ;;  %v947_v35 = vmin.f32 %v3269_v58, 0.0  ;;  %v3278_v14 = vadd.f32 %v3138_v49, %v720_v3  ;;  %v979_v36 = vmul.f32 0.5, %v915_v44  ;;  %v861_v4 = vpop.f32.mrf.mxu1 }
 0x16f   : > { %v2530_v15 = vpop.eup %2529  ;;  %1886 = vst.msk [vmem:[%s2859_s19 + $0x4c] sm:$0xf] %vm1866_vm6, %v2153_v12  ;;  %v2185_v18 = vpack.c.bf16 %v1597_v7, %v1597_v7  ;;  %v1563_v21 = vadd.f32 %v3221_v0, %v1492_v8  ;;  %v1130_v16 = vmul.f32 1.442695, %v915_v44  ;;  %v1453_v27 = vsel %vm1389_vm13, %v3180_v17, %v1325_v25 }
 0x170   : > { %v2532_v26 = vpop.eup %2531  ;;  %v1298_v45 = vmul.f32 %v2528_v10, %v1234_v13  ;;  %vm1362_vm14 = vcmp.gt.f32.partialorder %v3183_v50, 0.0  ;;  %v1266_v29 = vadd.f32 1.0, %v2530_v15  ;;  %v1524_v47 = vmul.f32 %v3209_v63, %v1453_v27 }
 0x171   : > { %1918 = vst.msk [vmem:[%s2859_s19 + $0xcc] sm:$0xf] %vm1866_vm6, %v2185_v18  ;;  %v2151_v30 = vpack.c.bf16 %v1563_v21, %v1563_v21  ;;  %v1011_v32 = vmul.f32 0.5, %v947_v35  ;;  %v1194_v33 = vmul.f32 1.442695, %v947_v35  ;;  %vm1394_vm15 = vcmp.gt.f32.partialorder %v3190_v42, 0.0 }
 0x172   : > { %v1426_v37 = vsel %vm1362_vm14, %v3183_v50, %v1298_v45  ;;  %v1330_v11 = vmul.f32 %v2532_v26, %v1266_v29  ;;  %2541 = vpow2.f32 %v1130_v16  ;;  %v1595_v17 = vadd.f32 %v3221_v0, %v1524_v47  ;;  %v2271_v50 = vpop.f32.mrf.mxu0 }
 0x173   : > { %1884 = vst.msk [vmem:[%s2859_s19 + $0x44] sm:$0xf] %vm1866_vm6, %v2151_v30  ;;  %v1497_v28 = vmul.f32 %v3209_v63, %v1426_v37  ;;  %2543 = vtanh.f32 %v979_v36  ;;  %v913_v41 = vmin.f32 %v3278_v14, 0.0  ;;  %v3299_v20 = vadd.f32 %v3138_v49, %v848_v34 }
 0x174   : > { %v1458_v38 = vsel %vm1394_vm15, %v3190_v42, %v1330_v11  ;;  %2545 = vpow2.f32 %v1194_v33  ;;  %v2183_v40 = vpack.c.bf16 %v1595_v17, %v1595_v17  ;;  %v3308_v60 = vadd.f32 %v3138_v49, %v2271_v50  ;;  %v733_v3 = vpop.f32.mrf.mxu0 }
 0x175   : > { %v2534_v39 = vpop.eup %2533  ;;  %v1568_v46 = vadd.f32 %v3221_v0, %v1497_v28  ;;  %v1529_v51 = vmul.f32 %v3209_v63, %v1458_v38  ;;  %2547 = vtanh.f32 %v1011_v32  ;;  %v977_v48 = vmul.f32 0.5, %v913_v41  ;;  %v2304_v32 = vpop.f32.mrf.mxu1 }
 0x176   : > { %v2536_v19 = vpop.eup %2535  ;;  %v1232_v43 = vadd.f32 1.0, %v2534_v39  ;;  %v1126_v52 = vmul.f32 1.442695, %v913_v41  ;;  %v945_v42 = vmin.f32 %v3299_v20, 0.0  ;;  %1916 = vst.msk [vmem:[%s2859_s19 + $0xc4] sm:$0xf] %vm1866_vm6, %v2183_v40  ;;  %v3316_v6 = vadd.f32 %v3138_v49, %v2303_v54  ;;  %v2272_v15 = vpop.f32.mrf.mxu0 }
 0x177   : > { %v2538_v62 = vpop.eup %2537  ;;  %v2156_v55 = vpack.c.bf16 %v1568_v46, %v1568_v46  ;;  %v1600_v59 = vadd.f32 %v3221_v0, %v1529_v51  ;;  %vm1360_vm0 = vcmp.gt.f32.partialorder %v3227_v31, 0.0  ;;  %v918_v56 = vmin.f32 %v3308_v60, 0.0 }
 0x178   : > { %v1296_v1 = vmul.f32 %v2536_v19, %v1232_v43  ;;  %v1264_v2 = vadd.f32 1.0, %v2538_v62  ;;  %2549 = vpow2.f32 %v1126_v52  ;;  %v1009_v5 = vmul.f32 0.5, %v945_v42  ;;  %v736_v11 = vpop.f32.mrf.mxu0  ;;  %v864_v52 = vpop.f32.mrf.mxu1 }
 0x179   : > { %v2540_v61 = vpop.eup %2539  ;;  %1889 = vst.msk [vmem:[%s2859_s19 + $0x58] sm:$0xf] %vm1866_vm6, %v2156_v55  ;;  %v2188_v57 = vpack.c.bf16 %v1600_v59, %v1600_v59  ;;  %v1190_v53 = vmul.f32 1.442695, %v945_v42  ;;  %2551 = vtanh.f32 %v977_v48  ;;  %vm1392_vm1 = vcmp.gt.f32.partialorder %v3230_v22, 0.0 }
 0x17a   : > { %v1424_v24 = vsel %vm1360_vm0, %v3227_v31, %v1296_v1  ;;  %v1328_v9 = vmul.f32 %v2540_v61, %v1264_v2  ;;  %v1136_v7 = vmul.f32 1.442695, %v918_v56  ;;  %v982_v44 = vmul.f32 0.5, %v918_v56 }
 0x17b   : > { %1921 = vst.msk [vmem:[%s2859_s19 + $0xd8] sm:$0xf] %vm1866_vm6, %v2188_v57  ;;  %v1495_v12 = vmul.f32 %v3209_v63, %v1424_v24  ;;  %2553 = vpow2.f32 %v1190_v53  ;;  %v950_v10 = vmin.f32 %v3316_v6, 0.0  ;;  %v3325_v31 = vadd.f32 %v3138_v49, %v733_v3 }
 0x17c   : > { %v1456_v8 = vsel %vm1392_vm1, %v3230_v22, %v1328_v9  ;;  %2555 = vtanh.f32 %v1009_v5  ;;  %v3330_v35 = vadd.f32 %v3138_v49, %v861_v4  ;;  %vm1363_vm2 = vcmp.gt.f32.partialorder %v3263_v23, 0.0 }
 0x17d   : > { %v1566_v25 = vadd.f32 %v3221_v0, %v1495_v12  ;;  %v1527_v13 = vmul.f32 %v3209_v63, %v1456_v8  ;;  %2557 = vpow2.f32 %v1136_v7  ;;  %v1014_v18 = vmul.f32 0.5, %v950_v10 }
 0x17e   : > { %v1200_v21 = vmul.f32 1.442695, %v950_v10  ;;  %v916_v22 = vmin.f32 %v3325_v31, 0.0  ;;  %v948_v27 = vmin.f32 %v3330_v35, 0.0  ;;  %2559 = vtanh.f32 %v982_v44 }
 0x17f   : > { %v2542_v36 = vpop.eup %2541  ;;  %v2154_v16 = vpack.c.bf16 %v1566_v25, %v1566_v25  ;;  %v1598_v26 = vadd.f32 %v3221_v0, %v1527_v13  ;;  %vm1395_vm3 = vcmp.gt.f32.partialorder %v3269_v58, 0.0  ;;  %vm1361_vm4 = vcmp.gt.f32.partialorder %v3278_v14, 0.0 }
 0x180   : > { %v2544_v45 = vpop.eup %2543  ;;  %v1235_v29 = vadd.f32 1.0, %v2542_v36  ;;  %v980_v30 = vmul.f32 0.5, %v916_v22  ;;  %v1132_v47 = vmul.f32 1.442695, %v916_v22  ;;  %2561 = vpow2.f32 %v1200_v21  ;;  %v2275_v21 = vpop.f32.mrf.mxu0 }
 0x181   : > { %v2546_v33 = vpop.eup %2545  ;;  %1887 = vst.msk [vmem:[%s2859_s19 + $0x50] sm:$0xf] %vm1866_vm6, %v2154_v16  ;;  %v2186_v34 = vpack.c.bf16 %v1598_v26, %v1598_v26  ;;  %v1196_v37 = vmul.f32 1.442695, %v948_v27  ;;  %2563 = vtanh.f32 %v1014_v18  ;;  %v1012_v38 = vmul.f32 0.5, %v948_v27  ;;  %v2307_v16 = vpop.f32.mrf.mxu1 }
 0x182   : > { %v2548_v17 = vpop.eup %2547  ;;  %v1299_v28 = vmul.f32 %v2544_v45, %v1235_v29  ;;  %v1267_v41 = vadd.f32 1.0, %v2546_v33  ;;  %2565 = vpow2.f32 %v1132_v47  ;;  %v3343_v50 = vadd.f32 %v3138_v49, %v2272_v15 }
 0x183   : > { %1919 = vst.msk [vmem:[%s2859_s19 + $0xd0] sm:$0xf] %vm1866_vm6, %v2186_v34  ;;  %v3346_v39 = vadd.f32 %v3138_v49, %v2304_v32  ;;  %2567 = vtanh.f32 %v980_v30  ;;  %v3352_v51 = vadd.f32 %v3138_v49, %v736_v11  ;;  %vm1393_vm5 = vcmp.gt.f32.partialorder %v3299_v20, 0.0 }
 0x184   : > { %v1427_v40 = vsel %vm1363_vm2, %v3263_v23, %v1299_v28  ;;  %v1331_v46 = vmul.f32 %v2548_v17, %v1267_v41  ;;  %2569 = vpow2.f32 %v1196_v37  ;;  %v919_v48 = vmin.f32 %v3343_v50, 0.0 }
 0x185   : > { %v2550_v19 = vpop.eup %2549  ;;  %v1498_v43 = vmul.f32 %v3209_v63, %v1427_v40  ;;  %2571 = vtanh.f32 %v1012_v38  ;;  %v951_v23 = vmin.f32 %v3346_v39, 0.0  ;;  %vm1366_vm7 = vcmp.gt.f32.partialorder %v3308_v60, 0.0 }
 0x186   : > { %v1459_v42 = vsel %vm1395_vm3, %v3269_v58, %v1331_v46  ;;  %v1233_v54 = vadd.f32 1.0, %v2550_v19  ;;  %v2552_v62 = vpop.eup %2551  ;;  %v983_v1 = vmul.f32 0.5, %v919_v48  ;;  %v1138_v2 = vmul.f32 1.442695, %v919_v48 }
 0x187   : > { %v1569_v55 = vadd.f32 %v3221_v0, %v1498_v43  ;;  %v1530_v59 = vmul.f32 %v3209_v63, %v1459_v42  ;;  %v1202_v5 = vmul.f32 1.442695, %v951_v23  ;;  %v917_v53 = vmin.f32 %v3352_v51, 0.0 }
 0x188   : > { %v2554_v61 = vpop.eup %2553  ;;  %v1297_v57 = vmul.f32 %v2552_v62, %v1233_v54  ;;  %v3366_v58 = vadd.f32 %v3138_v49, %v864_v52  ;;  %v1015_v9 = vmul.f32 0.5, %v951_v23  ;;  %vm1398_vm8 = vcmp.gt.f32.partialorder %v3316_v6, 0.0 }
 0x189   : > { %v2157_v56 = vpack.c.bf16 %v1569_v55, %v1569_v55  ;;  %v1601_v3 = vadd.f32 %v3221_v0, %v1530_v59  ;;  %v1265_v24 = vadd.f32 1.0, %v2554_v61  ;;  %v2556_v4 = vpop.eup %2555  ;;  %2573 = vpow2.f32 %v1138_v2  ;;  %v877_v2 = vpop.f32.mrf.mxu1 }
 0x18a   : > { %v1425_v12 = vsel %vm1361_vm4, %v3278_v14, %v1297_v57  ;;  %v1134_v7 = vmul.f32 1.442695, %v917_v53  ;;  %v2558_v8 = vpop.eup %2557  ;;  %2575 = vtanh.f32 %v983_v1  ;;  %v981_v15 = vmul.f32 0.5, %v917_v53  ;;  %v749_v1 = vpop.f32.mrf.mxu0 }
 0x18b   : > { %1890 = vst.msk [vmem:[%s2859_s19 + $0x5c] sm:$0xf] %vm1866_vm6, %v2157_v56  ;;  %v2189_v44 = vpack.c.bf16 %v1601_v3, %v1601_v3  ;;  %v1496_v10 = vmul.f32 %v3209_v63, %v1425_v12  ;;  %v1329_v25 = vmul.f32 %v2556_v4, %v1265_v24  ;;  %v1238_v13 = vadd.f32 1.0, %v2558_v8  ;;  %v2560_v14 = vpop.eup %2559 }
 0x18c   : > { %2577 = vpow2.f32 %v1202_v5  ;;  %v949_v18 = vmin.f32 %v3366_v58, 0.0  ;;  %vm1364_vm9 = vcmp.gt.f32.partialorder %v3325_v31, 0.0  ;;  %vm1396_vm10 = vcmp.gt.f32.partialorder %v3330_v35, 0.0 }
 0x18d   : > { %1922 = vst.msk [vmem:[%s2859_s19 + $0xdc] sm:$0xf] %vm1866_vm6, %v2189_v44  ;;  %v1567_v22 = vadd.f32 %v3221_v0, %v1496_v10  ;;  %v1457_v36 = vsel %vm1393_vm5, %v3299_v20, %v1329_v25  ;;  %2579 = vtanh.f32 %v1015_v9  ;;  %v2562_v26 = vpop.eup %2561  ;;  %v1302_v45 = vmul.f32 %v2560_v14, %v1238_v13 }
 0x18e   : > { %v1528_v27 = vmul.f32 %v3209_v63, %v1457_v36  ;;  %2581 = vpow2.f32 %v1134_v7  ;;  %v1013_v29 = vmul.f32 0.5, %v949_v18  ;;  %v2564_v30 = vpop.eup %2563  ;;  %v1270_v32 = vadd.f32 1.0, %v2562_v26 }
 0x18f   : > { %v2155_v47 = vpack.c.bf16 %v1567_v22, %v1567_v22  ;;  %v1198_v33 = vmul.f32 1.442695, %v949_v18  ;;  %v3387_v34 = vadd.f32 %v3138_v49, %v2275_v21  ;;  %v2566_v20 = vpop.eup %2565  ;;  %v1430_v11 = vsel %vm1366_vm7, %v3308_v60, %v1302_v45  ;;  %v2276_v45 = vpop.f32.mrf.mxu0 }
 0x190   : > { %v1599_v37 = vadd.f32 %v3221_v0, %v1528_v27  ;;  %2583 = vtanh.f32 %v981_v15  ;;  %v3394_v17 = vadd.f32 %v3138_v49, %v2307_v16  ;;  %v2568_v28 = vpop.eup %2567  ;;  %v1501_v41 = vmul.f32 %v3209_v63, %v1430_v11 }
 0x191   : > { %1888 = vst.msk [vmem:[%s2859_s19 + $0x54] sm:$0xf] %vm1866_vm6, %v2155_v47  ;;  %v1334_v38 = vmul.f32 %v2564_v30, %v1270_v32  ;;  %v1236_v40 = vadd.f32 1.0, %v2566_v20  ;;  %2585 = vpow2.f32 %v1198_v33  ;;  %v2570_v46 = vpop.eup %2569  ;;  %v922_v43 = vmin.f32 %v3387_v34, 0.0  ;;  %v2308_v33 = vpop.f32.mrf.mxu1 }
 0x192   : > { %v2187_v19 = vpack.c.bf16 %v1599_v37, %v1599_v37  ;;  %2587 = vtanh.f32 %v1013_v29  ;;  %v954_v60 = vmin.f32 %v3394_v17, 0.0  ;;  %v2572_v48 = vpop.eup %2571  ;;  %v1572_v52 = vadd.f32 %v3221_v0, %v1501_v41 }
 0x193   : > { %v1462_v42 = vsel %vm1398_vm8, %v3316_v6, %v1334_v38  ;;  %v1300_v54 = vmul.f32 %v2568_v28, %v1236_v40  ;;  %v1268_v23 = vadd.f32 1.0, %v2570_v46  ;;  %vm1367_vm11 = vcmp.gt.f32.partialorder %v3343_v50, 0.0 }
 0x194   : > { %1920 = vst.msk [vmem:[%s2859_s19 + $0xd4] sm:$0xf] %vm1866_vm6, %v2187_v19  ;;  %v1533_v62 = vmul.f32 %v3209_v63, %v1462_v42  ;;  %v986_v55 = vmul.f32 0.5, %v922_v43  ;;  %v1144_v59 = vmul.f32 1.442695, %v922_v43  ;;  %v2160_v61 = vpack.c.bf16 %v1572_v52, %v1572_v52  ;;  %v880_v52 = vpop.f32.mrf.mxu1 }
 0x195   : > { %v1428_v57 = vsel %vm1364_vm9, %v3325_v31, %v1300_v54  ;;  %v1332_v5 = vmul.f32 %v2572_v48, %v1268_v23  ;;  %v1018_v6 = vmul.f32 0.5, %v954_v60  ;;  %v1208_v3 = vmul.f32 1.442695, %v954_v60  ;;  %v752_v60 = vpop.f32.mrf.mxu0 }
 0x196   : > { %v1604_v53 = vadd.f32 %v3221_v0, %v1533_v62  ;;  %v1499_v56 = vmul.f32 %v3209_v63, %v1428_v57  ;;  %2589 = vtanh.f32 %v986_v55  ;;  %v2574_v24 = vpop.eup %2573  ;;  %1893 = vst.msk [vmem:[%s2859_s19 + $0x68] sm:$0xf] %vm1866_vm6, %v2160_v61  ;;  %v3420_v4 = vadd.f32 %v3138_v49, %v749_v1 }
 0x197   : > { %v1460_v9 = vsel %vm1396_vm10, %v3330_v35, %v1332_v5  ;;  %2591 = vpow2.f32 %v1144_v59  ;;  %v3423_v31 = vadd.f32 %v3138_v49, %v877_v2  ;;  %v2576_v12 = vpop.eup %2575  ;;  %v1239_v10 = vadd.f32 1.0, %v2574_v24 }
 0x198   : > { %v2192_v7 = vpack.c.bf16 %v1604_v53, %v1604_v53  ;;  %v1570_v8 = vadd.f32 %v3221_v0, %v1499_v56  ;;  %v1531_v44 = vmul.f32 %v3209_v63, %v1460_v9  ;;  %vm1399_vm12 = vcmp.gt.f32.partialorder %v3346_v39, 0.0 }
 0x199   : > { %v2578_v25 = vpop.eup %2577  ;;  %2593 = vtanh.f32 %v1018_v6  ;;  %v920_v35 = vmin.f32 %v3420_v4, 0.0  ;;  %v952_v13 = vmin.f32 %v3423_v31, 0.0  ;;  %v1303_v14 = vmul.f32 %v2576_v12, %v1239_v10 }
 0x19a   : > { %v2580_v15 = vpop.eup %2579  ;;  %1925 = vst.msk [vmem:[%s2859_s19 + $0xe8] sm:$0xf] %vm1866_vm6, %v2192_v7  ;;  %v2158_v18 = vpack.c.bf16 %v1570_v8, %v1570_v8  ;;  %v1602_v21 = vadd.f32 %v3221_v0, %v1531_v44  ;;  %v1271_v22 = vadd.f32 1.0, %v2578_v25  ;;  %2595 = vpow2.f32 %v1208_v3 }
 0x19b   : > { %v2582_v36 = vpop.eup %2581  ;;  %v984_v16 = vmul.f32 0.5, %v920_v35  ;;  %v1140_v26 = vmul.f32 1.442695, %v920_v35  ;;  %v1016_v27 = vmul.f32 0.5, %v952_v13  ;;  %v1431_v30 = vsel %vm1367_vm11, %v3343_v50, %v1303_v14 }
 0x19c   : > { %1891 = vst.msk [vmem:[%s2859_s19 + $0x60] sm:$0xf] %vm1866_vm6, %v2158_v18  ;;  %v2190_v29 = vpack.c.bf16 %v1602_v21, %v1602_v21  ;;  %v1335_v47 = vmul.f32 %v2580_v15, %v1271_v22  ;;  %v1237_v32 = vadd.f32 1.0, %v2582_v36  ;;  %v1502_v37 = vmul.f32 %v3209_v63, %v1431_v30 }
 0x19d   : > { %v2584_v20 = vpop.eup %2583  ;;  %vm1365_vm13 = vcmp.gt.f32.partialorder %v3352_v51, 0.0  ;;  %2597 = vtanh.f32 %v984_v16  ;;  %v1204_v11 = vmul.f32 1.442695, %v952_v13  ;;  %v3446_v50 = vadd.f32 %v3138_v49, %v2276_v45 }
 0x19e   : > { %v2586_v28 = vpop.eup %2585  ;;  %1923 = vst.msk [vmem:[%s2859_s19 + $0xe0] sm:$0xf] %vm1866_vm6, %v2190_v29  ;;  %v1463_v41 = vsel %vm1399_vm12, %v3346_v39, %v1335_v47  ;;  %v1301_v38 = vmul.f32 %v2584_v20, %v1237_v32  ;;  %2599 = vpow2.f32 %v1140_v26  ;;  %v1573_v46 = vadd.f32 %v3221_v0, %v1502_v37 }
 0x19f   : > { %v2588_v40 = vpop.eup %2587  ;;  %v1534_v19 = vmul.f32 %v3209_v63, %v1463_v41  ;;  %v1269_v43 = vadd.f32 1.0, %v2586_v28  ;;  %2601 = vtanh.f32 %v1016_v27  ;;  %vm1397_vm14 = vcmp.gt.f32.partialorder %v3366_v58, 0.0 }
 0x1a0   : > { %v1429_v48 = vsel %vm1365_vm13, %v3352_v51, %v1301_v38  ;;  %2603 = vpow2.f32 %v1204_v11  ;;  %v923_v39 = vmin.f32 %v3446_v50, 0.0  ;;  %v2161_v42 = vpack.c.bf16 %v1573_v46, %v1573_v46 }
 0x1a1   : > { %v1605_v54 = vadd.f32 %v3221_v0, %v1534_v19  ;;  %v1500_v23 = vmul.f32 %v3209_v63, %v1429_v48  ;;  %v1333_v62 = vmul.f32 %v2588_v40, %v1269_v43  ;;  %v3456_v1 = vadd.f32 %v3138_v49, %v2308_v33 }
 0x1a2   : > { %v987_v55 = vmul.f32 0.5, %v923_v39  ;;  %v1146_v59 = vmul.f32 1.442695, %v923_v39  ;;  %v3459_v51 = vadd.f32 %v3138_v49, %v752_v60  ;;  %1894 = vst.msk [vmem:[%s2859_s19 + $0x6c] sm:$0xf] %vm1866_vm6, %v2161_v42  ;;  %v3468_v6 = vadd.f32 %v3138_v49, %v880_v52 }
 0x1a3   : > { %v2590_v2 = vpop.eup %2589  ;;  %v2193_v61 = vpack.c.bf16 %v1605_v54, %v1605_v54  ;;  %v1571_v57 = vadd.f32 %v3221_v0, %v1500_v23  ;;  %v1461_v5 = vsel %vm1397_vm14, %v3366_v58, %v1333_v62  ;;  %v955_v3 = vmin.f32 %v3456_v1, 0.0 }
 0x1a4   : > { %v2592_v53 = vpop.eup %2591  ;;  %v1532_v56 = vmul.f32 %v3209_v63, %v1461_v5  ;;  %2605 = vpow2.f32 %v1146_v59  ;;  %v921_v12 = vmin.f32 %v3459_v51, 0.0  ;;  %v953_v25 = vmin.f32 %v3468_v6, 0.0 }
 0x1a5   : > { %1926 = vst.msk [vmem:[%s2859_s19 + $0xec] sm:$0xf] %vm1866_vm6, %v2193_v61  ;;  %v2159_v24 = vpack.c.bf16 %v1571_v57, %v1571_v57  ;;  %v1242_v9 = vadd.f32 1.0, %v2592_v53  ;;  %v1019_v58 = vmul.f32 0.5, %v955_v3  ;;  %v1210_v44 = vmul.f32 1.442695, %v955_v3 }
 0x1a6   : > { %v2594_v7 = vpop.eup %2593  ;;  %v1603_v8 = vadd.f32 %v3221_v0, %v1532_v56  ;;  %2607 = vtanh.f32 %v987_v55  ;;  %v1142_v10 = vmul.f32 1.442695, %v921_v12  ;;  %vm1370_vm15 = vcmp.gt.f32.partialorder %v3387_v34, 0.0 }
 0x1a7   : > { %1892 = vst.msk [vmem:[%s2859_s19 + $0x64] sm:$0xf] %vm1866_vm6, %v2159_v24  ;;  %v1306_v49 = vmul.f32 %v2590_v2, %v1242_v9  ;;  %v2596_v35 = vpop.eup %2595  ;;  %v985_v15 = vmul.f32 0.5, %v921_v12  ;;  %2609 = vpow2.f32 %v1210_v44  ;;  %v1206_v36 = vmul.f32 1.442695, %v953_v25 }
 0x1a8   : > { %v2191_v13 = vpack.c.bf16 %v1603_v8, %v1603_v8  ;;  %v1274_v21 = vadd.f32 1.0, %v2596_v35  ;;  %2611 = vtanh.f32 %v1019_v58  ;;  %v1017_v27 = vmul.f32 0.5, %v953_v25 }
 0x1a9   : > { %v1434_v18 = vsel %vm1370_vm15, %v3387_v34, %v1306_v49  ;;  %2613 = vpow2.f32 %v1142_v10  ;;  %vm1402_vm0 = vcmp.gt.f32.partialorder %v3394_v17, 0.0  ;;  %vm1368_vm1 = vcmp.gt.f32.partialorder %v3420_v4, 0.0 }
 0x1aa   : > { %v2598_v14 = vpop.eup %2597  ;;  %1924 = vst.msk [vmem:[%s2859_s19 + $0xe4] sm:$0xf] %vm1866_vm6, %v2191_v13  ;;  %v1505_v22 = vmul.f32 %v3209_v63, %v1434_v18  ;;  %v1338_v26 = vmul.f32 %v2594_v7, %v1274_v21  ;;  %2615 = vtanh.f32 %v985_v15  ;;  %vm1400_vm2 = vcmp.gt.f32.partialorder %v3423_v31, 0.0 }
 0x1ab   : > { %v2600_v16 = vpop.eup %2599  ;;  %2617 = vpow2.f32 %v1206_v36  ;;  %vm1371_vm3 = vcmp.gt.f32.partialorder %v3446_v50, 0.0  ;;  %vm1403_vm4 = vcmp.gt.f32.partialorder %v3456_v1, 0.0  ;;  %vm1369_vm5 = vcmp.gt.f32.partialorder %v3459_v51, 0.0 }
 0x1ac   : > { %v2602_v45 = vpop.eup %2601  ;;  %v1576_v29 = vadd.f32 %v3221_v0, %v1505_v22  ;;  %v1240_v34 = vadd.f32 1.0, %v2600_v16  ;;  %v1466_v47 = vsel %vm1402_vm0, %v3394_v17, %v1338_v26  ;;  %2619 = vtanh.f32 %v1017_v27 }
 0x1ad   : > { %v2604_v30 = vpop.eup %2603  ;;  %v1537_v33 = vmul.f32 %v3209_v63, %v1466_v47  ;;  %vm1401_vm7 = vcmp.gt.f32.partialorder %v3468_v6, 0.0 }
 0x1ae   : > { %v2164_v32 = vpack.c.bf16 %v1576_v29, %v1576_v29  ;;  %v1304_v20 = vmul.f32 %v2598_v14, %v1240_v34  ;;  %v1272_v37 = vadd.f32 1.0, %v2604_v30 }
 0x1af   : > { %v1608_v11 = vadd.f32 %v3221_v0, %v1537_v33 }
 0x1b0   : > { %1897 = vst.msk [vmem:[%s2859_s19 + $0x78] sm:$0xf] %vm1866_vm6, %v2164_v32  ;;  %v1432_v28 = vsel %vm1368_vm1, %v3420_v4, %v1304_v20  ;;  %v1336_v41 = vmul.f32 %v2602_v45, %v1272_v37 }
 0x1b1   : > { %v1503_v38 = vmul.f32 %v3209_v63, %v1432_v28  ;;  %v2606_v17 = vpop.eup %2605  ;;  %v2196_v40 = vpack.c.bf16 %v1608_v11, %v1608_v11 }
 0x1b2   : > { %v1464_v46 = vsel %vm1400_vm2, %v3423_v31, %v1336_v41  ;;  %v1243_v60 = vadd.f32 1.0, %v2606_v17 }
 0x1b3   : > { %v1574_v19 = vadd.f32 %v3221_v0, %v1503_v38  ;;  %v1535_v43 = vmul.f32 %v3209_v63, %v1464_v46  ;;  %v2608_v48 = vpop.eup %2607  ;;  %1929 = vst.msk [vmem:[%s2859_s19 + $0xf8] sm:$0xf] %vm1866_vm6, %v2196_v40 }
 0x1b4   : > { %v1307_v52 = vmul.f32 %v2608_v48, %v1243_v60  ;;  %v2610_v42 = vpop.eup %2609 }
 0x1b5   : > { %v2162_v4 = vpack.c.bf16 %v1574_v19, %v1574_v19  ;;  %v1606_v39 = vadd.f32 %v3221_v0, %v1535_v43  ;;  %v2612_v54 = vpop.eup %2611  ;;  %v1275_v62 = vadd.f32 1.0, %v2610_v42 }
 0x1b6   : > { %v1435_v23 = vsel %vm1371_vm3, %v3446_v50, %v1307_v52  ;;  %v2614_v55 = vpop.eup %2613 }
 0x1b7   : > { %1895 = vst.msk [vmem:[%s2859_s19 + $0x70] sm:$0xf] %vm1866_vm6, %v2162_v4  ;;  %v2194_v31 = vpack.c.bf16 %v1606_v39, %v1606_v39  ;;  %v1506_v59 = vmul.f32 %v3209_v63, %v1435_v23  ;;  %v2616_v2 = vpop.eup %2615  ;;  %v1339_v61 = vmul.f32 %v2612_v54, %v1275_v62  ;;  %v1241_v57 = vadd.f32 1.0, %v2614_v55 }
 0x1b8   : > { %v2618_v5 = vpop.eup %2617 }
 0x1b9   : > { %1927 = vst.msk [vmem:[%s2859_s19 + $0xf0] sm:$0xf] %vm1866_vm6, %v2194_v31  ;;  %v1577_v53 = vadd.f32 %v3221_v0, %v1506_v59  ;;  %v1467_v56 = vsel %vm1403_vm4, %v3456_v1, %v1339_v61  ;;  %v1305_v3 = vmul.f32 %v2616_v2, %v1241_v57  ;;  %v1273_v50 = vadd.f32 1.0, %v2618_v5  ;;  %v2620_v24 = vpop.eup %2619 }
 0x1ba   : > { %v1538_v12 = vmul.f32 %v3209_v63, %v1467_v56 }
 0x1bb   : > { %v2165_v9 = vpack.c.bf16 %v1577_v53, %v1577_v53  ;;  %v1433_v7 = vsel %vm1369_vm5, %v3459_v51, %v1305_v3  ;;  %v1337_v8 = vmul.f32 %v2620_v24, %v1273_v50 }
 0x1bc   : > { %v1609_v58 = vadd.f32 %v3221_v0, %v1538_v12  ;;  %v1504_v1 = vmul.f32 %v3209_v63, %v1433_v7 }
 0x1bd   : > { %1898 = vst.msk [vmem:[%s2859_s19 + $0x7c] sm:$0xf] %vm1866_vm6, %v2165_v9  ;;  %v1465_v44 = vsel %vm1401_vm7, %v3468_v6, %v1337_v8 }
 0x1be   : > { %v2197_v49 = vpack.c.bf16 %v1609_v58, %v1609_v58  ;;  %v1575_v10 = vadd.f32 %v3221_v0, %v1504_v1  ;;  %v1536_v25 = vmul.f32 %v3209_v63, %v1465_v44 }
 0x1c0   : > { %1930 = vst.msk [vmem:[%s2859_s19 + $0xfc] sm:$0xf] %vm1866_vm6, %v2197_v49  ;;  %v2163_v35 = vpack.c.bf16 %v1575_v10, %v1575_v10  ;;  %v1607_v51 = vadd.f32 %v3221_v0, %v1536_v25 }
 0x1c2   : > { %1896 = vst.msk [vmem:[%s2859_s19 + $0x74] sm:$0xf] %vm1866_vm6, %v2163_v35  ;;  %v2195_v13 = vpack.c.bf16 %v1607_v51, %v1607_v51 }
 0x1c4   : > { %1928 = vst.msk [vmem:[%s2859_s19 + $0xf4] sm:$0xf] %vm1866_vm6, %v2195_v13 }
 0x1c5 PF: > { %s15_s18 = sadd.s32 1, %s2630_s18  }
 0x1c6   : > { %p12_p4 = scmp.ge.s32.totalorder %s15_s18, 14  }
 0x1c8   :  { %14 = sbr.rel (!%p12_p4) target bundleno = 1 (0x1), region = 70 }

// kernel: net_forward.7
= control target key start
LH: loop header
LB: loop body
LE: loop exit
PB: predicated region body
PF: predicated region fallthrough
CT: control target
= control target key end

     0   :  { %s4686_s18 = smov 0   ;;  %s6462_s0 = inlined_call_operand.vmem [shape: bf16[1536,600], index: 0, kind: input, shape index: {}]   ;;  %s6463_s1 = inlined_call_operand.vmem [shape: bf16[600,32], index: 1, kind: input, shape index: {}]   ;;  %s6464_s2 = inlined_call_operand.vmem [shape: f32[1,32], index: 2, kind: input, shape index: {}]   ;;  %s6465_s3 = inlined_call_operand.vmem [shape: f32[1,32], index: 3, kind: input, shape index: {}]   ;;  %s6466_s4 = inlined_call_operand.vmem [shape: f32[1,32], index: 4, kind: input, shape index: {}]   ;;  %s6467_s5 = inlined_call_operand.vmem [shape: bf16[1536,32], index: 5, kind: output, shape index: {}]  }
   0x1 LB: > { %s3594_s19 = sadd.s32 4294967295, %s4653_s18   ;;  %p3598_p0 = scmp.ge.s32.totalorder %s4653_s18, 1  ;;  %s4653_s18 = sphi %s4686_s18, %s15_s18  }
   0x2   : > { %p189_p1 = scmp.lt.s32.totalorder %s4653_s18, 4 }
   0x4   : > { %p190_p2 = pnand %p3598_p0, %p189_p1 }
   0x6   : > { %193 = sbr.rel (%p190_p2) target bundleno = 698 (0x2ba), region = 40 }
   0xb   : > { %v4123_v0 = vld [vmem:[%s6463_s1 + $0x38] sm:$0xff]   ;;  %v4655_v1 = vmov 0   ;;  %s3599_s22 = sshll.u32 %s3594_s19, 6  ;;  %v4124_v2 = vld [vmem:[%s6463_s1 + $0x30] sm:$0xff]   ;;  %v4125_v3 = vld [vmem:[%s6463_s1 + $0x28] sm:$0xff]   ;;  %vm1628_vm0 = vcmask 1043456  }
   0xc   : > { %1632 = vmatprep.subr.bf16.mxu0 %v4655_v1  ;;  %4080 = vmatprep.subr.bf16.mxu1 %v4655_v1  ;;  %p219_p3 = scmp.lt.s32.totalorder %s3599_s22, 191  ;;  %v4126_v4 = vld [vmem:[%s6463_s1 + $0x20] sm:$0xff]   ;;  %v4127_v5 = vld [vmem:[%s6463_s1 + $0x18] sm:$0xff]   ;;  %v4128_v7 = vld [vmem:[%s6463_s1 + $0x10] sm:$0xff]   ;;  %vm1531_vm1 = vcmask 719872   ;;  %vm3473_vm4 = vcmask 257024  }
   0xd   : > { %1633 = vmatpush1.bf16.msra.mxu0 %v4123_v0  ;;  %4096 = vmatpush1.bf16.msra.mxu1 %v4123_v0  ;;  %v4129_v9 = vld [vmem:[%s6463_s1 + $0x8] sm:$0xff]   ;;  %v4130_v10 = vld [vmem:[%s6463_s1] sm:$0xff]   ;;  %v4131_v11 = vld [vmem:[%s6463_s1 + $0x78] sm:$0xff]  }
   0xe   : > { %1634 = vmatprep.subr.bf16.mxu0 %v4655_v1  ;;  %4081 = vmatprep.subr.bf16.mxu1 %v4655_v1  ;;  %s6523_s22 = smov (!%p219_p3, %s3599_s22), 191  ;;  %v4132_v12 = vld [vmem:[%s6463_s1 + $0x70] sm:$0xff]   ;;  %v4133_v13 = vld [vmem:[%s6463_s1 + $0x68] sm:$0xff]   ;;  %v4134_v14 = vld [vmem:[%s6463_s1 + $0x60] sm:$0xff]  }
   0xf   : > { %s4113_s29 = smul.u32 20, %s6523_s22  ;;  %v4135_v15 = vld [vmem:[%s6463_s1 + $0x58] sm:$0xff]   ;;  %v4136_v16 = vld [vmem:[%s6463_s1 + $0x50] sm:$0xff]   ;;  %v4137_v17 = vld [vmem:[%s6463_s1 + $0x48] sm:$0xff]   ;;  %s3602_s15 = sshll.u32 %s6523_s22, 2 }
  0x10   : > { %v4138_v18 = vld [vmem:[%s6463_s1 + $0x40] sm:$0xff]   ;;  %v4145_v19 = vld [vmem:[%s6463_s1 + $0x128] ss:$0 sps:$4 sm:$0xff]   ;;  %v4146_v22 = vld [vmem:[%s6463_s1 + $0xb8] sm:$0xff]   ;;  %s5512_s17 = scalar_lea.vmem %s6467_s5, %s3602_s15 }
  0x11   : > { %1635 = vmatpush1.bf16.msra.mxu0 %v4124_v2  ;;  %4097 = vmatpush1.bf16.msra.mxu1 %v4124_v2  ;;  %s4723_s9 = scalar_lea.vmem %s6462_s0, %s4113_s29  ;;  %v1630_v23 = vsel %vm1628_vm0, %v4145_v19, 0  ;;  %v4178_v26 = vld [vmem:[%s6463_s1 + $0x120] sm:$0xff]   ;;  %v4147_v27 = vld [vmem:[%s6463_s1 + $0xb0] sm:$0xff]   ;;  %v4211_v28 = vld [vmem:[%s6463_s1 + $0x118] sm:$0xff]  }
  0x12   : > { %1636 = vmatprep.subr.bf16.mxu0 %v4655_v1  ;;  %4082 = vmatprep.subr.bf16.mxu1 %v4655_v1  ;;  %v4141_v6 = vld [vmem:[%s4723_s9 + $0x4] ss:$20 sps:$4 sm:$0xff]   ;;  %v4139_v20 = vld [vmem:[%s4723_s9] ss:$20 sps:$4 sm:$0xff]   ;;  %v4152_v29 = vld [vmem:[%s4723_s9 + $0x28] ss:$20 sps:$4 sm:$0xff]  }
  0x13   : > { %v4144_v8 = vld [vmem:[%s4723_s9 + $0x3c4] ss:$20 sps:$4 sm:$0xff]   ;;  %1664 = vmatprep.mubr.bf16.mxu0 %v4141_v6  ;;  %v4142_v21 = vld [vmem:[%s4723_s9 + $0x3c0] ss:$20 sps:$4 sm:$0xff]   ;;  %v4153_v30 = vld [vmem:[%s4723_s9 + $0x3e8] ss:$20 sps:$4 sm:$0xff]  }
  0x14   : > { %1856 = vmatprep.mubr.bf16.mxu1 %v4144_v8  ;;  %v4148_v24 = vld [vmem:[%s4723_s9 + $0x2c] ss:$20 sps:$4 sm:$0xff]   ;;  %v4156_v32 = vld [vmem:[%s4723_s9 + $0x54] ss:$20 sps:$4 sm:$0xff]   ;;  %v4160_v36 = vld [vmem:[%s4723_s9 + $0x50] ss:$20 sps:$4 sm:$0xff]  }
  0x15   : > { %1637 = vmatpush1.bf16.msra.mxu0 %v4125_v3  ;;  %4098 = vmatpush1.bf16.msra.mxu1 %v4125_v3  ;;  %v4150_v25 = vld [vmem:[%s4723_s9 + $0x3ec] ss:$20 sps:$4 sm:$0xff]   ;;  %v4158_v33 = vld [vmem:[%s4723_s9 + $0x414] ss:$20 sps:$4 sm:$0xff]   ;;  %v4161_v37 = vld [vmem:[%s4723_s9 + $0x410] ss:$20 sps:$4 sm:$0xff]  }
  0x16   : > { %1638 = vmatprep.subr.bf16.mxu0 %v4655_v1  ;;  %4083 = vmatprep.subr.bf16.mxu1 %v4655_v1  ;;  %v4154_v31 = vld [vmem:[%s6463_s1 + $0xa8] sm:$0xff]   ;;  %v4236_v34 = vld [vmem:[%s6463_s1 + $0x110] sm:$0xff]   ;;  %v4155_v35 = vld [vmem:[%s6463_s1 + $0xa0] sm:$0xff]  }
  0x17   : > { %v4162_v38 = vld [vmem:[%s6463_s1 + $0x98] sm:$0xff]   ;;  %v4261_v41 = vld [vmem:[%s6463_s1 + $0x108] sm:$0xff]   ;;  %v4163_v42 = vld [vmem:[%s6463_s1 + $0x90] sm:$0xff]  }
  0x18   : > { %v4164_v39 = vld [vmem:[%s4723_s9 + $0x7c] ss:$20 sps:$4 sm:$0xff]   ;;  %v4168_v43 = vld [vmem:[%s4723_s9 + $0x78] ss:$20 sps:$4 sm:$0xff]   ;;  %v4171_v48 = vld [vmem:[%s6463_s1 + $0x80] sm:$0xff]  }
  0x19   : > { %1639 = vmatpush1.bf16.msra.mxu0 %v4126_v4  ;;  %4099 = vmatpush1.bf16.msra.mxu1 %v4126_v4  ;;  %v4166_v40 = vld [vmem:[%s4723_s9 + $0x43c] ss:$20 sps:$4 sm:$0xff]   ;;  %v4169_v44 = vld [vmem:[%s4723_s9 + $0x438] ss:$20 sps:$4 sm:$0xff]   ;;  %v4176_v49 = vld [vmem:[%s4723_s9 + $0xa0] ss:$20 sps:$4 sm:$0xff]  }
  0x1a   : > { %1640 = vmatprep.subr.bf16.mxu0 %v4655_v1  ;;  %4084 = vmatprep.subr.bf16.mxu1 %v4655_v1  ;;  %v4170_v45 = vld [vmem:[%s6463_s1 + $0x88] sm:$0xff]   ;;  %v4172_v46 = vld [vmem:[%s4723_s9 + $0xa4] ss:$20 sps:$4 sm:$0xff]   ;;  %v4177_v50 = vld [vmem:[%s4723_s9 + $0x460] ss:$20 sps:$4 sm:$0xff]  }
  0x1b   : > { %v4174_v47 = vld [vmem:[%s4723_s9 + $0x464] ss:$20 sps:$4 sm:$0xff]   ;;  %v4181_v52 = vld [vmem:[%s4723_s9 + $0xcc] ss:$20 sps:$4 sm:$0xff]   ;;  %v4180_v55 = vld [vmem:[%s6463_s1 + $0xf0] sm:$0xff]  }
  0x1c   : > { %v4179_v51 = vld [vmem:[%s6463_s1 + $0xf8] sm:$0xff]   ;;  %v4183_v53 = vld [vmem:[%s4723_s9 + $0x48c] ss:$20 sps:$4 sm:$0xff]   ;;  %v4189_v59 = vld [vmem:[%s4723_s9 + $0xf4] ss:$20 sps:$4 sm:$0xff]  }
  0x1d   : > { %1641 = vmatpush1.bf16.msra.mxu0 %v4127_v5  ;;  %4100 = vmatpush1.bf16.msra.mxu1 %v4127_v5  ;;  %v4286_v54 = vld [vmem:[%s6463_s1 + $0x100] sm:$0xff]   ;;  %v4185_v56 = vld [vmem:[%s4723_s9 + $0xc8] ss:$20 sps:$4 sm:$0xff]   ;;  %v4196_v4 = vld [vmem:[%s6463_s1 + $0xd0] sm:$0xff]  }
  0x1e   : > { %1642 = vmatprep.subr.bf16.mxu0 %v4655_v1  ;;  %4085 = vmatprep.subr.bf16.mxu1 %v4655_v1  ;;  %v4186_v57 = vld [vmem:[%s4723_s9 + $0x488] ss:$20 sps:$4 sm:$0xff]   ;;  %v4188_v61 = vld [vmem:[%s6463_s1 + $0xe0] sm:$0xff]   ;;  %v4201_v5 = vld [vmem:[%s4723_s9 + $0x118] ss:$20 sps:$4 sm:$0xff]  }
  0x1f   : > { %v4187_v58 = vld [vmem:[%s6463_s1 + $0xe8] sm:$0xff]   ;;  %v4193_v62 = vld [vmem:[%s4723_s9 + $0xf0] ss:$20 sps:$4 sm:$0xff]   ;;  %v4195_v0 = vld [vmem:[%s6463_s1 + $0xd8] sm:$0xff]  }
  0x20   : > { %v4191_v60 = vld [vmem:[%s4723_s9 + $0x4b4] ss:$20 sps:$4 sm:$0xff]   ;;  %v4194_v63 = vld [vmem:[%s4723_s9 + $0x4b0] ss:$20 sps:$4 sm:$0xff]   ;;  %v4202_v6 = vld [vmem:[%s4723_s9 + $0x4d8] ss:$20 sps:$4 sm:$0xff]  }
  0x21   : > { %1643 = vmatpush1.bf16.msra.mxu0 %v4128_v7  ;;  %4101 = vmatpush1.bf16.msra.mxu1 %v4128_v7  ;;  %v4197_v2 = vld [vmem:[%s4723_s9 + $0x11c] ss:$20 sps:$4 sm:$0xff]   ;;  %v4203_v7 = vld [vmem:[%s6463_s1 + $0xc8] sm:$0xff]   ;;  %v4205_v8 = vld [vmem:[%s4723_s9 + $0x144] ss:$20 sps:$4 sm:$0xff]  }
  0x22   : > { %1644 = vmatprep.subr.bf16.mxu0 %v4655_v1  ;;  %4086 = vmatprep.subr.bf16.mxu1 %v4655_v1  ;;  %v4199_v3 = vld [vmem:[%s4723_s9 + $0x4dc] ss:$20 sps:$4 sm:$0xff]  }
  0x25   : > { %1645 = vmatpush1.bf16.msra.mxu0 %v4129_v9  ;;  %4102 = vmatpush1.bf16.msra.mxu1 %v4129_v9  ;;  %v4209_v9 = vld [vmem:[%s4723_s9 + $0xc] ss:$20 sps:$4 sm:$0xff]  }
  0x26   : > { %1646 = vmatprep.subr.bf16.mxu0 %v4655_v1  ;;  %4087 = vmatprep.subr.bf16.mxu1 %v4655_v1 }
  0x29   : > { %1647 = vmatpush1.bf16.msra.mxu0 %v4130_v10  ;;  %4103 = vmatpush1.bf16.msra.mxu1 %v4130_v10  ;;  %v4204_v10 = vld [vmem:[%s6463_s1 + $0xc0] sm:$0xff]  }
  0x2a   : > { %1648 = vmatprep.subr.bf16.mxu0 %v4655_v1  ;;  %4088 = vmatprep.subr.bf16.mxu1 %v4655_v1 }
  0x2d   : > { %1649 = vmatpush2.bf16.msra.mxu0 %v4131_v11  ;;  %4104 = vmatpush2.bf16.msra.mxu1 %v4131_v11  ;;  %v4207_v11 = vld [vmem:[%s4723_s9 + $0x8] ss:$20 sps:$4 sm:$0xff]  }
  0x2e   : > { %1650 = vmatprep.subr.bf16.mxu0 %v4655_v1  ;;  %4089 = vmatprep.subr.bf16.mxu1 %v4655_v1 }
  0x31   : > { %1651 = vmatpush2.bf16.msra.mxu0 %v4132_v12  ;;  %4105 = vmatpush2.bf16.msra.mxu1 %v4132_v12  ;;  %v4210_v12 = vld [vmem:[%s4723_s9 + $0x140] ss:$20 sps:$4 sm:$0xff]  }
  0x32   : > { %1652 = vmatprep.subr.bf16.mxu0 %v4655_v1  ;;  %4090 = vmatprep.subr.bf16.mxu1 %v4655_v1 }
  0x35   : > { %1653 = vmatpush2.bf16.msra.mxu0 %v4133_v13  ;;  %4106 = vmatpush2.bf16.msra.mxu1 %v4133_v13  ;;  %v4212_v13 = vld [vmem:[%s4723_s9 + $0x16c] ss:$20 sps:$4 sm:$0xff]  }
  0x36   : > { %1654 = vmatprep.subr.bf16.mxu0 %v4655_v1  ;;  %4091 = vmatprep.subr.bf16.mxu1 %v4655_v1 }
  0x39   : > { %1655 = vmatpush2.bf16.msra.mxu0 %v4134_v14  ;;  %4107 = vmatpush2.bf16.msra.mxu1 %v4134_v14  ;;  %v4214_v14 = vld [vmem:[%s4723_s9 + $0x34] ss:$20 sps:$4 sm:$0xff]  }
  0x3a   : > { %1656 = vmatprep.subr.bf16.mxu0 %v4655_v1  ;;  %4092 = vmatprep.subr.bf16.mxu1 %v4655_v1 }
  0x3d   : > { %1657 = vmatpush2.bf16.msra.mxu0 %v4135_v15  ;;  %4108 = vmatpush2.bf16.msra.mxu1 %v4135_v15  ;;  %v4216_v15 = vld [vmem:[%s4723_s9 + $0x168] ss:$20 sps:$4 sm:$0xff]  }
  0x3e   : > { %1658 = vmatprep.subr.bf16.mxu0 %v4655_v1  ;;  %4093 = vmatprep.subr.bf16.mxu1 %v4655_v1 }
  0x41   : > { %1659 = vmatpush2.bf16.msra.mxu0 %v4136_v16  ;;  %4109 = vmatpush2.bf16.msra.mxu1 %v4136_v16  ;;  %v4217_v16 = vld [vmem:[%s4723_s9 + $0x30] ss:$20 sps:$4 sm:$0xff]  }
  0x42   : > { %1660 = vmatprep.subr.bf16.mxu0 %v4655_v1  ;;  %4094 = vmatprep.subr.bf16.mxu1 %v4655_v1 }
  0x45   : > { %1661 = vmatpush2.bf16.msra.mxu0 %v4137_v17  ;;  %4110 = vmatpush2.bf16.msra.mxu1 %v4137_v17  ;;  %v4218_v17 = vld [vmem:[%s4723_s9 + $0x194] ss:$20 sps:$4 sm:$0xff]  }
  0x46   : > { %1662 = vmatprep.subr.bf16.mxu0 %v4655_v1  ;;  %4095 = vmatprep.subr.bf16.mxu1 %v4655_v1 }
  0x49   : > { %1663 = vmatpush2.bf16.msra.mxu0 %v4138_v18  ;;  %4111 = vmatpush2.bf16.msra.mxu1 %v4138_v18  ;;  %v4222_v18 = vld [vmem:[%s4723_s9 + $0x190] ss:$20 sps:$4 sm:$0xff]  }
  0x4a   : > { %1921 = vmatprep.subr.bf16.mxu1 %v4655_v1  ;;  %4112 = vmatprep.subr.msk.bf16.mxu0 %vm1628_vm0, %v4145_v19  ;;  %v4223_v19 = vld [vmem:[%s4723_s9 + $0x58] ss:$20 sps:$4 sm:$0xff]  }
  0x4c   : > { %1665 = vmatmul.mubr.bf16.vlgmr.msra.gmra.mxu0 %v4139_v20  ;;  %1857 = vmatmul.mubr.bf16.vlgmr.msra.gmra.mxu1 %v4142_v21  ;;  %v4224_v20 = vld [vmem:[%s4723_s9 + $0x1bc] ss:$20 sps:$4 sm:$0xff]   ;;  %v4226_v21 = vld [vmem:[%s4723_s9 + $0x84] ss:$20 sps:$4 sm:$0xff]  }
  0x4d   : > { %1922 = vmatpush1.bf16.msra.mxu1 %v4146_v22  ;;  %4005 = vmatpush3.bf16.msra.mxu0 %v1630_v23  ;;  %v4228_v22 = vld [vmem:[%s4723_s9 + $0x1b8] ss:$20 sps:$4 sm:$0xff]   ;;  %v4229_v23 = vld [vmem:[%s4723_s9 + $0x80] ss:$20 sps:$4 sm:$0xff]  }
  0x4e   : > { %1923 = vmatprep.subr.bf16.mxu1 %v4655_v1  ;;  %1672 = vmatprep.mubr.bf16.mxu0 %v4148_v24  ;;  %v4230_v24 = vld [vmem:[%s4723_s9 + $0x1e4] ss:$20 sps:$4 sm:$0xff]  }
  0x4f   : > { %1864 = vmatprep.mubr.bf16.mxu1 %v4150_v25  ;;  %4006 = vmatprep.subr.bf16.mxu0 %v4178_v26  ;;  %v4232_v25 = vld [vmem:[%s4723_s9 + $0xac] ss:$20 sps:$4 sm:$0xff]  }
  0x51   : > { %1924 = vmatpush1.bf16.msra.mxu1 %v4147_v27  ;;  %4007 = vmatpush3.bf16.msra.mxu0 %v4178_v26  ;;  %v4234_v26 = vld [vmem:[%s4723_s9 + $0x1e0] ss:$20 sps:$4 sm:$0xff]   ;;  %v4235_v27 = vld [vmem:[%s4723_s9 + $0xa8] ss:$20 sps:$4 sm:$0xff]  }
  0x52   : > { %1925 = vmatprep.subr.bf16.mxu1 %v4655_v1  ;;  %4008 = vmatprep.subr.bf16.mxu0 %v4211_v28 }
  0x54   : > { %1673 = vmatmul.mubr.bf16.gmra.mxu0 %v4152_v29  ;;  %1865 = vmatmul.mubr.bf16.gmra.mxu1 %v4153_v30  ;;  %v4239_v29 = vld [vmem:[%s4723_s9 + $0xd4] ss:$20 sps:$4 sm:$0xff]  }
  0x55   : > { %1926 = vmatpush1.bf16.msra.mxu1 %v4154_v31  ;;  %1680 = vmatprep.mubr.bf16.mxu0 %v4156_v32  ;;  %v4241_v30 = vld [vmem:[%s4723_s9 + $0x208] ss:$20 sps:$4 sm:$0xff]   ;;  %v4242_v31 = vld [vmem:[%s4723_s9 + $0xd0] ss:$20 sps:$4 sm:$0xff]  }
  0x56   : > { %1927 = vmatprep.subr.bf16.mxu1 %v4655_v1  ;;  %1872 = vmatprep.mubr.bf16.mxu1 %v4158_v33  ;;  %v4243_v32 = vld [vmem:[%s4723_s9 + $0x234] ss:$20 sps:$4 sm:$0xff]   ;;  %v4245_v33 = vld [vmem:[%s4723_s9 + $0xfc] ss:$20 sps:$4 sm:$0xff]  }
  0x57   : > { %4009 = vmatpush3.bf16.msra.mxu0 %v4211_v28  ;;  %v4237_v28 = vld [vmem:[%s4723_s9 + $0x20c] ss:$20 sps:$4 sm:$0xff]  }
  0x58   : > { %4010 = vmatprep.subr.bf16.mxu0 %v4236_v34 }
  0x59   : > { %1928 = vmatpush1.bf16.msra.mxu1 %v4155_v35  ;;  %v4248_v35 = vld [vmem:[%s4723_s9 + $0xf8] ss:$20 sps:$4 sm:$0xff]  }
  0x5a   : > { %1929 = vmatprep.subr.bf16.mxu1 %v4655_v1 }
  0x5b   : > { %4011 = vmatpush3.bf16.msra.mxu0 %v4236_v34  ;;  %v4247_v34 = vld [vmem:[%s4723_s9 + $0x230] ss:$20 sps:$4 sm:$0xff]  }
  0x5c   : > { %1681 = vmatmul.mubr.bf16.gmra.mxu0 %v4160_v36  ;;  %1873 = vmatmul.mubr.bf16.gmra.mxu1 %v4161_v37  ;;  %v4249_v36 = vld [vmem:[%s4723_s9 + $0x25c] ss:$20 sps:$4 sm:$0xff]   ;;  %v4251_v37 = vld [vmem:[%s4723_s9 + $0x124] ss:$20 sps:$4 sm:$0xff]  }
  0x5d   : > { %1930 = vmatpush1.bf16.msra.mxu1 %v4162_v38  ;;  %1688 = vmatprep.mubr.bf16.mxu0 %v4164_v39  ;;  %v4253_v38 = vld [vmem:[%s4723_s9 + $0x258] ss:$20 sps:$4 sm:$0xff]   ;;  %v4254_v39 = vld [vmem:[%s4723_s9 + $0x120] ss:$20 sps:$4 sm:$0xff]  }
  0x5e   : > { %1931 = vmatprep.subr.bf16.mxu1 %v4655_v1  ;;  %1880 = vmatprep.mubr.bf16.mxu1 %v4166_v40  ;;  %v4255_v40 = vld [vmem:[%s4723_s9 + $0x284] ss:$20 sps:$4 sm:$0xff]  }
  0x5f   : > { %4012 = vmatprep.subr.bf16.mxu0 %v4261_v41 }
  0x60   : > { %4013 = vmatpush3.bf16.msra.mxu0 %v4261_v41  ;;  %v4257_v41 = vld [vmem:[%s4723_s9 + $0x14c] ss:$20 sps:$4 sm:$0xff]  }
  0x61   : > { %1932 = vmatpush1.bf16.msra.mxu1 %v4163_v42  ;;  %4014 = vmatprep.subr.bf16.mxu0 %v4286_v54  ;;  %v4259_v42 = vld [vmem:[%s4723_s9 + $0x280] ss:$20 sps:$4 sm:$0xff]  }
  0x62   : > { %1933 = vmatprep.subr.bf16.mxu1 %v4655_v1 }
  0x64   : > { %1689 = vmatmul.mubr.bf16.gmra.mxu0 %v4168_v43  ;;  %1881 = vmatmul.mubr.bf16.gmra.mxu1 %v4169_v44  ;;  %v4260_v43 = vld [vmem:[%s4723_s9 + $0x148] ss:$20 sps:$4 sm:$0xff]   ;;  %v4262_v44 = vld [vmem:[%s4723_s9 + $0x2ac] ss:$20 sps:$4 sm:$0xff]  }
  0x65   : > { %1934 = vmatpush1.bf16.msra.mxu1 %v4170_v45  ;;  %1696 = vmatprep.mubr.bf16.mxu0 %v4172_v46  ;;  %v4264_v45 = vld [vmem:[%s4723_s9 + $0x174] ss:$20 sps:$4 sm:$0xff]  }
  0x66   : > { %1935 = vmatprep.subr.bf16.mxu1 %v4655_v1  ;;  %1888 = vmatprep.mubr.bf16.mxu1 %v4174_v47  ;;  %v4266_v46 = vld [vmem:[%s4723_s9 + $0x2a8] ss:$20 sps:$4 sm:$0xff]   ;;  %v4267_v47 = vld [vmem:[%s4723_s9 + $0x170] ss:$20 sps:$4 sm:$0xff]  }
  0x67   : > { %4015 = vmatpush3.bf16.msra.mxu0 %v4286_v54  ;;  %v4278_v54 = vld [vmem:[%s4723_s9 + $0x2f8] ss:$20 sps:$4 sm:$0xff]  }
  0x69   : > { %1936 = vmatpush1.bf16.msra.mxu1 %v4171_v48  ;;  %v4268_v48 = vld [vmem:[%s4723_s9 + $0x2d4] ss:$20 sps:$4 sm:$0xff]  }
  0x6a   : > { %1937 = vmatprep.subr.bf16.mxu1 %v4655_v1 }
  0x6c   : > { %1697 = vmatmul.mubr.bf16.gmra.mxu0 %v4176_v49  ;;  %1889 = vmatmul.mubr.bf16.gmra.mxu1 %v4177_v50  ;;  %v4270_v49 = vld [vmem:[%s4723_s9 + $0x19c] ss:$20 sps:$4 sm:$0xff]  }
  0x6d   : > { %1938 = vmatpush2.bf16.msra.mxu1 %v4179_v51  ;;  %1704 = vmatprep.mubr.bf16.mxu0 %v4181_v52  ;;  %v4272_v50 = vld [vmem:[%s4723_s9 + $0x2d0] ss:$20 sps:$4 sm:$0xff]   ;;  %v4273_v51 = vld [vmem:[%s4723_s9 + $0x198] ss:$20 sps:$4 sm:$0xff]  }
  0x6e   : > { %1939 = vmatprep.subr.bf16.mxu1 %v4655_v1  ;;  %1896 = vmatprep.mubr.bf16.mxu1 %v4183_v53  ;;  %v4274_v52 = vld [vmem:[%s4723_s9 + $0x2fc] ss:$20 sps:$4 sm:$0xff]   ;;  %v4276_v53 = vld [vmem:[%s4723_s9 + $0x1c4] ss:$20 sps:$4 sm:$0xff]  }
  0x71   : > { %1940 = vmatpush2.bf16.msra.mxu1 %v4180_v55  ;;  %v4279_v55 = vld [vmem:[%s4723_s9 + $0x1c0] ss:$20 sps:$4 sm:$0xff]  }
  0x72   : > { %1941 = vmatprep.subr.bf16.mxu1 %v4655_v1 }
  0x74   : > { %1705 = vmatmul.mubr.bf16.gmra.mxu0 %v4185_v56  ;;  %1897 = vmatmul.mubr.bf16.gmra.mxu1 %v4186_v57  ;;  %v4280_v56 = vld [vmem:[%s4723_s9 + $0x324] ss:$20 sps:$4 sm:$0xff]   ;;  %v4282_v57 = vld [vmem:[%s4723_s9 + $0x1ec] ss:$20 sps:$4 sm:$0xff]  }
  0x75   : > { %1942 = vmatpush2.bf16.msra.mxu1 %v4187_v58  ;;  %1712 = vmatprep.mubr.bf16.mxu0 %v4189_v59  ;;  %v4284_v58 = vld [vmem:[%s4723_s9 + $0x320] ss:$20 sps:$4 sm:$0xff]   ;;  %v4285_v59 = vld [vmem:[%s4723_s9 + $0x1e8] ss:$20 sps:$4 sm:$0xff]  }
  0x76   : > { %1943 = vmatprep.subr.bf16.mxu1 %v4655_v1  ;;  %1904 = vmatprep.mubr.bf16.mxu1 %v4191_v60  ;;  %v4287_v60 = vld [vmem:[%s4723_s9 + $0x34c] ss:$20 sps:$4 sm:$0xff]  }
  0x79   : > { %1944 = vmatpush2.bf16.msra.mxu1 %v4188_v61  ;;  %v4289_v61 = vld [vmem:[%s4723_s9 + $0x214] ss:$20 sps:$4 sm:$0xff]  }
  0x7a   : > { %1945 = vmatprep.subr.bf16.mxu1 %v4655_v1 }
  0x7c   : > { %1713 = vmatmul.mubr.bf16.gmra.mxu0 %v4193_v62  ;;  %1905 = vmatmul.mubr.bf16.gmra.mxu1 %v4194_v63  ;;  %v4291_v62 = vld [vmem:[%s4723_s9 + $0x348] ss:$20 sps:$4 sm:$0xff]   ;;  %v4292_v63 = vld [vmem:[%s4723_s9 + $0x210] ss:$20 sps:$4 sm:$0xff]  }
  0x7d   : > { %1946 = vmatpush2.bf16.msra.mxu1 %v4195_v0  ;;  %1720 = vmatprep.mubr.bf16.mxu0 %v4197_v2  ;;  %v4293_v0 = vld [vmem:[%s4723_s9 + $0x374] ss:$20 sps:$4 sm:$0xff]   ;;  %v4295_v2 = vld [vmem:[%s4723_s9 + $0x23c] ss:$20 sps:$4 sm:$0xff]  }
  0x7e   : > { %1947 = vmatprep.subr.bf16.mxu1 %v4655_v1  ;;  %1912 = vmatprep.mubr.bf16.mxu1 %v4199_v3  ;;  %v4297_v3 = vld [vmem:[%s4723_s9 + $0x370] ss:$20 sps:$4 sm:$0xff]  }
  0x81   : > { %1948 = vmatpush2.bf16.msra.mxu1 %v4196_v4  ;;  %v4298_v4 = vld [vmem:[%s4723_s9 + $0x238] ss:$20 sps:$4 sm:$0xff]  }
  0x82   : > { %1949 = vmatprep.subr.bf16.mxu1 %v4655_v1 }
  0x84   : > { %1721 = vmatmul.mubr.bf16.gmra.mxu0 %v4201_v5  ;;  %1913 = vmatmul.mubr.bf16.gmra.mxu1 %v4202_v6  ;;  %v4299_v5 = vld [vmem:[%s4723_s9 + $0x39c] ss:$20 sps:$4 sm:$0xff]   ;;  %v4301_v6 = vld [vmem:[%s4723_s9 + $0x264] ss:$20 sps:$4 sm:$0xff]  }
  0x85   : > { %1950 = vmatpush2.bf16.msra.mxu1 %v4203_v7  ;;  %1728 = vmatprep.mubr.bf16.mxu0 %v4205_v8  ;;  %v4303_v7 = vld [vmem:[%s4723_s9 + $0x398] ss:$20 sps:$4 sm:$0xff]   ;;  %v4304_v8 = vld [vmem:[%s4723_s9 + $0x260] ss:$20 sps:$4 sm:$0xff]  }
  0x86   : > { %1951 = vmatprep.subr.bf16.mxu1 %v4655_v1  ;;  %1953 = vmatprep.mubr.bf16.mxu1 %v4209_v9  ;;  %v4220_v1 = vld [vmem:[%s4723_s9 + $0x5c] ss:$20 sps:$4 sm:$0xff]   ;;  %v4305_v9 = vld [vmem:[%s4723_s9 + $0x28c] ss:$20 sps:$4 sm:$0xff]  }
  0x89   : > { %1952 = vmatpush2.bf16.msra.mxu1 %v4204_v10  ;;  %v4307_v10 = vld [vmem:[%s4723_s9 + $0x10] ss:$20 sps:$4 sm:$0xff]  }
  0x8c   : > { %1729 = vmatmul.mubr.bf16.gmra.mxu0 %v4210_v12  ;;  %1954 = vmatmul.mubr.bf16.vlgmr.msra.gmra.mxu1 %v4207_v11  ;;  %v4308_v11 = vld [vmem:[%s4723_s9 + $0x288] ss:$20 sps:$4 sm:$0xff]   ;;  %v4309_v12 = vld [vmem:[%s4723_s9 + $0x38] ss:$20 sps:$4 sm:$0xff]  }
  0x8d   : > { %1736 = vmatprep.mubr.bf16.mxu0 %v4212_v13  ;;  %1961 = vmatprep.mubr.bf16.mxu1 %v4214_v14  ;;  %v4310_v13 = vld [vmem:[%s4723_s9 + $0x2b4] ss:$20 sps:$4 sm:$0xff]  }
  0x8e   : > { %v4312_v14 = vld [vmem:[%s4723_s9 + $0x60] ss:$20 sps:$4 sm:$0xff]  }
  0x94   : > { %1737 = vmatmul.mubr.bf16.gmra.mxu0 %v4216_v15  ;;  %1962 = vmatmul.mubr.bf16.gmra.mxu1 %v4217_v16 }
  0x95   : > { %1744 = vmatprep.mubr.bf16.mxu0 %v4218_v17  ;;  %1969 = vmatprep.mubr.bf16.mxu1 %v4220_v1 }
  0x9c   : > { %1745 = vmatmul.mubr.bf16.gmra.mxu0 %v4222_v18  ;;  %1970 = vmatmul.mubr.bf16.gmra.mxu1 %v4223_v19 }
  0x9d   : > { %1752 = vmatprep.mubr.bf16.mxu0 %v4224_v20  ;;  %1977 = vmatprep.mubr.bf16.mxu1 %v4226_v21  ;;  %v4313_v20 = vld [vmem:[%s4723_s9 + $0x2b0] ss:$20 sps:$4 sm:$0xff]   ;;  %v4314_v21 = vld [vmem:[%s4723_s9 + $0x88] ss:$20 sps:$4 sm:$0xff]  }
  0xa4   : > { %1753 = vmatmul.mubr.bf16.gmra.mxu0 %v4228_v22  ;;  %1978 = vmatmul.mubr.bf16.gmra.mxu1 %v4229_v23  ;;  %v4315_v22 = vld [vmem:[%s4723_s9 + $0x2dc] ss:$20 sps:$4 sm:$0xff]  }
  0xa5   : > { %1760 = vmatprep.mubr.bf16.mxu0 %v4230_v24  ;;  %1985 = vmatprep.mubr.bf16.mxu1 %v4232_v25  ;;  %v4317_v23 = vld [vmem:[%s4723_s9 + $0xb0] ss:$20 sps:$4 sm:$0xff]  }
  0xac   : > { %1761 = vmatmul.mubr.bf16.gmra.mxu0 %v4234_v26  ;;  %1986 = vmatmul.mubr.bf16.gmra.mxu1 %v4235_v27 }
  0xad   : > { %1768 = vmatprep.mubr.bf16.mxu0 %v4237_v28  ;;  %1993 = vmatprep.mubr.bf16.mxu1 %v4239_v29 }
  0xb4   : > { %1769 = vmatmul.mubr.bf16.gmra.mxu0 %v4241_v30  ;;  %1994 = vmatmul.mubr.bf16.gmra.mxu1 %v4242_v31 }
  0xb5   : > { %1776 = vmatprep.mubr.bf16.mxu0 %v4243_v32  ;;  %2001 = vmatprep.mubr.bf16.mxu1 %v4245_v33  ;;  %v4318_v32 = vld [vmem:[%s4723_s9 + $0x2d8] ss:$20 sps:$4 sm:$0xff]  }
  0xb6   : > { %v4319_v33 = vld [vmem:[%s4723_s9 + $0xd8] ss:$20 sps:$4 sm:$0xff]  }
  0xbc   : > { %1777 = vmatmul.mubr.bf16.gmra.mxu0 %v4247_v34  ;;  %2002 = vmatmul.mubr.bf16.gmra.mxu1 %v4248_v35  ;;  %v4320_v34 = vld [vmem:[%s4723_s9 + $0x304] ss:$20 sps:$4 sm:$0xff]   ;;  %v4322_v35 = vld [vmem:[%s4723_s9 + $0x100] ss:$20 sps:$4 sm:$0xff]  }
  0xbd   : > { %1784 = vmatprep.mubr.bf16.mxu0 %v4249_v36  ;;  %2009 = vmatprep.mubr.bf16.mxu1 %v4251_v37 }
  0xc4   : > { %1785 = vmatmul.mubr.bf16.gmra.mxu0 %v4253_v38  ;;  %2010 = vmatmul.mubr.bf16.gmra.mxu1 %v4254_v39 }
  0xc5   : > { %1792 = vmatprep.mubr.bf16.mxu0 %v4255_v40  ;;  %2017 = vmatprep.mubr.bf16.mxu1 %v4257_v41 }
  0xcc   : > { %1793 = vmatmul.mubr.bf16.gmra.mxu0 %v4259_v42  ;;  %2018 = vmatmul.mubr.bf16.gmra.mxu1 %v4260_v43 }
  0xcd   : > { %1800 = vmatprep.mubr.bf16.mxu0 %v4262_v44  ;;  %2025 = vmatprep.mubr.bf16.mxu1 %v4264_v45  ;;  %v4323_v44 = vld [vmem:[%s4723_s9 + $0x300] ss:$20 sps:$4 sm:$0xff]   ;;  %v4324_v45 = vld [vmem:[%s4723_s9 + $0x128] ss:$20 sps:$4 sm:$0xff]  }
  0xd4   : > { %1801 = vmatmul.mubr.bf16.gmra.mxu0 %v4266_v46  ;;  %2026 = vmatmul.mubr.bf16.gmra.mxu1 %v4267_v47  ;;  %v4327_v46 = vld [vmem:[%s4723_s9 + $0x32c] ss:$20 sps:$4 sm:$0xff]   ;;  %v4328_v47 = vld [vmem:[%s4723_s9 + $0x150] ss:$20 sps:$4 sm:$0xff]  }
  0xd5   : > { %1808 = vmatprep.mubr.bf16.mxu0 %v4268_v48  ;;  %2033 = vmatprep.mubr.bf16.mxu1 %v4270_v49 }
  0xdc   : > { %1809 = vmatmul.mubr.bf16.gmra.mxu0 %v4272_v50  ;;  %2034 = vmatmul.mubr.bf16.gmra.mxu1 %v4273_v51 }
  0xdd   : > { %1816 = vmatprep.mubr.bf16.mxu0 %v4274_v52  ;;  %2041 = vmatprep.mubr.bf16.mxu1 %v4276_v53 }
  0xe4   : > { %1817 = vmatmul.mubr.bf16.gmra.mxu0 %v4278_v54  ;;  %2042 = vmatmul.mubr.bf16.gmra.mxu1 %v4279_v55 }
  0xe5   : > { %1824 = vmatprep.mubr.bf16.mxu0 %v4280_v56  ;;  %2049 = vmatprep.mubr.bf16.mxu1 %v4282_v57  ;;  %v4325_v56 = vld [vmem:[%s4723_s9 + $0x328] ss:$20 sps:$4 sm:$0xff]   ;;  %v4329_v57 = vld [vmem:[%s4723_s9 + $0x178] ss:$20 sps:$4 sm:$0xff]  }
  0xec   : > { %1825 = vmatmul.mubr.bf16.gmra.mxu0 %v4284_v58  ;;  %2050 = vmatmul.mubr.bf16.gmra.mxu1 %v4285_v59  ;;  %v4332_v58 = vld [vmem:[%s4723_s9 + $0x354] ss:$20 sps:$4 sm:$0xff]  }
  0xed   : > { %1832 = vmatprep.mubr.bf16.mxu0 %v4287_v60  ;;  %2057 = vmatprep.mubr.bf16.mxu1 %v4289_v61  ;;  %v4333_v59 = vld [vmem:[%s4723_s9 + $0x1a0] ss:$20 sps:$4 sm:$0xff]  }
  0xf4   : > { %1833 = vmatmul.mubr.bf16.gmra.mxu0 %v4291_v62  ;;  %2058 = vmatmul.mubr.bf16.gmra.mxu1 %v4292_v63 }
  0xf5   : > { %1840 = vmatprep.mubr.bf16.mxu0 %v4293_v0  ;;  %2065 = vmatprep.mubr.bf16.mxu1 %v4295_v2 }
  0xfc   : > { %1841 = vmatmul.mubr.bf16.gmra.mxu0 %v4297_v3  ;;  %2066 = vmatmul.mubr.bf16.gmra.mxu1 %v4298_v4 }
  0xfd   : > { %1848 = vmatprep.mubr.bf16.mxu0 %v4299_v5  ;;  %2073 = vmatprep.mubr.bf16.mxu1 %v4301_v6  ;;  %v4330_v5 = vld [vmem:[%s4723_s9 + $0x350] ss:$20 sps:$4 sm:$0xff]   ;;  %v4334_v6 = vld [vmem:[%s4723_s9 + $0x1c8] ss:$20 sps:$4 sm:$0xff]  }
 0x104   : > { %1849 = vmatmul.mubr.bf16.gmra.mxu0 %v4303_v7  ;;  %2074 = vmatmul.mubr.bf16.gmra.mxu1 %v4304_v8  ;;  %v4337_v7 = vld [vmem:[%s4723_s9 + $0x37c] ss:$20 sps:$4 sm:$0xff]  }
 0x105   : > { %2081 = vmatprep.mubr.bf16.mxu1 %v4305_v9  ;;  %4016 = vmatprep.mubr.msk.bf16.mxu0 %vm1531_vm1, %v4307_v10  ;;  %v4338_v8 = vld [vmem:[%s4723_s9 + $0x1f0] ss:$20 sps:$4 sm:$0xff]  }
 0x10c   : > { %v4967_v15 = vpop.f32.mrf.mxu0  ;;  %v4969_v16 = vpop.f32.mrf.mxu1  ;;  %2082 = vmatmul.mubr.bf16.gmra.mxu1 %v4308_v11  ;;  %4017 = vmatmul.mubr.msk.bf16.vlgmr.msra.gmra.mxu0 %vm1531_vm1, %v4309_v12 }
 0x10d   : > { %2089 = vmatprep.mubr.bf16.mxu1 %v4310_v13  ;;  %4020 = vmatprep.mubr.msk.bf16.mxu0 %vm1531_vm1, %v4312_v14 }
 0x10e   : > { %v1668_v17 = vpop.f32.mrf.mxu0  ;;  %v1860_v1 = vpop.f32.mrf.mxu1 }
 0x110   : > { %v4973_v18 = vpop.f32.mrf.mxu0  ;;  %v4975_v19 = vpop.f32.mrf.mxu1 }
 0x112   : > { %v1671_v24 = vpop.f32.mrf.mxu0  ;;  %v1863_v25 = vpop.f32.mrf.mxu1 }
 0x114   : > { %v4981_v26 = vpop.f32.mrf.mxu0  ;;  %v4983_v27 = vpop.f32.mrf.mxu1  ;;  %2090 = vmatmul.mubr.bf16.gmra.mxu1 %v4313_v20  ;;  %4021 = vmatmul.mubr.msk.bf16.gmra.mxu0 %vm1531_vm1, %v4314_v21  ;;  %v4335_v20 = vld [vmem:[%s4723_s9 + $0x378] ss:$20 sps:$4 sm:$0xff]  }
 0x115   : > { %2097 = vmatprep.mubr.bf16.mxu1 %v4315_v22  ;;  %4024 = vmatprep.mubr.msk.bf16.mxu0 %vm1531_vm1, %v4317_v23  ;;  %v4339_v21 = vld [vmem:[%s4723_s9 + $0x218] ss:$20 sps:$4 sm:$0xff]   ;;  %v4343_v23 = vld [vmem:[%s4723_s9 + $0x240] ss:$20 sps:$4 sm:$0xff]  }
 0x116   : > { %v1676_v28 = vpop.f32.mrf.mxu0  ;;  %v1868_v29 = vpop.f32.mrf.mxu1  ;;  %v4342_v22 = vld [vmem:[%s4723_s9 + $0x3a4] ss:$20 sps:$4 sm:$0xff]  }
 0x118   : > { %v4987_v30 = vpop.f32.mrf.mxu0  ;;  %v4989_v31 = vpop.f32.mrf.mxu1 }
 0x11a   : > { %v1679_v36 = vpop.f32.mrf.mxu0  ;;  %v1871_v37 = vpop.f32.mrf.mxu1 }
 0x11b   : > { %v4340_v36 = vld [vmem:[%s4723_s9 + $0x3a0] ss:$20 sps:$4 sm:$0xff]   ;;  %v4344_v37 = vld [vmem:[%s4723_s9 + $0x268] ss:$20 sps:$4 sm:$0xff]  }
 0x11c   : > { %v4995_v38 = vpop.f32.mrf.mxu0  ;;  %v4997_v39 = vpop.f32.mrf.mxu1  ;;  %2098 = vmatmul.mubr.bf16.gmra.mxu1 %v4318_v32  ;;  %4025 = vmatmul.mubr.msk.bf16.gmra.mxu0 %vm1531_vm1, %v4319_v33 }
 0x11d   : > { %2105 = vmatprep.mubr.bf16.mxu1 %v4320_v34  ;;  %4028 = vmatprep.mubr.msk.bf16.mxu0 %vm1531_vm1, %v4322_v35 }
 0x11e   : > { %v1684_v40 = vpop.f32.mrf.mxu0  ;;  %v1876_v41 = vpop.f32.mrf.mxu1 }
 0x11f   : > { %v4347_v40 = vld [vmem:[%s4723_s9 + $0x3cc] ss:$20 sps:$4 sm:$0xff]   ;;  %v4348_v41 = vld [vmem:[%s4723_s9 + $0x290] ss:$20 sps:$4 sm:$0xff]  }
 0x120   : > { %v5001_v42 = vpop.f32.mrf.mxu0  ;;  %v5003_v43 = vpop.f32.mrf.mxu1 }
 0x122   : > { %v1687_v48 = vpop.f32.mrf.mxu0  ;;  %v1879_v49 = vpop.f32.mrf.mxu1 }
 0x124   : > { %v5009_v50 = vpop.f32.mrf.mxu0  ;;  %v5011_v51 = vpop.f32.mrf.mxu1  ;;  %2106 = vmatmul.mubr.bf16.gmra.mxu1 %v4323_v44  ;;  %4029 = vmatmul.mubr.msk.bf16.gmra.mxu0 %vm1531_vm1, %v4324_v45 }
 0x125   : > { %2113 = vmatprep.mubr.bf16.mxu1 %v4327_v46  ;;  %4032 = vmatprep.mubr.msk.bf16.mxu0 %vm1531_vm1, %v4328_v47 }
 0x126   : > { %v1692_v52 = vpop.f32.mrf.mxu0  ;;  %v1884_v53 = vpop.f32.mrf.mxu1 }
 0x127   : > { %v5074_v52 = vld [vmem:[%s6464_s2] ss:$0 sm:$0xff] }
 0x128   : > { %v5015_v54 = vpop.f32.mrf.mxu0  ;;  %v5017_v55 = vpop.f32.mrf.mxu1 }
 0x12a   : > { %v1695_v60 = vpop.f32.mrf.mxu0  ;;  %v1887_v61 = vpop.f32.mrf.mxu1 }
 0x12b   : > { %v4353_v60 = vld [vmem:[%s4723_s9 + $0x2e0] ss:$20 sps:$4 sm:$0xff]  }
 0x12c   : > { %v5023_v62 = vpop.f32.mrf.mxu0  ;;  %v5025_v63 = vpop.f32.mrf.mxu1  ;;  %2114 = vmatmul.mubr.bf16.gmra.mxu1 %v4325_v56  ;;  %4033 = vmatmul.mubr.msk.bf16.gmra.mxu0 %vm1531_vm1, %v4329_v57  ;;  %v4345_v57 = vld [vmem:[%s4723_s9 + $0x3c8] ss:$20 sps:$4 sm:$0xff]  }
 0x12d   : > { %2121 = vmatprep.mubr.bf16.mxu1 %v4332_v58  ;;  %4036 = vmatprep.mubr.msk.bf16.mxu0 %vm1531_vm1, %v4333_v59  ;;  %v4349_v58 = vld [vmem:[%s4723_s9 + $0x2b8] ss:$20 sps:$4 sm:$0xff]   ;;  %v4352_v59 = vld [vmem:[%s4723_s9 + $0x3f4] ss:$20 sps:$4 sm:$0xff]  }
 0x12e   : > { %v1700_v0 = vpop.f32.mrf.mxu0  ;;  %v1892_v2 = vpop.f32.mrf.mxu1 }
 0x12f   : > { %v1667_v2 = vadd.f32 %v5074_v52, %v4967_v15 }
 0x130   : > { %v5029_v3 = vpop.f32.mrf.mxu0  ;;  %v5031_v4 = vpop.f32.mrf.mxu1 }
 0x132   : > { %v1703_v9 = vpop.f32.mrf.mxu0  ;;  %v1895_v10 = vpop.f32.mrf.mxu1 }
 0x133   : > { %v1670_v10 = vadd.f32 %v5074_v52, %v4973_v18 }
 0x134   : > { %v5037_v11 = vpop.f32.mrf.mxu0  ;;  %v5039_v12 = vpop.f32.mrf.mxu1  ;;  %2122 = vmatmul.mubr.bf16.gmra.mxu1 %v4330_v5  ;;  %4037 = vmatmul.mubr.msk.bf16.gmra.mxu0 %vm1531_vm1, %v4334_v6 }
 0x135   : > { %2129 = vmatprep.mubr.bf16.mxu1 %v4337_v7  ;;  %4040 = vmatprep.mubr.msk.bf16.mxu0 %vm1531_vm1, %v4338_v8 }
 0x136   : > { %v1708_v13 = vpop.f32.mrf.mxu0  ;;  %v1900_v14 = vpop.f32.mrf.mxu1 }
 0x137   : > { %v4350_v14 = vld [vmem:[%s4723_s9 + $0x3f0] ss:$20 sps:$4 sm:$0xff]  }
 0x138   : > { %v5043_v17 = vpop.f32.mrf.mxu0  ;;  %v5045_v1 = vpop.f32.mrf.mxu1 }
 0x13a   : > { %v1711_v24 = vpop.f32.mrf.mxu0  ;;  %v1903_v25 = vpop.f32.mrf.mxu1 }
 0x13c   : > { %v5051_v28 = vpop.f32.mrf.mxu0  ;;  %v5053_v29 = vpop.f32.mrf.mxu1  ;;  %2130 = vmatmul.mubr.bf16.gmra.mxu1 %v4335_v20  ;;  %4041 = vmatmul.mubr.msk.bf16.gmra.mxu0 %vm1531_vm1, %v4339_v21  ;;  %v4354_v20 = vld [vmem:[%s4723_s9 + $0x308] ss:$20 sps:$4 sm:$0xff]  }
 0x13d   : > { %2137 = vmatprep.mubr.bf16.mxu1 %v4342_v22  ;;  %4044 = vmatprep.mubr.msk.bf16.mxu0 %vm1531_vm1, %v4343_v23  ;;  %v4357_v22 = vld [vmem:[%s4723_s9 + $0x41c] ss:$20 sps:$4 sm:$0xff]  }
 0x13e   : > { %v1716_v32 = vpop.f32.mrf.mxu0  ;;  %v1908_v33 = vpop.f32.mrf.mxu1  ;;  %v4358_v23 = vld [vmem:[%s4723_s9 + $0x330] ss:$20 sps:$4 sm:$0xff]  }
 0x13f   : > { %v1675_v32 = vadd.f32 %v5074_v52, %v4981_v26 }
 0x140   : > { %v5057_v34 = vpop.f32.mrf.mxu0  ;;  %v5059_v35 = vpop.f32.mrf.mxu1 }
 0x141   : > { %6468 = vst [vmem:[#allocation2_spill] sm:$0xff] %v5059_v35 }
 0x142   : > { %v1719_v44 = vpop.f32.mrf.mxu0  ;;  %v1911_v45 = vpop.f32.mrf.mxu1 }
 0x143   : > { %v4355_v45 = vld [vmem:[%s4723_s9 + $0x418] ss:$20 sps:$4 sm:$0xff]  }
 0x144   : > { %v5065_v46 = vpop.f32.mrf.mxu0  ;;  %v5067_v47 = vpop.f32.mrf.mxu1  ;;  %2138 = vmatmul.mubr.bf16.gmra.mxu1 %v4340_v36  ;;  %4045 = vmatmul.mubr.msk.bf16.gmra.mxu0 %vm1531_vm1, %v4344_v37 }
 0x145   : > { %6469 = vst [vmem:[#allocation3_spill] sm:$0xff] %v5067_v47  ;;  %2145 = vmatprep.mubr.bf16.mxu1 %v4347_v40  ;;  %4048 = vmatprep.mubr.msk.bf16.mxu0 %vm1531_vm1, %v4348_v41  ;;  %v1678_v41 = vadd.f32 %v5074_v52, %v4987_v30 }
 0x146   : > { %v1724_v48 = vpop.f32.mrf.mxu0  ;;  %v1916_v49 = vpop.f32.mrf.mxu1 }
 0x147   : > { %v4359_v48 = vld [vmem:[%s4723_s9 + $0x358] ss:$20 sps:$4 sm:$0xff]  }
 0x148   : > { %v5076_v53 = vpop.f32.mrf.mxu0  ;;  %v5078_v56 = vpop.f32.mrf.mxu1 }
 0x149   : > { %6470 = vst [vmem:[#allocation4_spill] sm:$0xff] %v5078_v56 }
 0x14a   : > { %v1727_v61 = vpop.f32.mrf.mxu0  ;;  %v1919_v0 = vpop.f32.mrf.mxu1 }
 0x14b   : > { %v1683_v61 = vadd.f32 %v5074_v52, %v4995_v38 }
 0x14c   : > { %v5086_v5 = vpop.f32.mrf.mxu0  ;;  %v1955_v6 = vpop.f32.mrf.mxu1  ;;  %2146 = vmatmul.mubr.bf16.gmra.mxu1 %v4345_v57  ;;  %4049 = vmatmul.mubr.msk.bf16.gmra.mxu0 %vm1531_vm1, %v4349_v58  ;;  %v4362_v57 = vld [vmem:[%s4723_s9 + $0x444] ss:$20 sps:$4 sm:$0xff]   ;;  %v4363_v58 = vld [vmem:[%s4723_s9 + $0x380] ss:$20 sps:$4 sm:$0xff]  }
 0x14d   : > { %v5089_v7 = vadd.f32 %v1955_v6, %v1667_v2  ;;  %2153 = vmatprep.mubr.bf16.mxu1 %v4352_v59  ;;  %4052 = vmatprep.mubr.msk.bf16.mxu0 %vm1531_vm1, %v4353_v60 }
 0x14e   : > { %v1732_v8 = vpop.f32.mrf.mxu0  ;;  %v1957_v9 = vpop.f32.mrf.mxu1 }
 0x14f   : > { %v1686_v9 = vadd.f32 %v5074_v52, %v5001_v42 }
 0x150   : > { %v5094_v13 = vpop.f32.mrf.mxu0  ;;  %v1958_v15 = vpop.f32.mrf.mxu1 }
 0x151   : > { %v5098_v21 = vadd.f32 %v1958_v15, %v1670_v10  ;;  %v4360_v15 = vld [vmem:[%s4723_s9 + $0x440] ss:$20 sps:$4 sm:$0xff]  }
 0x152   : > { %v1735_v24 = vpop.f32.mrf.mxu0  ;;  %v1960_v25 = vpop.f32.mrf.mxu1 }
 0x154   : > { %v5104_v33 = vpop.f32.mrf.mxu0  ;;  %v1963_v18 = vpop.f32.mrf.mxu1  ;;  %2154 = vmatmul.mubr.bf16.gmra.mxu1 %v4350_v14  ;;  %4053 = vmatmul.mubr.msk.bf16.gmra.mxu0 %vm1531_vm1, %v4354_v20  ;;  %v4364_v14 = vld [vmem:[%s4723_s9 + $0x3a8] ss:$20 sps:$4 sm:$0xff]  }
 0x155   : > { %v5107_v36 = vadd.f32 %v1963_v18, %v1675_v32  ;;  %2161 = vmatprep.mubr.bf16.mxu1 %v4357_v22  ;;  %4056 = vmatprep.mubr.msk.bf16.mxu0 %vm1531_vm1, %v4358_v23  ;;  %v4367_v22 = vld [vmem:[%s4723_s9 + $0x46c] ss:$20 sps:$4 sm:$0xff]   ;;  %v4368_v23 = vld [vmem:[%s4723_s9 + $0x3d0] ss:$20 sps:$4 sm:$0xff]   ;;  %v1691_v32 = vadd.f32 %v5074_v52, %v5009_v50 }
 0x156   : > { %v1740_v37 = vpop.f32.mrf.mxu0  ;;  %v1965_v40 = vpop.f32.mrf.mxu1 }
 0x158   : > { %v5112_v44 = vpop.f32.mrf.mxu0  ;;  %v1966_v26 = vpop.f32.mrf.mxu1 }
 0x159   : > { %v5116_v49 = vadd.f32 %v1966_v26, %v1678_v41  ;;  %v1694_v26 = vadd.f32 %v5074_v52, %v5015_v54 }
 0x15a   : > { %v1743_v59 = vpop.f32.mrf.mxu0  ;;  %v1968_v60 = vpop.f32.mrf.mxu1 }
 0x15b   : > { %v4372_v59 = vld [vmem:[%s4723_s9 + $0x494] ss:$20 sps:$4 sm:$0xff]  }
 0x15c   : > { %v5122_v0 = vpop.f32.mrf.mxu0  ;;  %v1971_v30 = vpop.f32.mrf.mxu1  ;;  %2162 = vmatmul.mubr.bf16.gmra.mxu1 %v4355_v45  ;;  %4057 = vmatmul.mubr.msk.bf16.gmra.mxu0 %vm1531_vm1, %v4359_v48  ;;  %v4365_v48 = vld [vmem:[%s4723_s9 + $0x468] ss:$20 sps:$4 sm:$0xff]   ;;  %v4373_v60 = vld [vmem:[%s4723_s9 + $0x420] ss:$20 sps:$4 sm:$0xff]  }
 0x15d   : > { %v5125_v2 = vadd.f32 %v1971_v30, %v1683_v61  ;;  %2169 = vmatprep.mubr.bf16.mxu1 %v4362_v57  ;;  %4060 = vmatprep.mubr.msk.bf16.mxu0 %vm1531_vm1, %v4363_v58  ;;  %v4369_v57 = vld [vmem:[%s4723_s9 + $0x3f8] ss:$20 sps:$4 sm:$0xff]  }
 0x15e   : > { %v1748_v6 = vpop.f32.mrf.mxu0  ;;  %v1973_v8 = vpop.f32.mrf.mxu1 }
 0x15f   : > { %v1699_v6 = vadd.f32 %v5074_v52, %v5023_v62 }
 0x160   : > { %v5130_v10 = vpop.f32.mrf.mxu0  ;;  %v1974_v38 = vpop.f32.mrf.mxu1 }
 0x161   : > { %v5134_v20 = vadd.f32 %v1974_v38, %v1686_v9 }
 0x162   : > { %v1751_v24 = vpop.f32.mrf.mxu0  ;;  %v1976_v25 = vpop.f32.mrf.mxu1 }
 0x163   : > { %v4374_v24 = vld [vmem:[%s4723_s9 + $0x448] ss:$20 sps:$4 sm:$0xff]  }
 0x164   : > { %v5140_v18 = vpop.f32.mrf.mxu0  ;;  %v1979_v42 = vpop.f32.mrf.mxu1  ;;  %2170 = vmatmul.mubr.bf16.gmra.mxu1 %v4360_v15  ;;  %4061 = vmatmul.mubr.msk.bf16.gmra.mxu0 %vm1531_vm1, %v4364_v14  ;;  %v1702_v14 = vadd.f32 %v5074_v52, %v5029_v3 }
 0x165   : > { %v5143_v37 = vadd.f32 %v1979_v42, %v1691_v32  ;;  %2177 = vmatprep.mubr.bf16.mxu1 %v4367_v22  ;;  %4064 = vmatprep.mubr.msk.bf16.mxu0 %vm1531_vm1, %v4368_v23  ;;  %v4370_v23 = vld [vmem:[%s4723_s9 + $0x490] ss:$20 sps:$4 sm:$0xff]  }
 0x166   : > { %v1756_v40 = vpop.f32.mrf.mxu0  ;;  %v1981_v41 = vpop.f32.mrf.mxu1  ;;  %v4377_v32 = vld [vmem:[%s4723_s9 + $0x4bc] ss:$20 sps:$4 sm:$0xff]  }
 0x167   : > { %v4378_v42 = vld [vmem:[%s4723_s9 + $0x470] ss:$20 sps:$4 sm:$0xff]  }
 0x168   : > { %v5148_v45 = vpop.f32.mrf.mxu0  ;;  %v1982_v50 = vpop.f32.mrf.mxu1 }
 0x169   : > { %v5152_v58 = vadd.f32 %v1982_v50, %v1694_v26  ;;  %v1707_v26 = vadd.f32 %v5074_v52, %v5037_v11 }
 0x16a   : > { %v1759_v61 = vpop.f32.mrf.mxu0  ;;  %v1984_v30 = vpop.f32.mrf.mxu1 }
 0x16b   : > { %v4375_v30 = vld [vmem:[%s4723_s9 + $0x4b8] ss:$20 sps:$4 sm:$0xff]  }
 0x16c   : > { %v5158_v8 = vpop.f32.mrf.mxu0  ;;  %v1987_v54 = vpop.f32.mrf.mxu1  ;;  %2178 = vmatmul.mubr.bf16.gmra.mxu1 %v4365_v48  ;;  %4065 = vmatmul.mubr.msk.bf16.gmra.mxu0 %vm1531_vm1, %v4369_v57 }
 0x16d   : > { %v5161_v9 = vadd.f32 %v1987_v54, %v1699_v6  ;;  %2185 = vmatprep.mubr.bf16.mxu1 %v4372_v59  ;;  %4068 = vmatprep.mubr.msk.bf16.mxu0 %vm1531_vm1, %v4373_v60  ;;  %v1710_v60 = vadd.f32 %v5074_v52, %v5043_v17  ;;  %v4379_v6 = vld [vmem:[%s4723_s9 + $0x498] ss:$20 sps:$4 sm:$0xff]  }
 0x16e   : > { %v1764_v38 = vpop.f32.mrf.mxu0  ;;  %v1989_v15 = vpop.f32.mrf.mxu1 }
 0x16f   : > { %v4382_v38 = vld [vmem:[%s4723_s9 + $0x4e4] ss:$20 sps:$4 sm:$0xff]   ;;  %v4383_v15 = vld [vmem:[%s4723_s9 + $0x4c0] ss:$20 sps:$4 sm:$0xff]  }
 0x170   : > { %v5166_v22 = vpop.f32.mrf.mxu0  ;;  %v1990_v62 = vpop.f32.mrf.mxu1 }
 0x171   : > { %v5170_v25 = vadd.f32 %v1990_v62, %v1702_v14 }
 0x172   : > { %v1767_v40 = vpop.f32.mrf.mxu0  ;;  %v1992_v41 = vpop.f32.mrf.mxu1 }
 0x173   : > { %v1718_v41 = vadd.f32 %v5074_v52, %v5057_v34 }
 0x174   : > { %v5176_v50 = vpop.f32.mrf.mxu0  ;;  %v1995_v3 = vpop.f32.mrf.mxu1  ;;  %2186 = vmatmul.mubr.bf16.gmra.mxu1 %v4370_v23  ;;  %4069 = vmatmul.mubr.msk.bf16.gmra.mxu0 %vm1531_vm1, %v4374_v24  ;;  %v1715_v23 = vadd.f32 %v5074_v52, %v5051_v28  ;;  %v4380_v28 = vld [vmem:[%s4723_s9 + $0x4e0] ss:$20 sps:$4 sm:$0xff]  }
 0x175   : > { %v5179_v48 = vadd.f32 %v1995_v3, %v1707_v26  ;;  %2193 = vmatprep.mubr.bf16.mxu1 %v4377_v32  ;;  %4072 = vmatprep.mubr.msk.bf16.mxu0 %vm1531_vm1, %v4378_v42 }
 0x176   : > { %v1772_v57 = vpop.f32.mrf.mxu0  ;;  %v1997_v59 = vpop.f32.mrf.mxu1 }
 0x177   : > { %v4384_v57 = vld [vmem:[%s4723_s9 + $0x4e8] ss:$20 sps:$4 sm:$0xff]  }
 0x178   : > { %v5184_v61 = vpop.f32.mrf.mxu0  ;;  %v1998_v11 = vpop.f32.mrf.mxu1 }
 0x179   : > { %v5188_v54 = vadd.f32 %v1998_v11, %v1710_v60 }
 0x17a   : > { %v1775_v14 = vpop.f32.mrf.mxu0  ;;  %v2000_v62 = vpop.f32.mrf.mxu1 }
 0x17b   : > { %v1726_v62 = vadd.f32 %v5074_v52, %v5076_v53  ;;  %v1734_v53 = vadd.f32 %v5074_v52, %v5094_v13  ;;  %v1742_v13 = vadd.f32 %v5074_v52, %v5112_v44  ;;  %v1750_v44 = vadd.f32 %v5074_v52, %v5130_v10 }
 0x17c   : > { %v5194_v24 = vpop.f32.mrf.mxu0  ;;  %v2003_v32 = vpop.f32.mrf.mxu1  ;;  %2194 = vmatmul.mubr.bf16.gmra.mxu1 %v4375_v30  ;;  %4073 = vmatmul.mubr.msk.bf16.gmra.mxu0 %vm1531_vm1, %v4379_v6  ;;  %v1723_v30 = vadd.f32 %v5074_v52, %v5065_v46  ;;  %v1758_v10 = vadd.f32 %v5074_v52, %v5148_v45  ;;  %v1766_v45 = vadd.f32 %v5074_v52, %v5166_v22 }
 0x17d   : > { %v5197_v17 = vadd.f32 %v2003_v32, %v1715_v23  ;;  %2201 = vmatprep.mubr.bf16.mxu1 %v4382_v38  ;;  %4076 = vmatprep.mubr.msk.bf16.mxu0 %vm1531_vm1, %v4383_v15  ;;  %v1774_v22 = vadd.f32 %v5074_v52, %v5184_v61 }
 0x17e   : > { %v1780_v42 = vpop.f32.mrf.mxu0  ;;  %v2005_v40 = vpop.f32.mrf.mxu1 }
 0x180   : > { %v5202_v26 = vpop.f32.mrf.mxu0  ;;  %v2006_v3 = vpop.f32.mrf.mxu1 }
 0x181   : > { %v5206_v59 = vadd.f32 %v2006_v3, %v1718_v41  ;;  %v1731_v41 = vadd.f32 %v5074_v52, %v5086_v5  ;;  %v1739_v5 = vadd.f32 %v5074_v52, %v5104_v33  ;;  %v1747_v33 = vadd.f32 %v5074_v52, %v5122_v0 }
 0x182   : > { %v1783_v60 = vpop.f32.mrf.mxu0  ;;  %v2008_v11 = vpop.f32.mrf.mxu1  ;;  %v1755_v0 = vadd.f32 %v5074_v52, %v5140_v18  ;;  %v1763_v18 = vadd.f32 %v5074_v52, %v5158_v8  ;;  %v1771_v8 = vadd.f32 %v5074_v52, %v5176_v50  ;;  %v1779_v50 = vadd.f32 %v5074_v52, %v5194_v24 }
 0x183   : > { %v1782_v61 = vadd.f32 %v5074_v52, %v5202_v26 }
 0x184   : > { %v5210_v6 = vpop.f32.mrf.mxu0  ;;  %v2011_v38 = vpop.f32.mrf.mxu1  ;;  %2202 = vmatmul.mubr.bf16.gmra.mxu1 %v4380_v28  ;;  %4077 = vmatmul.mubr.msk.bf16.gmra.mxu0 %vm1531_vm1, %v4384_v57 }
 0x185   : > { %v5213_v15 = vadd.f32 %v2011_v38, %v1723_v30  ;;  %v1787_v24 = vadd.f32 %v5074_v52, %v5210_v6 }
 0x186   : > { %v1788_v34 = vpop.f32.mrf.mxu0  ;;  %v2013_v14 = vpop.f32.mrf.mxu1 }
 0x188   : > { %v5217_v23 = vpop.f32.mrf.mxu0  ;;  %v2014_v32 = vpop.f32.mrf.mxu1 }
 0x189   : > { %v5219_v42 = vadd.f32 %v2014_v32, %v1726_v62  ;;  %v1790_v26 = vadd.f32 %v5074_v52, %v5217_v23 }
 0x18a   : > { %v1791_v40 = vpop.f32.mrf.mxu0  ;;  %v2016_v46 = vpop.f32.mrf.mxu1 }
 0x18c   : > { %v5223_v3 = vpop.f32.mrf.mxu0  ;;  %v2019_v28 = vpop.f32.mrf.mxu1 }
 0x18d   : > { %v5225_v57 = vadd.f32 %v2019_v28, %v1731_v41  ;;  %v1795_v6 = vadd.f32 %v5074_v52, %v5223_v3  ;;  %v5338_v3 = vadd.f32 %v5074_v52, %v4989_v31 }
 0x18e   : > { %v1796_v60 = vpop.f32.mrf.mxu0  ;;  %v2021_v11 = vpop.f32.mrf.mxu1 }
 0x18f   : > { %6482 = vst [vmem:[#allocation16_spill] sm:$0xff] %v5338_v3 }
 0x190   : > { %v5229_v30 = vpop.f32.mrf.mxu0  ;;  %v2022_v38 = vpop.f32.mrf.mxu1 }
 0x191   : > { %v5231_v34 = vadd.f32 %v2022_v38, %v1734_v53 }
 0x192   : > { %v1799_v14 = vpop.f32.mrf.mxu0  ;;  %v2024_v62 = vpop.f32.mrf.mxu1 }
 0x194   : > { %v5235_v32 = vpop.f32.mrf.mxu0  ;;  %v2027_v40 = vpop.f32.mrf.mxu1 }
 0x195   : > { %v5237_v46 = vadd.f32 %v2027_v40, %v1739_v5 }
 0x196   : > { %v1804_v41 = vpop.f32.mrf.mxu0  ;;  %v2029_v28 = vpop.f32.mrf.mxu1 }
 0x198   : > { %v5241_v60 = vpop.f32.mrf.mxu0  ;;  %v2030_v11 = vpop.f32.mrf.mxu1 }
 0x199   : > { %v5243_v53 = vadd.f32 %v2030_v11, %v1742_v13 }
 0x19a   : > { %v1807_v38 = vpop.f32.mrf.mxu0  ;;  %v2032_v14 = vpop.f32.mrf.mxu1 }
 0x19c   : > { %v5247_v62 = vpop.f32.mrf.mxu0  ;;  %v2035_v56 = vpop.f32.mrf.mxu1 }
 0x19d   : > { %v5249_v5 = vadd.f32 %v2035_v56, %v1747_v33 }
 0x19e   : > { %v1812_v40 = vpop.f32.mrf.mxu0  ;;  %v2037_v41 = vpop.f32.mrf.mxu1 }
 0x19f   : > { %6471 = vst [vmem:[#allocation5_spill] sm:$0xff] %v5249_v5 }
 0x1a0   : > { %v5253_v28 = vpop.f32.mrf.mxu0  ;;  %v2038_v47 = vpop.f32.mrf.mxu1 }
 0x1a1   : > { %v5255_v13 = vadd.f32 %v2038_v47, %v1750_v44 }
 0x1a2   : > { %v1815_v11 = vpop.f32.mrf.mxu0  ;;  %v2040_v38 = vpop.f32.mrf.mxu1 }
 0x1a3   : > { %6472 = vst [vmem:[#allocation6_spill] sm:$0xff] %v5255_v13 }
 0x1a4   : > { %v5259_v14 = vpop.f32.mrf.mxu0  ;;  %v2043_v35 = vpop.f32.mrf.mxu1 }
 0x1a5   : > { %v5261_v56 = vadd.f32 %v2043_v35, %v1755_v0 }
 0x1a6   : > { %v1820_v33 = vpop.f32.mrf.mxu0  ;;  %v2045_v40 = vpop.f32.mrf.mxu1 }
 0x1a7   : > { %6473 = vst [vmem:[#allocation7_spill] sm:$0xff] %v5261_v56 }
 0x1a8   : > { %v5265_v41 = vpop.f32.mrf.mxu0  ;;  %v2046_v5 = vpop.f32.mrf.mxu1 }
 0x1a9   : > { %v5267_v47 = vadd.f32 %v2046_v5, %v1758_v10 }
 0x1aa   : > { %v1823_v44 = vpop.f32.mrf.mxu0  ;;  %v2048_v11 = vpop.f32.mrf.mxu1 }
 0x1ab   : > { %6474 = vst [vmem:[#allocation8_spill] sm:$0xff] %v5267_v47 }
 0x1ac   : > { %v5271_v38 = vpop.f32.mrf.mxu0  ;;  %v2051_v13 = vpop.f32.mrf.mxu1 }
 0x1ad   : > { %v5273_v35 = vadd.f32 %v2051_v13, %v1763_v18 }
 0x1ae   : > { %v1828_v0 = vpop.f32.mrf.mxu0  ;;  %v2053_v33 = vpop.f32.mrf.mxu1 }
 0x1af   : > { %6475 = vst [vmem:[#allocation9_spill] sm:$0xff] %v5273_v35 }
 0x1b0   : > { %v5277_v40 = vpop.f32.mrf.mxu0  ;;  %v2054_v56 = vpop.f32.mrf.mxu1 }
 0x1b1   : > { %v5279_v5 = vadd.f32 %v2054_v56, %v1766_v45 }
 0x1b2   : > { %v1831_v10 = vpop.f32.mrf.mxu0  ;;  %v2056_v44 = vpop.f32.mrf.mxu1 }
 0x1b3   : > { %6476 = vst [vmem:[#allocation10_spill] sm:$0xff] %v5279_v5 }
 0x1b4   : > { %v5283_v11 = vpop.f32.mrf.mxu0  ;;  %v2059_v47 = vpop.f32.mrf.mxu1 }
 0x1b5   : > { %v5285_v13 = vadd.f32 %v2059_v47, %v1771_v8 }
 0x1b6   : > { %v1836_v18 = vpop.f32.mrf.mxu0  ;;  %v2061_v0 = vpop.f32.mrf.mxu1 }
 0x1b7   : > { %6477 = vst [vmem:[#allocation11_spill] sm:$0xff] %v5285_v13 }
 0x1b8   : > { %v5289_v33 = vpop.f32.mrf.mxu0  ;;  %v2062_v35 = vpop.f32.mrf.mxu1 }
 0x1b9   : > { %v5291_v56 = vadd.f32 %v2062_v35, %v1774_v22 }
 0x1ba   : > { %v1839_v45 = vpop.f32.mrf.mxu0  ;;  %v2064_v10 = vpop.f32.mrf.mxu1 }
 0x1bb   : > { %6478 = vst [vmem:[#allocation12_spill] sm:$0xff] %v5291_v56 }
 0x1bc   : > { %v5295_v44 = vpop.f32.mrf.mxu0  ;;  %v2067_v5 = vpop.f32.mrf.mxu1 }
 0x1bd   : > { %v5297_v47 = vadd.f32 %v2067_v5, %v1779_v50 }
 0x1be   : > { %v1844_v8 = vpop.f32.mrf.mxu0  ;;  %v2069_v18 = vpop.f32.mrf.mxu1 }
 0x1bf   : > { %6479 = vst [vmem:[#allocation13_spill] sm:$0xff] %v5297_v47 }
 0x1c0   : > { %v5301_v0 = vpop.f32.mrf.mxu0  ;;  %v2070_v13 = vpop.f32.mrf.mxu1 }
 0x1c1   : > { %v5303_v35 = vadd.f32 %v2070_v13, %v1782_v61 }
 0x1c2   : > { %v1847_v22 = vpop.f32.mrf.mxu0  ;;  %v2072_v45 = vpop.f32.mrf.mxu1 }
 0x1c3   : > { %6480 = vst [vmem:[#allocation14_spill] sm:$0xff] %v5303_v35 }
 0x1c4   : > { %v5307_v10 = vpop.f32.mrf.mxu0  ;;  %v2075_v56 = vpop.f32.mrf.mxu1 }
 0x1c5   : > { %v5309_v5 = vadd.f32 %v2075_v56, %v1787_v24  ;;  %v5321_v56 = vadd.f32 %v5074_v52, %v4969_v16  ;;  %v5325_v24 = vadd.f32 %v5074_v52, %v4975_v19  ;;  %v5342_v16 = vadd.f32 %v5074_v52, %v4997_v39 }
 0x1c6   : > { %v1852_v50 = vpop.f32.mrf.mxu0  ;;  %v2077_v8 = vpop.f32.mrf.mxu1  ;;  %v5346_v19 = vadd.f32 %v5074_v52, %v5003_v43  ;;  %v5362_v39 = vadd.f32 %v5074_v52, %v5025_v63  ;;  %v5366_v43 = vadd.f32 %v5074_v52, %v5031_v4  ;;  %v5381_v4 = vadd.f32 %v5074_v52, %v5053_v29 }
 0x1c7   : > { %v5334_v50 = vadd.f32 %v5074_v52, %v4983_v27  ;;  %6483 = vst [vmem:[#allocation17_spill] sm:$0xff] %v5342_v16  ;;  %v5354_v27 = vadd.f32 %v5074_v52, %v5017_v55  ;;  %v1798_v55 = vadd.f32 %v5074_v52, %v5229_v30  ;;  %v1811_v29 = vadd.f32 %v5074_v52, %v5247_v62 }
 0x1c8   : > { %v5313_v18 = vpop.f32.mrf.mxu0  ;;  %v2078_v47 = vpop.f32.mrf.mxu1  ;;  %6484 = vst [vmem:[#allocation18_spill] sm:$0xff] %v5346_v19  ;;  %6487 = vst [vmem:[#allocation21_spill] sm:$0xff] %v5362_v39 }
 0x1c9   : > { %v5315_v13 = vadd.f32 %v2078_v47, %v1790_v26  ;;  %6481 = vst [vmem:[#allocation15_spill] sm:$0xff] %v5334_v50  ;;  %6486 = vst [vmem:[#allocation20_spill] sm:$0xff] %v5354_v27 }
 0x1ca   : > { %v1855_v61 = vpop.f32.mrf.mxu0  ;;  %v2080_v22 = vpop.f32.mrf.mxu1  ;;  %6488 = vst [vmem:[#allocation22_spill] sm:$0xff] %v5366_v43  ;;  %6491 = vst [vmem:[#allocation25_spill] sm:$0xff] %v5381_v4 }
 0x1cc   : > { %v2083_v45 = vpop.f32.mrf.mxu1  ;;  %v4018_v35 = vpop.f32.mrf.mxu0 }
 0x1cd   : > { %v5327_v23 = vadd.f32 %v2083_v45, %v1795_v6  ;;  %v5330_v47 = vadd.f32 %v4018_v35, %v5107_v36  ;;  %v5350_v36 = vadd.f32 %v5074_v52, %v5011_v51  ;;  %v5370_v51 = vadd.f32 %v5074_v52, %v5039_v12 }
 0x1ce   : > { %v2085_v8 = vpop.f32.mrf.mxu1  ;;  %v2244_v26 = vpop.f32.mrf.mxu0  ;;  %v1803_v12 = vadd.f32 %v5074_v52, %v5235_v32  ;;  %v5399_v32 = vadd.f32 %v5074_v52, %v5253_v28 }
 0x1cf   : > { %6485 = vst [vmem:[#allocation19_spill] sm:$0xff] %v5350_v36  ;;  %v2501_v31 = vmin.f32 %v5330_v47, 0.0  ;;  %v5358_v35 = vadd.f32 %v2244_v26, %v5089_v7  ;;  %6489 = vst [vmem:[#allocation23_spill] sm:$0xff] %v5370_v51  ;;  %v5376_v7 = vadd.f32 %v5074_v52, %v5045_v1  ;;  %v1806_v1 = vadd.f32 %v5074_v52, %v5241_v60 }
 0x1d0   : > { %v2086_v61 = vpop.f32.mrf.mxu1  ;;  %v4019_v22 = vpop.f32.mrf.mxu0  ;;  %v5404_v60 = vadd.f32 %v5074_v52, %v5259_v14  ;;  %v5417_v14 = vadd.f32 %v5074_v52, %v5265_v41  ;;  %vm2949_vm2 = vcmp.gt.f32.partialorder %v5330_v47, 0.0 }
 0x1d1   : > { %6490 = vst [vmem:[#allocation24_spill] sm:$0xff] %v5376_v7  ;;  %v2565_v6 = vmul.f32 0.5, %v2501_v31  ;;  %v2695_v63 = vmul.f32 1.442695, %v2501_v31  ;;  %v2499_v45 = vmin.f32 %v5358_v35, 0.0  ;;  %v5385_v8 = vadd.f32 %v2086_v61, %v1798_v55 }
 0x1d2   : > { %v5388_v30 = vadd.f32 %v4019_v22, %v5116_v49  ;;  %v2088_v26 = vpop.f32.mrf.mxu1  ;;  %v2247_v51 = vpop.f32.mrf.mxu0  ;;  %vm2947_vm3 = vcmp.gt.f32.partialorder %v5358_v35, 0.0 }
 0x1d3   : > { %v2563_v31 = vmul.f32 0.5, %v2499_v45  ;;  %v2691_v7 = vmul.f32 1.442695, %v2499_v45  ;;  %v5393_v43 = vadd.f32 %v2247_v51, %v5098_v21  ;;  %4385 = vpow2.f32 %v2695_v63 }
 0x1d4   : > { %v2502_v49 = vmin.f32 %v5388_v30, 0.0  ;;  %v2091_v55 = vpop.f32.mrf.mxu1  ;;  %v4022_v61 = vpop.f32.mrf.mxu0  ;;  %4387 = vtanh.f32 %v2565_v6  ;;  %vm2950_vm5 = vcmp.gt.f32.partialorder %v5388_v30, 0.0 }
 0x1d5   : > { %v2500_v21 = vmin.f32 %v5393_v43, 0.0  ;;  %v5407_v51 = vadd.f32 %v2091_v55, %v1803_v12  ;;  %4389 = vpow2.f32 %v2691_v7  ;;  %v5410_v28 = vadd.f32 %v4022_v61, %v5143_v37 }
 0x1d6   : > { %v2566_v62 = vmul.f32 0.5, %v2502_v49  ;;  %v2697_v22 = vmul.f32 1.442695, %v2502_v49  ;;  %v2093_v63 = vpop.f32.mrf.mxu1  ;;  %v2260_v45 = vpop.f32.mrf.mxu0  ;;  %4391 = vtanh.f32 %v2563_v31  ;;  %v5421_v7 = vadd.f32 %v5074_v52, %v5271_v38 }
 0x1d7   : > { %v2564_v26 = vmul.f32 0.5, %v2500_v21  ;;  %v2693_v4 = vmul.f32 1.442695, %v2500_v21  ;;  %v5413_v39 = vadd.f32 %v2260_v45, %v5125_v2  ;;  %v2505_v37 = vmin.f32 %v5410_v28, 0.0 }
 0x1d8   : > { %4393 = vtanh.f32 %v2566_v62  ;;  %v2094_v6 = vpop.f32.mrf.mxu1  ;;  %v4023_v12 = vpop.f32.mrf.mxu0  ;;  %v5426_v31 = vadd.f32 %v5074_v52, %v5277_v40  ;;  %v5439_v40 = vadd.f32 %v5074_v52, %v5283_v11  ;;  %vm2948_vm6 = vcmp.gt.f32.partialorder %v5393_v43, 0.0 }
 0x1d9   : > { %4395 = vpow2.f32 %v2697_v22  ;;  %v2503_v2 = vmin.f32 %v5413_v39, 0.0  ;;  %v5429_v49 = vadd.f32 %v2094_v6, %v1806_v1  ;;  %v2569_v41 = vmul.f32 0.5, %v2505_v37 }
 0x1da   : > { %4397 = vtanh.f32 %v2564_v26  ;;  %v2703_v55 = vmul.f32 1.442695, %v2505_v37  ;;  %v5432_v38 = vadd.f32 %v4023_v12, %v5152_v58  ;;  %v2096_v61 = vpop.f32.mrf.mxu1  ;;  %v2263_v21 = vpop.f32.mrf.mxu0  ;;  %v5443_v1 = vadd.f32 %v5074_v52, %v5289_v33 }
 0x1db   : > { %4399 = vpow2.f32 %v2693_v4  ;;  %v2567_v62 = vmul.f32 0.5, %v2503_v2  ;;  %v2699_v63 = vmul.f32 1.442695, %v2503_v2  ;;  %v5435_v45 = vadd.f32 %v2263_v21, %v5134_v20 }
 0x1dc   : > { %4401 = vtanh.f32 %v2569_v41  ;;  %v2506_v58 = vmin.f32 %v5432_v38, 0.0  ;;  %v2099_v22 = vpop.f32.mrf.mxu1  ;;  %v4026_v26 = vpop.f32.mrf.mxu0  ;;  %v5448_v4 = vadd.f32 %v5074_v52, %v5295_v44  ;;  %v5461_v44 = vadd.f32 %v5074_v52, %v5301_v0 }
 0x1dd   : > { %4403 = vpow2.f32 %v2703_v55  ;;  %v2504_v20 = vmin.f32 %v5435_v45, 0.0  ;;  %v5451_v37 = vadd.f32 %v2099_v22, %v1811_v29  ;;  %v5454_v33 = vadd.f32 %v4026_v26, %v5179_v48 }
 0x1de   : > { %4405 = vtanh.f32 %v2567_v62  ;;  %v2570_v11 = vmul.f32 0.5, %v2506_v58  ;;  %v2705_v6 = vmul.f32 1.442695, %v2506_v58  ;;  %v2101_v12 = vpop.f32.mrf.mxu1  ;;  %v2276_v2 = vpop.f32.mrf.mxu0  ;;  %vm2953_vm7 = vcmp.gt.f32.partialorder %v5410_v28, 0.0 }
 0x1df   : > { %6492 = vst [vmem:[#allocation26_spill] sm:$0xff] %v5451_v37  ;;  %4407 = vpow2.f32 %v2699_v63  ;;  %v2568_v41 = vmul.f32 0.5, %v2504_v20  ;;  %v2701_v61 = vmul.f32 1.442695, %v2504_v20  ;;  %v5457_v21 = vadd.f32 %v2276_v2, %v5161_v9 }
 0x1e0   : > { %4409 = vtanh.f32 %v2570_v11  ;;  %v2509_v29 = vmin.f32 %v5454_v33, 0.0  ;;  %v2102_v55 = vpop.f32.mrf.mxu1  ;;  %v4027_v48 = vpop.f32.mrf.mxu0  ;;  %vm2951_vm8 = vcmp.gt.f32.partialorder %v5413_v39, 0.0  ;;  %vm2954_vm9 = vcmp.gt.f32.partialorder %v5432_v38, 0.0 }
 0x1e1   : > { %v4386_v62 = vpop.eup %4385  ;;  %4411 = vpow2.f32 %v2705_v6  ;;  %v2507_v63 = vmin.f32 %v5457_v21, 0.0  ;;  %v5468_v9 = vadd.f32 %v2102_v55, %v5399_v32  ;;  %v5472_v6 = vadd.f32 %v4027_v48, %v5188_v54  ;;  %v5477_v32 = vld [vmem:[%s6465_s3] ss:$0 sm:$0xff] }
 0x1e2   : > { %v4388_v58 = vpop.eup %4387  ;;  %v2821_v22 = vadd.f32 1.0, %v4386_v62  ;;  %4413 = vtanh.f32 %v2568_v41  ;;  %v2573_v52 = vmul.f32 0.5, %v2509_v29  ;;  %v2711_v0 = vmul.f32 1.442695, %v2509_v29  ;;  %v2104_v26 = vpop.f32.mrf.mxu1 }
 0x1e3   : > { %6493 = vst [vmem:[#allocation27_spill] sm:$0xff] %v5468_v9  ;;  %v2279_v20 = vpop.f32.mrf.mxu0  ;;  %v4390_v11 = vpop.eup %4389  ;;  %4415 = vpow2.f32 %v2701_v61  ;;  %v2707_v12 = vmul.f32 1.442695, %v2507_v63  ;;  %v2571_v55 = vmul.f32 0.5, %v2507_v63  ;;  %v2510_v54 = vmin.f32 %v5472_v6, 0.0 }
 0x1e4   : > { %v4392_v2 = vpop.eup %4391  ;;  %v2885_v27 = vmul.f32 %v4388_v58, %v2821_v22  ;;  %v2819_v41 = vadd.f32 1.0, %v4390_v11  ;;  %v5480_v29 = vadd.f32 %v2279_v20, %v5170_v25  ;;  %v2107_v62 = vpop.f32.mrf.mxu1  ;;  %4417 = vpow2.f32 %v2711_v0  ;;  %v5493_v25 = vld [vmem:[%s6466_s4] ss:$0 sm:$0xff] }
 0x1e5   : > { %v4030_v26 = vpop.f32.mrf.mxu0  ;;  %v4394_v61 = vpop.eup %4393  ;;  %v5485_v48 = vadd.f32 %v2107_v62, %v5404_v60  ;;  %4419 = vtanh.f32 %v2573_v52  ;;  %v2713_v52 = vmul.f32 1.442695, %v2510_v54  ;;  %vm2952_vm10 = vcmp.gt.f32.partialorder %v5435_v45, 0.0 }
 0x1e6   : > { %v4396_v58 = vpop.eup %4395  ;;  %v3013_v63 = vsel %vm2949_vm2, %v5330_v47, %v2885_v27  ;;  %v2883_v22 = vmul.f32 %v4392_v2, %v2819_v41  ;;  %v2508_v20 = vmin.f32 %v5480_v29, 0.0  ;;  %v2109_v0 = vpop.f32.mrf.mxu1  ;;  %4421 = vpow2.f32 %v2707_v12 }
 0x1e7   : > { %6494 = vst [vmem:[#allocation28_spill] sm:$0xff] %v5485_v48  ;;  %v2292_v11 = vpop.f32.mrf.mxu0  ;;  %v4398_v36 = vpop.eup %4397  ;;  %v3084_v60 = vmul.f32 %v5477_v32, %v3013_v63  ;;  %v2822_v62 = vadd.f32 1.0, %v4396_v58  ;;  %v2574_v47 = vmul.f32 0.5, %v2510_v54  ;;  %4423 = vtanh.f32 %v2571_v55 }
 0x1e8   : > { %v4400_v27 = vpop.eup %4399  ;;  %v3011_v19 = vsel %vm2947_vm3, %v5358_v35, %v2883_v22  ;;  %v5503_v2 = vpop.f32.mrf.mxu1  ;;  %v2572_v35 = vmul.f32 0.5, %v2508_v20  ;;  %v2709_v55 = vmul.f32 1.442695, %v2508_v20  ;;  %v5516_v54 = vadd.f32 %v4030_v26, %v5213_v15 }
 0x1e9   : > { %v5505_v41 = vpop.f32.mrf.mxu0  ;;  %v4402_v0 = vpop.eup %4401  ;;  %v3155_v58 = vadd.f32 %v5493_v25, %v3084_v60  ;;  %v3082_v63 = vmul.f32 %v5477_v32, %v3011_v19  ;;  %v2886_v12 = vmul.f32 %v4394_v61, %v2822_v62  ;;  %v2820_v16 = vadd.f32 1.0, %v4400_v27 }
 0x1ea   : > { %v4404_v9 = vpop.eup %4403  ;;  %4425 = vtanh.f32 %v2574_v47  ;;  %v2112_v22 = vpop.f32.mrf.mxu1  ;;  %v2513_v15 = vmin.f32 %v5516_v54, 0.0  ;;  %vm2957_vm11 = vcmp.gt.f32.partialorder %v5454_v33, 0.0  ;;  %vm2955_vm12 = vcmp.gt.f32.partialorder %v5457_v21, 0.0 }
 0x1eb   : > { %v5518_v60 = vpop.f32.mrf.mxu0  ;;  %v4406_v19 = vpop.eup %4405  ;;  %v3904_v61 = vpack.c.bf16 %v3155_v58, %v3155_v58  ;;  %v3153_v62 = vadd.f32 %v5493_v25, %v3082_v63  ;;  %v3014_v27 = vsel %vm2950_vm5, %v5388_v30, %v2886_v12  ;;  %v2884_v3 = vmul.f32 %v4398_v36, %v2820_v16 }
 0x1ec   : > { %v4408_v37 = vpop.eup %4407  ;;  %v3085_v47 = vmul.f32 %v5477_v32, %v3014_v27  ;;  %v2825_v20 = vadd.f32 1.0, %v4404_v9  ;;  %4427 = vpow2.f32 %v2713_v52  ;;  %v5527_v26 = vpop.f32.mrf.mxu1  ;;  %v5537_v30 = vadd.f32 %v2292_v11, %v5197_v17 }
 0x1ed   : > { %v5529_v58 = vpop.f32.mrf.mxu0  ;;  %v4410_v63 = vpop.eup %4409  ;;  %3476 = vst.msk [vmem:[%s5512_s17 + $0x8] sm:$0xf] %vm3473_vm4, %v3904_v61  ;;  %v3902_v22 = vpack.c.bf16 %v3153_v62, %v3153_v62  ;;  %v3012_v16 = vsel %vm2948_vm6, %v5393_v43, %v2884_v3  ;;  %v2823_v36 = vadd.f32 1.0, %v4408_v37  ;;  %4429 = vpow2.f32 %v2709_v55 }
 0x1ee   : > { %v4412_v9 = vpop.eup %4411  ;;  %v3156_v52 = vadd.f32 %v5493_v25, %v3085_v47  ;;  %v3083_v12 = vmul.f32 %v5477_v32, %v3012_v16  ;;  %v2889_v27 = vmul.f32 %v4402_v0, %v2825_v20  ;;  %v2117_v48 = vpop.f32.mrf.mxu1  ;;  %4431 = vtanh.f32 %v2572_v35 }
 0x1ef   : > { %v5541_v50 = vpop.f32.mrf.mxu0  ;;  %v4414_v61 = vpop.eup %4413  ;;  %3474 = vst.msk [vmem:[%s5512_s17] sm:$0xf] %vm3473_vm4, %v3902_v22  ;;  %v2887_v62 = vmul.f32 %v4406_v19, %v2823_v36  ;;  %v2826_v3 = vadd.f32 1.0, %v4412_v9  ;;  %v2719_v48 = vmul.f32 1.442695, %v2513_v15  ;;  %v2577_v36 = vmul.f32 0.5, %v2513_v15 }
 0x1f0   : > { %v4416_v17 = vpop.eup %4415  ;;  %v3905_v43 = vpack.c.bf16 %v3156_v52, %v3156_v52  ;;  %v3154_v37 = vadd.f32 %v5493_v25, %v3083_v12  ;;  %v3017_v11 = vsel %vm2953_vm7, %v5410_v28, %v2889_v27  ;;  %v5550_v0 = vpop.f32.mrf.mxu1  ;;  %v2511_v9 = vmin.f32 %v5537_v30, 0.0 }
 0x1f1   : > { %v5552_v55 = vpop.f32.mrf.mxu0  ;;  %v3088_v19 = vmul.f32 %v5477_v32, %v3017_v11  ;;  %v3015_v47 = vsel %vm2951_vm8, %v5413_v39, %v2887_v62  ;;  %v2890_v35 = vmul.f32 %v4410_v63, %v2826_v3  ;;  %v2824_v20 = vadd.f32 1.0, %v4416_v17  ;;  %v4418_v22 = vpop.eup %4417 }
 0x1f2   : > { %3477 = vst.msk [vmem:[%s5512_s17 + $0xc] sm:$0xf] %vm3473_vm4, %v3905_v43  ;;  %v3903_v16 = vpack.c.bf16 %v3154_v37, %v3154_v37  ;;  %v3086_v28 = vmul.f32 %v5477_v32, %v3015_v47  ;;  %v2120_v52 = vpop.f32.mrf.mxu1  ;;  %v4420_v27 = vpop.eup %4419  ;;  %v2829_v62 = vadd.f32 1.0, %v4418_v22  ;;  %4433 = vpow2.f32 %v2719_v48 }
 0x1f3   : > { %v5562_v12 = vpop.f32.mrf.mxu0  ;;  %v3159_v11 = vadd.f32 %v5493_v25, %v3088_v19  ;;  %v3018_v39 = vsel %vm2954_vm9, %v5432_v38, %v2890_v35  ;;  %v2888_v63 = vmul.f32 %v4414_v61, %v2824_v20  ;;  %v4422_v3 = vpop.eup %4421  ;;  %4435 = vtanh.f32 %v2577_v36 }
 0x1f4   : > { %3475 = vst.msk [vmem:[%s5512_s17 + $0x4] sm:$0xf] %vm3473_vm4, %v3903_v16  ;;  %v3157_v17 = vadd.f32 %v5493_v25, %v3086_v28  ;;  %v3089_v15 = vmul.f32 %v5477_v32, %v3018_v39  ;;  %v5573_v43 = vpop.f32.mrf.mxu1  ;;  %v4424_v19 = vpop.eup %4423  ;;  %v2893_v61 = vmul.f32 %v4420_v27, %v2829_v62  ;;  %v2827_v35 = vadd.f32 1.0, %v4422_v3 }
 0x1f5   : > { %v5575_v37 = vpop.f32.mrf.mxu0  ;;  %v3908_v47 = vpack.c.bf16 %v3159_v11, %v3159_v11  ;;  %v3016_v38 = vsel %vm2952_vm10, %v5435_v45, %v2888_v63  ;;  %v2575_v27 = vmul.f32 0.5, %v2511_v9  ;;  %v2715_v39 = vmul.f32 1.442695, %v2511_v9 }
 0x1f6   : > { %v3906_v20 = vpack.c.bf16 %v3157_v17, %v3157_v17  ;;  %v3160_v22 = vadd.f32 %v5493_v25, %v3089_v15  ;;  %v3087_v16 = vmul.f32 %v5477_v32, %v3016_v38  ;;  %v2125_v48 = vpop.f32.mrf.mxu1  ;;  %v3021_v11 = vsel %vm2957_vm11, %v5454_v33, %v2893_v61 }
 0x1f7   : > { %v5582_v28 = vpop.f32.mrf.mxu0  ;;  %v4426_v52 = vpop.eup %4425  ;;  %3480 = vst.msk [vmem:[%s5512_s17 + $0x18] sm:$0xf] %vm3473_vm4, %v3908_v47  ;;  %v2891_v45 = vmul.f32 %v4424_v19, %v2827_v35  ;;  %v3092_v36 = vmul.f32 %v5477_v32, %v3021_v11  ;;  %v5595_v3 = vadd.f32 %v5503_v2, %v5417_v14  ;;  %4437 = vpow2.f32 %v2715_v39 }
 0x1f8   : > { %3478 = vst.msk [vmem:[%s5512_s17 + $0x10] sm:$0xf] %vm3473_vm4, %v3906_v20  ;;  %v3909_v63 = vpack.c.bf16 %v3160_v22, %v3160_v22  ;;  %v3158_v62 = vadd.f32 %v5493_v25, %v3087_v16  ;;  %v5597_v17 = vpop.f32.mrf.mxu1  ;;  %v5606_v19 = vadd.f32 %v5505_v41, %v5219_v42  ;;  %v5610_v47 = vadd.f32 %v5518_v60, %v5206_v59 }
 0x1f9   : > { %v5599_v15 = vpop.f32.mrf.mxu0  ;;  %v4428_v33 = vpop.eup %4427  ;;  %v3019_v9 = vsel %vm2955_vm12, %v5457_v21, %v2891_v45  ;;  %v3163_v2 = vadd.f32 %v5493_v25, %v3092_v36  ;;  %vm2958_vm13 = vcmp.gt.f32.partialorder %v5472_v6, 0.0  ;;  %4439 = vtanh.f32 %v2575_v27 }
 0x1fa   : > { %3481 = vst.msk [vmem:[%s5512_s17 + $0x1c] sm:$0xf] %vm3473_vm4, %v3909_v63  ;;  %v3907_v14 = vpack.c.bf16 %v3158_v62, %v3158_v62  ;;  %v3090_v38 = vmul.f32 %v5477_v32, %v3019_v9  ;;  %v2830_v61 = vadd.f32 1.0, %v4428_v33  ;;  %v2128_v35 = vpop.f32.mrf.mxu1  ;;  %v4430_v20 = vpop.eup %4429  ;;  %v2514_v42 = vmin.f32 %v5606_v19, 0.0 }
 0x1fb   : > { %v5616_v21 = vpop.f32.mrf.mxu0  ;;  %v2512_v59 = vmin.f32 %v5610_v47, 0.0  ;;  %v4432_v41 = vpop.eup %4431  ;;  %v3912_v60 = vpack.c.bf16 %v3163_v2, %v3163_v2  ;;  %v2828_v48 = vadd.f32 1.0, %v4430_v20  ;;  %vm2956_vm14 = vcmp.gt.f32.partialorder %v5480_v29, 0.0 }
 0x1fc   : > { %3479 = vst.msk [vmem:[%s5512_s17 + $0x14] sm:$0xf] %vm3473_vm4, %v3907_v14  ;;  %v3161_v22 = vadd.f32 %v5493_v25, %v3090_v38  ;;  %v2894_v16 = vmul.f32 %v4426_v52, %v2830_v61  ;;  %v5624_v11 = vpop.f32.mrf.mxu1  ;;  %v2578_v27 = vmul.f32 0.5, %v2514_v42  ;;  %v2721_v39 = vmul.f32 1.442695, %v2514_v42 }
 0x1fd   : > { %v5626_v45 = vpop.f32.mrf.mxu0  ;;  %v2717_v63 = vmul.f32 1.442695, %v2512_v59  ;;  %3484 = vst.msk [vmem:[%s5512_s17 + $0x28] sm:$0xf] %vm3473_vm4, %v3912_v60  ;;  %v2892_v33 = vmul.f32 %v4432_v41, %v2828_v48  ;;  %v5636_v52 = vadd.f32 %v5527_v26, %v5421_v7  ;;  %v5643_v38 = vadd.f32 %v5529_v58, %v5237_v46 }
 0x1fe   : > { %v3910_v62 = vpack.c.bf16 %v3161_v22, %v3161_v22  ;;  %v3022_v36 = vsel %vm2958_vm13, %v5472_v6, %v2894_v16  ;;  %v2133_v9 = vpop.f32.mrf.mxu1  ;;  %4441 = vtanh.f32 %v2578_v27  ;;  %v5647_v61 = vadd.f32 %v5541_v50, %v5225_v57 }
 0x1ff   : > { %v5638_v14 = vpop.f32.mrf.mxu0  ;;  %v3093_v2 = vmul.f32 %v5477_v32, %v3022_v36  ;;  %v3020_v7 = vsel %vm2956_vm14, %v5480_v29, %v2892_v33  ;;  %4443 = vpow2.f32 %v2721_v39  ;;  %v2576_v6 = vmul.f32 0.5, %v2512_v59  ;;  %v4434_v46 = vpop.eup %4433 }
 0x200   : > { %3482 = vst.msk [vmem:[%s5512_s17 + $0x20] sm:$0xf] %vm3473_vm4, %v3910_v62  ;;  %v5656_v26 = vadd.f32 %v5550_v0, %v5426_v31  ;;  %v5658_v35 = vpop.f32.mrf.mxu1  ;;  %v3091_v57 = vmul.f32 %v5477_v32, %v3020_v7  ;;  %v2517_v50 = vmin.f32 %v5643_v38, 0.0  ;;  %v5665_v20 = vadd.f32 %v5552_v55, %v5243_v53  ;;  %v5672_v31 = vld [vmem:[%s6464_s2] ss:$0 sm:$0xff]  ;;  %v4436_v60 = vpop.eup %4435 }
 0x201   : > { %v3164_v58 = vadd.f32 %v5493_v25, %v3093_v2  ;;  %v5667_v29 = vpop.f32.mrf.mxu0  ;;  %v5676_v0 = vadd.f32 %v5672_v31, %v5307_v10  ;;  %v2833_v42 = vadd.f32 1.0, %v4434_v46  ;;  %4445 = vpow2.f32 %v2717_v63 }
 0x202   : > { %v2515_v59 = vmin.f32 %v5647_v61, 0.0  ;;  %v2136_v41 = vpop.f32.mrf.mxu1  ;;  %v3162_v55 = vadd.f32 %v5493_v25, %v3091_v57  ;;  %v2581_v22 = vmul.f32 0.5, %v2517_v50  ;;  %v2727_v16 = vmul.f32 1.442695, %v2517_v50 }
 0x203   : > { %v3913_v53 = vpack.c.bf16 %v3164_v58, %v3164_v58  ;;  %v5682_v48 = vadd.f32 %v5672_v31, %v5313_v18  ;;  %v2897_v27 = vmul.f32 %v4436_v60, %v2833_v42  ;;  %4447 = vtanh.f32 %v2576_v6  ;;  %v5690_v33 = vpop.f32.mrf.mxu0  ;;  %v6495_v42 = vld [vmem:[#allocation7_spill] sm:$0xff] }
 0x204   : > { %v2723_v10 = vmul.f32 1.442695, %v2515_v59  ;;  %v5684_v39 = vpop.f32.mrf.mxu1  ;;  %v3911_v63 = vpack.c.bf16 %v3162_v55, %v3162_v55  ;;  %vm2961_vm15 = vcmp.gt.f32.partialorder %v5516_v54, 0.0  ;;  %v2579_v62 = vmul.f32 0.5, %v2515_v59  ;;  %v4438_v9 = vpop.eup %4437  ;;  %v6496_v55 = vld [vmem:[#allocation5_spill] sm:$0xff] }
 0x205   : > { %3485 = vst.msk [vmem:[%s5512_s17 + $0x2c] sm:$0xf] %vm3473_vm4, %v3913_v53  ;;  %v2518_v36 = vmin.f32 %v5665_v20, 0.0  ;;  %v3025_v18 = vsel %vm2961_vm15, %v5516_v54, %v2897_v27  ;;  %4449 = vpow2.f32 %v2727_v16  ;;  %v5695_v2 = vadd.f32 %v5562_v12, %v5231_v34  ;;  %v5713_v41 = vpop.f32.mrf.mxu0 }
 0x206   : > { %v5699_v7 = vadd.f32 %v5573_v43, %v5439_v40  ;;  %v2141_v6 = vpop.f32.mrf.mxu1  ;;  %3483 = vst.msk [vmem:[%s5512_s17 + $0x24] sm:$0xf] %vm3473_vm4, %v3911_v63  ;;  %v3096_v46 = vmul.f32 %v5477_v32, %v3025_v18  ;;  %v2831_v58 = vadd.f32 1.0, %v4438_v9  ;;  %vm2959_vm0 = vcmp.gt.f32.partialorder %v5537_v30, 0.0  ;;  %v4440_v57 = vpop.eup %4439 }
 0x207   : > { %4451 = vtanh.f32 %v2581_v22  ;;  %v2582_v54 = vmul.f32 0.5, %v2518_v36  ;;  %v2729_v50 = vmul.f32 1.442695, %v2518_v36  ;;  %v2516_v34 = vmin.f32 %v5695_v2, 0.0 }
 0x208   : > { %4453 = vpow2.f32 %v2723_v10  ;;  %v5706_v12 = vpop.f32.mrf.mxu1  ;;  %v3167_v40 = vadd.f32 %v5493_v25, %v3096_v46  ;;  %v2895_v43 = vmul.f32 %v4440_v57, %v2831_v58  ;;  %v5711_v59 = vadd.f32 %v5575_v37, %v6495_v42  ;;  %v5735_v46 = vpop.f32.mrf.mxu0 }
 0x209   : > { %4455 = vtanh.f32 %v2579_v62  ;;  %v2580_v60 = vmul.f32 0.5, %v2516_v34  ;;  %v2725_v53 = vmul.f32 1.442695, %v2516_v34  ;;  %v5717_v22 = vadd.f32 %v5582_v28, %v6496_v55 }
 0x20a   : > { %4457 = vpow2.f32 %v2729_v50  ;;  %v2144_v16 = vpop.f32.mrf.mxu1  ;;  %v3916_v27 = vpack.c.bf16 %v3167_v40, %v3167_v40  ;;  %v3023_v10 = vsel %vm2959_vm0, %v5537_v30, %v2895_v43  ;;  %vm2962_vm1 = vcmp.gt.f32.partialorder %v5606_v19, 0.0  ;;  %v6497_v43 = vld [vmem:[#allocation8_spill] sm:$0xff] }
 0x20b   : > { %v2521_v37 = vmin.f32 %v5711_v59, 0.0  ;;  %v4442_v63 = vpop.eup %4441  ;;  %v3094_v62 = vmul.f32 %v5477_v32, %v3023_v10  ;;  %vm2960_vm2 = vcmp.gt.f32.partialorder %v5610_v47, 0.0  ;;  %4459 = vtanh.f32 %v2582_v54 }
 0x20c   : > { %v2519_v36 = vmin.f32 %v5717_v22, 0.0  ;;  %v5727_v28 = vpop.f32.mrf.mxu1  ;;  %v4444_v9 = vpop.eup %4443  ;;  %3488 = vst.msk [vmem:[%s5512_s17 + $0x38] sm:$0xf] %vm3473_vm4, %v3916_v27  ;;  %4461 = vpow2.f32 %v2725_v53  ;;  %v5733_v6 = vadd.f32 %v5597_v17, %v5443_v1  ;;  %v5740_v42 = vadd.f32 %v5599_v15, %v6497_v43  ;;  %v6498_v53 = vld [vmem:[#allocation6_spill] sm:$0xff] }
 0x20d   : > { %v2585_v18 = vmul.f32 0.5, %v2521_v37  ;;  %v2735_v30 = vmul.f32 1.442695, %v2521_v37  ;;  %v3165_v58 = vadd.f32 %v5493_v25, %v3094_v62  ;;  %v2834_v57 = vadd.f32 1.0, %v4444_v9 }
 0x20e   : > { %4463 = vtanh.f32 %v2580_v60  ;;  %v2731_v54 = vmul.f32 1.442695, %v2519_v36  ;;  %v2149_v50 = vpop.f32.mrf.mxu1  ;;  %v4446_v34 = vpop.eup %4445  ;;  %v2583_v40 = vmul.f32 0.5, %v2519_v36  ;;  %v5744_v55 = vadd.f32 %v5616_v21, %v6498_v53 }
 0x20f   : > { %v5748_v1 = vadd.f32 %v5624_v11, %v5448_v4  ;;  %v3914_v17 = vpack.c.bf16 %v3165_v58, %v3165_v58  ;;  %v2898_v16 = vmul.f32 %v4442_v63, %v2834_v57  ;;  %v2832_v60 = vadd.f32 1.0, %v4446_v34  ;;  %v5755_v21 = vpop.f32.mrf.mxu0  ;;  %v6499_v50 = vld [vmem:[#allocation11_spill] sm:$0xff] }
 0x210   : > { %4465 = vpow2.f32 %v2735_v30  ;;  %v5750_v27 = vpop.f32.mrf.mxu1  ;;  %v4448_v10 = vpop.eup %4447  ;;  %vm2965_vm3 = vcmp.gt.f32.partialorder %v5643_v38, 0.0  ;;  %v2522_v15 = vmin.f32 %v5740_v42, 0.0  ;;  %v2520_v37 = vmin.f32 %v5744_v55, 0.0 }
 0x211   : > { %4467 = vtanh.f32 %v2585_v18  ;;  %3486 = vst.msk [vmem:[%s5512_s17 + $0x30] sm:$0xf] %vm3473_vm4, %v3914_v17  ;;  %v3026_v4 = vsel %vm2962_vm1, %v5606_v19, %v2898_v16  ;;  %v2896_v11 = vmul.f32 %v4448_v10, %v2832_v60  ;;  %vm2963_vm5 = vcmp.gt.f32.partialorder %v5647_v61, 0.0  ;;  %v6500_v16 = vld [vmem:[#allocation9_spill] sm:$0xff]  ;;  %v5780_v10 = vpop.f32.mrf.mxu0 }
 0x212   : > { %4469 = vpow2.f32 %v2731_v54  ;;  %v2152_v63 = vpop.f32.mrf.mxu1  ;;  %v4450_v62 = vpop.eup %4449  ;;  %v3097_v36 = vmul.f32 %v5477_v32, %v3026_v4  ;;  %vm2966_vm6 = vcmp.gt.f32.partialorder %v5665_v20, 0.0  ;;  %v2586_v9 = vmul.f32 0.5, %v2522_v15 }
 0x213   : > { %4471 = vtanh.f32 %v2583_v40  ;;  %v2737_v18 = vmul.f32 1.442695, %v2522_v15  ;;  %v3024_v58 = vsel %vm2960_vm2, %v5610_v47, %v2896_v11  ;;  %v2837_v57 = vadd.f32 1.0, %v4450_v62 }
 0x214   : > { %v4452_v30 = vpop.eup %4451  ;;  %v2733_v19 = vmul.f32 1.442695, %v2520_v37  ;;  %v5770_v34 = vadd.f32 %v5626_v45, %v6499_v50  ;;  %v5772_v54 = vpop.f32.mrf.mxu1  ;;  %v3168_v53 = vadd.f32 %v5493_v25, %v3097_v36  ;;  %v3095_v40 = vmul.f32 %v5477_v32, %v3024_v58 }
 0x215   : > { %v4454_v43 = vpop.eup %4453  ;;  %v2584_v17 = vmul.f32 0.5, %v2520_v37  ;;  %v5778_v60 = vadd.f32 %v5638_v14, %v6500_v16  ;;  %v2901_v15 = vmul.f32 %v4452_v30, %v2837_v57  ;;  %4473 = vpow2.f32 %v2737_v18 }
 0x216   : > { %v4456_v47 = vpop.eup %4455  ;;  %v2835_v4 = vadd.f32 1.0, %v4454_v43  ;;  %v2525_v45 = vmin.f32 %v5770_v34, 0.0  ;;  %v2157_v11 = vpop.f32.mrf.mxu1  ;;  %v3917_v62 = vpack.c.bf16 %v3168_v53, %v3168_v53  ;;  %v3166_v36 = vadd.f32 %v5493_v25, %v3095_v40 }
 0x217   : > { %v4458_v63 = vpop.eup %4457  ;;  %vm2964_vm7 = vcmp.gt.f32.partialorder %v5695_v2, 0.0  ;;  %4475 = vtanh.f32 %v2586_v9  ;;  %v3029_v14 = vsel %vm2965_vm3, %v5643_v38, %v2901_v15  ;;  %vm2969_vm8 = vcmp.gt.f32.partialorder %v5711_v59, 0.0  ;;  %v5794_v43 = vpop.f32.mrf.mxu0 }
 0x218   : > { %v2899_v37 = vmul.f32 %v4456_v47, %v2835_v4  ;;  %v2838_v58 = vadd.f32 1.0, %v4458_v63  ;;  %4477 = vpow2.f32 %v2733_v19  ;;  %v5788_v30 = vpop.f32.mrf.mxu1  ;;  %v4460_v18 = vpop.eup %4459  ;;  %3489 = vst.msk [vmem:[%s5512_s17 + $0x3c] sm:$0xf] %vm3473_vm4, %v3917_v62  ;;  %v3915_v57 = vpack.c.bf16 %v3166_v36, %v3166_v36 }
 0x219   : > { %v3100_v50 = vmul.f32 %v5477_v32, %v3029_v14  ;;  %4479 = vtanh.f32 %v2584_v17  ;;  %v2743_v9 = vmul.f32 1.442695, %v2525_v45  ;;  %v4462_v53 = vpop.eup %4461  ;;  %v2589_v40 = vmul.f32 0.5, %v2525_v45 }
 0x21a   : > { %v3027_v38 = vsel %vm2963_vm5, %v5647_v61, %v2899_v37  ;;  %v2902_v19 = vmul.f32 %v4460_v18, %v2838_v58  ;;  %v2523_v16 = vmin.f32 %v5778_v60, 0.0  ;;  %v2160_v47 = vpop.f32.mrf.mxu1  ;;  %3487 = vst.msk [vmem:[%s5512_s17 + $0x34] sm:$0xf] %vm3473_vm4, %v3915_v57  ;;  %v2836_v11 = vadd.f32 1.0, %v4462_v53  ;;  %v5812_v57 = vpop.f32.mrf.mxu0 }
 0x21b   : > { %v4464_v15 = vpop.eup %4463  ;;  %v3171_v4 = vadd.f32 %v5493_v25, %v3100_v50  ;;  %v3098_v17 = vmul.f32 %v5477_v32, %v3027_v38  ;;  %vm2967_vm9 = vcmp.gt.f32.partialorder %v5717_v22, 0.0  ;;  %4481 = vpow2.f32 %v2743_v9  ;;  %v6501_v9 = vld [vmem:[#allocation12_spill] sm:$0xff] }
 0x21c   : > { %v3030_v63 = vsel %vm2966_vm6, %v5665_v20, %v2902_v19  ;;  %v2587_v61 = vmul.f32 0.5, %v2523_v16  ;;  %v2739_v45 = vmul.f32 1.442695, %v2523_v16  ;;  %v5808_v62 = vpop.f32.mrf.mxu1  ;;  %v2900_v18 = vmul.f32 %v4464_v15, %v2836_v11 }
 0x21d   : > { %v4466_v36 = vpop.eup %4465  ;;  %v3920_v14 = vpack.c.bf16 %v3171_v4, %v3171_v4  ;;  %v3169_v37 = vadd.f32 %v5493_v25, %v3098_v17  ;;  %v3101_v58 = vmul.f32 %v5477_v32, %v3030_v63  ;;  %4483 = vtanh.f32 %v2589_v40 }
 0x21e   : > { %v4468_v50 = vpop.eup %4467  ;;  %v2841_v53 = vadd.f32 1.0, %v4466_v36  ;;  %v5816_v20 = vadd.f32 %v5658_v35, %v5461_v44  ;;  %v5820_v38 = vadd.f32 %v5667_v29, %v6501_v9  ;;  %v2165_v19 = vpop.f32.mrf.mxu1  ;;  %v3028_v40 = vsel %vm2964_vm7, %v5695_v2, %v2900_v18  ;;  %v6502_v36 = vld [vmem:[#allocation10_spill] sm:$0xff] }
 0x21f   : > { %v4470_v16 = vpop.eup %4469  ;;  %3492 = vst.msk [vmem:[%s5512_s17 + $0x48] sm:$0xf] %vm3473_vm4, %v3920_v14  ;;  %v3918_v47 = vpack.c.bf16 %v3169_v37, %v3169_v37  ;;  %v3172_v15 = vadd.f32 %v5493_v25, %v3101_v58  ;;  %4485 = vpow2.f32 %v2739_v45  ;;  %v3099_v44 = vmul.f32 %v5477_v32, %v3028_v40  ;;  %v5842_v45 = vpop.f32.mrf.mxu0 }
 0x220   : > { %v4472_v4 = vpop.eup %4471  ;;  %v2905_v35 = vmul.f32 %v4468_v50, %v2841_v53  ;;  %v2839_v17 = vadd.f32 1.0, %v4470_v16  ;;  %v2526_v29 = vmin.f32 %v5820_v38, 0.0  ;;  %v5830_v11 = vpop.f32.mrf.mxu1  ;;  %4487 = vtanh.f32 %v2587_v61 }
 0x221   : > { %3490 = vst.msk [vmem:[%s5512_s17 + $0x40] sm:$0xf] %vm3473_vm4, %v3918_v47  ;;  %v3921_v63 = vpack.c.bf16 %v3172_v15, %v3172_v15  ;;  %v5836_v14 = vadd.f32 %v5690_v33, %v6502_v36  ;;  %v5840_v2 = vadd.f32 %v5684_v39, %v5676_v0  ;;  %v3170_v37 = vadd.f32 %v5493_v25, %v3099_v44 }
 0x222   : > { %v3033_v58 = vsel %vm2969_vm8, %v5711_v59, %v2905_v35  ;;  %v2903_v18 = vmul.f32 %v4472_v4, %v2839_v17  ;;  %vm2970_vm10 = vcmp.gt.f32.partialorder %v5740_v42, 0.0  ;;  %v2168_v61 = vpop.f32.mrf.mxu1  ;;  %v4474_v50 = vpop.eup %4473  ;;  %v2590_v53 = vmul.f32 0.5, %v2526_v29 }
 0x223   : > { %3493 = vst.msk [vmem:[%s5512_s17 + $0x4c] sm:$0xf] %vm3473_vm4, %v3921_v63  ;;  %v3104_v33 = vmul.f32 %v5477_v32, %v3033_v58  ;;  %v2745_v0 = vmul.f32 1.442695, %v2526_v29  ;;  %v2524_v39 = vmin.f32 %v5836_v14, 0.0  ;;  %v3919_v19 = vpack.c.bf16 %v3170_v37, %v3170_v37  ;;  %v5861_v35 = vpop.f32.mrf.mxu0  ;;  %v6503_v61 = vld [vmem:[#allocation13_spill] sm:$0xff] }
 0x224   : > { %v4476_v9 = vpop.eup %4475  ;;  %v3031_v59 = vsel %vm2967_vm9, %v5717_v22, %v2903_v18  ;;  %v2842_v16 = vadd.f32 1.0, %v4474_v50  ;;  %vm2968_vm11 = vcmp.gt.f32.partialorder %v5744_v55, 0.0  ;;  %v5857_v47 = vpop.f32.mrf.mxu1  ;;  %v5867_v36 = vadd.f32 %v5713_v41, %v5309_v5 }
 0x225   : > { %v4478_v15 = vpop.eup %4477  ;;  %v3175_v40 = vadd.f32 %v5493_v25, %v3104_v33  ;;  %v3102_v4 = vmul.f32 %v5477_v32, %v3031_v59  ;;  %4489 = vpow2.f32 %v2745_v0  ;;  %v2588_v44 = vmul.f32 0.5, %v2524_v39  ;;  %3491 = vst.msk [vmem:[%s5512_s17 + $0x44] sm:$0xf] %vm3473_vm4, %v3919_v19  ;;  %v5884_v19 = vpop.f32.mrf.mxu0 }
 0x226   : > { %v4480_v17 = vpop.eup %4479  ;;  %v2906_v29 = vmul.f32 %v4476_v9, %v2842_v16  ;;  %v2840_v22 = vadd.f32 1.0, %v4478_v15  ;;  %v2741_v63 = vmul.f32 1.442695, %v2524_v39  ;;  %v2173_v37 = vpop.f32.mrf.mxu1  ;;  %4491 = vtanh.f32 %v2590_v53 }
 0x227   : > { %v3924_v58 = vpack.c.bf16 %v3175_v40, %v3175_v40  ;;  %v3173_v18 = vadd.f32 %v5493_v25, %v3102_v4  ;;  %v5872_v50 = vadd.f32 %v5735_v46, %v6503_v61  ;;  %v2529_v39 = vmin.f32 %v5867_v36, 0.0 }
 0x228   : > { %v3034_v33 = vsel %vm2970_vm10, %v5740_v42, %v2906_v29  ;;  %v2904_v0 = vmul.f32 %v4480_v17, %v2840_v22  ;;  %4493 = vpow2.f32 %v2741_v63  ;;  %v5878_v5 = vpop.f32.mrf.mxu1  ;;  %v4482_v41 = vpop.eup %4481  ;;  %v6504_v17 = vld [vmem:[#allocation2_spill] sm:$0xff]  ;;  %vm2973_vm12 = vcmp.gt.f32.partialorder %v5770_v34, 0.0 }
 0x229   : > { %3496 = vst.msk [vmem:[%s5512_s17 + $0x58] sm:$0xf] %vm3473_vm4, %v3924_v58  ;;  %v3922_v9 = vpack.c.bf16 %v3173_v18, %v3173_v18  ;;  %v3105_v53 = vmul.f32 %v5477_v32, %v3034_v33  ;;  %4495 = vtanh.f32 %v2588_v44  ;;  %v2527_v46 = vmin.f32 %v5872_v50, 0.0 }
 0x22a   : > { %v3032_v42 = vsel %vm2968_vm11, %v5744_v55, %v2904_v0  ;;  %v2845_v59 = vadd.f32 1.0, %v4482_v41  ;;  %v2593_v16 = vmul.f32 0.5, %v2529_v39  ;;  %v2751_v15 = vmul.f32 1.442695, %v2529_v39  ;;  %v2176_v40 = vpop.f32.mrf.mxu1  ;;  %v4484_v4 = vpop.eup %4483 }
 0x22b   : > { %v5891_v29 = vadd.f32 %v5672_v31, %v6504_v17  ;;  %3494 = vst.msk [vmem:[%s5512_s17 + $0x50] sm:$0xf] %vm3473_vm4, %v3922_v9  ;;  %v3176_v44 = vadd.f32 %v5493_v25, %v3105_v53  ;;  %v3103_v22 = vmul.f32 %v5477_v32, %v3032_v42  ;;  %v2747_v63 = vmul.f32 1.442695, %v2527_v46  ;;  %v5905_v41 = vpop.f32.mrf.mxu0 }
 0x22c   : > { %v4486_v37 = vpop.eup %4485  ;;  %v2909_v58 = vmul.f32 %v4484_v4, %v2845_v59  ;;  %v2591_v55 = vmul.f32 0.5, %v2527_v46  ;;  %v5900_v18 = vadd.f32 %v5706_v12, %v5682_v48  ;;  %v5902_v61 = vpop.f32.mrf.mxu1  ;;  %4497 = vpow2.f32 %v2751_v15  ;;  %v6505_v48 = vld [vmem:[#allocation14_spill] sm:$0xff] }
 0x22d   : > { %v3925_v33 = vpack.c.bf16 %v3176_v44, %v3176_v44  ;;  %v3174_v0 = vadd.f32 %v5493_v25, %v3103_v22  ;;  %v2843_v39 = vadd.f32 1.0, %v4486_v37  ;;  %v4488_v9 = vpop.eup %4487  ;;  %4499 = vtanh.f32 %v2593_v16  ;;  %v5936_v44 = vpop.f32.mrf.mxu0 }
 0x22e   : > { %v3037_v53 = vsel %vm2973_vm12, %v5770_v34, %v2909_v58  ;;  %v5910_v46 = vadd.f32 %v5755_v21, %v5315_v13  ;;  %v5914_v12 = vadd.f32 %v5780_v10, %v6505_v48  ;;  %v2181_v42 = vpop.f32.mrf.mxu1  ;;  %4501 = vpow2.f32 %v2747_v63  ;;  %v6506_v63 = vld [vmem:[#allocation3_spill] sm:$0xff] }
 0x22f   : > { %3497 = vst.msk [vmem:[%s5512_s17 + $0x5c] sm:$0xf] %vm3473_vm4, %v3925_v33  ;;  %v3923_v59 = vpack.c.bf16 %v3174_v0, %v3174_v0  ;;  %v3108_v15 = vmul.f32 %v5477_v32, %v3037_v53  ;;  %v2907_v40 = vmul.f32 %v4488_v9, %v2843_v39  ;;  %vm2971_vm13 = vcmp.gt.f32.partialorder %v5778_v60, 0.0 }
 0x230   : > { %4503 = vtanh.f32 %v2591_v55  ;;  %v2530_v34 = vmin.f32 %v5910_v46, 0.0  ;;  %v2528_v13 = vmin.f32 %v5914_v12, 0.0  ;;  %v5922_v21 = vpop.f32.mrf.mxu1  ;;  %v5930_v4 = vadd.f32 %v5727_v28, %v5321_v56 }
 0x231   : > { %3495 = vst.msk [vmem:[%s5512_s17 + $0x54] sm:$0xf] %vm3473_vm4, %v3923_v59  ;;  %v3179_v10 = vadd.f32 %v5493_v25, %v3108_v15  ;;  %v3035_v16 = vsel %vm2971_vm13, %v5778_v60, %v2907_v40  ;;  %v5934_v17 = vadd.f32 %v5794_v43, %v5407_v51  ;;  %v5940_v37 = vadd.f32 %v5672_v31, %v6506_v63  ;;  %v5954_v15 = vpop.f32.mrf.mxu0 }
 0x232   : > { %v4490_v22 = vpop.eup %4489  ;;  %v3106_v58 = vmul.f32 %v5477_v32, %v3035_v16  ;;  %v2594_v55 = vmul.f32 0.5, %v2530_v34  ;;  %v2753_v60 = vmul.f32 1.442695, %v2530_v34  ;;  %v2184_v33 = vpop.f32.mrf.mxu1  ;;  %v2749_v28 = vmul.f32 1.442695, %v2528_v13 }
 0x233   : > { %v3928_v0 = vpack.c.bf16 %v3179_v10, %v3179_v10  ;;  %v2846_v56 = vadd.f32 1.0, %v4490_v22  ;;  %v2533_v39 = vmin.f32 %v5934_v17, 0.0  ;;  %v4492_v51 = vpop.eup %4491  ;;  %v2592_v9 = vmul.f32 0.5, %v2528_v13 }
 0x234   : > { %v3177_v43 = vadd.f32 %v5493_v25, %v3106_v58  ;;  %4505 = vtanh.f32 %v2594_v55  ;;  %v5947_v31 = vadd.f32 %v5812_v57, %v5327_v23  ;;  %v5949_v53 = vpop.f32.mrf.mxu1  ;;  %vm2974_vm14 = vcmp.gt.f32.partialorder %v5820_v38, 0.0 }
 0x235   : > { %v4494_v48 = vpop.eup %4493  ;;  %3500 = vst.msk [vmem:[%s5512_s17 + $0x68] sm:$0xf] %vm3473_vm4, %v3928_v0  ;;  %v2910_v42 = vmul.f32 %v4492_v51, %v2846_v56  ;;  %4507 = vpow2.f32 %v2753_v60  ;;  %v2759_v59 = vmul.f32 1.442695, %v2533_v39  ;;  %v2597_v10 = vmul.f32 0.5, %v2533_v39  ;;  %v6507_v39 = vld [vmem:[#allocation15_spill] sm:$0xff] }
 0x236   : > { %v4496_v40 = vpop.eup %4495  ;;  %v3926_v34 = vpack.c.bf16 %v3177_v43, %v3177_v43  ;;  %v2844_v13 = vadd.f32 1.0, %v4494_v48  ;;  %v2531_v23 = vmin.f32 %v5947_v31, 0.0  ;;  %v2189_v57 = vpop.f32.mrf.mxu1  ;;  %vm2972_vm15 = vcmp.gt.f32.partialorder %v5836_v14, 0.0 }
 0x237   : > { %v3038_v16 = vsel %vm2974_vm14, %v5820_v38, %v2910_v42  ;;  %4509 = vpow2.f32 %v2749_v28  ;;  %v5961_v22 = vadd.f32 %v5750_v27, %v5325_v24  ;;  %v5970_v38 = vadd.f32 %v5842_v45, %v5429_v49  ;;  %v5976_v24 = vpop.f32.mrf.mxu0  ;;  %v6508_v57 = vld [vmem:[#allocation28_spill] sm:$0xff] }
 0x238   : > { %3498 = vst.msk [vmem:[%s5512_s17 + $0x60] sm:$0xf] %vm3473_vm4, %v3926_v34  ;;  %v3109_v63 = vmul.f32 %v5477_v32, %v3038_v16  ;;  %v2908_v58 = vmul.f32 %v4496_v40, %v2844_v13  ;;  %4511 = vtanh.f32 %v2592_v9  ;;  %v2595_v55 = vmul.f32 0.5, %v2531_v23  ;;  %v5966_v60 = vpop.f32.mrf.mxu1 }
 0x239   : > { %4513 = vpow2.f32 %v2759_v59  ;;  %v2755_v33 = vmul.f32 1.442695, %v2531_v23  ;;  %v5974_v0 = vadd.f32 %v5861_v35, %v5385_v8  ;;  %v4498_v27 = vpop.eup %4497  ;;  %v5984_v51 = vadd.f32 %v5772_v54, %v6507_v39  ;;  %v5993_v13 = vpop.f32.mrf.mxu0 }
 0x23a   : > { %v3180_v56 = vadd.f32 %v5493_v25, %v3109_v63  ;;  %v3036_v28 = vsel %vm2972_vm15, %v5836_v14, %v2908_v58  ;;  %4515 = vtanh.f32 %v2597_v10  ;;  %v2192_v49 = vpop.f32.mrf.mxu1  ;;  %v4500_v45 = vpop.eup %4499  ;;  %v2849_v8 = vadd.f32 1.0, %v4498_v27 }
 0x23b   : > { %v3107_v43 = vmul.f32 %v5477_v32, %v3036_v28  ;;  %4517 = vpow2.f32 %v2755_v33  ;;  %v2534_v35 = vmin.f32 %v5970_v38, 0.0  ;;  %v4502_v9 = vpop.eup %4501  ;;  %vm2977_vm0 = vcmp.gt.f32.partialorder %v5867_v36, 0.0  ;;  %v6009_v33 = vld [vmem:[%s6465_s3] ss:$0 sm:$0xff] }
 0x23c   : > { %v3929_v48 = vpack.c.bf16 %v3180_v56, %v3180_v56  ;;  %4519 = vtanh.f32 %v2595_v55  ;;  %v2532_v14 = vmin.f32 %v5974_v0, 0.0  ;;  %v5990_v42 = vpop.f32.mrf.mxu1  ;;  %v2913_v40 = vmul.f32 %v4500_v45, %v2849_v8  ;;  %v6509_v49 = vld [vmem:[#allocation26_spill] sm:$0xff] }
 0x23d   : > { %v4504_v54 = vpop.eup %4503  ;;  %v3178_v59 = vadd.f32 %v5493_v25, %v3107_v43  ;;  %v2847_v34 = vadd.f32 1.0, %v4502_v9  ;;  %v2598_v32 = vmul.f32 0.5, %v2534_v35  ;;  %vm2975_vm1 = vcmp.gt.f32.partialorder %v5872_v50, 0.0  ;;  %v6510_v43 = vld [vmem:[#allocation16_spill] sm:$0xff] }
 0x23e   : > { %3501 = vst.msk [vmem:[%s5512_s17 + $0x6c] sm:$0xf] %vm3473_vm4, %v3929_v48  ;;  %v2761_v10 = vmul.f32 1.442695, %v2534_v35  ;;  %v2757_v23 = vmul.f32 1.442695, %v2532_v14  ;;  %v6000_v16 = vadd.f32 %v5884_v19, %v6508_v57  ;;  %v2197_v63 = vpop.f32.mrf.mxu1  ;;  %v3041_v25 = vsel %vm2977_vm0, %v5867_v36, %v2913_v40  ;;  %v6029_v35 = vpop.f32.mrf.mxu0 }
 0x23f   : > { %v3927_v58 = vpack.c.bf16 %v3178_v59, %v3178_v59  ;;  %v2911_v55 = vmul.f32 %v4504_v54, %v2847_v34  ;;  %vm2978_vm2 = vcmp.gt.f32.partialorder %v5910_v46, 0.0  ;;  %v3112_v27 = vmul.f32 %v6009_v33, %v3041_v25  ;;  %v6034_v48 = vld [vmem:[%s6466_s4] ss:$0 sm:$0xff] }
 0x240   : > { %vm2976_vm3 = vcmp.gt.f32.partialorder %v5914_v12, 0.0  ;;  %4521 = vpow2.f32 %v2761_v10  ;;  %v2596_v19 = vmul.f32 0.5, %v2532_v14  ;;  %v2537_v56 = vmin.f32 %v6000_v16, 0.0  ;;  %v6014_v28 = vpop.f32.mrf.mxu1 }
 0x241   : > { %v4506_v39 = vpop.eup %4505  ;;  %3499 = vst.msk [vmem:[%s5512_s17 + $0x64] sm:$0xf] %vm3473_vm4, %v3927_v58  ;;  %v3039_v36 = vsel %vm2975_vm1, %v5872_v50, %v2911_v55  ;;  %4523 = vtanh.f32 %v2598_v32  ;;  %v6023_v45 = vadd.f32 %v5905_v41, %v6509_v49  ;;  %v6027_v8 = vadd.f32 %v5788_v30, %v6510_v43  ;;  %v6048_v55 = vpop.f32.mrf.mxu0 }
 0x242   : > { %v4508_v9 = vpop.eup %4507  ;;  %v3183_v14 = vadd.f32 %v6034_v48, %v3112_v27  ;;  %v3110_v50 = vmul.f32 %v6009_v33, %v3039_v36  ;;  %vm2981_vm5 = vcmp.gt.f32.partialorder %v5934_v17, 0.0  ;;  %4525 = vpow2.f32 %v2757_v23  ;;  %v2200_v41 = vpop.f32.mrf.mxu1 }
 0x243   : > { %v2850_v54 = vadd.f32 1.0, %v4508_v9  ;;  %v2601_v59 = vmul.f32 0.5, %v2537_v56  ;;  %v2767_v30 = vmul.f32 1.442695, %v2537_v56  ;;  %v2535_v40 = vmin.f32 %v6023_v45, 0.0 }
 0x244   : > { %v4510_v34 = vpop.eup %4509  ;;  %v3932_v32 = vpack.c.bf16 %v3183_v14, %v3183_v14  ;;  %v3181_v10 = vadd.f32 %v6034_v48, %v3110_v50  ;;  %4527 = vtanh.f32 %v2596_v19  ;;  %v6043_v57 = vadd.f32 %v5936_v44, %v5595_v3  ;;  %v6045_v63 = vpop.f32.mrf.mxu1 }
 0x245   : > { %v4512_v58 = vpop.eup %4511  ;;  %v2914_v23 = vmul.f32 %v4506_v39, %v2850_v54  ;;  %v2848_v25 = vadd.f32 1.0, %v4510_v34  ;;  %vm2979_vm6 = vcmp.gt.f32.partialorder %v5947_v31, 0.0  ;;  %4529 = vpow2.f32 %v2767_v30 }
 0x246   : > { %v4514_v27 = vpop.eup %4513  ;;  %3504 = vst.msk [vmem:[%s5512_s17 + $0x78] sm:$0xf] %vm3473_vm4, %v3932_v32  ;;  %v3930_v56 = vpack.c.bf16 %v3181_v10, %v3181_v10  ;;  %v2599_v19 = vmul.f32 0.5, %v2535_v40  ;;  %v2763_v36 = vmul.f32 1.442695, %v2535_v40  ;;  %v2538_v3 = vmin.f32 %v6043_v57, 0.0  ;;  %v2205_v44 = vpop.f32.mrf.mxu1 }
 0x247   : > { %v4516_v49 = vpop.eup %4515  ;;  %v3042_v39 = vsel %vm2978_vm2, %v5910_v46, %v2914_v23  ;;  %v2912_v43 = vmul.f32 %v4512_v58, %v2848_v25  ;;  %v2853_v9 = vadd.f32 1.0, %v4514_v27  ;;  %4531 = vtanh.f32 %v2601_v59  ;;  %v6511_v10 = vld [vmem:[#allocation27_spill] sm:$0xff]  ;;  %v6068_v58 = vpop.f32.mrf.mxu0  ;;  %v6512_v27 = vld [vmem:[#allocation17_spill] sm:$0xff] }
 0x248   : > { %v4518_v14 = vpop.eup %4517  ;;  %3502 = vst.msk [vmem:[%s5512_s17 + $0x70] sm:$0xf] %vm3473_vm4, %v3930_v56  ;;  %v3113_v50 = vmul.f32 %v6009_v33, %v3042_v39  ;;  %4533 = vpow2.f32 %v2763_v36  ;;  %v2602_v41 = vmul.f32 0.5, %v2538_v3  ;;  %v2769_v54 = vmul.f32 1.442695, %v2538_v3  ;;  %v6059_v30 = vpop.f32.mrf.mxu1 }
 0x249   : > { %v4520_v40 = vpop.eup %4519  ;;  %v3040_v34 = vsel %vm2976_vm3, %v5914_v12, %v2912_v43  ;;  %v2917_v32 = vmul.f32 %v4516_v49, %v2853_v9  ;;  %v2851_v46 = vadd.f32 1.0, %v4518_v14  ;;  %v6066_v59 = vadd.f32 %v5954_v15, %v6511_v10  ;;  %v6090_v9 = vpop.f32.mrf.mxu0 }
 0x24a   : > { %v3184_v23 = vadd.f32 %v6034_v48, %v3113_v50  ;;  %v3111_v25 = vmul.f32 %v6009_v33, %v3040_v34  ;;  %4535 = vtanh.f32 %v2599_v19  ;;  %v6074_v56 = vadd.f32 %v5808_v62, %v6512_v27  ;;  %v2208_v36 = vpop.f32.mrf.mxu1 }
 0x24b   : > { %v3045_v12 = vsel %vm2981_vm5, %v5934_v17, %v2917_v32  ;;  %v2915_v3 = vmul.f32 %v4520_v40, %v2851_v46  ;;  %4537 = vpow2.f32 %v2769_v54  ;;  %v2536_v15 = vmin.f32 %v6066_v59, 0.0 }
 0x24c   : > { %v3933_v44 = vpack.c.bf16 %v3184_v23, %v3184_v23  ;;  %v3182_v49 = vadd.f32 %v6034_v48, %v3111_v25  ;;  %v3116_v39 = vmul.f32 %v6009_v33, %v3045_v12  ;;  %vm2982_vm7 = vcmp.gt.f32.partialorder %v5970_v38, 0.0 }
 0x24d   : > { %v4522_v19 = vpop.eup %4521  ;;  %v3043_v62 = vsel %vm2979_vm6, %v5947_v31, %v2915_v3  ;;  %4539 = vtanh.f32 %v2602_v41  ;;  %v2765_v43 = vmul.f32 1.442695, %v2536_v15  ;;  %v6088_v17 = vadd.f32 %v5976_v24, %v5699_v7  ;;  %v6106_v3 = vpop.f32.mrf.mxu0 }
 0x24e   : > { %v4524_v14 = vpop.eup %4523  ;;  %3505 = vst.msk [vmem:[%s5512_s17 + $0x7c] sm:$0xf] %vm3473_vm4, %v3933_v44  ;;  %v3931_v50 = vpack.c.bf16 %v3182_v49, %v3182_v49  ;;  %v3187_v54 = vadd.f32 %v6034_v48, %v3116_v39  ;;  %v3114_v40 = vmul.f32 %v6009_v33, %v3043_v62  ;;  %v2854_v34 = vadd.f32 1.0, %v4522_v19 }
 0x24f   : > { %v4526_v32 = vpop.eup %4525  ;;  %vm2980_vm8 = vcmp.gt.f32.partialorder %v5974_v0, 0.0  ;;  %v2600_v31 = vmul.f32 0.5, %v2536_v15  ;;  %v2541_v41 = vmin.f32 %v6088_v17, 0.0  ;;  %v6100_v7 = vadd.f32 %v5993_v13, %v5636_v52 }
 0x250   : > { %3503 = vst.msk [vmem:[%s5512_s17 + $0x74] sm:$0xf] %vm3473_vm4, %v3931_v50  ;;  %v3936_v24 = vpack.c.bf16 %v3187_v54, %v3187_v54  ;;  %v3185_v46 = vadd.f32 %v6034_v48, %v3114_v40  ;;  %v2918_v10 = vmul.f32 %v4524_v14, %v2854_v34  ;;  %v2852_v23 = vadd.f32 1.0, %v4526_v32  ;;  %v6513_v50 = vld [vmem:[#allocation18_spill] sm:$0xff] }
 0x251   : > { %v4528_v25 = vpop.eup %4527  ;;  %4541 = vpow2.f32 %v2765_v43  ;;  %v2605_v27 = vmul.f32 0.5, %v2541_v41  ;;  %v2775_v36 = vmul.f32 1.442695, %v2541_v41  ;;  %v2539_v12 = vmin.f32 %v6100_v7, 0.0 }
 0x252   : > { %v4530_v15 = vpop.eup %4529  ;;  %3508 = vst.msk [vmem:[%s5512_s17 + $0x88] sm:$0xf] %vm3473_vm4, %v3936_v24  ;;  %v3934_v52 = vpack.c.bf16 %v3185_v46, %v3185_v46  ;;  %v3046_v13 = vsel %vm2982_vm7, %v5970_v38, %v2918_v10  ;;  %v2916_v44 = vmul.f32 %v4528_v25, %v2852_v23  ;;  %vm2985_vm9 = vcmp.gt.f32.partialorder %v6000_v16, 0.0  ;;  %v6514_v25 = vld [vmem:[#allocation19_spill] sm:$0xff] }
 0x253   : > { %v3117_v49 = vmul.f32 %v6009_v33, %v3046_v13  ;;  %v2857_v39 = vadd.f32 1.0, %v4530_v15  ;;  %4543 = vtanh.f32 %v2600_v31  ;;  %v2603_v19 = vmul.f32 0.5, %v2539_v12  ;;  %v6126_v31 = vpop.f32.mrf.mxu0 }
 0x254   : > { %v4532_v62 = vpop.eup %4531  ;;  %3506 = vst.msk [vmem:[%s5512_s17 + $0x80] sm:$0xf] %vm3473_vm4, %v3934_v52  ;;  %v3044_v43 = vsel %vm2980_vm8, %v5974_v0, %v2916_v44  ;;  %4545 = vpow2.f32 %v2775_v36  ;;  %v2771_v14 = vmul.f32 1.442695, %v2539_v12  ;;  %v6122_v38 = vadd.f32 %v5830_v11, %v6513_v50 }
 0x255   : > { %v4534_v54 = vpop.eup %4533  ;;  %v3188_v40 = vadd.f32 %v6034_v48, %v3117_v49  ;;  %v3115_v34 = vmul.f32 %v6009_v33, %v3044_v43  ;;  %v2921_v32 = vmul.f32 %v4532_v62, %v2857_v39  ;;  %4547 = vtanh.f32 %v2605_v27  ;;  %v6150_v15 = vpop.f32.mrf.mxu0 }
 0x256   : > { %v2855_v41 = vadd.f32 1.0, %v4534_v54  ;;  %4549 = vpow2.f32 %v2771_v14  ;;  %v6130_v0 = vadd.f32 %v6029_v35, %v5733_v6  ;;  %v6134_v11 = vadd.f32 %v6048_v55, %v5656_v26 }
 0x257   : > { %v4536_v24 = vpop.eup %4535  ;;  %v3937_v46 = vpack.c.bf16 %v3188_v40, %v3188_v40  ;;  %v3186_v10 = vadd.f32 %v6034_v48, %v3115_v34  ;;  %v3049_v23 = vsel %vm2985_vm9, %v6000_v16, %v2921_v32  ;;  %v6142_v27 = vadd.f32 %v5857_v47, %v6514_v25  ;;  %v6515_v34 = vld [vmem:[#allocation20_spill] sm:$0xff] }
 0x258   : > { %v4538_v36 = vpop.eup %4537  ;;  %v3120_v6 = vmul.f32 %v6009_v33, %v3049_v23  ;;  %v2919_v35 = vmul.f32 %v4536_v24, %v2855_v41  ;;  %4551 = vtanh.f32 %v2603_v19  ;;  %v2542_v26 = vmin.f32 %v6130_v0, 0.0  ;;  %v6172_v41 = vpop.f32.mrf.mxu0 }
 0x259   : > { %3509 = vst.msk [vmem:[%s5512_s17 + $0x8c] sm:$0xf] %vm3473_vm4, %v3937_v46  ;;  %v3935_v55 = vpack.c.bf16 %v3186_v10, %v3186_v10  ;;  %vm2983_vm10 = vcmp.gt.f32.partialorder %v6023_v45, 0.0  ;;  %v2858_v12 = vadd.f32 1.0, %v4538_v36  ;;  %v2540_v16 = vmin.f32 %v6134_v11, 0.0 }
 0x25a   : > { %v4540_v47 = vpop.eup %4539  ;;  %v3191_v52 = vadd.f32 %v6034_v48, %v3120_v6  ;;  %v3047_v13 = vsel %vm2983_vm10, %v6023_v45, %v2919_v35  ;;  %v2606_v44 = vmul.f32 0.5, %v2542_v26  ;;  %v2777_v49 = vmul.f32 1.442695, %v2542_v26  ;;  %v4067_v26 = vpop.f32.mrf.mxu0 }
 0x25b   : > { %3507 = vst.msk [vmem:[%s5512_s17 + $0x84] sm:$0xf] %vm3473_vm4, %v3935_v55  ;;  %v3118_v39 = vmul.f32 %v6009_v33, %v3047_v13  ;;  %v2922_v19 = vmul.f32 %v4540_v47, %v2858_v12  ;;  %vm2986_vm11 = vcmp.gt.f32.partialorder %v6043_v57, 0.0  ;;  %v2773_v62 = vmul.f32 1.442695, %v2540_v16 }
 0x25c   : > { %v3940_v43 = vpack.c.bf16 %v3191_v52, %v3191_v52  ;;  %v2604_v14 = vmul.f32 0.5, %v2540_v16  ;;  %v6160_v50 = vadd.f32 %v6068_v58, %v5840_v2  ;;  %v6164_v45 = vadd.f32 %v6090_v9, %v5748_v1 }
 0x25d   : > { %v3189_v54 = vadd.f32 %v6034_v48, %v3118_v39  ;;  %v3050_v40 = vsel %vm2986_vm11, %v6043_v57, %v2922_v19  ;;  %4553 = vpow2.f32 %v2777_v49  ;;  %v6170_v32 = vadd.f32 %v5878_v5, %v6515_v34 }
 0x25e   : > { %v4542_v24 = vpop.eup %4541  ;;  %3512 = vst.msk [vmem:[%s5512_s17 + $0x98] sm:$0xf] %vm3473_vm4, %v3940_v43  ;;  %v3121_v2 = vmul.f32 %v6009_v33, %v3050_v40  ;;  %vm2984_vm12 = vcmp.gt.f32.partialorder %v6066_v59, 0.0  ;;  %4555 = vtanh.f32 %v2606_v44  ;;  %v2545_v1 = vmin.f32 %v6160_v50, 0.0  ;;  %v2439_v43 = vpop.f32.mrf.mxu0 }
 0x25f   : > { %v3938_v58 = vpack.c.bf16 %v3189_v54, %v3189_v54  ;;  %v2856_v57 = vadd.f32 1.0, %v4542_v24  ;;  %4557 = vpow2.f32 %v2773_v62  ;;  %v2543_v9 = vmin.f32 %v6164_v45, 0.0 }
 0x260   : > { %v4544_v5 = vpop.eup %4543  ;;  %v3192_v46 = vadd.f32 %v6034_v48, %v3121_v2  ;;  %vm2989_vm13 = vcmp.gt.f32.partialorder %v6088_v17, 0.0  ;;  %v2609_v10 = vmul.f32 0.5, %v2545_v1  ;;  %v2783_v23 = vmul.f32 1.442695, %v2545_v1 }
 0x261   : > { %v4546_v25 = vpop.eup %4545  ;;  %3510 = vst.msk [vmem:[%s5512_s17 + $0x90] sm:$0xf] %vm3473_vm4, %v3938_v58  ;;  %v2920_v36 = vmul.f32 %v4544_v5, %v2856_v57  ;;  %4559 = vtanh.f32 %v2604_v14  ;;  %v2779_v6 = vmul.f32 1.442695, %v2543_v9  ;;  %v6186_v35 = vadd.f32 %v6106_v3, %v5900_v18  ;;  %v6516_v58 = vld [vmem:[#allocation21_spill] sm:$0xff] }
 0x262   : > { %v4548_v55 = vpop.eup %4547  ;;  %v3941_v12 = vpack.c.bf16 %v3192_v46, %v3192_v46  ;;  %v2861_v16 = vadd.f32 1.0, %v4546_v25  ;;  %vm2987_vm14 = vcmp.gt.f32.partialorder %v6100_v7, 0.0  ;;  %v6191_v47 = vadd.f32 %v6126_v31, %v5816_v20  ;;  %v4070_v46 = vpop.f32.mrf.mxu0 }
 0x263   : > { %v4550_v52 = vpop.eup %4549  ;;  %v3048_v13 = vsel %vm2984_vm12, %v6066_v59, %v2920_v36  ;;  %4561 = vpow2.f32 %v2783_v23  ;;  %v2607_v44 = vmul.f32 0.5, %v2543_v9  ;;  %v2546_v18 = vmin.f32 %v6186_v35, 0.0 }
 0x264   : > { %3513 = vst.msk [vmem:[%s5512_s17 + $0x9c] sm:$0xf] %vm3473_vm4, %v3941_v12  ;;  %v3119_v3 = vmul.f32 %v6009_v33, %v3048_v13  ;;  %v2925_v49 = vmul.f32 %v4548_v55, %v2861_v16  ;;  %v2859_v39 = vadd.f32 1.0, %v4550_v52  ;;  %4563 = vtanh.f32 %v2609_v10  ;;  %v2452_v52 = vpop.f32.mrf.mxu0 }
 0x265   : > { %v4552_v19 = vpop.eup %4551  ;;  %4565 = vpow2.f32 %v2779_v6  ;;  %v2610_v20 = vmul.f32 0.5, %v2546_v18  ;;  %v2785_v31 = vmul.f32 1.442695, %v2546_v18  ;;  %v2544_v62 = vmin.f32 %v6191_v47, 0.0 }
 0x266   : > { %v3190_v59 = vadd.f32 %v6034_v48, %v3119_v3  ;;  %v3053_v14 = vsel %vm2989_vm13, %v6088_v17, %v2925_v49  ;;  %v2923_v54 = vmul.f32 %v4552_v19, %v2859_v39  ;;  %vm2990_vm15 = vcmp.gt.f32.partialorder %v6130_v0, 0.0 }
 0x267   : > { %v3124_v40 = vmul.f32 %v6009_v33, %v3053_v14  ;;  %4567 = vtanh.f32 %v2607_v44  ;;  %v2608_v34 = vmul.f32 0.5, %v2544_v62  ;;  %v2781_v24 = vmul.f32 1.442695, %v2544_v62 }
 0x268   : > { %v3939_v2 = vpack.c.bf16 %v3190_v59, %v3190_v59  ;;  %v3051_v1 = vsel %vm2987_vm14, %v6100_v7, %v2923_v54  ;;  %4569 = vpow2.f32 %v2785_v31  ;;  %v6212_v57 = vadd.f32 %v5902_v61, %v6516_v58  ;;  %v6517_v61 = vld [vmem:[#allocation22_spill] sm:$0xff] }
 0x269   : > { %v3195_v17 = vadd.f32 %v6034_v48, %v3124_v40  ;;  %v3122_v9 = vmul.f32 %v6009_v33, %v3051_v1  ;;  %4571 = vtanh.f32 %v2610_v20  ;;  %v6218_v5 = vadd.f32 %v6150_v15, %v5984_v51 }
 0x26a   : > { %v4554_v10 = vpop.eup %4553  ;;  %3511 = vst.msk [vmem:[%s5512_s17 + $0x94] sm:$0xf] %vm3473_vm4, %v3939_v2  ;;  %4573 = vpow2.f32 %v2781_v24  ;;  %v6224_v7 = vadd.f32 %v6172_v41, %v5930_v4  ;;  %v6228_v23 = vadd.f32 %v5922_v21, %v6517_v61  ;;  %v6231_v25 = vadd.f32 %v4067_v26, %v6027_v8  ;;  %v4071_v24 = vpop.f32.mrf.mxu0 }
 0x26b   : > { %v4556_v36 = vpop.eup %4555  ;;  %v3944_v51 = vpack.c.bf16 %v3195_v17, %v3195_v17  ;;  %v3193_v15 = vadd.f32 %v6034_v48, %v3122_v9  ;;  %v2862_v6 = vadd.f32 1.0, %v4554_v10  ;;  %v2549_v55 = vmin.f32 %v6218_v5, 0.0 }
 0x26c   : > { %v4558_v12 = vpop.eup %4557  ;;  %vm2988_vm0 = vcmp.gt.f32.partialorder %v6134_v11, 0.0  ;;  %4575 = vtanh.f32 %v2608_v34  ;;  %v2547_v4 = vmin.f32 %v6224_v7, 0.0  ;;  %v2550_v21 = vmin.f32 %v6231_v25, 0.0  ;;  %v6518_v34 = vld [vmem:[#allocation23_spill] sm:$0xff] }
 0x26d   : > { %3516 = vst.msk [vmem:[%s5512_s17 + $0xa8] sm:$0xf] %vm3473_vm4, %v3944_v51  ;;  %v3942_v8 = vpack.c.bf16 %v3193_v15, %v3193_v15  ;;  %v2926_v41 = vmul.f32 %v4556_v36, %v2862_v6  ;;  %v2860_v26 = vadd.f32 1.0, %v4558_v12  ;;  %v2613_v16 = vmul.f32 0.5, %v2549_v55 }
 0x26e   : > { %v4560_v13 = vpop.eup %4559  ;;  %vm2993_vm1 = vcmp.gt.f32.partialorder %v6160_v50, 0.0  ;;  %v2791_v44 = vmul.f32 1.442695, %v2549_v55  ;;  %v2611_v18 = vmul.f32 0.5, %v2547_v4  ;;  %v2787_v3 = vmul.f32 1.442695, %v2547_v4  ;;  %v2455_v55 = vpop.f32.mrf.mxu0 }
 0x26f   : > { %3514 = vst.msk [vmem:[%s5512_s17 + $0xa0] sm:$0xf] %vm3473_vm4, %v3942_v8  ;;  %v3054_v49 = vsel %vm2990_vm15, %v6130_v0, %v2926_v41  ;;  %v2924_v39 = vmul.f32 %v4560_v13, %v2860_v26  ;;  %4577 = vtanh.f32 %v2613_v16  ;;  %v2614_v19 = vmul.f32 0.5, %v2550_v21 }
 0x270   : > { %v4562_v20 = vpop.eup %4561  ;;  %v3125_v31 = vmul.f32 %v6009_v33, %v3054_v49  ;;  %4579 = vpow2.f32 %v2791_v44  ;;  %v2793_v62 = vmul.f32 1.442695, %v2550_v21  ;;  %v6248_v59 = vadd.f32 %v2439_v43, %v5961_v22 }
 0x271   : > { %v4564_v14 = vpop.eup %4563  ;;  %v3052_v54 = vsel %vm2988_vm0, %v6134_v11, %v2924_v39  ;;  %v2865_v40 = vadd.f32 1.0, %v4562_v20  ;;  %4581 = vtanh.f32 %v2611_v18  ;;  %v6255_v0 = vadd.f32 %v5949_v53, %v6518_v34 }
 0x272   : > { %v4566_v2 = vpop.eup %4565  ;;  %v3196_v1 = vadd.f32 %v6034_v48, %v3125_v31  ;;  %v3123_v58 = vmul.f32 %v6009_v33, %v3052_v54  ;;  %4583 = vpow2.f32 %v2787_v3  ;;  %v2548_v22 = vmin.f32 %v6248_v59, 0.0  ;;  %v4644_v54 = vld [vmem:[%s6464_s2] ss:$0 sm:$0xff] }
 0x273   : > { %v2929_v43 = vmul.f32 %v4564_v14, %v2865_v40  ;;  %v2863_v17 = vadd.f32 1.0, %v4566_v2  ;;  %vm2991_vm2 = vcmp.gt.f32.partialorder %v6164_v45, 0.0  ;;  %4585 = vtanh.f32 %v2614_v19  ;;  %v4074_v19 = vpop.f32.mrf.mxu0  ;;  %v6520_v40 = vld [vmem:[#allocation4_spill] sm:$0xff] }
 0x274   : > { %v4568_v11 = vpop.eup %4567  ;;  %v3945_v9 = vpack.c.bf16 %v3196_v1, %v3196_v1  ;;  %v3194_v53 = vadd.f32 %v6034_v48, %v3123_v58  ;;  %4587 = vpow2.f32 %v2793_v62  ;;  %v2612_v10 = vmul.f32 0.5, %v2548_v22 }
 0x275   : > { %v4570_v61 = vpop.eup %4569  ;;  %v3057_v36 = vsel %vm2993_vm1, %v6160_v50, %v2929_v43  ;;  %v2927_v51 = vmul.f32 %v4568_v11, %v2863_v17  ;;  %v2789_v15 = vmul.f32 1.442695, %v2548_v22  ;;  %v6266_v6 = vadd.f32 %v4070_v46, %v6142_v27  ;;  %v2468_v11 = vpop.f32.mrf.mxu0 }
 0x276   : > { %v4572_v12 = vpop.eup %4571  ;;  %3517 = vst.msk [vmem:[%s5512_s17 + $0xac] sm:$0xf] %vm3473_vm4, %v3945_v9  ;;  %v3943_v4 = vpack.c.bf16 %v3194_v53, %v3194_v53  ;;  %v3128_v21 = vmul.f32 %v6009_v33, %v3057_v36  ;;  %v2866_v8 = vadd.f32 1.0, %v4570_v61  ;;  %4589 = vtanh.f32 %v2612_v10 }
 0x277   : > { %v4574_v41 = vpop.eup %4573  ;;  %v3055_v50 = vsel %vm2991_vm2, %v6164_v45, %v2927_v51  ;;  %vm2994_vm3 = vcmp.gt.f32.partialorder %v6186_v35, 0.0  ;;  %4591 = vpow2.f32 %v2789_v15  ;;  %v2553_v27 = vmin.f32 %v6266_v6, 0.0  ;;  %v6519_v45 = vld [vmem:[#allocation24_spill] sm:$0xff] }
 0x278   : > { %3515 = vst.msk [vmem:[%s5512_s17 + $0xa4] sm:$0xf] %vm3473_vm4, %v3943_v4  ;;  %v3199_v46 = vadd.f32 %v6034_v48, %v3128_v21  ;;  %v3126_v26 = vmul.f32 %v6009_v33, %v3055_v50  ;;  %v2930_v16 = vmul.f32 %v4572_v12, %v2866_v8  ;;  %v2864_v13 = vadd.f32 1.0, %v4574_v41  ;;  %v4075_v41 = vpop.f32.mrf.mxu0 }
 0x279   : > { %v4576_v44 = vpop.eup %4575  ;;  %v2617_v18 = vmul.f32 0.5, %v2553_v27  ;;  %v2799_v3 = vmul.f32 1.442695, %v2553_v27  ;;  %v6281_v49 = vadd.f32 %v2452_v52, %v6074_v56  ;;  %v6285_v39 = vadd.f32 %v5966_v60, %v6519_v45 }
 0x27a   : > { %v3948_v20 = vpack.c.bf16 %v3199_v46, %v3199_v46  ;;  %v3197_v31 = vadd.f32 %v6034_v48, %v3126_v26  ;;  %v3058_v62 = vsel %vm2994_vm3, %v6186_v35, %v2930_v16  ;;  %v2928_v14 = vmul.f32 %v4576_v44, %v2864_v13 }
 0x27b   : > { %v6295_v56 = vadd.f32 %v4644_v54, %v6520_v40  ;;  %v3129_v52 = vmul.f32 %v6009_v33, %v3058_v62  ;;  %vm2992_vm5 = vcmp.gt.f32.partialorder %v6191_v47, 0.0  ;;  %v2551_v60 = vmin.f32 %v6281_v49, 0.0  ;;  %v2471_v54 = vpop.f32.mrf.mxu0 }
 0x27c   : > { %v4578_v34 = vpop.eup %4577  ;;  %3520 = vst.msk [vmem:[%s5512_s17 + $0xb8] sm:$0xf] %vm3473_vm4, %v3948_v20  ;;  %v3946_v2 = vpack.c.bf16 %v3197_v31, %v3197_v31  ;;  %v3056_v35 = vsel %vm2992_vm5, %v6191_v47, %v2928_v14  ;;  %4593 = vpow2.f32 %v2799_v3  ;;  %v6304_v1 = vadd.f32 %v4071_v24, %v6170_v32 }
 0x27d   : > { %v4580_v58 = vpop.eup %4579  ;;  %v3200_v22 = vadd.f32 %v6034_v48, %v3129_v52  ;;  %v3127_v43 = vmul.f32 %v6009_v33, %v3056_v35  ;;  %4595 = vtanh.f32 %v2617_v18  ;;  %v2795_v17 = vmul.f32 1.442695, %v2551_v60 }
 0x27e   : > { %v4582_v9 = vpop.eup %4581  ;;  %3518 = vst.msk [vmem:[%s5512_s17 + $0xb0] sm:$0xf] %vm3473_vm4, %v3946_v2  ;;  %v2869_v53 = vadd.f32 1.0, %v4580_v58  ;;  %v2615_v10 = vmul.f32 0.5, %v2551_v60  ;;  %v2554_v47 = vmin.f32 %v6304_v1, 0.0  ;;  %v6312_v61 = vadd.f32 %v2455_v55, %v6122_v38 }
 0x27f   : > { %v4584_v32 = vpop.eup %4583  ;;  %v3949_v24 = vpack.c.bf16 %v3200_v22, %v3200_v22  ;;  %v3198_v36 = vadd.f32 %v6034_v48, %v3127_v43  ;;  %vm2997_vm6 = vcmp.gt.f32.partialorder %v6218_v5, 0.0  ;;  %vm2995_vm7 = vcmp.gt.f32.partialorder %v6224_v7, 0.0  ;;  %v4078_v43 = vpop.f32.mrf.mxu0 }
 0x280   : > { %v4586_v51 = vpop.eup %4585  ;;  %v2933_v15 = vmul.f32 %v4578_v34, %v2869_v53  ;;  %v2867_v12 = vadd.f32 1.0, %v4584_v32  ;;  %vm2998_vm8 = vcmp.gt.f32.partialorder %v6231_v25, 0.0  ;;  %4597 = vpow2.f32 %v2795_v17 }
 0x281   : > { %v4588_v4 = vpop.eup %4587  ;;  %3521 = vst.msk [vmem:[%s5512_s17 + $0xbc] sm:$0xf] %vm3473_vm4, %v3949_v24  ;;  %v3947_v38 = vpack.c.bf16 %v3198_v36, %v3198_v36  ;;  %v2618_v55 = vmul.f32 0.5, %v2554_v47  ;;  %v2801_v21 = vmul.f32 1.442695, %v2554_v47  ;;  %v2552_v8 = vmin.f32 %v6312_v61, 0.0 }
 0x282   : > { %v3061_v50 = vsel %vm2997_vm6, %v6218_v5, %v2933_v15  ;;  %v2931_v27 = vmul.f32 %v4582_v9, %v2867_v12  ;;  %v2870_v46 = vadd.f32 1.0, %v4588_v4  ;;  %4599 = vtanh.f32 %v2615_v10  ;;  %v6521_v15 = vld [vmem:[#allocation25_spill] sm:$0xff] }
 0x283   : > { %v4590_v26 = vpop.eup %4589  ;;  %3519 = vst.msk [vmem:[%s5512_s17 + $0xb4] sm:$0xf] %vm3473_vm4, %v3947_v38  ;;  %v3132_v16 = vmul.f32 %v6009_v33, %v3061_v50  ;;  %4601 = vpow2.f32 %v2801_v21  ;;  %v2616_v13 = vmul.f32 0.5, %v2552_v8  ;;  %v2797_v44 = vmul.f32 1.442695, %v2552_v8  ;;  %v2484_v38 = vpop.f32.mrf.mxu0 }
 0x284   : > { %v4592_v18 = vpop.eup %4591  ;;  %v3059_v3 = vsel %vm2995_vm7, %v6224_v7, %v2931_v27  ;;  %v2934_v45 = vmul.f32 %v4586_v51, %v2870_v46  ;;  %v6329_v20 = vadd.f32 %v4074_v19, %v6255_v0  ;;  %v6332_v5 = vadd.f32 %v2468_v11, %v6212_v57 }
 0x285   : > { %v3203_v31 = vadd.f32 %v6034_v48, %v3132_v16  ;;  %v3130_v62 = vmul.f32 %v6009_v33, %v3059_v3  ;;  %v2868_v14 = vadd.f32 1.0, %v4592_v18  ;;  %4603 = vtanh.f32 %v2618_v55 }
 0x286   : > { %v3062_v40 = vsel %vm2998_vm8, %v6231_v25, %v2934_v45  ;;  %vm2996_vm9 = vcmp.gt.f32.partialorder %v6248_v59, 0.0  ;;  %4605 = vpow2.f32 %v2797_v44  ;;  %v2557_v7 = vmin.f32 %v6329_v20, 0.0  ;;  %v4079_v44 = vpop.f32.mrf.mxu0 }
 0x287   : > { %v3952_v0 = vpack.c.bf16 %v3203_v31, %v3203_v31  ;;  %v3201_v57 = vadd.f32 %v6034_v48, %v3130_v62  ;;  %v3133_v19 = vmul.f32 %v6009_v33, %v3062_v40  ;;  %v2932_v52 = vmul.f32 %v4590_v26, %v2868_v14 }
 0x288   : > { %4607 = vtanh.f32 %v2616_v13  ;;  %v2621_v60 = vmul.f32 0.5, %v2557_v7  ;;  %v2807_v34 = vmul.f32 1.442695, %v2557_v7  ;;  %v2555_v2 = vmin.f32 %v6332_v5, 0.0 }
 0x289   : > { %v4594_v35 = vpop.eup %4593  ;;  %3524 = vst.msk [vmem:[%s5512_s17 + $0xc8] sm:$0xf] %vm3473_vm4, %v3952_v0  ;;  %v3950_v25 = vpack.c.bf16 %v3201_v57, %v3201_v57  ;;  %v3204_v58 = vadd.f32 %v6034_v48, %v3133_v19  ;;  %v3060_v22 = vsel %vm2996_vm9, %v6248_v59, %v2932_v52  ;;  %vm3001_vm10 = vcmp.gt.f32.partialorder %v6266_v6, 0.0 }
 0x28a   : > { %v4596_v17 = vpop.eup %4595  ;;  %v3131_v11 = vmul.f32 %v6009_v33, %v3060_v22  ;;  %v2873_v9 = vadd.f32 1.0, %v4594_v35  ;;  %vm2999_vm11 = vcmp.gt.f32.partialorder %v6281_v49, 0.0  ;;  %v2619_v53 = vmul.f32 0.5, %v2555_v2 }
 0x28b   : > { %3522 = vst.msk [vmem:[%s5512_s17 + $0xc0] sm:$0xf] %vm3473_vm4, %v3950_v25  ;;  %v3953_v10 = vpack.c.bf16 %v3204_v58, %v3204_v58  ;;  %4609 = vpow2.f32 %v2807_v34  ;;  %v2803_v47 = vmul.f32 1.442695, %v2555_v2  ;;  %v6354_v32 = vadd.f32 %v4075_v41, %v6285_v39  ;;  %v2487_v2 = vpop.f32.mrf.mxu0 }
 0x28c   : > { %v3202_v59 = vadd.f32 %v6034_v48, %v3131_v11  ;;  %v2937_v24 = vmul.f32 %v4596_v17, %v2873_v9  ;;  %4611 = vtanh.f32 %v2621_v60  ;;  %v6358_v36 = vadd.f32 %v2471_v54, %v6228_v23 }
 0x28d   : > { %v4598_v51 = vpop.eup %4597  ;;  %3525 = vst.msk [vmem:[%s5512_s17 + $0xcc] sm:$0xf] %vm3473_vm4, %v3953_v10  ;;  %v2196_v12 = vadd.f32 %v5990_v42, %v6521_v15  ;;  %4613 = vpow2.f32 %v2803_v47  ;;  %v2558_v4 = vmin.f32 %v6354_v32, 0.0  ;;  %v2204_v39 = vadd.f32 %v6045_v63, %v5940_v37 }
 0x28e   : > { %v3951_v55 = vpack.c.bf16 %v3202_v59, %v3202_v59  ;;  %v3065_v23 = vsel %vm3001_vm10, %v6266_v6, %v2937_v24  ;;  %v2871_v21 = vadd.f32 1.0, %v4598_v51  ;;  %v2556_v8 = vmin.f32 %v6358_v36, 0.0 }
 0x28f   : > { %v4600_v41 = vpop.eup %4599  ;;  %v3136_v50 = vmul.f32 %v6009_v33, %v3065_v23  ;;  %4615 = vtanh.f32 %v2619_v53  ;;  %v2622_v42 = vmul.f32 0.5, %v2558_v4  ;;  %v2809_v27 = vmul.f32 1.442695, %v2558_v4 }
 0x290   : > { %v4602_v46 = vpop.eup %4601  ;;  %3523 = vst.msk [vmem:[%s5512_s17 + $0xc4] sm:$0xf] %vm3473_vm4, %v3951_v55  ;;  %v2935_v26 = vmul.f32 %v4600_v41, %v2871_v21  ;;  %vm3002_vm12 = vcmp.gt.f32.partialorder %v6304_v1, 0.0  ;;  %v2805_v37 = vmul.f32 1.442695, %v2556_v8  ;;  %v6375_v63 = vadd.f32 %v4078_v43, %v2204_v39 }
 0x291   : > { %v3207_v6 = vadd.f32 %v6034_v48, %v3136_v50  ;;  %v2874_v16 = vadd.f32 1.0, %v4602_v46  ;;  %vm3000_vm13 = vcmp.gt.f32.partialorder %v6312_v61, 0.0  ;;  %v6379_v13 = vadd.f32 %v2484_v38, %v2196_v12 }
 0x292   : > { %v4604_v18 = vpop.eup %4603  ;;  %v3063_v3 = vsel %vm2999_vm11, %v6281_v49, %v2935_v26  ;;  %4617 = vpow2.f32 %v2809_v27  ;;  %v2620_v45 = vmul.f32 0.5, %v2556_v8  ;;  %v2561_v31 = vmin.f32 %v6375_v63, 0.0 }
 0x293   : > { %v4606_v62 = vpop.eup %4605  ;;  %v3956_v14 = vpack.c.bf16 %v3207_v6, %v3207_v6  ;;  %v3134_v54 = vmul.f32 %v6009_v33, %v3063_v3  ;;  %v2938_v40 = vmul.f32 %v4604_v18, %v2874_v16  ;;  %4619 = vtanh.f32 %v2622_v42 }
 0x294   : > { %v2872_v7 = vadd.f32 1.0, %v4606_v62  ;;  %v2199_v0 = vadd.f32 %v6014_v28, %v5891_v29  ;;  %4621 = vpow2.f32 %v2805_v37  ;;  %v2815_v57 = vmul.f32 1.442695, %v2561_v31  ;;  %v4645_v62 = vld [vmem:[%s6465_s3] ss:$0 sm:$0xff] }
 0x295   : > { %v4608_v19 = vpop.eup %4607  ;;  %3528 = vst.msk [vmem:[%s5512_s17 + $0xd8] sm:$0xf] %vm3473_vm4, %v3956_v14  ;;  %v3205_v49 = vadd.f32 %v6034_v48, %v3134_v54  ;;  %v3066_v52 = vsel %vm3002_vm12, %v6304_v1, %v2938_v40  ;;  %v2625_v60 = vmul.f32 0.5, %v2561_v31  ;;  %v2559_v34 = vmin.f32 %v6379_v13, 0.0 }
 0x296   : > { %v3137_v35 = vmul.f32 %v6009_v33, %v3066_v52  ;;  %v2936_v25 = vmul.f32 %v4608_v19, %v2872_v7  ;;  %4623 = vtanh.f32 %v2620_v45  ;;  %v2207_v29 = vadd.f32 %v6059_v30, %v6295_v56 }
 0x297   : > { %v3954_v28 = vpack.c.bf16 %v3205_v49, %v3205_v49  ;;  %4625 = vpow2.f32 %v2815_v57  ;;  %v2623_v58 = vmul.f32 0.5, %v2559_v34  ;;  %v2811_v22 = vmul.f32 1.442695, %v2559_v34  ;;  %v4646_v34 = vld [vmem:[%s6466_s4] ss:$0 sm:$0xff] }
 0x298   : > { %v4610_v43 = vpop.eup %4609  ;;  %v3208_v17 = vadd.f32 %v6034_v48, %v3137_v35  ;;  %v3064_v1 = vsel %vm3000_vm13, %v6312_v61, %v2936_v25  ;;  %v6402_v11 = vadd.f32 %v4079_v44, %v2207_v29  ;;  %v6404_v9 = vadd.f32 %v2487_v2, %v2199_v0 }
 0x299   : > { %v4612_v53 = vpop.eup %4611  ;;  %3526 = vst.msk [vmem:[%s5512_s17 + $0xd0] sm:$0xf] %vm3473_vm4, %v3954_v28  ;;  %v3135_v30 = vmul.f32 %v6009_v33, %v3064_v1  ;;  %v2877_v56 = vadd.f32 1.0, %v4610_v43  ;;  %4627 = vtanh.f32 %v2625_v60  ;;  %vm3005_vm14 = vcmp.gt.f32.partialorder %v6329_v20, 0.0 }
 0x29a   : > { %v4614_v10 = vpop.eup %4613  ;;  %v3957_v47 = vpack.c.bf16 %v3208_v17, %v3208_v17  ;;  %4629 = vpow2.f32 %v2811_v22  ;;  %v2562_v59 = vmin.f32 %v6402_v11, 0.0  ;;  %v2560_v15 = vmin.f32 %v6404_v9, 0.0 }
 0x29b   : > { %v3206_v24 = vadd.f32 %v6034_v48, %v3135_v30  ;;  %v2941_v61 = vmul.f32 %v4612_v53, %v2877_v56  ;;  %v2875_v51 = vadd.f32 1.0, %v4614_v10  ;;  %4631 = vtanh.f32 %v2623_v58 }
 0x29c   : > { %v4616_v12 = vpop.eup %4615  ;;  %3529 = vst.msk [vmem:[%s5512_s17 + $0xdc] sm:$0xf] %vm3473_vm4, %v3957_v47  ;;  %v2626_v4 = vmul.f32 0.5, %v2562_v59  ;;  %v2817_v39 = vmul.f32 1.442695, %v2562_v59  ;;  %vm3003_vm15 = vcmp.gt.f32.partialorder %v6332_v5, 0.0 }
 0x29d   : > { %v3955_v38 = vpack.c.bf16 %v3206_v24, %v3206_v24  ;;  %v3069_v55 = vsel %vm3005_vm14, %v6329_v20, %v2941_v61  ;;  %v2939_v23 = vmul.f32 %v4616_v12, %v2875_v51  ;;  %v2813_v8 = vmul.f32 1.442695, %v2560_v15 }
 0x29e   : > { %v3140_v21 = vmul.f32 %v6009_v33, %v3069_v55  ;;  %4633 = vpow2.f32 %v2817_v39  ;;  %v2624_v42 = vmul.f32 0.5, %v2560_v15  ;;  %vm3006_vm0 = vcmp.gt.f32.partialorder %v6354_v32, 0.0 }
 0x29f   : > { %v4618_v41 = vpop.eup %4617  ;;  %3527 = vst.msk [vmem:[%s5512_s17 + $0xd4] sm:$0xf] %vm3473_vm4, %v3955_v38  ;;  %v3067_v50 = vsel %vm3003_vm15, %v6332_v5, %v2939_v23  ;;  %4635 = vtanh.f32 %v2626_v4  ;;  %vm3004_vm1 = vcmp.gt.f32.partialorder %v6358_v36, 0.0  ;;  %vm3009_vm2 = vcmp.gt.f32.partialorder %v6375_v63, 0.0 }
 0x2a0   : > { %v4620_v27 = vpop.eup %4619  ;;  %v3211_v46 = vadd.f32 %v6034_v48, %v3140_v21  ;;  %v3138_v26 = vmul.f32 %v6009_v33, %v3067_v50  ;;  %v2878_v20 = vadd.f32 1.0, %v4618_v41  ;;  %4637 = vpow2.f32 %v2813_v8 }
 0x2a1   : > { %v4622_v37 = vpop.eup %4621  ;;  %4639 = vtanh.f32 %v2624_v42  ;;  %vm3007_vm3 = vcmp.gt.f32.partialorder %v6379_v13, 0.0  ;;  %vm3010_vm5 = vcmp.gt.f32.partialorder %v6402_v11, 0.0  ;;  %vm3008_vm6 = vcmp.gt.f32.partialorder %v6404_v9, 0.0 }
 0x2a2   : > { %v3960_v6 = vpack.c.bf16 %v3211_v46, %v3211_v46  ;;  %v3209_v16 = vadd.f32 %v6034_v48, %v3138_v26  ;;  %v2942_v44 = vmul.f32 %v4620_v27, %v2878_v20  ;;  %v2876_v18 = vadd.f32 1.0, %v4622_v37 }
 0x2a3   : > { %v4624_v3 = vpop.eup %4623 }
 0x2a4   : > { %v4626_v5 = vpop.eup %4625  ;;  %3532 = vst.msk [vmem:[%s5512_s17 + $0xe8] sm:$0xf] %vm3473_vm4, %v3960_v6  ;;  %v3958_v45 = vpack.c.bf16 %v3209_v16, %v3209_v16  ;;  %v3070_v33 = vsel %vm3006_vm0, %v6354_v32, %v2942_v44  ;;  %v2940_v31 = vmul.f32 %v4624_v3, %v2876_v18 }
 0x2a5   : > { %v3141_v14 = vmul.f32 %v4645_v62, %v3070_v33  ;;  %v2881_v54 = vadd.f32 1.0, %v4626_v5 }
 0x2a6   : > { %v4628_v40 = vpop.eup %4627  ;;  %3530 = vst.msk [vmem:[%s5512_s17 + $0xe0] sm:$0xf] %vm3473_vm4, %v3958_v45  ;;  %v3068_v7 = vsel %vm3004_vm1, %v6358_v36, %v2940_v31 }
 0x2a7   : > { %v4630_v0 = vpop.eup %4629  ;;  %v3212_v57 = vadd.f32 %v6034_v48, %v3141_v14  ;;  %v3139_v19 = vmul.f32 %v4645_v62, %v3068_v7  ;;  %v2945_v32 = vmul.f32 %v4628_v40, %v2881_v54 }
 0x2a8   : > { %v2879_v49 = vadd.f32 1.0, %v4630_v0  ;;  %v4632_v52 = vpop.eup %4631 }
 0x2a9   : > { %v3961_v60 = vpack.c.bf16 %v3212_v57, %v3212_v57  ;;  %v3210_v2 = vadd.f32 %v4646_v34, %v3139_v19  ;;  %v3073_v35 = vsel %vm3009_vm2, %v6375_v63, %v2945_v32 }
 0x2aa   : > { %v3144_v25 = vmul.f32 %v4645_v62, %v3073_v35  ;;  %v2943_v36 = vmul.f32 %v4632_v52, %v2879_v49 }
 0x2ab   : > { %3533 = vst.msk [vmem:[%s5512_s17 + $0xec] sm:$0xf] %vm3473_vm4, %v3961_v60  ;;  %v3959_v48 = vpack.c.bf16 %v3210_v2, %v3210_v2  ;;  %v4634_v29 = vpop.eup %4633 }
 0x2ac   : > { %v3215_v28 = vadd.f32 %v4646_v34, %v3144_v25  ;;  %v3071_v58 = vsel %vm3007_vm3, %v6379_v13, %v2943_v36  ;;  %v4636_v22 = vpop.eup %4635  ;;  %v2882_v17 = vadd.f32 1.0, %v4634_v29 }
 0x2ad   : > { %3531 = vst.msk [vmem:[%s5512_s17 + $0xe4] sm:$0xf] %vm3473_vm4, %v3959_v48  ;;  %v3142_v43 = vmul.f32 %v4645_v62, %v3071_v58  ;;  %v4638_v1 = vpop.eup %4637 }
 0x2ae   : > { %v3964_v63 = vpack.c.bf16 %v3215_v28, %v3215_v28  ;;  %v2946_v30 = vmul.f32 %v4636_v22, %v2882_v17  ;;  %v2880_v56 = vadd.f32 1.0, %v4638_v1  ;;  %v4640_v10 = vpop.eup %4639 }
 0x2af   : > { %v3213_v53 = vadd.f32 %v4646_v34, %v3142_v43 }
 0x2b0   : > { %3536 = vst.msk [vmem:[%s5512_s17 + $0xf8] sm:$0xf] %vm3473_vm4, %v3964_v63  ;;  %v3074_v13 = vsel %vm3010_vm5, %v6402_v11, %v2946_v30  ;;  %v2944_v59 = vmul.f32 %v4640_v10, %v2880_v56 }
 0x2b1   : > { %v3962_v47 = vpack.c.bf16 %v3213_v53, %v3213_v53  ;;  %v3145_v24 = vmul.f32 %v4645_v62, %v3074_v13 }
 0x2b2   : > { %v3072_v61 = vsel %vm3008_vm6, %v6404_v9, %v2944_v59 }
 0x2b3   : > { %3534 = vst.msk [vmem:[%s5512_s17 + $0xf0] sm:$0xf] %vm3473_vm4, %v3962_v47  ;;  %v3216_v51 = vadd.f32 %v4646_v34, %v3145_v24  ;;  %v3143_v15 = vmul.f32 %v4645_v62, %v3072_v61 }
 0x2b5   : > { %v3965_v12 = vpack.c.bf16 %v3216_v51, %v3216_v51  ;;  %v3214_v4 = vadd.f32 %v4646_v34, %v3143_v15 }
 0x2b7   : > { %3537 = vst.msk [vmem:[%s5512_s17 + $0xfc] sm:$0xf] %vm3473_vm4, %v3965_v12  ;;  %v3963_v39 = vpack.c.bf16 %v3214_v4, %v3214_v4 }
 0x2b9   : > { %3535 = vst.msk [vmem:[%s5512_s17 + $0xf4] sm:$0xf] %vm3473_vm4, %v3963_v39 }
 0x2ba PF: > { %s15_s18 = sadd.s32 1, %s4653_s18  }
 0x2bb   : > { %p12_p4 = scmp.ge.s32.totalorder %s15_s18, 5  }
 0x2bd   :  { %14 = sbr.rel (!%p12_p4) target bundleno = 1 (0x1), region = 70 }

// kernel: net_forward.8
= control target key start
LH: loop header
LB: loop body
LE: loop exit
PB: predicated region body
PF: predicated region fallthrough
CT: control target
= control target key end

     0   :  { %v4156_v0 = vmov 0   ;;  %vm1460_vm0 = vcmask 261120   ;;  %vm3167_vm3 = vcmask 322560   ;;  %s5941_s1 = inlined_call_operand.vmem [shape: bf16[800,40], index: 1, kind: input, shape index: {}]   ;;  %s5942_s0 = inlined_call_operand.vmem [shape: bf16[384,800], index: 0, kind: input, shape index: {}]   ;;  %s5943_s2 = inlined_call_operand.vmem [shape: f32[1,40], index: 2, kind: input, shape index: {}]   ;;  %s5944_s3 = inlined_call_operand.vmem [shape: f32[1,40], index: 3, kind: input, shape index: {}]   ;;  %s5945_s4 = inlined_call_operand.vmem [shape: f32[1,40], index: 4, kind: input, shape index: {}]   ;;  %s5946_s5 = inlined_call_operand.vmem [shape: bf16[384,40], index: 5, kind: output, shape index: {}]  }
   0x1   :  { %1533 = vmatprep.subr.bf16.mxu0 %v4156_v0  ;;  %1758 = vmatprep.subr.bf16.mxu1 %v4156_v0  ;;  %v3672_v1 = vld [vmem:[%s5941_s1 + $0x38] sm:$0xff]   ;;  %v3674_v3 = vld [vmem:[%s5941_s1 + $0x30] sm:$0xff]   ;;  %v3676_v5 = vld [vmem:[%s5941_s1 + $0x28] sm:$0xff]  }
   0x2   :  { %v3673_v2 = vld [vmem:[%s5941_s1 + $0xb8] sm:$0xff]   ;;  %1534 = vmatpush1.bf16.msra.mxu0 %v3672_v1  ;;  %v3675_v4 = vld [vmem:[%s5941_s1 + $0xb0] sm:$0xff]   ;;  %v3677_v6 = vld [vmem:[%s5941_s1 + $0xa8] sm:$0xff]  }
   0x3   :  { %1759 = vmatpush1.bf16.msra.mxu1 %v3673_v2  ;;  %1535 = vmatprep.subr.bf16.mxu0 %v4156_v0  ;;  %v3678_v7 = vld [vmem:[%s5941_s1 + $0x20] sm:$0xff]   ;;  %v3680_v9 = vld [vmem:[%s5941_s1 + $0x18] sm:$0xff]   ;;  %v3682_v11 = vld [vmem:[%s5941_s1 + $0x10] sm:$0xff]  }
   0x4   :  { %1760 = vmatprep.subr.bf16.mxu1 %v4156_v0  ;;  %v3679_v8 = vld [vmem:[%s5941_s1 + $0xa0] sm:$0xff]   ;;  %v3681_v10 = vld [vmem:[%s5941_s1 + $0x98] sm:$0xff]   ;;  %v3683_v12 = vld [vmem:[%s5941_s1 + $0x90] sm:$0xff]  }
   0x5   :  { %v3684_v13 = vld [vmem:[%s5941_s1 + $0x8] sm:$0xff]   ;;  %v3686_v15 = vld [vmem:[%s5941_s1] sm:$0xff]   ;;  %v3688_v17 = vld [vmem:[%s5941_s1 + $0x78] sm:$0xff]  }
   0x6   :  { %1536 = vmatpush1.bf16.msra.mxu0 %v3674_v3  ;;  %v3685_v14 = vld [vmem:[%s5941_s1 + $0x88] sm:$0xff]   ;;  %v3687_v16 = vld [vmem:[%s5941_s1 + $0x80] sm:$0xff]   ;;  %v3689_v18 = vld [vmem:[%s5941_s1 + $0xf8] sm:$0xff]  }
   0x7   :  { %1761 = vmatpush1.bf16.msra.mxu1 %v3675_v4  ;;  %1537 = vmatprep.subr.bf16.mxu0 %v4156_v0  ;;  %v3706_v19 = vld [vmem:[%s5942_s0 + $0x4] ss:$28 sps:$4 sm:$0xff]   ;;  %v3690_v20 = vld [vmem:[%s5941_s1 + $0x70] sm:$0xff]   ;;  %v3709_v21 = vld [vmem:[%s5942_s0 + $0xc] ss:$28 sps:$4 sm:$0xff]  }
   0x8   :  { %1762 = vmatprep.subr.bf16.mxu1 %v4156_v0  ;;  %v3691_v22 = vld [vmem:[%s5941_s1 + $0xf0] sm:$0xff]   ;;  %1565 = vmatprep.mubr.bf16.mxu0 %v3706_v19  ;;  %v3692_v23 = vld [vmem:[%s5941_s1 + $0x68] sm:$0xff]   ;;  %v3694_v25 = vld [vmem:[%s5941_s1 + $0x60] sm:$0xff]  }
   0x9   :  { %1790 = vmatprep.mubr.bf16.mxu1 %v3709_v21  ;;  %v3693_v24 = vld [vmem:[%s5941_s1 + $0xe8] sm:$0xff]   ;;  %v3695_v26 = vld [vmem:[%s5941_s1 + $0xe0] sm:$0xff]   ;;  %v3696_v27 = vld [vmem:[%s5941_s1 + $0x58] sm:$0xff]  }
   0xa   :  { %1538 = vmatpush1.bf16.msra.mxu0 %v3676_v5  ;;  %v3697_v28 = vld [vmem:[%s5941_s1 + $0xd8] sm:$0xff]   ;;  %v3698_v29 = vld [vmem:[%s5941_s1 + $0x50] sm:$0xff]   ;;  %v3700_v31 = vld [vmem:[%s5941_s1 + $0x48] sm:$0xff]  }
   0xb   :  { %1763 = vmatpush1.bf16.msra.mxu1 %v3677_v6  ;;  %1539 = vmatprep.subr.bf16.mxu0 %v4156_v0  ;;  %v3699_v30 = vld [vmem:[%s5941_s1 + $0xd0] sm:$0xff]   ;;  %v3701_v32 = vld [vmem:[%s5941_s1 + $0xc8] sm:$0xff]   ;;  %v3702_v33 = vld [vmem:[%s5941_s1 + $0x40] sm:$0xff]  }
   0xc   :  { %1764 = vmatprep.subr.bf16.mxu1 %v4156_v0  ;;  %v3703_v34 = vld [vmem:[%s5941_s1 + $0xc0] sm:$0xff]   ;;  %v3710_v37 = vld [vmem:[%s5941_s1 + $0x138] sm:$0xff]   ;;  %v3717_v40 = vld [vmem:[%s5941_s1 + $0x130] sm:$0xff]  }
   0xd   :  { %v3704_v35 = vld [vmem:[%s5942_s0] ss:$28 sps:$4 sm:$0xff]   ;;  %v3707_v36 = vld [vmem:[%s5942_s0 + $0x8] ss:$28 sps:$4 sm:$0xff]   ;;  %v3715_v41 = vld [vmem:[%s5942_s0 + $0x38] ss:$28 sps:$4 sm:$0xff]  }
   0xe   :  { %1540 = vmatpush1.bf16.msra.mxu0 %v3678_v7  ;;  %v3711_v38 = vld [vmem:[%s5942_s0 + $0x3c] ss:$28 sps:$4 sm:$0xff]   ;;  %v3713_v39 = vld [vmem:[%s5942_s0 + $0x44] ss:$28 sps:$4 sm:$0xff]   ;;  %v3718_v43 = vld [vmem:[%s5942_s0 + $0x74] ss:$28 sps:$4 sm:$0xff]  }
   0xf   :  { %1765 = vmatpush1.bf16.msra.mxu1 %v3679_v8  ;;  %1541 = vmatprep.subr.bf16.mxu0 %v4156_v0  ;;  %v3716_v42 = vld [vmem:[%s5942_s0 + $0x40] ss:$28 sps:$4 sm:$0xff]   ;;  %v3730_v45 = vld [vmem:[%s5941_s1 + $0x128] sm:$0xff]   ;;  %v3723_v48 = vld [vmem:[%s5942_s0 + $0x78] ss:$28 sps:$4 sm:$0xff]  }
  0x10   :  { %1766 = vmatprep.subr.bf16.mxu1 %v4156_v0  ;;  %v3720_v44 = vld [vmem:[%s5942_s0 + $0x7c] ss:$28 sps:$4 sm:$0xff]   ;;  %v3737_v46 = vld [vmem:[%s5941_s1 + $0x120] sm:$0xff]   ;;  %v3722_v47 = vld [vmem:[%s5942_s0 + $0x70] ss:$28 sps:$4 sm:$0xff]  }
  0x11   :  { %v3724_v49 = vld [vmem:[%s5942_s0 + $0xac] ss:$28 sps:$4 sm:$0xff]   ;;  %v3726_v50 = vld [vmem:[%s5942_s0 + $0xb4] ss:$28 sps:$4 sm:$0xff]   ;;  %v3750_v51 = vld [vmem:[%s5941_s1 + $0x118] sm:$0xff]  }
  0x12   :  { %1542 = vmatpush1.bf16.msra.mxu0 %v3680_v9  ;;  %v3757_v52 = vld [vmem:[%s5941_s1 + $0x110] sm:$0xff]   ;;  %v3728_v53 = vld [vmem:[%s5942_s0 + $0xa8] ss:$28 sps:$4 sm:$0xff]   ;;  %v3735_v59 = vld [vmem:[%s5942_s0 + $0xe0] ss:$28 sps:$4 sm:$0xff]  }
  0x13   :  { %1767 = vmatpush1.bf16.msra.mxu1 %v3681_v10  ;;  %1543 = vmatprep.subr.bf16.mxu0 %v4156_v0  ;;  %v3729_v54 = vld [vmem:[%s5942_s0 + $0xb0] ss:$28 sps:$4 sm:$0xff]   ;;  %v3731_v55 = vld [vmem:[%s5942_s0 + $0xe4] ss:$28 sps:$4 sm:$0xff]   ;;  %v3738_v61 = vld [vmem:[%s5942_s0 + $0x11c] ss:$28 sps:$4 sm:$0xff]  }
  0x14   :  { %1768 = vmatprep.subr.bf16.mxu1 %v4156_v0  ;;  %v3733_v56 = vld [vmem:[%s5942_s0 + $0xec] ss:$28 sps:$4 sm:$0xff]   ;;  %v3777_v58 = vld [vmem:[%s5941_s1 + $0x100] sm:$0xff]   ;;  %v3790_v63 = vld [vmem:[%s5941_s1 + $0x178] sm:$0xff]  }
  0x15   :  { %v3770_v57 = vld [vmem:[%s5941_s1 + $0x108] sm:$0xff]   ;;  %v3740_v62 = vld [vmem:[%s5942_s0 + $0x124] ss:$28 sps:$4 sm:$0xff]   ;;  %v3797_v1 = vld [vmem:[%s5941_s1 + $0x170] sm:$0xff]  }
  0x16   :  { %1544 = vmatpush1.bf16.msra.mxu0 %v3682_v11  ;;  %v3736_v60 = vld [vmem:[%s5942_s0 + $0xe8] ss:$28 sps:$4 sm:$0xff]   ;;  %v3742_v2 = vld [vmem:[%s5942_s0 + $0x118] ss:$28 sps:$4 sm:$0xff]   ;;  %v3743_v3 = vld [vmem:[%s5942_s0 + $0x120] ss:$28 sps:$4 sm:$0xff]  }
  0x17   :  { %1769 = vmatpush1.bf16.msra.mxu1 %v3683_v12  ;;  %1545 = vmatprep.subr.bf16.mxu0 %v4156_v0  ;;  %v3744_v4 = vld [vmem:[%s5942_s0 + $0x154] ss:$28 sps:$4 sm:$0xff]   ;;  %v3746_v5 = vld [vmem:[%s5942_s0 + $0x15c] ss:$28 sps:$4 sm:$0xff]   ;;  %v3810_v6 = vld [vmem:[%s5941_s1 + $0x168] sm:$0xff]  }
  0x18   :  { %1770 = vmatprep.subr.bf16.mxu1 %v4156_v0  ;;  %v3748_v7 = vld [vmem:[%s5942_s0 + $0x150] ss:$28 sps:$4 sm:$0xff]   ;;  %v3817_v8 = vld [vmem:[%s5941_s1 + $0x160] sm:$0xff]   ;;  %v3749_v9 = vld [vmem:[%s5942_s0 + $0x158] ss:$28 sps:$4 sm:$0xff]  }
  0x19   :  { %v3751_v10 = vld [vmem:[%s5942_s0 + $0x18c] ss:$28 sps:$4 sm:$0xff]   ;;  %v3753_v11 = vld [vmem:[%s5942_s0 + $0x194] ss:$28 sps:$4 sm:$0xff]   ;;  %v3830_v12 = vld [vmem:[%s5941_s1 + $0x158] sm:$0xff]  }
  0x1a   :  { %1546 = vmatpush1.bf16.msra.mxu0 %v3684_v13  ;;  %v3755_v13 = vld [vmem:[%s5942_s0 + $0x188] ss:$28 sps:$4 sm:$0xff]   ;;  %v3762_v19 = vld [vmem:[%s5942_s0 + $0x1c0] ss:$28 sps:$4 sm:$0xff]  }
  0x1b   :  { %1771 = vmatpush1.bf16.msra.mxu1 %v3685_v14  ;;  %1547 = vmatprep.subr.bf16.mxu0 %v4156_v0  ;;  %v3837_v14 = vld [vmem:[%s5941_s1 + $0x150] sm:$0xff]   ;;  %v3763_v21 = vld [vmem:[%s5942_s0 + $0x1c8] ss:$28 sps:$4 sm:$0xff]  }
  0x1c   :  { %1772 = vmatprep.subr.bf16.mxu1 %v4156_v0 }
  0x1e   :  { %1548 = vmatpush1.bf16.msra.mxu0 %v3686_v15  ;;  %v3756_v15 = vld [vmem:[%s5942_s0 + $0x190] ss:$28 sps:$4 sm:$0xff]  }
  0x1f   :  { %1773 = vmatpush1.bf16.msra.mxu1 %v3687_v16  ;;  %1549 = vmatprep.subr.bf16.mxu0 %v4156_v0  ;;  %v3758_v16 = vld [vmem:[%s5942_s0 + $0x1c4] ss:$28 sps:$4 sm:$0xff]  }
  0x20   :  { %1774 = vmatprep.subr.bf16.mxu1 %v4156_v0 }
  0x22   :  { %1550 = vmatpush2.bf16.msra.mxu0 %v3688_v17  ;;  %v3760_v17 = vld [vmem:[%s5942_s0 + $0x1cc] ss:$28 sps:$4 sm:$0xff]  }
  0x23   :  { %1775 = vmatpush2.bf16.msra.mxu1 %v3689_v18  ;;  %1551 = vmatprep.subr.bf16.mxu0 %v4156_v0  ;;  %v3850_v18 = vld [vmem:[%s5941_s1 + $0x148] sm:$0xff]  }
  0x24   :  { %1776 = vmatprep.subr.bf16.mxu1 %v4156_v0 }
  0x26   :  { %1552 = vmatpush2.bf16.msra.mxu0 %v3690_v20  ;;  %v3857_v20 = vld [vmem:[%s5941_s1 + $0x140] sm:$0xff]  }
  0x27   :  { %1777 = vmatpush2.bf16.msra.mxu1 %v3691_v22  ;;  %1553 = vmatprep.subr.bf16.mxu0 %v4156_v0  ;;  %v3764_v22 = vld [vmem:[%s5942_s0 + $0x1fc] ss:$28 sps:$4 sm:$0xff]  }
  0x28   :  { %1778 = vmatprep.subr.bf16.mxu1 %v4156_v0 }
  0x2a   :  { %1554 = vmatpush2.bf16.msra.mxu0 %v3692_v23  ;;  %v3766_v23 = vld [vmem:[%s5942_s0 + $0x204] ss:$28 sps:$4 sm:$0xff]  }
  0x2b   :  { %1779 = vmatpush2.bf16.msra.mxu1 %v3693_v24  ;;  %1555 = vmatprep.subr.bf16.mxu0 %v4156_v0  ;;  %v3768_v24 = vld [vmem:[%s5942_s0 + $0x1f8] ss:$28 sps:$4 sm:$0xff]  }
  0x2c   :  { %1780 = vmatprep.subr.bf16.mxu1 %v4156_v0 }
  0x2e   :  { %1556 = vmatpush2.bf16.msra.mxu0 %v3694_v25  ;;  %v3769_v25 = vld [vmem:[%s5942_s0 + $0x200] ss:$28 sps:$4 sm:$0xff]  }
  0x2f   :  { %1781 = vmatpush2.bf16.msra.mxu1 %v3695_v26  ;;  %1557 = vmatprep.subr.bf16.mxu0 %v4156_v0  ;;  %v3771_v26 = vld [vmem:[%s5942_s0 + $0x234] ss:$28 sps:$4 sm:$0xff]  }
  0x30   :  { %1782 = vmatprep.subr.bf16.mxu1 %v4156_v0 }
  0x32   :  { %1558 = vmatpush2.bf16.msra.mxu0 %v3696_v27  ;;  %v3773_v27 = vld [vmem:[%s5942_s0 + $0x23c] ss:$28 sps:$4 sm:$0xff]  }
  0x33   :  { %1783 = vmatpush2.bf16.msra.mxu1 %v3697_v28  ;;  %1559 = vmatprep.subr.bf16.mxu0 %v4156_v0  ;;  %v3775_v28 = vld [vmem:[%s5942_s0 + $0x230] ss:$28 sps:$4 sm:$0xff]  }
  0x34   :  { %1784 = vmatprep.subr.bf16.mxu1 %v4156_v0 }
  0x36   :  { %1560 = vmatpush2.bf16.msra.mxu0 %v3698_v29  ;;  %v3776_v29 = vld [vmem:[%s5942_s0 + $0x238] ss:$28 sps:$4 sm:$0xff]  }
  0x37   :  { %1785 = vmatpush2.bf16.msra.mxu1 %v3699_v30  ;;  %1561 = vmatprep.subr.bf16.mxu0 %v4156_v0  ;;  %v3778_v30 = vld [vmem:[%s5942_s0 + $0x26c] ss:$28 sps:$4 sm:$0xff]  }
  0x38   :  { %1786 = vmatprep.subr.bf16.mxu1 %v4156_v0 }
  0x3a   :  { %1562 = vmatpush2.bf16.msra.mxu0 %v3700_v31  ;;  %v3780_v31 = vld [vmem:[%s5942_s0 + $0x274] ss:$28 sps:$4 sm:$0xff]  }
  0x3b   :  { %1787 = vmatpush2.bf16.msra.mxu1 %v3701_v32  ;;  %1563 = vmatprep.subr.bf16.mxu0 %v4156_v0  ;;  %v3782_v32 = vld [vmem:[%s5942_s0 + $0x268] ss:$28 sps:$4 sm:$0xff]  }
  0x3c   :  { %1788 = vmatprep.subr.bf16.mxu1 %v4156_v0 }
  0x3e   :  { %1564 = vmatpush2.bf16.msra.mxu0 %v3702_v33  ;;  %v3783_v33 = vld [vmem:[%s5942_s0 + $0x270] ss:$28 sps:$4 sm:$0xff]  }
  0x3f   :  { %1789 = vmatpush2.bf16.msra.mxu1 %v3703_v34  ;;  %1983 = vmatprep.subr.bf16.mxu0 %v4156_v0  ;;  %v3784_v34 = vld [vmem:[%s5942_s0 + $0x2a4] ss:$28 sps:$4 sm:$0xff]  }
  0x40   :  { %3639 = vmatprep.subr.bf16.mxu1 %v4156_v0 }
  0x41   :  { %1566 = vmatmul.mubr.bf16.vlgmr.msra.gmra.mxu0 %v3704_v35  ;;  %v3786_v35 = vld [vmem:[%s5942_s0 + $0x2ac] ss:$28 sps:$4 sm:$0xff]  }
  0x42   :  { %1791 = vmatmul.mubr.bf16.vlgmr.msra.gmra.mxu1 %v3707_v36  ;;  %1984 = vmatpush1.bf16.msra.mxu0 %v3710_v37  ;;  %v3788_v36 = vld [vmem:[%s5942_s0 + $0x2a0] ss:$28 sps:$4 sm:$0xff]  }
  0x43   :  { %3655 = vmatpush1.bf16.msra.mxu1 %v3710_v37  ;;  %1573 = vmatprep.mubr.bf16.mxu0 %v3711_v38  ;;  %v3789_v37 = vld [vmem:[%s5942_s0 + $0x2a8] ss:$28 sps:$4 sm:$0xff]   ;;  %v3791_v38 = vld [vmem:[%s5942_s0 + $0x2dc] ss:$28 sps:$4 sm:$0xff]  }
  0x44   :  { %1798 = vmatprep.mubr.bf16.mxu1 %v3713_v39  ;;  %1985 = vmatprep.subr.bf16.mxu0 %v4156_v0  ;;  %v3793_v39 = vld [vmem:[%s5942_s0 + $0x2e4] ss:$28 sps:$4 sm:$0xff]  }
  0x45   :  { %3640 = vmatprep.subr.bf16.mxu1 %v4156_v0 }
  0x46   :  { %1986 = vmatpush1.bf16.msra.mxu0 %v3717_v40 }
  0x47   :  { %3656 = vmatpush1.bf16.msra.mxu1 %v3717_v40  ;;  %1987 = vmatprep.subr.bf16.mxu0 %v4156_v0  ;;  %v3795_v40 = vld [vmem:[%s5942_s0 + $0x2d8] ss:$28 sps:$4 sm:$0xff]  }
  0x48   :  { %3641 = vmatprep.subr.bf16.mxu1 %v4156_v0 }
  0x49   :  { %1574 = vmatmul.mubr.bf16.gmra.mxu0 %v3715_v41  ;;  %v3796_v41 = vld [vmem:[%s5942_s0 + $0x2e0] ss:$28 sps:$4 sm:$0xff]  }
  0x4a   :  { %1799 = vmatmul.mubr.bf16.gmra.mxu1 %v3716_v42  ;;  %1581 = vmatprep.mubr.bf16.mxu0 %v3718_v43  ;;  %v3798_v42 = vld [vmem:[%s5942_s0 + $0x314] ss:$28 sps:$4 sm:$0xff]   ;;  %v3800_v43 = vld [vmem:[%s5942_s0 + $0x31c] ss:$28 sps:$4 sm:$0xff]  }
  0x4b   :  { %1806 = vmatprep.mubr.bf16.mxu1 %v3720_v44  ;;  %1988 = vmatpush1.bf16.msra.mxu0 %v3730_v45  ;;  %v3802_v44 = vld [vmem:[%s5942_s0 + $0x310] ss:$28 sps:$4 sm:$0xff]  }
  0x4c   :  { %3657 = vmatpush1.bf16.msra.mxu1 %v3730_v45  ;;  %1989 = vmatprep.subr.bf16.mxu0 %v4156_v0  ;;  %v3803_v45 = vld [vmem:[%s5942_s0 + $0x318] ss:$28 sps:$4 sm:$0xff]  }
  0x4d   :  { %3642 = vmatprep.subr.bf16.mxu1 %v4156_v0 }
  0x4f   :  { %1990 = vmatpush1.bf16.msra.mxu0 %v3737_v46 }
  0x50   :  { %3658 = vmatpush1.bf16.msra.mxu1 %v3737_v46  ;;  %1991 = vmatprep.subr.bf16.mxu0 %v4156_v0  ;;  %v3804_v46 = vld [vmem:[%s5942_s0 + $0x34c] ss:$28 sps:$4 sm:$0xff]  }
  0x51   :  { %1582 = vmatmul.mubr.bf16.gmra.mxu0 %v3722_v47  ;;  %3643 = vmatprep.subr.bf16.mxu1 %v4156_v0  ;;  %v3806_v47 = vld [vmem:[%s5942_s0 + $0x354] ss:$28 sps:$4 sm:$0xff]  }
  0x52   :  { %1807 = vmatmul.mubr.bf16.gmra.mxu1 %v3723_v48  ;;  %1589 = vmatprep.mubr.bf16.mxu0 %v3724_v49  ;;  %v3808_v48 = vld [vmem:[%s5942_s0 + $0x348] ss:$28 sps:$4 sm:$0xff]   ;;  %v3809_v49 = vld [vmem:[%s5942_s0 + $0x350] ss:$28 sps:$4 sm:$0xff]  }
  0x53   :  { %1814 = vmatprep.mubr.bf16.mxu1 %v3726_v50  ;;  %1992 = vmatpush1.bf16.msra.mxu0 %v3750_v51  ;;  %v3811_v50 = vld [vmem:[%s5942_s0 + $0x384] ss:$28 sps:$4 sm:$0xff]  }
  0x54   :  { %3659 = vmatpush1.bf16.msra.mxu1 %v3750_v51  ;;  %1993 = vmatprep.subr.bf16.mxu0 %v4156_v0  ;;  %v3813_v51 = vld [vmem:[%s5942_s0 + $0x38c] ss:$28 sps:$4 sm:$0xff]  }
  0x55   :  { %3644 = vmatprep.subr.bf16.mxu1 %v4156_v0 }
  0x57   :  { %1994 = vmatpush1.bf16.msra.mxu0 %v3757_v52 }
  0x58   :  { %3660 = vmatpush1.bf16.msra.mxu1 %v3757_v52  ;;  %1995 = vmatprep.subr.bf16.mxu0 %v4156_v0  ;;  %v3815_v52 = vld [vmem:[%s5942_s0 + $0x380] ss:$28 sps:$4 sm:$0xff]  }
  0x59   :  { %1590 = vmatmul.mubr.bf16.gmra.mxu0 %v3728_v53  ;;  %3645 = vmatprep.subr.bf16.mxu1 %v4156_v0  ;;  %v3816_v53 = vld [vmem:[%s5942_s0 + $0x388] ss:$28 sps:$4 sm:$0xff]  }
  0x5a   :  { %1815 = vmatmul.mubr.bf16.gmra.mxu1 %v3729_v54  ;;  %1597 = vmatprep.mubr.bf16.mxu0 %v3731_v55  ;;  %v3818_v54 = vld [vmem:[%s5942_s0 + $0x3bc] ss:$28 sps:$4 sm:$0xff]   ;;  %v3820_v55 = vld [vmem:[%s5942_s0 + $0x3c4] ss:$28 sps:$4 sm:$0xff]  }
  0x5b   :  { %1822 = vmatprep.mubr.bf16.mxu1 %v3733_v56  ;;  %1996 = vmatpush1.bf16.msra.mxu0 %v3770_v57  ;;  %v3822_v56 = vld [vmem:[%s5942_s0 + $0x3b8] ss:$28 sps:$4 sm:$0xff]  }
  0x5c   :  { %3661 = vmatpush1.bf16.msra.mxu1 %v3770_v57  ;;  %1997 = vmatprep.subr.bf16.mxu0 %v4156_v0  ;;  %v3823_v57 = vld [vmem:[%s5942_s0 + $0x3c0] ss:$28 sps:$4 sm:$0xff]  }
  0x5d   :  { %3646 = vmatprep.subr.bf16.mxu1 %v4156_v0 }
  0x5f   :  { %1998 = vmatpush1.bf16.msra.mxu0 %v3777_v58 }
  0x60   :  { %3662 = vmatpush1.bf16.msra.mxu1 %v3777_v58  ;;  %1999 = vmatprep.subr.bf16.mxu0 %v4156_v0  ;;  %v3824_v58 = vld [vmem:[%s5942_s0 + $0x3f4] ss:$28 sps:$4 sm:$0xff]  }
  0x61   :  { %1598 = vmatmul.mubr.bf16.gmra.mxu0 %v3735_v59  ;;  %3647 = vmatprep.subr.bf16.mxu1 %v4156_v0  ;;  %v3826_v59 = vld [vmem:[%s5942_s0 + $0x3fc] ss:$28 sps:$4 sm:$0xff]  }
  0x62   :  { %1823 = vmatmul.mubr.bf16.gmra.mxu1 %v3736_v60  ;;  %1605 = vmatprep.mubr.bf16.mxu0 %v3738_v61  ;;  %v3828_v60 = vld [vmem:[%s5942_s0 + $0x3f0] ss:$28 sps:$4 sm:$0xff]   ;;  %v3829_v61 = vld [vmem:[%s5942_s0 + $0x3f8] ss:$28 sps:$4 sm:$0xff]  }
  0x63   :  { %1830 = vmatprep.mubr.bf16.mxu1 %v3740_v62  ;;  %2000 = vmatpush2.bf16.msra.mxu0 %v3790_v63  ;;  %v3831_v62 = vld [vmem:[%s5942_s0 + $0x42c] ss:$28 sps:$4 sm:$0xff]  }
  0x64   :  { %3663 = vmatpush2.bf16.msra.mxu1 %v3790_v63  ;;  %2001 = vmatprep.subr.bf16.mxu0 %v4156_v0  ;;  %v3833_v63 = vld [vmem:[%s5942_s0 + $0x434] ss:$28 sps:$4 sm:$0xff]  }
  0x65   :  { %3648 = vmatprep.subr.bf16.mxu1 %v4156_v0 }
  0x67   :  { %2002 = vmatpush2.bf16.msra.mxu0 %v3797_v1 }
  0x68   :  { %3664 = vmatpush2.bf16.msra.mxu1 %v3797_v1  ;;  %2003 = vmatprep.subr.bf16.mxu0 %v4156_v0  ;;  %v3835_v1 = vld [vmem:[%s5942_s0 + $0x428] ss:$28 sps:$4 sm:$0xff]  }
  0x69   :  { %1606 = vmatmul.mubr.bf16.gmra.mxu0 %v3742_v2  ;;  %3649 = vmatprep.subr.bf16.mxu1 %v4156_v0  ;;  %v3836_v2 = vld [vmem:[%s5942_s0 + $0x430] ss:$28 sps:$4 sm:$0xff]  }
  0x6a   :  { %1831 = vmatmul.mubr.bf16.gmra.mxu1 %v3743_v3  ;;  %1613 = vmatprep.mubr.bf16.mxu0 %v3744_v4  ;;  %v3838_v3 = vld [vmem:[%s5942_s0 + $0x464] ss:$28 sps:$4 sm:$0xff]   ;;  %v3840_v4 = vld [vmem:[%s5942_s0 + $0x46c] ss:$28 sps:$4 sm:$0xff]  }
  0x6b   :  { %1838 = vmatprep.mubr.bf16.mxu1 %v3746_v5  ;;  %2004 = vmatpush2.bf16.msra.mxu0 %v3810_v6  ;;  %v3842_v5 = vld [vmem:[%s5942_s0 + $0x460] ss:$28 sps:$4 sm:$0xff]  }
  0x6c   :  { %3665 = vmatpush2.bf16.msra.mxu1 %v3810_v6  ;;  %2005 = vmatprep.subr.bf16.mxu0 %v4156_v0  ;;  %v3843_v6 = vld [vmem:[%s5942_s0 + $0x468] ss:$28 sps:$4 sm:$0xff]  }
  0x6d   :  { %3650 = vmatprep.subr.bf16.mxu1 %v4156_v0 }
  0x6f   :  { %2006 = vmatpush2.bf16.msra.mxu0 %v3817_v8 }
  0x70   :  { %3666 = vmatpush2.bf16.msra.mxu1 %v3817_v8  ;;  %2007 = vmatprep.subr.bf16.mxu0 %v4156_v0  ;;  %v3846_v8 = vld [vmem:[%s5942_s0 + $0x4a4] ss:$28 sps:$4 sm:$0xff]  }
  0x71   :  { %1614 = vmatmul.mubr.bf16.gmra.mxu0 %v3748_v7  ;;  %3651 = vmatprep.subr.bf16.mxu1 %v4156_v0  ;;  %v3844_v7 = vld [vmem:[%s5942_s0 + $0x49c] ss:$28 sps:$4 sm:$0xff]  }
  0x72   :  { %1839 = vmatmul.mubr.bf16.gmra.mxu1 %v3749_v9  ;;  %1621 = vmatprep.mubr.bf16.mxu0 %v3751_v10  ;;  %v3848_v9 = vld [vmem:[%s5942_s0 + $0x498] ss:$28 sps:$4 sm:$0xff]   ;;  %v3849_v10 = vld [vmem:[%s5942_s0 + $0x4a0] ss:$28 sps:$4 sm:$0xff]  }
  0x73   :  { %1846 = vmatprep.mubr.bf16.mxu1 %v3753_v11  ;;  %2008 = vmatpush2.bf16.msra.mxu0 %v3830_v12  ;;  %v3851_v11 = vld [vmem:[%s5942_s0 + $0x4d4] ss:$28 sps:$4 sm:$0xff]  }
  0x74   :  { %3667 = vmatpush2.bf16.msra.mxu1 %v3830_v12  ;;  %2009 = vmatprep.subr.bf16.mxu0 %v4156_v0  ;;  %v3853_v12 = vld [vmem:[%s5942_s0 + $0x4dc] ss:$28 sps:$4 sm:$0xff]  }
  0x75   :  { %3652 = vmatprep.subr.bf16.mxu1 %v4156_v0 }
  0x77   :  { %2010 = vmatpush2.bf16.msra.mxu0 %v3837_v14 }
  0x78   :  { %3668 = vmatpush2.bf16.msra.mxu1 %v3837_v14  ;;  %2011 = vmatprep.subr.bf16.mxu0 %v4156_v0  ;;  %v3856_v14 = vld [vmem:[%s5942_s0 + $0x4d8] ss:$28 sps:$4 sm:$0xff]  }
  0x79   :  { %1622 = vmatmul.mubr.bf16.gmra.mxu0 %v3755_v13  ;;  %3653 = vmatprep.subr.bf16.mxu1 %v4156_v0  ;;  %v3855_v13 = vld [vmem:[%s5942_s0 + $0x4d0] ss:$28 sps:$4 sm:$0xff]  }
  0x7a   :  { %1847 = vmatmul.mubr.bf16.gmra.mxu1 %v3756_v15  ;;  %1629 = vmatprep.mubr.bf16.mxu0 %v3758_v16  ;;  %v3858_v15 = vld [vmem:[%s5942_s0 + $0x50c] ss:$28 sps:$4 sm:$0xff]   ;;  %v3860_v16 = vld [vmem:[%s5942_s0 + $0x514] ss:$28 sps:$4 sm:$0xff]  }
  0x7b   :  { %1854 = vmatprep.mubr.bf16.mxu1 %v3760_v17  ;;  %2012 = vmatpush2.bf16.msra.mxu0 %v3850_v18  ;;  %v3862_v17 = vld [vmem:[%s5942_s0 + $0x508] ss:$28 sps:$4 sm:$0xff]  }
  0x7c   :  { %3669 = vmatpush2.bf16.msra.mxu1 %v3850_v18  ;;  %2013 = vmatprep.subr.bf16.mxu0 %v4156_v0  ;;  %v3863_v18 = vld [vmem:[%s5942_s0 + $0x510] ss:$28 sps:$4 sm:$0xff]  }
  0x7d   :  { %3654 = vmatprep.subr.bf16.mxu1 %v4156_v0  ;;  %v4521_v0 = vld [vmem:[%s5941_s1 + $0x188] sm:$0xff]  }
  0x7f   :  { %2014 = vmatpush2.bf16.msra.mxu0 %v3857_v20 }
  0x80   :  { %3670 = vmatpush2.bf16.msra.mxu1 %v3857_v20  ;;  %v3869_v20 = vld [vmem:[%s5942_s0 + $0x404] ss:$28 sps:$4 sm:$0xff]  }
  0x81   :  { %1630 = vmatmul.mubr.bf16.gmra.mxu0 %v3762_v19  ;;  %3587 = vmatprep.subr.bf16.mxu1 %v4521_v0  ;;  %v3866_v19 = vld [vmem:[%s5942_s0 + $0x14] ss:$28 sps:$4 sm:$0xff]  }
  0x82   :  { %1855 = vmatmul.mubr.bf16.gmra.mxu1 %v3763_v21  ;;  %1637 = vmatprep.mubr.bf16.mxu0 %v3764_v22  ;;  %v3864_v21 = vld [vmem:[%s5942_s0 + $0x10] ss:$28 sps:$4 sm:$0xff]   ;;  %v3867_v22 = vld [vmem:[%s5942_s0 + $0x400] ss:$28 sps:$4 sm:$0xff]  }
  0x83   :  { %1862 = vmatprep.mubr.bf16.mxu1 %v3766_v23  ;;  %v3871_v23 = vld [vmem:[%s5942_s0 + $0x4c] ss:$28 sps:$4 sm:$0xff]  }
  0x89   :  { %1638 = vmatmul.mubr.bf16.gmra.mxu0 %v3768_v24  ;;  %v4707_v24 = vld [vmem:[%s5943_s2] ss:$0 sm:$0xff] }
  0x8a   :  { %1863 = vmatmul.mubr.bf16.gmra.mxu1 %v3769_v25  ;;  %1645 = vmatprep.mubr.bf16.mxu0 %v3771_v26  ;;  %v3873_v25 = vld [vmem:[%s5942_s0 + $0x43c] ss:$28 sps:$4 sm:$0xff]   ;;  %v3889_v26 = vld [vmem:[%s5941_s1 + $0x180] sm:$0xff]  }
  0x8b   :  { %1870 = vmatprep.mubr.bf16.mxu1 %v3773_v27 }
  0x91   :  { %1646 = vmatmul.mubr.bf16.gmra.mxu0 %v3775_v28 }
  0x92   :  { %1871 = vmatmul.mubr.bf16.gmra.mxu1 %v3776_v29  ;;  %1653 = vmatprep.mubr.bf16.mxu0 %v3778_v30 }
  0x93   :  { %1878 = vmatprep.mubr.bf16.mxu1 %v3780_v31 }
  0x99   :  { %1654 = vmatmul.mubr.bf16.gmra.mxu0 %v3782_v32 }
  0x9a   :  { %1879 = vmatmul.mubr.bf16.gmra.mxu1 %v3783_v33  ;;  %1661 = vmatprep.mubr.bf16.mxu0 %v3784_v34  ;;  %v3875_v34 = vld [vmem:[%s5942_s0 + $0x48] ss:$28 sps:$4 sm:$0xff]  }
  0x9b   :  { %1886 = vmatprep.mubr.bf16.mxu1 %v3786_v35 }
  0xa1   :  { %1662 = vmatmul.mubr.bf16.gmra.mxu0 %v3788_v36 }
  0xa2   :  { %1887 = vmatmul.mubr.bf16.gmra.mxu1 %v3789_v37  ;;  %1669 = vmatprep.mubr.bf16.mxu0 %v3791_v38  ;;  %v3876_v37 = vld [vmem:[%s5942_s0 + $0x438] ss:$28 sps:$4 sm:$0xff]  }
  0xa3   :  { %1894 = vmatprep.mubr.bf16.mxu1 %v3793_v39  ;;  %v3879_v39 = vld [vmem:[%s5942_s0 + $0x474] ss:$28 sps:$4 sm:$0xff]  }
  0xa9   :  { %1670 = vmatmul.mubr.bf16.gmra.mxu0 %v3795_v40 }
  0xaa   :  { %1895 = vmatmul.mubr.bf16.gmra.mxu1 %v3796_v41  ;;  %1677 = vmatprep.mubr.bf16.mxu0 %v3798_v42 }
  0xab   :  { %1902 = vmatprep.mubr.bf16.mxu1 %v3800_v43 }
  0xb1   :  { %1678 = vmatmul.mubr.bf16.gmra.mxu0 %v3802_v44 }
  0xb2   :  { %1903 = vmatmul.mubr.bf16.gmra.mxu1 %v3803_v45  ;;  %1685 = vmatprep.mubr.bf16.mxu0 %v3804_v46 }
  0xb3   :  { %1910 = vmatprep.mubr.bf16.mxu1 %v3806_v47 }
  0xb9   :  { %1686 = vmatmul.mubr.bf16.gmra.mxu0 %v3808_v48 }
  0xba   :  { %1911 = vmatmul.mubr.bf16.gmra.mxu1 %v3809_v49  ;;  %1693 = vmatprep.mubr.bf16.mxu0 %v3811_v50  ;;  %v3881_v49 = vld [vmem:[%s5942_s0 + $0x80] ss:$28 sps:$4 sm:$0xff]  }
  0xbb   :  { %1918 = vmatprep.mubr.bf16.mxu1 %v3813_v51 }
  0xc1   :  { %1694 = vmatmul.mubr.bf16.gmra.mxu0 %v3815_v52  ;;  %v3882_v52 = vld [vmem:[%s5942_s0 + $0x470] ss:$28 sps:$4 sm:$0xff]  }
  0xc2   :  { %1919 = vmatmul.mubr.bf16.gmra.mxu1 %v3816_v53  ;;  %1701 = vmatprep.mubr.bf16.mxu0 %v3818_v54  ;;  %v3883_v53 = vld [vmem:[%s5942_s0 + $0xbc] ss:$28 sps:$4 sm:$0xff]  }
  0xc3   :  { %1926 = vmatprep.mubr.bf16.mxu1 %v3820_v55  ;;  %v3885_v55 = vld [vmem:[%s5942_s0 + $0x4ac] ss:$28 sps:$4 sm:$0xff]  }
  0xc9   :  { %1702 = vmatmul.mubr.bf16.gmra.mxu0 %v3822_v56 }
  0xca   :  { %1927 = vmatmul.mubr.bf16.gmra.mxu1 %v3823_v57  ;;  %1709 = vmatprep.mubr.bf16.mxu0 %v3824_v58 }
  0xcb   :  { %1934 = vmatprep.mubr.bf16.mxu1 %v3826_v59 }
  0xd1   :  { %1710 = vmatmul.mubr.bf16.gmra.mxu0 %v3828_v60 }
  0xd2   :  { %1935 = vmatmul.mubr.bf16.gmra.mxu1 %v3829_v61  ;;  %1717 = vmatprep.mubr.bf16.mxu0 %v3831_v62 }
  0xd3   :  { %1942 = vmatprep.mubr.bf16.mxu1 %v3833_v63 }
  0xd9   :  { %1718 = vmatmul.mubr.bf16.gmra.mxu0 %v3835_v1 }
  0xda   :  { %1943 = vmatmul.mubr.bf16.gmra.mxu1 %v3836_v2  ;;  %1725 = vmatprep.mubr.bf16.mxu0 %v3838_v3  ;;  %v3887_v2 = vld [vmem:[%s5942_s0 + $0xb8] ss:$28 sps:$4 sm:$0xff]  }
  0xdb   :  { %1950 = vmatprep.mubr.bf16.mxu1 %v3840_v4 }
  0xe1   :  { %1726 = vmatmul.mubr.bf16.gmra.mxu0 %v3842_v5  ;;  %v3888_v5 = vld [vmem:[%s5942_s0 + $0x4a8] ss:$28 sps:$4 sm:$0xff]  }
  0xe2   :  { %1951 = vmatmul.mubr.bf16.gmra.mxu1 %v3843_v6  ;;  %1733 = vmatprep.mubr.bf16.mxu0 %v3844_v7  ;;  %v3892_v6 = vld [vmem:[%s5942_s0 + $0xf4] ss:$28 sps:$4 sm:$0xff]  }
  0xe3   :  { %1958 = vmatprep.mubr.bf16.mxu1 %v3846_v8  ;;  %v3895_v8 = vld [vmem:[%s5942_s0 + $0x4e4] ss:$28 sps:$4 sm:$0xff]  }
  0xe9   :  { %1734 = vmatmul.mubr.bf16.gmra.mxu0 %v3848_v9 }
  0xea   :  { %1959 = vmatmul.mubr.bf16.gmra.mxu1 %v3849_v10  ;;  %1741 = vmatprep.mubr.bf16.mxu0 %v3851_v11 }
  0xeb   :  { %1966 = vmatprep.mubr.bf16.mxu1 %v3853_v12 }
  0xf1   :  { %1742 = vmatmul.mubr.bf16.gmra.mxu0 %v3855_v13 }
  0xf2   :  { %1967 = vmatmul.mubr.bf16.gmra.mxu1 %v3856_v14  ;;  %1749 = vmatprep.mubr.bf16.mxu0 %v3858_v15 }
  0xf3   :  { %1974 = vmatprep.mubr.bf16.mxu1 %v3860_v16 }
  0xf9   :  { %1750 = vmatmul.mubr.bf16.gmra.mxu0 %v3862_v17 }
  0xfa   :  { %1975 = vmatmul.mubr.bf16.gmra.mxu1 %v3863_v18  ;;  %2015 = vmatprep.mubr.bf16.mxu0 %v3866_v19  ;;  %v3890_v18 = vld [vmem:[%s5942_s0 + $0xf0] ss:$28 sps:$4 sm:$0xff]  }
  0xfb   :  { %2159 = vmatprep.mubr.bf16.mxu1 %v3869_v20 }
 0x101   :  { %v1567_v27 = vpop.f32.mrf.mxu0  ;;  %2016 = vmatmul.mubr.bf16.vlgmr.msra.gmra.mxu0 %v3864_v21  ;;  %v3893_v21 = vld [vmem:[%s5942_s0 + $0x4e0] ss:$28 sps:$4 sm:$0xff]  }
 0x102   :  { %v1568_v28 = vadd.f32 %v4707_v24, %v1567_v27  ;;  %v1792_v29 = vpop.f32.mrf.mxu1  ;;  %2160 = vmatmul.mubr.bf16.vlgmr.msra.gmra.mxu1 %v3867_v22  ;;  %2023 = vmatprep.mubr.bf16.mxu0 %v3871_v23  ;;  %v3898_v22 = vld [vmem:[%s5942_s0 + $0x12c] ss:$28 sps:$4 sm:$0xff]  }
 0x103   :  { %3588 = vmatpush3.bf16.msra.mxu1 %v4521_v0  ;;  %v1569_v30 = vpop.f32.mrf.mxu0  ;;  %2167 = vmatprep.mubr.bf16.mxu1 %v3873_v25  ;;  %v3877_v0 = vld [vmem:[%s5942_s0 + $0x84] ss:$28 sps:$4 sm:$0xff]   ;;  %v3901_v25 = vld [vmem:[%s5942_s0 + $0x51c] ss:$28 sps:$4 sm:$0xff]  }
 0x104   :  { %v4717_v31 = vadd.f32 %v1792_v29, %v1568_v28  ;;  %v1794_v32 = vpop.f32.mrf.mxu1  ;;  %3589 = vmatprep.subr.bf16.mxu1 %v3889_v26 }
 0x105   :  { %v1570_v33 = vpop.f32.mrf.mxu0 }
 0x106   :  { %v1571_v35 = vadd.f32 %v4707_v24, %v1570_v33  ;;  %v1795_v36 = vpop.f32.mrf.mxu1 }
 0x107   :  { %v1572_v38 = vpop.f32.mrf.mxu0  ;;  %3590 = vmatpush3.bf16.msra.mxu1 %v3889_v26 }
 0x108   :  { %v4732_v40 = vadd.f32 %v1795_v36, %v1571_v35  ;;  %v1797_v41 = vpop.f32.mrf.mxu1  ;;  %v3896_v36 = vld [vmem:[%s5942_s0 + $0x128] ss:$28 sps:$4 sm:$0xff]   ;;  %v3899_v38 = vld [vmem:[%s5942_s0 + $0x518] ss:$28 sps:$4 sm:$0xff]  }
 0x109   :  { %v1575_v42 = vpop.f32.mrf.mxu0  ;;  %2024 = vmatmul.mubr.bf16.gmra.mxu0 %v3875_v34 }
 0x10a   :  { %v1576_v43 = vadd.f32 %v4707_v24, %v1575_v42  ;;  %v1800_v44 = vpop.f32.mrf.mxu1  ;;  %2168 = vmatmul.mubr.bf16.gmra.mxu1 %v3876_v37  ;;  %2031 = vmatprep.mubr.bf16.mxu0 %v3877_v0  ;;  %v3905_v42 = vld [vmem:[%s5942_s0 + $0x18] ss:$28 sps:$4 sm:$0xff]  }
 0x10b   :  { %v1577_v45 = vpop.f32.mrf.mxu0  ;;  %2175 = vmatprep.mubr.bf16.mxu1 %v3879_v39  ;;  %v3904_v39 = vld [vmem:[%s5942_s0 + $0x164] ss:$28 sps:$4 sm:$0xff]  }
 0x10c   :  { %v4735_v46 = vadd.f32 %v1800_v44, %v1576_v43  ;;  %v1802_v47 = vpop.f32.mrf.mxu1 }
 0x10d   :  { %v1578_v48 = vpop.f32.mrf.mxu0 }
 0x10e   :  { %v1579_v50 = vadd.f32 %v4707_v24, %v1578_v48  ;;  %v1803_v51 = vpop.f32.mrf.mxu1 }
 0x10f   :  { %v1580_v54 = vpop.f32.mrf.mxu0 }
 0x110   :  { %v4750_v56 = vadd.f32 %v1803_v51, %v1579_v50  ;;  %v1805_v57 = vpop.f32.mrf.mxu1 }
 0x111   :  { %v1583_v58 = vpop.f32.mrf.mxu0  ;;  %2032 = vmatmul.mubr.bf16.gmra.mxu0 %v3881_v49  ;;  %v3906_v57 = vld [vmem:[%s5942_s0 + $0x50] ss:$28 sps:$4 sm:$0xff]  }
 0x112   :  { %v1584_v59 = vadd.f32 %v4707_v24, %v1583_v58  ;;  %v1808_v60 = vpop.f32.mrf.mxu1  ;;  %2176 = vmatmul.mubr.bf16.gmra.mxu1 %v3882_v52  ;;  %2039 = vmatprep.mubr.bf16.mxu0 %v3883_v53  ;;  %v3902_v53 = vld [vmem:[%s5942_s0 + $0x160] ss:$28 sps:$4 sm:$0xff]  }
 0x113   :  { %v1585_v61 = vpop.f32.mrf.mxu0  ;;  %2183 = vmatprep.mubr.bf16.mxu1 %v3885_v55  ;;  %v3909_v58 = vld [vmem:[%s5942_s0 + $0x19c] ss:$28 sps:$4 sm:$0xff]  }
 0x114   :  { %v4753_v62 = vadd.f32 %v1808_v60, %v1584_v59  ;;  %v1810_v63 = vpop.f32.mrf.mxu1  ;;  %v3910_v60 = vld [vmem:[%s5942_s0 + $0x88] ss:$28 sps:$4 sm:$0xff]  }
 0x115   :  { %v1586_v1 = vpop.f32.mrf.mxu0 }
 0x116   :  { %v1587_v3 = vadd.f32 %v4707_v24, %v1586_v1  ;;  %v1811_v4 = vpop.f32.mrf.mxu1 }
 0x117   :  { %v1588_v7 = vpop.f32.mrf.mxu0 }
 0x118   :  { %v4768_v9 = vadd.f32 %v1811_v4, %v1587_v3  ;;  %v1813_v10 = vpop.f32.mrf.mxu1 }
 0x119   :  { %v1591_v11 = vpop.f32.mrf.mxu0  ;;  %2040 = vmatmul.mubr.bf16.gmra.mxu0 %v3887_v2 }
 0x11a   :  { %v1592_v12 = vadd.f32 %v4707_v24, %v1591_v11  ;;  %v1816_v13 = vpop.f32.mrf.mxu1  ;;  %2184 = vmatmul.mubr.bf16.gmra.mxu1 %v3888_v5  ;;  %2047 = vmatprep.mubr.bf16.mxu0 %v3892_v6 }
 0x11b   :  { %v1593_v14 = vpop.f32.mrf.mxu0  ;;  %2191 = vmatprep.mubr.bf16.mxu1 %v3895_v8  ;;  %v3907_v8 = vld [vmem:[%s5942_s0 + $0x198] ss:$28 sps:$4 sm:$0xff]  }
 0x11c   :  { %v4771_v15 = vadd.f32 %v1816_v13, %v1592_v12  ;;  %v1818_v16 = vpop.f32.mrf.mxu1  ;;  %v3911_v12 = vld [vmem:[%s5942_s0 + $0xc0] ss:$28 sps:$4 sm:$0xff]   ;;  %v3914_v13 = vld [vmem:[%s5942_s0 + $0x1d4] ss:$28 sps:$4 sm:$0xff]  }
 0x11d   :  { %v1594_v17 = vpop.f32.mrf.mxu0  ;;  %v3915_v16 = vld [vmem:[%s5942_s0 + $0xf8] ss:$28 sps:$4 sm:$0xff]  }
 0x11e   :  { %v1595_v19 = vadd.f32 %v4707_v24, %v1594_v17  ;;  %v1819_v20 = vpop.f32.mrf.mxu1 }
 0x11f   :  { %v1596_v23 = vpop.f32.mrf.mxu0 }
 0x120   :  { %v4786_v26 = vadd.f32 %v1819_v20, %v1595_v19  ;;  %v1821_v27 = vpop.f32.mrf.mxu1 }
 0x121   :  { %v1599_v28 = vpop.f32.mrf.mxu0  ;;  %2048 = vmatmul.mubr.bf16.gmra.mxu0 %v3890_v18 }
 0x122   :  { %v1600_v29 = vadd.f32 %v4707_v24, %v1599_v28  ;;  %v1824_v30 = vpop.f32.mrf.mxu1  ;;  %2192 = vmatmul.mubr.bf16.gmra.mxu1 %v3893_v21  ;;  %2055 = vmatprep.mubr.bf16.mxu0 %v3898_v22  ;;  %v3912_v28 = vld [vmem:[%s5942_s0 + $0x1d0] ss:$28 sps:$4 sm:$0xff]  }
 0x123   :  { %v1601_v32 = vpop.f32.mrf.mxu0  ;;  %2199 = vmatprep.mubr.bf16.mxu1 %v3901_v25 }
 0x124   :  { %v4789_v33 = vadd.f32 %v1824_v30, %v1600_v29  ;;  %v1826_v34 = vpop.f32.mrf.mxu1  ;;  %v3916_v32 = vld [vmem:[%s5942_s0 + $0x130] ss:$28 sps:$4 sm:$0xff]  }
 0x125   :  { %v1602_v35 = vpop.f32.mrf.mxu0  ;;  %v3919_v34 = vld [vmem:[%s5942_s0 + $0x20c] ss:$28 sps:$4 sm:$0xff]  }
 0x126   :  { %v1603_v37 = vadd.f32 %v4707_v24, %v1602_v35  ;;  %v1827_v0 = vpop.f32.mrf.mxu1 }
 0x127   :  { %v1604_v41 = vpop.f32.mrf.mxu0 }
 0x128   :  { %v4804_v43 = vadd.f32 %v1827_v0, %v1603_v37  ;;  %v1829_v44 = vpop.f32.mrf.mxu1 }
 0x129   :  { %v1607_v45 = vpop.f32.mrf.mxu0  ;;  %2056 = vmatmul.mubr.bf16.gmra.mxu0 %v3896_v36  ;;  %v3920_v36 = vld [vmem:[%s5942_s0 + $0x168] ss:$28 sps:$4 sm:$0xff]  }
 0x12a   :  { %v1608_v47 = vadd.f32 %v4707_v24, %v1607_v45  ;;  %v1832_v48 = vpop.f32.mrf.mxu1  ;;  %2200 = vmatmul.mubr.bf16.gmra.mxu1 %v3899_v38  ;;  %2063 = vmatprep.mubr.bf16.mxu0 %v3904_v39 }
 0x12b   :  { %v1609_v49 = vpop.f32.mrf.mxu0  ;;  %3591 = vmatprep.mubr.msk.bf16.mxu1 %vm1460_vm0, %v3905_v42 }
 0x12c   :  { %v4808_v50 = vadd.f32 %v1832_v48, %v1608_v47  ;;  %v1834_v51 = vpop.f32.mrf.mxu1  ;;  %v3917_v48 = vld [vmem:[%s5942_s0 + $0x208] ss:$28 sps:$4 sm:$0xff]  }
 0x12d   :  { %v1610_v52 = vpop.f32.mrf.mxu0 }
 0x12e   :  { %v1611_v54 = vadd.f32 %v4707_v24, %v1610_v52  ;;  %v1835_v55 = vpop.f32.mrf.mxu1  ;;  %v3921_v52 = vld [vmem:[%s5942_s0 + $0x1a0] ss:$28 sps:$4 sm:$0xff]  }
 0x12f   :  { %v1612_v59 = vpop.f32.mrf.mxu0 }
 0x130   :  { %v4823_v61 = vadd.f32 %v1835_v55, %v1611_v54  ;;  %v1837_v63 = vpop.f32.mrf.mxu1  ;;  %v3925_v55 = vld [vmem:[%s5942_s0 + $0x1d8] ss:$28 sps:$4 sm:$0xff]  }
 0x131   :  { %v1615_v1 = vpop.f32.mrf.mxu0  ;;  %2064 = vmatmul.mubr.bf16.gmra.mxu0 %v3902_v53  ;;  %v3924_v53 = vld [vmem:[%s5942_s0 + $0x244] ss:$28 sps:$4 sm:$0xff]  }
 0x132   :  { %v1616_v2 = vadd.f32 %v4707_v24, %v1615_v1  ;;  %v1840_v3 = vpop.f32.mrf.mxu1  ;;  %3592 = vmatmul.mubr.msk.bf16.vlgmr.msra.gmra.mxu1 %vm1460_vm0, %v3906_v57  ;;  %2071 = vmatprep.mubr.bf16.mxu0 %v3909_v58 }
 0x133   :  { %v1617_v4 = vpop.f32.mrf.mxu0  ;;  %3595 = vmatprep.mubr.msk.bf16.mxu1 %vm1460_vm0, %v3910_v60 }
 0x134   :  { %v4828_v5 = vadd.f32 %v1840_v3, %v1616_v2  ;;  %v1842_v6 = vpop.f32.mrf.mxu1 }
 0x135   :  { %v1618_v7 = vpop.f32.mrf.mxu0  ;;  %v3922_v6 = vld [vmem:[%s5942_s0 + $0x240] ss:$28 sps:$4 sm:$0xff]  }
 0x136   :  { %v1619_v10 = vadd.f32 %v4707_v24, %v1618_v7  ;;  %v1843_v11 = vpop.f32.mrf.mxu1 }
 0x137   :  { %v1620_v14 = vpop.f32.mrf.mxu0 }
 0x138   :  { %v4843_v17 = vadd.f32 %v1843_v11, %v1619_v10  ;;  %v1845_v18 = vpop.f32.mrf.mxu1  ;;  %v3926_v10 = vld [vmem:[%s5942_s0 + $0x210] ss:$28 sps:$4 sm:$0xff]   ;;  %v3929_v11 = vld [vmem:[%s5942_s0 + $0x27c] ss:$28 sps:$4 sm:$0xff]  }
 0x139   :  { %v1623_v19 = vpop.f32.mrf.mxu0  ;;  %2072 = vmatmul.mubr.bf16.gmra.mxu0 %v3907_v8 }
 0x13a   :  { %v1624_v20 = vadd.f32 %v4707_v24, %v1623_v19  ;;  %v1848_v21 = vpop.f32.mrf.mxu1  ;;  %3596 = vmatmul.mubr.msk.bf16.gmra.mxu1 %vm1460_vm0, %v3911_v12  ;;  %2079 = vmatprep.mubr.bf16.mxu0 %v3914_v13  ;;  %v3930_v13 = vld [vmem:[%s5942_s0 + $0x248] ss:$28 sps:$4 sm:$0xff]  }
 0x13b   :  { %v1625_v22 = vpop.f32.mrf.mxu0  ;;  %3599 = vmatprep.mubr.msk.bf16.mxu1 %vm1460_vm0, %v3915_v16 }
 0x13c   :  { %v4848_v23 = vadd.f32 %v1848_v21, %v1624_v20  ;;  %v1850_v25 = vpop.f32.mrf.mxu1 }
 0x13d   :  { %v1626_v27 = vpop.f32.mrf.mxu0 }
 0x13e   :  { %v1627_v29 = vadd.f32 %v4707_v24, %v1626_v27  ;;  %v1851_v30 = vpop.f32.mrf.mxu1 }
 0x13f   :  { %v1628_v35 = vpop.f32.mrf.mxu0 }
 0x140   :  { %v4863_v37 = vadd.f32 %v1851_v30, %v1627_v29  ;;  %v1853_v0 = vpop.f32.mrf.mxu1 }
 0x141   :  { %v1631_v38 = vpop.f32.mrf.mxu0  ;;  %2080 = vmatmul.mubr.bf16.gmra.mxu0 %v3912_v28  ;;  %v3927_v28 = vld [vmem:[%s5942_s0 + $0x278] ss:$28 sps:$4 sm:$0xff]  }
 0x142   :  { %v1632_v39 = vadd.f32 %v4707_v24, %v1631_v38  ;;  %v1856_v41 = vpop.f32.mrf.mxu1  ;;  %3600 = vmatmul.mubr.msk.bf16.gmra.mxu1 %vm1460_vm0, %v3916_v32  ;;  %2087 = vmatprep.mubr.bf16.mxu0 %v3919_v34  ;;  %v3931_v32 = vld [vmem:[%s5942_s0 + $0x280] ss:$28 sps:$4 sm:$0xff]   ;;  %v3934_v34 = vld [vmem:[%s5942_s0 + $0x2b4] ss:$28 sps:$4 sm:$0xff]  }
 0x143   :  { %v1633_v42 = vpop.f32.mrf.mxu0  ;;  %3603 = vmatprep.mubr.msk.bf16.mxu1 %vm1460_vm0, %v3920_v36  ;;  %v3935_v36 = vld [vmem:[%s5942_s0 + $0x2b8] ss:$28 sps:$4 sm:$0xff]  }
 0x144   :  { %v4868_v44 = vadd.f32 %v1856_v41, %v1632_v39  ;;  %v1858_v45 = vpop.f32.mrf.mxu1 }
 0x145   :  { %v1634_v47 = vpop.f32.mrf.mxu0 }
 0x146   :  { %v1635_v49 = vadd.f32 %v4707_v24, %v1634_v47  ;;  %v1859_v51 = vpop.f32.mrf.mxu1 }
 0x147   :  { %v1636_v54 = vpop.f32.mrf.mxu0 }
 0x148   :  { %v4883_v57 = vadd.f32 %v1859_v51, %v1635_v49  ;;  %v1861_v58 = vpop.f32.mrf.mxu1  ;;  %v3932_v51 = vld [vmem:[%s5942_s0 + $0x2b0] ss:$28 sps:$4 sm:$0xff]  }
 0x149   :  { %v1639_v59 = vpop.f32.mrf.mxu0  ;;  %2088 = vmatmul.mubr.bf16.gmra.mxu0 %v3917_v48  ;;  %v3936_v54 = vld [vmem:[%s5942_s0 + $0x2f0] ss:$28 sps:$4 sm:$0xff]  }
 0x14a   :  { %v1640_v60 = vadd.f32 %v4707_v24, %v1639_v59  ;;  %v1864_v63 = vpop.f32.mrf.mxu1  ;;  %3604 = vmatmul.mubr.msk.bf16.gmra.mxu1 %vm1460_vm0, %v3921_v52  ;;  %2095 = vmatprep.mubr.bf16.mxu0 %v3924_v53  ;;  %v3940_v59 = vld [vmem:[%s5942_s0 + $0x328] ss:$28 sps:$4 sm:$0xff]  }
 0x14b   :  { %v1641_v1 = vpop.f32.mrf.mxu0  ;;  %3607 = vmatprep.mubr.msk.bf16.mxu1 %vm1460_vm0, %v3925_v55  ;;  %v3939_v55 = vld [vmem:[%s5942_s0 + $0x2ec] ss:$28 sps:$4 sm:$0xff]  }
 0x14c   :  { %v4888_v2 = vadd.f32 %v1864_v63, %v1640_v60  ;;  %v1866_v3 = vpop.f32.mrf.mxu1 }
 0x14d   :  { %v1642_v4 = vpop.f32.mrf.mxu0 }
 0x14e   :  { %v1643_v7 = vadd.f32 %v4707_v24, %v1642_v4  ;;  %v1867_v8 = vpop.f32.mrf.mxu1 }
 0x14f   :  { %v1644_v12 = vpop.f32.mrf.mxu0 }
 0x150   :  { %v4903_v14 = vadd.f32 %v1867_v8, %v1643_v7  ;;  %v1869_v16 = vpop.f32.mrf.mxu1 }
 0x151   :  { %v1647_v18 = vpop.f32.mrf.mxu0  ;;  %2096 = vmatmul.mubr.bf16.gmra.mxu0 %v3922_v6  ;;  %v3941_v16 = vld [vmem:[%s5942_s0 + $0x360] ss:$28 sps:$4 sm:$0xff]  }
 0x152   :  { %v1648_v19 = vadd.f32 %v4707_v24, %v1647_v18  ;;  %v1872_v20 = vpop.f32.mrf.mxu1  ;;  %3608 = vmatmul.mubr.msk.bf16.gmra.mxu1 %vm1460_vm0, %v3926_v10  ;;  %2103 = vmatprep.mubr.bf16.mxu0 %v3929_v11  ;;  %v3937_v11 = vld [vmem:[%s5942_s0 + $0x2e8] ss:$28 sps:$4 sm:$0xff]  }
 0x153   :  { %v1649_v21 = vpop.f32.mrf.mxu0  ;;  %3611 = vmatprep.mubr.msk.bf16.mxu1 %vm1460_vm0, %v3930_v13  ;;  %v3944_v18 = vld [vmem:[%s5942_s0 + $0x324] ss:$28 sps:$4 sm:$0xff]  }
 0x154   :  { %v4908_v22 = vadd.f32 %v1872_v20, %v1648_v19  ;;  %v1874_v25 = vpop.f32.mrf.mxu1  ;;  %v3945_v20 = vld [vmem:[%s5942_s0 + $0x398] ss:$28 sps:$4 sm:$0xff]  }
 0x155   :  { %v1650_v27 = vpop.f32.mrf.mxu0 }
 0x156   :  { %v1651_v29 = vadd.f32 %v4707_v24, %v1650_v27  ;;  %v1875_v30 = vpop.f32.mrf.mxu1 }
 0x157   :  { %v1652_v35 = vpop.f32.mrf.mxu0 }
 0x158   :  { %v4923_v0 = vadd.f32 %v1875_v30, %v1651_v29  ;;  %v1877_v38 = vpop.f32.mrf.mxu1 }
 0x159   :  { %v1655_v39 = vpop.f32.mrf.mxu0  ;;  %2104 = vmatmul.mubr.bf16.gmra.mxu0 %v3927_v28 }
 0x15a   :  { %v1656_v41 = vadd.f32 %v4707_v24, %v1655_v39  ;;  %v1880_v42 = vpop.f32.mrf.mxu1  ;;  %3612 = vmatmul.mubr.msk.bf16.gmra.mxu1 %vm1460_vm0, %v3931_v32  ;;  %2111 = vmatprep.mubr.bf16.mxu0 %v3934_v34 }
 0x15b   :  { %v1657_v45 = vpop.f32.mrf.mxu0  ;;  %3615 = vmatprep.mubr.msk.bf16.mxu1 %vm1460_vm0, %v3935_v36  ;;  %v3942_v36 = vld [vmem:[%s5942_s0 + $0x320] ss:$28 sps:$4 sm:$0xff]  }
 0x15c   :  { %v4928_v47 = vadd.f32 %v1880_v42, %v1656_v41  ;;  %v1882_v48 = vpop.f32.mrf.mxu1  ;;  %v3946_v41 = vld [vmem:[%s5942_s0 + $0x3d0] ss:$28 sps:$4 sm:$0xff]   ;;  %v3949_v42 = vld [vmem:[%s5942_s0 + $0x35c] ss:$28 sps:$4 sm:$0xff]  }
 0x15d   :  { %v1658_v49 = vpop.f32.mrf.mxu0  ;;  %v3950_v48 = vld [vmem:[%s5942_s0 + $0x408] ss:$28 sps:$4 sm:$0xff]  }
 0x15e   :  { %v1659_v52 = vadd.f32 %v4707_v24, %v1658_v49  ;;  %v1883_v53 = vpop.f32.mrf.mxu1 }
 0x15f   :  { %v1660_v58 = vpop.f32.mrf.mxu0 }
 0x160   :  { %v4943_v60 = vadd.f32 %v1883_v53, %v1659_v52  ;;  %v1885_v63 = vpop.f32.mrf.mxu1 }
 0x161   :  { %v1663_v1 = vpop.f32.mrf.mxu0  ;;  %2112 = vmatmul.mubr.bf16.gmra.mxu0 %v3932_v51 }
 0x162   :  { %v1664_v3 = vadd.f32 %v4707_v24, %v1663_v1  ;;  %v1888_v4 = vpop.f32.mrf.mxu1  ;;  %3616 = vmatmul.mubr.msk.bf16.gmra.mxu1 %vm1460_vm0, %v3936_v54  ;;  %2119 = vmatprep.mubr.bf16.mxu0 %v3939_v55  ;;  %v3947_v1 = vld [vmem:[%s5942_s0 + $0x358] ss:$28 sps:$4 sm:$0xff]  }
 0x163   :  { %v1665_v6 = vpop.f32.mrf.mxu0  ;;  %3619 = vmatprep.mubr.msk.bf16.mxu1 %vm1460_vm0, %v3940_v59 }
 0x164   :  { %v4948_v7 = vadd.f32 %v1888_v4, %v1664_v3  ;;  %v1890_v8 = vpop.f32.mrf.mxu1  ;;  %v3951_v6 = vld [vmem:[%s5942_s0 + $0x440] ss:$28 sps:$4 sm:$0xff]  }
 0x165   :  { %v1666_v10 = vpop.f32.mrf.mxu0  ;;  %v3954_v8 = vld [vmem:[%s5942_s0 + $0x394] ss:$28 sps:$4 sm:$0xff]  }
 0x166   :  { %v1667_v12 = vadd.f32 %v4707_v24, %v1666_v10  ;;  %v1891_v13 = vpop.f32.mrf.mxu1 }
 0x167   :  { %v1668_v19 = vpop.f32.mrf.mxu0 }
 0x168   :  { %v4963_v21 = vadd.f32 %v1891_v13, %v1667_v12  ;;  %v1893_v25 = vpop.f32.mrf.mxu1 }
 0x169   :  { %v1671_v27 = vpop.f32.mrf.mxu0  ;;  %2120 = vmatmul.mubr.bf16.gmra.mxu0 %v3937_v11  ;;  %v3955_v11 = vld [vmem:[%s5942_s0 + $0x478] ss:$28 sps:$4 sm:$0xff]  }
 0x16a   :  { %v1672_v28 = vadd.f32 %v4707_v24, %v1671_v27  ;;  %v1896_v29 = vpop.f32.mrf.mxu1  ;;  %3620 = vmatmul.mubr.msk.bf16.gmra.mxu1 %vm1460_vm0, %v3941_v16  ;;  %2127 = vmatprep.mubr.bf16.mxu0 %v3944_v18 }
 0x16b   :  { %v1673_v30 = vpop.f32.mrf.mxu0  ;;  %3623 = vmatprep.mubr.msk.bf16.mxu1 %vm1460_vm0, %v3945_v20 }
 0x16c   :  { %v4968_v32 = vadd.f32 %v1896_v29, %v1672_v28  ;;  %v1898_v34 = vpop.f32.mrf.mxu1  ;;  %v3952_v29 = vld [vmem:[%s5942_s0 + $0x390] ss:$28 sps:$4 sm:$0xff]  }
 0x16d   :  { %v1674_v35 = vpop.f32.mrf.mxu0 }
 0x16e   :  { %v1675_v38 = vadd.f32 %v4707_v24, %v1674_v35  ;;  %v1899_v39 = vpop.f32.mrf.mxu1  ;;  %v3956_v35 = vld [vmem:[%s5942_s0 + $0x4b0] ss:$28 sps:$4 sm:$0xff]  }
 0x16f   :  { %v1676_v45 = vpop.f32.mrf.mxu0 }
 0x170   :  { %v4983_v49 = vadd.f32 %v1899_v39, %v1675_v38  ;;  %v1901_v51 = vpop.f32.mrf.mxu1  ;;  %v3960_v39 = vld [vmem:[%s5942_s0 + $0x4e8] ss:$28 sps:$4 sm:$0xff]  }
 0x171   :  { %v1679_v52 = vpop.f32.mrf.mxu0  ;;  %2128 = vmatmul.mubr.bf16.gmra.mxu0 %v3942_v36  ;;  %v3959_v36 = vld [vmem:[%s5942_s0 + $0x3cc] ss:$28 sps:$4 sm:$0xff]  }
 0x172   :  { %v1680_v53 = vadd.f32 %v4707_v24, %v1679_v52  ;;  %v1904_v54 = vpop.f32.mrf.mxu1  ;;  %3624 = vmatmul.mubr.msk.bf16.gmra.mxu1 %vm1460_vm0, %v3946_v41  ;;  %2135 = vmatprep.mubr.bf16.mxu0 %v3949_v42 }
 0x173   :  { %v1681_v55 = vpop.f32.mrf.mxu0  ;;  %3627 = vmatprep.mubr.msk.bf16.mxu1 %vm1460_vm0, %v3950_v48 }
 0x174   :  { %v4988_v58 = vadd.f32 %v1904_v54, %v1680_v53  ;;  %v1906_v59 = vpop.f32.mrf.mxu1 }
 0x175   :  { %v1682_v63 = vpop.f32.mrf.mxu0  ;;  %v3957_v59 = vld [vmem:[%s5942_s0 + $0x3c8] ss:$28 sps:$4 sm:$0xff]  }
 0x176   :  { %v1683_v3 = vadd.f32 %v4707_v24, %v1682_v63  ;;  %v1907_v4 = vpop.f32.mrf.mxu1 }
 0x177   :  { %v1684_v10 = vpop.f32.mrf.mxu0 }
 0x178   :  { %v5003_v12 = vadd.f32 %v1907_v4, %v1683_v3  ;;  %v1909_v13 = vpop.f32.mrf.mxu1  ;;  %v3961_v3 = vld [vmem:[%s5942_s0 + $0x520] ss:$28 sps:$4 sm:$0xff]  }
 0x179   :  { %v1687_v16 = vpop.f32.mrf.mxu0  ;;  %2136 = vmatmul.mubr.bf16.gmra.mxu0 %v3947_v1 }
 0x17a   :  { %v1688_v18 = vadd.f32 %v4707_v24, %v1687_v16  ;;  %v1912_v19 = vpop.f32.mrf.mxu1  ;;  %3628 = vmatmul.mubr.msk.bf16.gmra.mxu1 %vm1460_vm0, %v3951_v6  ;;  %2143 = vmatprep.mubr.bf16.mxu0 %v3954_v8 }
 0x17b   :  { %v1689_v20 = vpop.f32.mrf.mxu0  ;;  %3631 = vmatprep.mubr.msk.bf16.mxu1 %vm1460_vm0, %v3955_v11 }
 0x17c   :  { %v5008_v25 = vadd.f32 %v1912_v19, %v1688_v18  ;;  %v1914_v27 = vpop.f32.mrf.mxu1 }
 0x17d   :  { %v1690_v28 = vpop.f32.mrf.mxu0 }
 0x17e   :  { %v1691_v30 = vadd.f32 %v4707_v24, %v1690_v28  ;;  %v1915_v34 = vpop.f32.mrf.mxu1 }
 0x17f   :  { %v1692_v38 = vpop.f32.mrf.mxu0 }
 0x180   :  { %v5023_v41 = vadd.f32 %v1915_v34, %v1691_v30  ;;  %v1917_v42 = vpop.f32.mrf.mxu1 }
 0x181   :  { %v1695_v45 = vpop.f32.mrf.mxu0  ;;  %2144 = vmatmul.mubr.bf16.gmra.mxu0 %v3952_v29 }
 0x182   :  { %v1696_v48 = vadd.f32 %v4707_v24, %v1695_v45  ;;  %v1920_v51 = vpop.f32.mrf.mxu1  ;;  %3632 = vmatmul.mubr.msk.bf16.gmra.mxu1 %vm1460_vm0, %v3956_v35  ;;  %2151 = vmatprep.mubr.bf16.mxu0 %v3959_v36 }
 0x183   :  { %v1697_v52 = vpop.f32.mrf.mxu0  ;;  %3635 = vmatprep.mubr.msk.bf16.mxu1 %vm1460_vm0, %v3960_v39 }
 0x184   :  { %v5028_v53 = vadd.f32 %v1920_v51, %v1696_v48  ;;  %v1922_v54 = vpop.f32.mrf.mxu1 }
 0x185   :  { %v1698_v55 = vpop.f32.mrf.mxu0 }
 0x186   :  { %5947 = vst [vmem:[#allocation2_spill] sm:$0xff] %v5028_v53  ;;  %v1699_v63 = vadd.f32 %v4707_v24, %v1698_v55  ;;  %v1923_v1 = vpop.f32.mrf.mxu1 }
 0x187   :  { %v1700_v4 = vpop.f32.mrf.mxu0 }
 0x188   :  { %v5037_v6 = vadd.f32 %v1923_v1, %v1699_v63  ;;  %v1925_v8 = vpop.f32.mrf.mxu1 }
 0x189   :  { %v1703_v10 = vpop.f32.mrf.mxu0  ;;  %2152 = vmatmul.mubr.bf16.gmra.mxu0 %v3957_v59 }
 0x18a   :  { %5948 = vst [vmem:[#allocation3_spill] sm:$0xff] %v5037_v6  ;;  %v1704_v11 = vadd.f32 %v4707_v24, %v1703_v10  ;;  %v1928_v13 = vpop.f32.mrf.mxu1  ;;  %3636 = vmatmul.mubr.msk.bf16.gmra.mxu1 %vm1460_vm0, %v3961_v3 }
 0x18b   :  { %v1705_v16 = vpop.f32.mrf.mxu0 }
 0x18c   :  { %v5041_v18 = vadd.f32 %v1928_v13, %v1704_v11  ;;  %v1930_v19 = vpop.f32.mrf.mxu1 }
 0x18d   :  { %v1706_v20 = vpop.f32.mrf.mxu0 }
 0x18e   :  { %5949 = vst [vmem:[#allocation4_spill] sm:$0xff] %v5041_v18  ;;  %v1707_v27 = vadd.f32 %v4707_v24, %v1706_v20  ;;  %v1931_v28 = vpop.f32.mrf.mxu1 }
 0x18f   :  { %v1708_v29 = vpop.f32.mrf.mxu0 }
 0x190   :  { %v5044_v30 = vadd.f32 %v1931_v28, %v1707_v27  ;;  %v1933_v34 = vpop.f32.mrf.mxu1 }
 0x191   :  { %v1711_v35 = vpop.f32.mrf.mxu0 }
 0x192   :  { %5950 = vst [vmem:[#allocation5_spill] sm:$0xff] %v5044_v30  ;;  %v1712_v36 = vadd.f32 %v4707_v24, %v1711_v35  ;;  %v1936_v38 = vpop.f32.mrf.mxu1 }
 0x193   :  { %v1713_v39 = vpop.f32.mrf.mxu0 }
 0x194   :  { %v5047_v42 = vadd.f32 %v1936_v38, %v1712_v36  ;;  %v1938_v45 = vpop.f32.mrf.mxu1 }
 0x195   :  { %v1714_v48 = vpop.f32.mrf.mxu0 }
 0x196   :  { %v1715_v51 = vadd.f32 %v4707_v24, %v1714_v48  ;;  %v1939_v52 = vpop.f32.mrf.mxu1 }
 0x197   :  { %v1716_v54 = vpop.f32.mrf.mxu0 }
 0x198   :  { %v5050_v55 = vadd.f32 %v1939_v52, %v1715_v51  ;;  %v1941_v59 = vpop.f32.mrf.mxu1 }
 0x199   :  { %v1719_v63 = vpop.f32.mrf.mxu0 }
 0x19a   :  { %v1720_v1 = vadd.f32 %v4707_v24, %v1719_v63  ;;  %v1944_v3 = vpop.f32.mrf.mxu1 }
 0x19b   :  { %v1721_v4 = vpop.f32.mrf.mxu0 }
 0x19c   :  { %v5053_v8 = vadd.f32 %v1944_v3, %v1720_v1  ;;  %v1946_v10 = vpop.f32.mrf.mxu1 }
 0x19d   :  { %v1722_v11 = vpop.f32.mrf.mxu0 }
 0x19e   :  { %v1723_v13 = vadd.f32 %v4707_v24, %v1722_v11  ;;  %v1947_v16 = vpop.f32.mrf.mxu1 }
 0x19f   :  { %v1724_v19 = vpop.f32.mrf.mxu0 }
 0x1a0   :  { %v5056_v20 = vadd.f32 %v1947_v16, %v1723_v13  ;;  %v1949_v27 = vpop.f32.mrf.mxu1 }
 0x1a1   :  { %v1727_v28 = vpop.f32.mrf.mxu0 }
 0x1a2   :  { %v1728_v29 = vadd.f32 %v4707_v24, %v1727_v28  ;;  %v1952_v34 = vpop.f32.mrf.mxu1 }
 0x1a3   :  { %v1729_v35 = vpop.f32.mrf.mxu0 }
 0x1a4   :  { %v5059_v36 = vadd.f32 %v1952_v34, %v1728_v29  ;;  %v1954_v38 = vpop.f32.mrf.mxu1 }
 0x1a5   :  { %v1730_v39 = vpop.f32.mrf.mxu0 }
 0x1a6   :  { %v1731_v45 = vadd.f32 %v4707_v24, %v1730_v39  ;;  %v1955_v48 = vpop.f32.mrf.mxu1 }
 0x1a7   :  { %v1732_v51 = vpop.f32.mrf.mxu0 }
 0x1a8   :  { %v5062_v52 = vadd.f32 %v1955_v48, %v1731_v45  ;;  %v1957_v54 = vpop.f32.mrf.mxu1 }
 0x1a9   :  { %v1735_v59 = vpop.f32.mrf.mxu0 }
 0x1aa   :  { %v1736_v63 = vadd.f32 %v4707_v24, %v1735_v59  ;;  %v1960_v1 = vpop.f32.mrf.mxu1 }
 0x1ab   :  { %v1737_v3 = vpop.f32.mrf.mxu0 }
 0x1ac   :  { %v5065_v4 = vadd.f32 %v1960_v1, %v1736_v63  ;;  %v1962_v10 = vpop.f32.mrf.mxu1 }
 0x1ad   :  { %v1738_v11 = vpop.f32.mrf.mxu0 }
 0x1ae   :  { %v1739_v13 = vadd.f32 %v4707_v24, %v1738_v11  ;;  %v1963_v16 = vpop.f32.mrf.mxu1 }
 0x1af   :  { %v1740_v19 = vpop.f32.mrf.mxu0 }
 0x1b0   :  { %v5068_v27 = vadd.f32 %v1963_v16, %v1739_v13  ;;  %v1965_v28 = vpop.f32.mrf.mxu1 }
 0x1b1   :  { %v1743_v29 = vpop.f32.mrf.mxu0 }
 0x1b2   :  { %v1744_v34 = vadd.f32 %v4707_v24, %v1743_v29  ;;  %v1968_v35 = vpop.f32.mrf.mxu1 }
 0x1b3   :  { %v1745_v38 = vpop.f32.mrf.mxu0 }
 0x1b4   :  { %v1969_v39 = vadd.f32 %v1968_v35, %v1744_v34  ;;  %v1970_v45 = vpop.f32.mrf.mxu1 }
 0x1b5   :  { %v1746_v48 = vpop.f32.mrf.mxu0 }
 0x1b6   :  { %v1747_v51 = vadd.f32 %v4707_v24, %v1746_v48  ;;  %v1971_v54 = vpop.f32.mrf.mxu1 }
 0x1b7   :  { %v1748_v59 = vpop.f32.mrf.mxu0 }
 0x1b8   :  { %v1972_v63 = vadd.f32 %v1971_v54, %v1747_v51  ;;  %v1973_v1 = vpop.f32.mrf.mxu1 }
 0x1b9   :  { %v1751_v3 = vpop.f32.mrf.mxu0 }
 0x1ba   :  { %v1752_v10 = vadd.f32 %v4707_v24, %v1751_v3  ;;  %v1976_v11 = vpop.f32.mrf.mxu1 }
 0x1bb   :  { %v1753_v13 = vpop.f32.mrf.mxu0 }
 0x1bc   :  { %v1977_v16 = vadd.f32 %v1976_v11, %v1752_v10  ;;  %v1978_v19 = vpop.f32.mrf.mxu1 }
 0x1bd   :  { %v1754_v28 = vpop.f32.mrf.mxu0 }
 0x1be   :  { %v1755_v29 = vadd.f32 %v4707_v24, %v1754_v28  ;;  %v1979_v38 = vpop.f32.mrf.mxu1 }
 0x1bf   :  { %v1756_v34 = vpop.f32.mrf.mxu0 }
 0x1c0   :  { %v1980_v35 = vadd.f32 %v1979_v38, %v1755_v29  ;;  %v1981_v45 = vpop.f32.mrf.mxu1 }
 0x1c1   :  { %v5074_v30 = vpop.f32.mrf.mxu0 }
 0x1c2   :  { %v2161_v48 = vpop.f32.mrf.mxu1 }
 0x1c3   :  { %v5077_v51 = vadd.f32 %v2161_v48, %v5047_v42  ;;  %v2019_v54 = vpop.f32.mrf.mxu0 }
 0x1c4   :  { %v2163_v59 = vpop.f32.mrf.mxu1 }
 0x1c5   :  { %v5079_v1 = vpop.f32.mrf.mxu0 }
 0x1c6   :  { %v2164_v3 = vpop.f32.mrf.mxu1 }
 0x1c7   :  { %v5082_v10 = vadd.f32 %v2164_v3, %v5050_v55  ;;  %v2022_v11 = vpop.f32.mrf.mxu0 }
 0x1c8   :  { %v2166_v24 = vpop.f32.mrf.mxu1 }
 0x1c9   :  { %5951 = vst [vmem:[#allocation6_spill] sm:$0xff] %v5082_v10  ;;  %v2025_v13 = vpop.f32.mrf.mxu0 }
 0x1ca   :  { %v2169_v19 = vpop.f32.mrf.mxu1 }
 0x1cb   :  { %v5085_v28 = vadd.f32 %v2169_v19, %v5053_v8  ;;  %v2027_v29 = vpop.f32.mrf.mxu0 }
 0x1cc   :  { %v2171_v38 = vpop.f32.mrf.mxu1 }
 0x1cd   :  { %v2028_v34 = vpop.f32.mrf.mxu0 }
 0x1ce   :  { %v2172_v42 = vpop.f32.mrf.mxu1 }
 0x1cf   :  { %v5088_v45 = vadd.f32 %v2172_v42, %v5056_v20  ;;  %v2030_v48 = vpop.f32.mrf.mxu0 }
 0x1d0   :  { %v2174_v54 = vpop.f32.mrf.mxu1 }
 0x1d1   :  { %v5090_v59 = vpop.f32.mrf.mxu0 }
 0x1d2   :  { %v2177_v55 = vpop.f32.mrf.mxu1 }
 0x1d3   :  { %v5093_v3 = vadd.f32 %v2177_v55, %v5059_v36  ;;  %v2035_v11 = vpop.f32.mrf.mxu0 }
 0x1d4   :  { %v2179_v24 = vpop.f32.mrf.mxu1 }
 0x1d5   :  { %5952 = vst [vmem:[#allocation7_spill] sm:$0xff] %v5093_v3  ;;  %v5095_v18 = vpop.f32.mrf.mxu0 }
 0x1d6   :  { %v2180_v8 = vpop.f32.mrf.mxu1 }
 0x1d7   :  { %v5098_v19 = vadd.f32 %v2180_v8, %v5062_v52  ;;  %v2038_v29 = vpop.f32.mrf.mxu0 }
 0x1d8   :  { %v2182_v38 = vpop.f32.mrf.mxu1 }
 0x1d9   :  { %5953 = vst [vmem:[#allocation8_spill] sm:$0xff] %v5098_v19  ;;  %v2041_v20 = vpop.f32.mrf.mxu0 }
 0x1da   :  { %v2185_v42 = vpop.f32.mrf.mxu1 }
 0x1db   :  { %v5101_v48 = vadd.f32 %v2185_v42, %v5065_v4  ;;  %v2043_v54 = vpop.f32.mrf.mxu0 }
 0x1dc   :  { %v2187_v6 = vpop.f32.mrf.mxu1 }
 0x1dd   :  { %5954 = vst [vmem:[#allocation9_spill] sm:$0xff] %v5101_v48  ;;  %v2044_v53 = vpop.f32.mrf.mxu0 }
 0x1de   :  { %v2188_v36 = vpop.f32.mrf.mxu1 }
 0x1df   :  { %v5104_v55 = vadd.f32 %v2188_v36, %v5068_v27  ;;  %v2046_v11 = vpop.f32.mrf.mxu0 }
 0x1e0   :  { %v2190_v24 = vpop.f32.mrf.mxu1 }
 0x1e1   :  { %5955 = vst [vmem:[#allocation10_spill] sm:$0xff] %v5104_v55  ;;  %v5106_v3 = vpop.f32.mrf.mxu0 }
 0x1e2   :  { %v2193_v52 = vpop.f32.mrf.mxu1 }
 0x1e3   :  { %v5108_v8 = vadd.f32 %v2193_v52, %v1969_v39  ;;  %v2051_v29 = vpop.f32.mrf.mxu0 }
 0x1e4   :  { %v2195_v38 = vpop.f32.mrf.mxu1 }
 0x1e5   :  { %5956 = vst [vmem:[#allocation11_spill] sm:$0xff] %v5108_v8  ;;  %v5110_v19 = vpop.f32.mrf.mxu0  ;;  %v2026_v8 = vadd.f32 %v2025_v13, %v4735_v46  ;;  %v2021_v46 = vadd.f32 %v5079_v1, %v4732_v40 }
 0x1e6   :  { %v2196_v4 = vpop.f32.mrf.mxu1 }
 0x1e7   :  { %v5112_v42 = vadd.f32 %v2196_v4, %v1972_v63  ;;  %v2054_v6 = vpop.f32.mrf.mxu0 }
 0x1e8   :  { %v2198_v54 = vpop.f32.mrf.mxu1  ;;  %v2018_v6 = vadd.f32 %v5074_v30, %v4717_v31 }
 0x1e9   :  { %5957 = vst [vmem:[#allocation12_spill] sm:$0xff] %v5112_v42  ;;  %v5114_v48 = vpop.f32.mrf.mxu0 }
 0x1ea   :  { %v2201_v27 = vpop.f32.mrf.mxu1 }
 0x1eb   :  { %v5116_v36 = vadd.f32 %v2201_v27, %v1977_v16  ;;  %v2059_v11 = vpop.f32.mrf.mxu0 }
 0x1ec   :  { %v2203_v24 = vpop.f32.mrf.mxu1 }
 0x1ed   :  { %5958 = vst [vmem:[#allocation13_spill] sm:$0xff] %v5116_v36  ;;  %v5118_v55 = vpop.f32.mrf.mxu0 }
 0x1ee   :  { %v2204_v39 = vpop.f32.mrf.mxu1 }
 0x1ef   :  { %v5120_v52 = vadd.f32 %v2204_v39, %v1980_v35  ;;  %v2062_v29 = vpop.f32.mrf.mxu0  ;;  %v2029_v39 = vadd.f32 %v2028_v34, %v4750_v56 }
 0x1f0   :  { %v2206_v38 = vpop.f32.mrf.mxu1 }
 0x1f1   :  { %5959 = vst [vmem:[#allocation14_spill] sm:$0xff] %v5120_v52  ;;  %v5123_v63 = vpop.f32.mrf.mxu0 }
 0x1f2   :  { %v3593_v4 = vpop.f32.mrf.mxu1 }
 0x1f3   :  { %v5127_v54 = vadd.f32 %v3593_v4, %v2026_v8  ;;  %v2067_v16 = vpop.f32.mrf.mxu0 }
 0x1f4   :  { %v2242_v27 = vpop.f32.mrf.mxu1  ;;  %v2042_v16 = vadd.f32 %v2041_v20, %v4771_v15 }
 0x1f5   :  { %v2435_v11 = vmin.f32 %v5127_v54, 0.0  ;;  %v5130_v24 = vadd.f32 %v2242_v27, %v2018_v6  ;;  %v5132_v35 = vpop.f32.mrf.mxu0  ;;  %vm2771_vm1 = vcmp.gt.f32.partialorder %v5127_v54, 0.0 }
 0x1f6   :  { %v3594_v29 = vpop.f32.mrf.mxu1 }
 0x1f7   :  { %v2483_v13 = vmul.f32 0.5, %v2435_v11  ;;  %v2581_v38 = vmul.f32 1.442695, %v2435_v11  ;;  %v2433_v31 = vmin.f32 %v5130_v24, 0.0  ;;  %v2070_v30 = vpop.f32.mrf.mxu0  ;;  %v5138_v8 = vadd.f32 %v3594_v29, %v2029_v39 }
 0x1f8   :  { %v2245_v4 = vpop.f32.mrf.mxu1  ;;  %v2034_v29 = vadd.f32 %v5090_v59, %v4753_v62  ;;  %v2045_v30 = vadd.f32 %v2044_v53, %v4786_v26  ;;  %v2050_v26 = vadd.f32 %v5106_v3, %v4789_v33  ;;  %vm2769_vm2 = vcmp.gt.f32.partialorder %v5130_v24, 0.0 }
 0x1f9   :  { %v2577_v6 = vmul.f32 1.442695, %v2433_v31  ;;  %v5141_v27 = vadd.f32 %v2245_v4, %v2021_v46  ;;  %v5143_v42 = vpop.f32.mrf.mxu0  ;;  %3962 = vpow2.f32 %v2581_v38  ;;  %v2481_v56 = vmul.f32 0.5, %v2433_v31 }
 0x1fa   :  { %v2436_v34 = vmin.f32 %v5138_v8, 0.0  ;;  %v3597_v40 = vpop.f32.mrf.mxu1  ;;  %3964 = vtanh.f32 %v2483_v13  ;;  %vm2772_vm4 = vcmp.gt.f32.partialorder %v5138_v8, 0.0 }
 0x1fb   :  { %v2434_v1 = vmin.f32 %v5141_v27, 0.0  ;;  %v5147_v11 = vadd.f32 %v3597_v40, %v2042_v16  ;;  %v2075_v39 = vpop.f32.mrf.mxu0  ;;  %3966 = vpow2.f32 %v2577_v6  ;;  %v2037_v40 = vadd.f32 %v5095_v18, %v4768_v9 }
 0x1fc   :  { %v2484_v15 = vmul.f32 0.5, %v2436_v34  ;;  %v2583_v20 = vmul.f32 1.442695, %v2436_v34  ;;  %v2258_v46 = vpop.f32.mrf.mxu1  ;;  %3968 = vtanh.f32 %v2481_v56  ;;  %vm2770_vm5 = vcmp.gt.f32.partialorder %v5141_v27, 0.0 }
 0x1fd   :  { %v2579_v38 = vmul.f32 1.442695, %v2434_v1  ;;  %v2439_v31 = vmin.f32 %v5147_v11, 0.0  ;;  %v5153_v4 = vpop.f32.mrf.mxu0  ;;  %v2482_v13 = vmul.f32 0.5, %v2434_v1  ;;  %v5155_v52 = vadd.f32 %v2258_v46, %v2034_v29 }
 0x1fe   :  { %v3598_v16 = vpop.f32.mrf.mxu1  ;;  %3970 = vpow2.f32 %v2583_v20  ;;  %v5166_v1 = vadd.f32 %v5110_v19, %v4804_v43  ;;  %v2058_v29 = vadd.f32 %v5114_v48, %v4808_v50  ;;  %v2061_v20 = vadd.f32 %v5118_v55, %v4823_v61 }
 0x1ff   :  { %v2589_v62 = vmul.f32 1.442695, %v2439_v31  ;;  %v5159_v59 = vadd.f32 %v3598_v16, %v2045_v30  ;;  %v2078_v6 = vpop.f32.mrf.mxu0  ;;  %3972 = vtanh.f32 %v2484_v15  ;;  %v2487_v53 = vmul.f32 0.5, %v2439_v31 }
 0x200   :  { %v2437_v34 = vmin.f32 %v5155_v52, 0.0  ;;  %v2261_v56 = vpop.f32.mrf.mxu1  ;;  %3974 = vpow2.f32 %v2579_v38  ;;  %v5178_v30 = vadd.f32 %v5123_v63, %v4828_v5  ;;  %v5189_v55 = vadd.f32 %v5132_v35, %v4843_v17 }
 0x201   :  { %v2440_v9 = vmin.f32 %v5159_v59, 0.0  ;;  %v5169_v18 = vadd.f32 %v2261_v56, %v2037_v40  ;;  %v2081_v39 = vpop.f32.mrf.mxu0  ;;  %3976 = vtanh.f32 %v2482_v13  ;;  %vm2775_vm6 = vcmp.gt.f32.partialorder %v5147_v11, 0.0 }
 0x202   :  { %v2485_v33 = vmul.f32 0.5, %v2437_v34  ;;  %v2585_v3 = vmul.f32 1.442695, %v2437_v34  ;;  %v3601_v15 = vpop.f32.mrf.mxu1  ;;  %3978 = vpow2.f32 %v2589_v62  ;;  %vm2773_vm7 = vcmp.gt.f32.partialorder %v5155_v52, 0.0 }
 0x203   :  { %v2591_v46 = vmul.f32 1.442695, %v2440_v9  ;;  %v2438_v43 = vmin.f32 %v5169_v18, 0.0  ;;  %v2083_v19 = vpop.f32.mrf.mxu0  ;;  %3980 = vtanh.f32 %v2487_v53  ;;  %v2488_v38 = vmul.f32 0.5, %v2440_v9 }
 0x204   :  { %v5180_v31 = vadd.f32 %v3601_v15, %v2058_v29  ;;  %v2274_v50 = vpop.f32.mrf.mxu1  ;;  %3982 = vpow2.f32 %v2585_v3  ;;  %v2074_v29 = vadd.f32 %v5143_v42, %v4848_v23  ;;  %v5210_v23 = vadd.f32 %v5153_v4, %v4863_v37 }
 0x205   :  { %v2587_v48 = vmul.f32 1.442695, %v2438_v43  ;;  %v5183_v13 = vadd.f32 %v2274_v50, %v2050_v26  ;;  %v5185_v61 = vpop.f32.mrf.mxu0  ;;  %3984 = vtanh.f32 %v2485_v33  ;;  %v2486_v5 = vmul.f32 0.5, %v2438_v43 }
 0x206   :  { %v2443_v63 = vmin.f32 %v5180_v31, 0.0  ;;  %v3602_v16 = vpop.f32.mrf.mxu1  ;;  %v3963_v40 = vpop.eup %3962  ;;  %3986 = vpow2.f32 %v2591_v46  ;;  %v5205_v46 = vld [vmem:[%s5944_s3] ss:$0 sm:$0xff]  ;;  %v5213_v42 = vadd.f32 %v2081_v39, %v4868_v44  ;;  %vm2776_vm8 = vcmp.gt.f32.partialorder %v5159_v59, 0.0 }
 0x207   :  { %v2441_v62 = vmin.f32 %v5183_v13, 0.0  ;;  %v5194_v6 = vadd.f32 %v3602_v16, %v2061_v20  ;;  %v2086_v26 = vpop.f32.mrf.mxu0  ;;  %v3965_v53 = vpop.eup %3964  ;;  %v2675_v34 = vadd.f32 1.0, %v3963_v40  ;;  %3988 = vtanh.f32 %v2488_v38  ;;  %v5224_v40 = vld [vmem:[%s5945_s4] ss:$0 sm:$0xff] }
 0x208   :  { %v2491_v17 = vmul.f32 0.5, %v2443_v63  ;;  %v2597_v35 = vmul.f32 1.442695, %v2443_v63  ;;  %v2277_v56 = vpop.f32.mrf.mxu1  ;;  %v3967_v9 = vpop.eup %3966  ;;  %3990 = vpow2.f32 %v2587_v48  ;;  %vm2774_vm9 = vcmp.gt.f32.partialorder %v5169_v18, 0.0 }
 0x209   :  { %v2593_v33 = vmul.f32 1.442695, %v2441_v62  ;;  %v2444_v3 = vmin.f32 %v5194_v6, 0.0  ;;  %v5200_v15 = vpop.f32.mrf.mxu0  ;;  %v2723_v20 = vmul.f32 %v3965_v53, %v2675_v34  ;;  %v2673_v43 = vadd.f32 1.0, %v3967_v9  ;;  %v3969_v50 = vpop.eup %3968 }
 0x20a   :  { %3992 = vtanh.f32 %v2486_v5  ;;  %v2489_v19 = vmul.f32 0.5, %v2441_v62  ;;  %v3605_v38 = vpop.f32.mrf.mxu1  ;;  %v5216_v48 = vadd.f32 %v2277_v56, %v5166_v1  ;;  %vm2779_vm10 = vcmp.gt.f32.partialorder %v5180_v31, 0.0 }
 0x20b   :  { %3994 = vpow2.f32 %v2597_v35  ;;  %v2091_v63 = vpop.f32.mrf.mxu0  ;;  %v3971_v16 = vpop.eup %3970  ;;  %v2819_v5 = vsel %vm2771_vm1, %v5127_v54, %v2723_v20  ;;  %v2721_v37 = vmul.f32 %v3969_v50, %v2673_v43  ;;  %v2599_v4 = vmul.f32 1.442695, %v2444_v3 }
 0x20c   :  { %3996 = vtanh.f32 %v2491_v17  ;;  %v5226_v44 = vpop.f32.mrf.mxu1  ;;  %v3973_v39 = vpop.eup %3972  ;;  %v2874_v1 = vmul.f32 %v5205_v46, %v2819_v5  ;;  %v2676_v62 = vadd.f32 1.0, %v3971_v16  ;;  %v2442_v26 = vmin.f32 %v5216_v48, 0.0 }
 0x20d   :  { %3998 = vpow2.f32 %v2593_v33  ;;  %v5231_v54 = vpop.f32.mrf.mxu0  ;;  %v3975_v53 = vpop.eup %3974  ;;  %v2817_v34 = vsel %vm2769_vm2, %v5130_v24, %v2721_v37  ;;  %v2492_v17 = vmul.f32 0.5, %v2444_v3  ;;  %v5237_v35 = vadd.f32 %v3605_v38, %v2074_v29 }
 0x20e   :  { %4000 = vtanh.f32 %v2489_v19  ;;  %v5239_v56 = vpop.f32.mrf.mxu1  ;;  %v3977_v9 = vpop.eup %3976  ;;  %v2929_v33 = vadd.f32 %v5224_v40, %v2874_v1  ;;  %v2872_v20 = vmul.f32 %v5205_v46, %v2817_v34  ;;  %v2724_v43 = vmul.f32 %v3973_v39, %v2676_v62 }
 0x20f   :  { %v2674_v50 = vadd.f32 1.0, %v3975_v53  ;;  %v2094_v63 = vpop.f32.mrf.mxu0  ;;  %v3979_v16 = vpop.eup %3978  ;;  %4002 = vpow2.f32 %v2599_v4  ;;  %v2490_v24 = vmul.f32 0.5, %v2442_v26  ;;  %v2595_v5 = vmul.f32 1.442695, %v2442_v26 }
 0x210   :  { %v2447_v3 = vmin.f32 %v5237_v35, 0.0  ;;  %v5245_v29 = vpop.f32.mrf.mxu1  ;;  %v3981_v19 = vpop.eup %3980  ;;  %v3515_v38 = vpack.c.bf16 %v2929_v33, %v2929_v33  ;;  %v2927_v37 = vadd.f32 %v5224_v40, %v2872_v20  ;;  %v2820_v39 = vsel %vm2772_vm4, %v5138_v8, %v2724_v43 }
 0x211   :  { %v2722_v1 = vmul.f32 %v3977_v9, %v2674_v50  ;;  %v5251_v62 = vpop.f32.mrf.mxu0  ;;  %v3983_v53 = vpop.eup %3982  ;;  %v2875_v4 = vmul.f32 %v5205_v46, %v2820_v39  ;;  %v2679_v34 = vadd.f32 1.0, %v3979_v16  ;;  %4004 = vtanh.f32 %v2492_v17 }
 0x212   :  { %v2495_v26 = vmul.f32 0.5, %v2447_v3  ;;  %v5255_v63 = vpop.f32.mrf.mxu1  ;;  %v3985_v33 = vpop.eup %3984  ;;  %3170 = vst.msk [vmem:[%s5946_s5 + $0x8] sm:$0xf] %vm3167_vm3, %v3515_v38  ;;  %v3513_v8 = vpack.c.bf16 %v2927_v37, %v2927_v37  ;;  %v2677_v20 = vadd.f32 1.0, %v3983_v53  ;;  %4006 = vpow2.f32 %v2595_v5 }
 0x213   :  { %v2818_v9 = vsel %vm2770_vm5, %v5141_v27, %v2722_v1  ;;  %v2099_v43 = vpop.f32.mrf.mxu0  ;;  %v3987_v50 = vpop.eup %3986  ;;  %v2930_v17 = vadd.f32 %v5224_v40, %v2875_v4  ;;  %v2727_v39 = vmul.f32 %v3981_v19, %v2679_v34  ;;  %4008 = vtanh.f32 %v2490_v24 }
 0x214   :  { %v2873_v16 = vmul.f32 %v5205_v46, %v2818_v9  ;;  %v5266_v36 = vpop.f32.mrf.mxu1  ;;  %v3989_v10 = vpop.eup %3988  ;;  %3168 = vst.msk [vmem:[%s5946_s5] sm:$0xf] %vm3167_vm3, %v3513_v8  ;;  %v2725_v38 = vmul.f32 %v3985_v33, %v2677_v20  ;;  %v2680_v27 = vadd.f32 1.0, %v3987_v50  ;;  %4010 = vtanh.f32 %v2495_v26 }
 0x215   :  { %v2605_v5 = vmul.f32 1.442695, %v2447_v3  ;;  %v5272_v37 = vpop.f32.mrf.mxu0  ;;  %v3991_v1 = vpop.eup %3990  ;;  %v3516_v53 = vpack.c.bf16 %v2930_v17, %v2930_v17  ;;  %v2823_v24 = vsel %vm2775_vm6, %v5147_v11, %v2727_v39  ;;  %v5280_v19 = vadd.f32 %v5226_v44, %v5178_v30 }
 0x216   :  { %v2928_v4 = vadd.f32 %v5224_v40, %v2873_v16  ;;  %v5282_v34 = vpop.f32.mrf.mxu1  ;;  %v2878_v26 = vmul.f32 %v5205_v46, %v2823_v24  ;;  %v2821_v3 = vsel %vm2773_vm7, %v5155_v52, %v2725_v38  ;;  %v2728_v8 = vmul.f32 %v3989_v10, %v2680_v27 }
 0x217   :  { %v3993_v33 = vpop.eup %3992  ;;  %v2678_v9 = vadd.f32 1.0, %v3991_v1  ;;  %v2102_v20 = vpop.f32.mrf.mxu0  ;;  %3171 = vst.msk [vmem:[%s5946_s5 + $0xc] sm:$0xf] %vm3167_vm3, %v3516_v53  ;;  %v2876_v30 = vmul.f32 %v5205_v46, %v2821_v3  ;;  %4012 = vpow2.f32 %v2605_v5  ;;  %v2445_v44 = vmin.f32 %v5280_v19, 0.0 }
 0x218   :  { %v3995_v43 = vpop.eup %3994  ;;  %v3514_v11 = vpack.c.bf16 %v2928_v4, %v2928_v4  ;;  %v5294_v50 = vpop.f32.mrf.mxu1  ;;  %v2933_v52 = vadd.f32 %v5224_v40, %v2878_v26  ;;  %v2824_v10 = vsel %vm2776_vm8, %v5159_v59, %v2728_v8  ;;  %vm2777_vm11 = vcmp.gt.f32.partialorder %v5183_v13, 0.0 }
 0x219   :  { %v3997_v17 = vpop.eup %3996  ;;  %v2726_v16 = vmul.f32 %v3993_v33, %v2678_v9  ;;  %v2683_v39 = vadd.f32 1.0, %v3995_v43  ;;  %v5300_v38 = vpop.f32.mrf.mxu0  ;;  %v2931_v5 = vadd.f32 %v5224_v40, %v2876_v30  ;;  %v2879_v1 = vmul.f32 %v5205_v46, %v2824_v10 }
 0x21a   :  { %v3999_v27 = vpop.eup %3998  ;;  %3169 = vst.msk [vmem:[%s5946_s5 + $0x4] sm:$0xf] %vm3167_vm3, %v3514_v11  ;;  %v2493_v53 = vmul.f32 0.5, %v2445_v44  ;;  %v2601_v4 = vmul.f32 1.442695, %v2445_v44  ;;  %v5308_v24 = vpop.f32.mrf.mxu1  ;;  %v3519_v59 = vpack.c.bf16 %v2933_v52, %v2933_v52  ;;  %vm2780_vm12 = vcmp.gt.f32.partialorder %v5194_v6, 0.0 }
 0x21b   :  { %v4001_v26 = vpop.eup %4000  ;;  %v2822_v33 = vsel %vm2774_vm9, %v5169_v18, %v2726_v16  ;;  %v2731_v3 = vmul.f32 %v3997_v17, %v2683_v39  ;;  %v2681_v8 = vadd.f32 1.0, %v3999_v27  ;;  %v2107_v9 = vpop.f32.mrf.mxu0  ;;  %v3517_v20 = vpack.c.bf16 %v2931_v5, %v2931_v5 }
 0x21c   :  { %v2934_v43 = vadd.f32 %v5224_v40, %v2879_v1  ;;  %v2877_v11 = vmul.f32 %v5205_v46, %v2822_v33  ;;  %v5316_v30 = vpop.f32.mrf.mxu1  ;;  %v4003_v44 = vpop.eup %4002  ;;  %3174 = vst.msk [vmem:[%s5946_s5 + $0x18] sm:$0xf] %vm3167_vm3, %v3519_v59  ;;  %4014 = vpow2.f32 %v2601_v4  ;;  %v5337_v4 = vadd.f32 %v5239_v56, %v5210_v23 }
 0x21d   :  { %v2827_v18 = vsel %vm2779_vm10, %v5180_v31, %v2731_v3  ;;  %v2729_v17 = vmul.f32 %v4001_v26, %v2681_v8  ;;  %v5324_v52 = vpop.f32.mrf.mxu0  ;;  %3172 = vst.msk [vmem:[%s5946_s5 + $0x10] sm:$0xf] %vm3167_vm3, %v3517_v20  ;;  %v2684_v27 = vadd.f32 1.0, %v4003_v44  ;;  %4016 = vtanh.f32 %v2493_v53 }
 0x21e   :  { %v3520_v10 = vpack.c.bf16 %v2934_v43, %v2934_v43  ;;  %v2932_v16 = vadd.f32 %v5224_v40, %v2877_v11  ;;  %v2882_v39 = vmul.f32 %v5205_v46, %v2827_v18  ;;  %v5332_v5 = vpop.f32.mrf.mxu1  ;;  %v4005_v31 = vpop.eup %4004  ;;  %v5341_v26 = vadd.f32 %v5245_v29, %v5189_v55 }
 0x21f   :  { %v2825_v1 = vsel %vm2777_vm11, %v5183_v13, %v2729_v17  ;;  %v2110_v59 = vpop.f32.mrf.mxu0  ;;  %v4007_v33 = vpop.eup %4006  ;;  %v2732_v53 = vmul.f32 %v4005_v31, %v2684_v27  ;;  %v2448_v56 = vmin.f32 %v5337_v4, 0.0  ;;  %v2090_v17 = vadd.f32 %v5200_v15, %v4888_v2 }
 0x220   :  { %3175 = vst.msk [vmem:[%s5946_s5 + $0x1c] sm:$0xf] %vm3167_vm3, %v3520_v10  ;;  %v3518_v3 = vpack.c.bf16 %v2932_v16, %v2932_v16  ;;  %v2937_v8 = vadd.f32 %v5224_v40, %v2882_v39  ;;  %v2880_v13 = vmul.f32 %v5205_v46, %v2825_v1  ;;  %v5349_v9 = vpop.f32.mrf.mxu1  ;;  %v4009_v23 = vpop.eup %4008  ;;  %v2682_v55 = vadd.f32 1.0, %v4007_v33 }
 0x221   :  { %v2446_v29 = vmin.f32 %v5341_v26, 0.0  ;;  %v5354_v20 = vpop.f32.mrf.mxu0  ;;  %v4011_v43 = vpop.eup %4010  ;;  %v2828_v18 = vsel %vm2780_vm12, %v5194_v6, %v2732_v53  ;;  %v2496_v27 = vmul.f32 0.5, %v2448_v56  ;;  %v2607_v31 = vmul.f32 1.442695, %v2448_v56 }
 0x222   :  { %3173 = vst.msk [vmem:[%s5946_s5 + $0x14] sm:$0xf] %vm3167_vm3, %v3518_v3  ;;  %v3523_v11 = vpack.c.bf16 %v2937_v8, %v2937_v8  ;;  %v2935_v44 = vadd.f32 %v5224_v40, %v2880_v13  ;;  %v5364_v10 = vpop.f32.mrf.mxu1  ;;  %v2883_v16 = vmul.f32 %v5205_v46, %v2828_v18  ;;  %v2730_v39 = vmul.f32 %v4009_v23, %v2682_v55 }
 0x223   :  { %v2115_v1 = vpop.f32.mrf.mxu0  ;;  %v2085_v6 = vadd.f32 %v5185_v61, %v4883_v57  ;;  %vm2778_vm13 = vcmp.gt.f32.partialorder %v5216_v48, 0.0  ;;  %v2603_v2 = vmul.f32 1.442695, %v2446_v29  ;;  %v2494_v13 = vmul.f32 0.5, %v2446_v29 }
 0x224   :  { %3178 = vst.msk [vmem:[%s5946_s5 + $0x28] sm:$0xf] %vm3167_vm3, %v3523_v11  ;;  %v3521_v59 = vpack.c.bf16 %v2935_v44, %v2935_v44  ;;  %v5374_v15 = vpop.f32.mrf.mxu1  ;;  %v4013_v33 = vpop.eup %4012  ;;  %v2938_v3 = vadd.f32 %v5224_v40, %v2883_v16  ;;  %v2826_v8 = vsel %vm2778_vm13, %v5216_v48, %v2730_v39  ;;  %v5379_v53 = vadd.f32 %v5255_v63, %v2090_v17 }
 0x225   :  { %v5381_v23 = vpop.f32.mrf.mxu0  ;;  %v2881_v57 = vmul.f32 %v5205_v46, %v2826_v8  ;;  %v2687_v61 = vadd.f32 1.0, %v4013_v33  ;;  %4018 = vpow2.f32 %v2607_v31  ;;  %v5390_v55 = vadd.f32 %v5266_v36, %v5213_v42 }
 0x226   :  { %3176 = vst.msk [vmem:[%s5946_s5 + $0x20] sm:$0xf] %vm3167_vm3, %v3521_v59  ;;  %v5392_v48 = vpop.f32.mrf.mxu1  ;;  %v3524_v56 = vpack.c.bf16 %v2938_v3, %v2938_v3  ;;  %vm2783_vm14 = vcmp.gt.f32.partialorder %v5237_v35, 0.0  ;;  %4020 = vtanh.f32 %v2496_v27  ;;  %v2451_v63 = vmin.f32 %v5379_v53, 0.0 }
 0x227   :  { %v2118_v29 = vpop.f32.mrf.mxu0  ;;  %v2936_v11 = vadd.f32 %v5224_v40, %v2881_v57  ;;  %v2735_v44 = vmul.f32 %v4011_v43, %v2687_v61  ;;  %4022 = vpow2.f32 %v2603_v2  ;;  %v2449_v18 = vmin.f32 %v5390_v55, 0.0 }
 0x228   :  { %3179 = vst.msk [vmem:[%s5946_s5 + $0x2c] sm:$0xf] %vm3167_vm3, %v3524_v56  ;;  %v2093_v36 = vadd.f32 %v5231_v54, %v4903_v14  ;;  %v2098_v42 = vadd.f32 %v5251_v62, %v4908_v22  ;;  %v2499_v17 = vmul.f32 0.5, %v2451_v63  ;;  %v2613_v16 = vmul.f32 1.442695, %v2451_v63  ;;  %v5411_v59 = vpop.f32.mrf.mxu1 }
 0x229   :  { %v5406_v39 = vpop.f32.mrf.mxu0  ;;  %v4015_v27 = vpop.eup %4014  ;;  %v3522_v43 = vpack.c.bf16 %v2936_v11, %v2936_v11  ;;  %v2831_v31 = vsel %vm2783_vm14, %v5237_v35, %v2735_v44  ;;  %4024 = vtanh.f32 %v2494_v13  ;;  %v2609_v1 = vmul.f32 1.442695, %v2449_v18 }
 0x22a   :  { %v2886_v2 = vmul.f32 %v5205_v46, %v2831_v31  ;;  %v2685_v14 = vadd.f32 1.0, %v4015_v27  ;;  %4026 = vtanh.f32 %v2499_v17  ;;  %v5415_v22 = vadd.f32 %v5282_v34, %v2093_v36  ;;  %v4017_v62 = vpop.eup %4016 }
 0x22b   :  { %v2123_v54 = vpop.f32.mrf.mxu0  ;;  %3177 = vst.msk [vmem:[%s5946_s5 + $0x24] sm:$0xf] %vm3167_vm3, %v3522_v43  ;;  %4028 = vpow2.f32 %v2613_v16  ;;  %v2497_v35 = vmul.f32 0.5, %v2449_v18  ;;  %v5422_v33 = vadd.f32 %v5294_v50, %v2085_v6  ;;  %v2106_v3 = vadd.f32 %v5300_v38, %v4928_v47  ;;  %v5435_v50 = vpop.f32.mrf.mxu1 }
 0x22c   :  { %v2941_v8 = vadd.f32 %v5224_v40, %v2886_v2  ;;  %v2733_v13 = vmul.f32 %v4017_v62, %v2685_v14  ;;  %v2452_v34 = vmin.f32 %v5415_v22, 0.0  ;;  %v5429_v57 = vadd.f32 %v5316_v30, %v2098_v42 }
 0x22d   :  { %v5431_v61 = vpop.f32.mrf.mxu0  ;;  %vm2781_vm15 = vcmp.gt.f32.partialorder %v5280_v19, 0.0  ;;  %4030 = vpow2.f32 %v2609_v1  ;;  %v2450_v56 = vmin.f32 %v5422_v33, 0.0  ;;  %v5440_v44 = vadd.f32 %v5308_v24, %v2106_v3  ;;  %v5455_v16 = vpop.f32.mrf.mxu1 }
 0x22e   :  { %v3527_v6 = vpack.c.bf16 %v2941_v8, %v2941_v8  ;;  %v2829_v47 = vsel %vm2781_vm15, %v5280_v19, %v2733_v13  ;;  %v2500_v38 = vmul.f32 0.5, %v2452_v34  ;;  %v2615_v63 = vmul.f32 1.442695, %v2452_v34 }
 0x22f   :  { %v2126_v29 = vpop.f32.mrf.mxu0  ;;  %v2884_v11 = vmul.f32 %v5205_v46, %v2829_v47  ;;  %4032 = vtanh.f32 %v2497_v35  ;;  %v2611_v30 = vmul.f32 1.442695, %v2450_v56  ;;  %vm2784_vm0 = vcmp.gt.f32.partialorder %v5337_v4, 0.0  ;;  %v5473_v34 = vpop.f32.mrf.mxu1 }
 0x230   :  { %3182 = vst.msk [vmem:[%s5946_s5 + $0x38] sm:$0xf] %vm3167_vm3, %v3527_v6  ;;  %v2498_v18 = vmul.f32 0.5, %v2450_v56  ;;  %v2453_v19 = vmin.f32 %v5429_v57, 0.0  ;;  %v2109_v36 = vadd.f32 %v5324_v52, %v4943_v60  ;;  %vm2782_vm1 = vcmp.gt.f32.partialorder %v5341_v26, 0.0 }
 0x231   :  { %v5450_v42 = vpop.f32.mrf.mxu0  ;;  %v2939_v17 = vadd.f32 %v5224_v40, %v2884_v11  ;;  %4034 = vpow2.f32 %v2615_v63  ;;  %v2455_v24 = vmin.f32 %v5440_v44, 0.0  ;;  %v2101_v43 = vadd.f32 %v5272_v37, %v4923_v0 }
 0x232   :  { %v4019_v27 = vpop.eup %4018  ;;  %4036 = vtanh.f32 %v2500_v38  ;;  %v2501_v31 = vmul.f32 0.5, %v2453_v19  ;;  %v5460_v1 = vadd.f32 %v5332_v5, %v2109_v36  ;;  %v2617_v54 = vmul.f32 1.442695, %v2453_v19 }
 0x233   :  { %v2131_v60 = vpop.f32.mrf.mxu0  ;;  %v4021_v52 = vpop.eup %4020  ;;  %v3525_v2 = vpack.c.bf16 %v2939_v17, %v2939_v17  ;;  %v2688_v14 = vadd.f32 1.0, %v4019_v27  ;;  %4038 = vpow2.f32 %v2611_v30  ;;  %vm2787_vm2 = vcmp.gt.f32.partialorder %v5379_v53, 0.0 }
 0x234   :  { %v4023_v62 = vpop.eup %4022  ;;  %4040 = vtanh.f32 %v2498_v18  ;;  %v2503_v35 = vmul.f32 0.5, %v2455_v24  ;;  %v2621_v3 = vmul.f32 1.442695, %v2455_v24  ;;  %v2456_v8 = vmin.f32 %v5460_v1, 0.0  ;;  %v5491_v24 = vpop.f32.mrf.mxu1 }
 0x235   :  { %v5464_v0 = vpop.f32.mrf.mxu0  ;;  %3180 = vst.msk [vmem:[%s5946_s5 + $0x30] sm:$0xf] %vm3167_vm3, %v3525_v2  ;;  %v2736_v37 = vmul.f32 %v4021_v52, %v2688_v14  ;;  %v2686_v5 = vadd.f32 1.0, %v4023_v62  ;;  %4042 = vtanh.f32 %v2501_v31  ;;  %v5471_v13 = vadd.f32 %v5349_v9, %v2101_v43 }
 0x236   :  { %v4025_v56 = vpop.eup %4024  ;;  %4044 = vpow2.f32 %v2621_v3  ;;  %v2504_v6 = vmul.f32 0.5, %v2456_v8  ;;  %v2623_v47 = vmul.f32 1.442695, %v2456_v8  ;;  %v2114_v38 = vadd.f32 %v5354_v20, %v4948_v7 }
 0x237   :  { %v2134_v63 = vpop.f32.mrf.mxu0  ;;  %v4027_v29 = vpop.eup %4026  ;;  %v2832_v11 = vsel %vm2784_vm0, %v5337_v4, %v2736_v37  ;;  %v2734_v30 = vmul.f32 %v4025_v56, %v2686_v5  ;;  %4046 = vpow2.f32 %v2617_v54  ;;  %v2454_v9 = vmin.f32 %v5471_v13, 0.0 }
 0x238   :  { %v4029_v18 = vpop.eup %4028  ;;  %v2887_v19 = vmul.f32 %v5205_v46, %v2832_v11  ;;  %vm2785_vm4 = vcmp.gt.f32.partialorder %v5390_v55, 0.0  ;;  %4048 = vtanh.f32 %v2503_v35  ;;  %v5484_v36 = vadd.f32 %v5374_v15, %v2114_v38 }
 0x239   :  { %v5486_v7 = vpop.f32.mrf.mxu0  ;;  %v2830_v20 = vsel %vm2782_vm1, %v5341_v26, %v2734_v30  ;;  %v2691_v4 = vadd.f32 1.0, %v4029_v18  ;;  %4050 = vpow2.f32 %v2623_v47  ;;  %v2502_v17 = vmul.f32 0.5, %v2454_v9 }
 0x23a   :  { %v4031_v27 = vpop.eup %4030  ;;  %v2942_v43 = vadd.f32 %v5224_v40, %v2887_v19  ;;  %v2885_v31 = vmul.f32 %v5205_v46, %v2830_v20  ;;  %v2619_v60 = vmul.f32 1.442695, %v2454_v9  ;;  %v2457_v15 = vmin.f32 %v5484_v36, 0.0 }
 0x23b   :  { %v2139_v52 = vpop.f32.mrf.mxu0  ;;  %v2739_v2 = vmul.f32 %v4027_v29, %v2691_v4  ;;  %v2689_v14 = vadd.f32 1.0, %v4031_v27  ;;  %vm2788_vm5 = vcmp.gt.f32.partialorder %v5415_v22, 0.0  ;;  %4052 = vtanh.f32 %v2504_v6  ;;  %v5506_v6 = vpop.f32.mrf.mxu1 }
 0x23c   :  { %v4033_v26 = vpop.eup %4032  ;;  %v3528_v54 = vpack.c.bf16 %v2942_v43, %v2942_v43  ;;  %v2940_v62 = vadd.f32 %v5224_v40, %v2885_v31  ;;  %vm2786_vm6 = vcmp.gt.f32.partialorder %v5422_v33, 0.0  ;;  %4054 = vpow2.f32 %v2619_v60 }
 0x23d   :  { %v2505_v35 = vmul.f32 0.5, %v2457_v15  ;;  %v5499_v3 = vpop.f32.mrf.mxu0  ;;  %v2835_v8 = vsel %vm2787_vm2, %v5379_v53, %v2739_v2  ;;  %v2737_v37 = vmul.f32 %v4033_v26, %v2689_v14  ;;  %v2625_v5 = vmul.f32 1.442695, %v2457_v15 }
 0x23e   :  { %v2117_v56 = vadd.f32 %v5381_v23, %v4963_v21  ;;  %v4035_v47 = vpop.eup %4034  ;;  %3183 = vst.msk [vmem:[%s5946_s5 + $0x3c] sm:$0xf] %vm3167_vm3, %v3528_v54  ;;  %v3526_v38 = vpack.c.bf16 %v2940_v62, %v2940_v62  ;;  %v2890_v63 = vmul.f32 %v5205_v46, %v2835_v8  ;;  %4056 = vtanh.f32 %v2502_v17  ;;  %v5535_v17 = vpop.f32.mrf.mxu1 }
 0x23f   :  { %v2122_v53 = vadd.f32 %v5406_v39, %v4968_v32  ;;  %v2142_v29 = vpop.f32.mrf.mxu0  ;;  %v4037_v11 = vpop.eup %4036  ;;  %v2833_v21 = vsel %vm2785_vm4, %v5390_v55, %v2737_v37  ;;  %v2692_v23 = vadd.f32 1.0, %v4035_v47  ;;  %4058 = vpow2.f32 %v2625_v5 }
 0x240   :  { %v5519_v30 = vadd.f32 %v5411_v59, %v2117_v56  ;;  %v4039_v9 = vpop.eup %4038  ;;  %3181 = vst.msk [vmem:[%s5946_s5 + $0x34] sm:$0xf] %vm3167_vm3, %v3526_v38  ;;  %v2945_v18 = vadd.f32 %v5224_v40, %v2890_v63  ;;  %v2888_v32 = vmul.f32 %v5205_v46, %v2833_v21  ;;  %vm2791_vm7 = vcmp.gt.f32.partialorder %v5440_v44, 0.0  ;;  %v5556_v38 = vpop.f32.mrf.mxu1 }
 0x241   :  { %vm2789_vm8 = vcmp.gt.f32.partialorder %v5429_v57, 0.0  ;;  %v5530_v55 = vadd.f32 %v5364_v10, %v2122_v53  ;;  %v5532_v39 = vpop.f32.mrf.mxu0  ;;  %v4041_v59 = vpop.eup %4040  ;;  %v2740_v19 = vmul.f32 %v4037_v11, %v2692_v23  ;;  %v2690_v20 = vadd.f32 1.0, %v4039_v9 }
 0x242   :  { %4060 = vtanh.f32 %v2505_v35  ;;  %v2458_v4 = vmin.f32 %v5519_v30, 0.0  ;;  %v4043_v27 = vpop.eup %4042  ;;  %v3531_v43 = vpack.c.bf16 %v2945_v18, %v2945_v18  ;;  %v2943_v31 = vadd.f32 %v5224_v40, %v2888_v32 }
 0x243   :  { %v2459_v60 = vmin.f32 %v5530_v55, 0.0  ;;  %v2125_v10 = vadd.f32 %v5431_v61, %v4983_v49  ;;  %v2147_v15 = vpop.f32.mrf.mxu0  ;;  %v4045_v52 = vpop.eup %4044  ;;  %v2836_v2 = vsel %vm2788_vm5, %v5415_v22, %v2740_v19  ;;  %v2738_v14 = vmul.f32 %v4041_v59, %v2690_v20 }
 0x244   :  { %v2506_v26 = vmul.f32 0.5, %v2458_v4  ;;  %v2627_v54 = vmul.f32 1.442695, %v2458_v4  ;;  %v4047_v62 = vpop.eup %4046  ;;  %3186 = vst.msk [vmem:[%s5946_s5 + $0x48] sm:$0xf] %vm3167_vm3, %v3531_v43  ;;  %v3529_v35 = vpack.c.bf16 %v2943_v31, %v2943_v31  ;;  %v2891_v8 = vmul.f32 %v5205_v46, %v2836_v2 }
 0x245   :  { %v2695_v37 = vadd.f32 1.0, %v4045_v52  ;;  %vm2792_vm9 = vcmp.gt.f32.partialorder %v5460_v1, 0.0  ;;  %v5550_v49 = vpop.f32.mrf.mxu0  ;;  %v4049_v61 = vpop.eup %4048  ;;  %v2834_v22 = vsel %vm2786_vm6, %v5422_v33, %v2738_v14  ;;  %v2693_v5 = vadd.f32 1.0, %v4047_v62 }
 0x246   :  { %vm2790_vm10 = vcmp.gt.f32.partialorder %v5471_v13, 0.0  ;;  %v2507_v56 = vmul.f32 0.5, %v2459_v60  ;;  %v2629_v47 = vmul.f32 1.442695, %v2459_v60  ;;  %v4051_v63 = vpop.eup %4050  ;;  %3184 = vst.msk [vmem:[%s5946_s5 + $0x40] sm:$0xf] %vm3167_vm3, %v3529_v35  ;;  %v2946_v53 = vadd.f32 %v5224_v40, %v2891_v8  ;;  %v5578_v60 = vpop.f32.mrf.mxu1 }
 0x247   :  { %v2889_v29 = vmul.f32 %v5205_v46, %v2834_v22  ;;  %v2743_v11 = vmul.f32 %v4049_v61, %v2695_v37  ;;  %4062 = vpow2.f32 %v2627_v54  ;;  %v2150_v33 = vpop.f32.mrf.mxu0  ;;  %v2741_v21 = vmul.f32 %v4043_v27, %v2693_v5 }
 0x248   :  { %v2696_v23 = vadd.f32 1.0, %v4051_v63  ;;  %4064 = vtanh.f32 %v2506_v26  ;;  %v5565_v9 = vadd.f32 %v5392_v48, %v2125_v10  ;;  %v4053_v18 = vpop.eup %4052  ;;  %v3532_v32 = vpack.c.bf16 %v2946_v53, %v2946_v53 }
 0x249   :  { %v2944_v59 = vadd.f32 %v5224_v40, %v2889_v29  ;;  %v2839_v19 = vsel %vm2791_vm7, %v5440_v44, %v2743_v11  ;;  %4066 = vpow2.f32 %v2629_v47  ;;  %v5571_v20 = vpop.f32.mrf.mxu0  ;;  %v4055_v4 = vpop.eup %4054  ;;  %v2837_v27 = vsel %vm2789_vm8, %v5429_v57, %v2741_v21 }
 0x24a   :  { %v2894_v43 = vmul.f32 %v5205_v46, %v2839_v19  ;;  %v2744_v48 = vmul.f32 %v4053_v18, %v2696_v23  ;;  %v2460_v31 = vmin.f32 %v5565_v9, 0.0  ;;  %3187 = vst.msk [vmem:[%s5946_s5 + $0x4c] sm:$0xf] %vm3167_vm3, %v3532_v32  ;;  %v2892_v10 = vmul.f32 %v5205_v46, %v2837_v27  ;;  %v3629_v47 = vpop.f32.mrf.mxu1 }
 0x24b   :  { %v3530_v44 = vpack.c.bf16 %v2944_v59, %v2944_v59  ;;  %v2694_v15 = vadd.f32 1.0, %v4055_v4  ;;  %4068 = vtanh.f32 %v2507_v56  ;;  %v2155_v52 = vpop.f32.mrf.mxu0  ;;  %v4057_v2 = vpop.eup %4056  ;;  %v2130_v61 = vadd.f32 %v5450_v42, %v4988_v58 }
 0x24c   :  { %v2949_v14 = vadd.f32 %v5224_v40, %v2894_v43  ;;  %v2840_v57 = vsel %vm2792_vm9, %v5460_v1, %v2744_v48  ;;  %v2508_v26 = vmul.f32 0.5, %v2460_v31  ;;  %v2631_v54 = vmul.f32 1.442695, %v2460_v31  ;;  %v4059_v62 = vpop.eup %4058 }
 0x24d   :  { %3185 = vst.msk [vmem:[%s5946_s5 + $0x44] sm:$0xf] %vm3167_vm3, %v3530_v44  ;;  %v2947_v35 = vadd.f32 %v5224_v40, %v2892_v10  ;;  %v2895_v8 = vmul.f32 %v5205_v46, %v2840_v57  ;;  %v2742_v37 = vmul.f32 %v4057_v2, %v2694_v15  ;;  %v5597_v22 = vpop.f32.mrf.mxu0  ;;  %v2697_v1 = vadd.f32 1.0, %v4059_v62 }
 0x24e   :  { %v3535_v5 = vpack.c.bf16 %v2949_v14, %v2949_v14  ;;  %vm2793_vm11 = vcmp.gt.f32.partialorder %v5484_v36, 0.0  ;;  %v2133_v56 = vadd.f32 %v5464_v0, %v5003_v12  ;;  %4070 = vpow2.f32 %v2631_v54 }
 0x24f   :  { %v4061_v63 = vpop.eup %4060  ;;  %v3533_v53 = vpack.c.bf16 %v2947_v35, %v2947_v35  ;;  %v2950_v29 = vadd.f32 %v5224_v40, %v2895_v8  ;;  %v2838_v11 = vsel %vm2790_vm10, %v5471_v13, %v2742_v37  ;;  %v2158_v58 = vpop.f32.mrf.mxu0  ;;  %v5612_v12 = vadd.f32 %v5455_v16, %v2130_v61 }
 0x250   :  { %3190 = vst.msk [vmem:[%s5946_s5 + $0x58] sm:$0xf] %vm3167_vm3, %v3535_v5  ;;  %v2893_v42 = vmul.f32 %v5205_v46, %v2838_v11  ;;  %v2745_v33 = vmul.f32 %v4061_v63, %v2697_v1  ;;  %v5615_v0 = vadd.f32 %v5491_v24, %v2133_v56  ;;  %4072 = vtanh.f32 %v2508_v26 }
 0x251   :  { %3188 = vst.msk [vmem:[%s5946_s5 + $0x50] sm:$0xf] %vm3167_vm3, %v3533_v53  ;;  %v3536_v13 = vpack.c.bf16 %v2950_v29, %v2950_v29  ;;  %v2138_v21 = vadd.f32 %v5486_v7, %v5008_v25  ;;  %v5624_v23 = vadd.f32 %v3629_v47, %v5085_v28  ;;  %v2461_v24 = vmin.f32 %v5612_v12, 0.0  ;;  %v2386_v7 = vpop.f32.mrf.mxu1 }
 0x252   :  { %v2948_v18 = vadd.f32 %v5224_v40, %v2893_v42  ;;  %v2841_v16 = vsel %vm2793_vm11, %v5484_v36, %v2745_v33  ;;  %v2462_v25 = vmin.f32 %v5615_v0, 0.0  ;;  %vm2794_vm12 = vcmp.gt.f32.partialorder %v5519_v30, 0.0 }
 0x253   :  { %3191 = vst.msk [vmem:[%s5946_s5 + $0x5c] sm:$0xf] %vm3167_vm3, %v3536_v13  ;;  %v2896_v32 = vmul.f32 %v5205_v46, %v2841_v16  ;;  %v5638_v28 = vadd.f32 %v5435_v50, %v2138_v21  ;;  %v2509_v4 = vmul.f32 0.5, %v2461_v24  ;;  %v2633_v43 = vmul.f32 1.442695, %v2461_v24  ;;  %v3630_v26 = vpop.f32.mrf.mxu1 }
 0x254   :  { %v4063_v59 = vpop.eup %4062  ;;  %v3534_v19 = vpack.c.bf16 %v2948_v18, %v2948_v18  ;;  %v2635_v31 = vmul.f32 1.442695, %v2462_v25  ;;  %v2471_v44 = vmin.f32 %v5624_v23, 0.0  ;;  %v2510_v50 = vmul.f32 0.5, %v2462_v25 }
 0x255   :  { %v4065_v36 = vpop.eup %4064  ;;  %v2951_v27 = vadd.f32 %v5224_v40, %v2896_v32  ;;  %v2698_v48 = vadd.f32 1.0, %v4063_v59  ;;  %v2463_v15 = vmin.f32 %v5638_v28, 0.0  ;;  %v5649_v52 = vadd.f32 %v2386_v7, %v5077_v51  ;;  %v2389_v53 = vpop.f32.mrf.mxu1  ;;  %v5960_v7 = vld [vmem:[#allocation6_spill] sm:$0xff] }
 0x256   :  { %v4067_v10 = vpop.eup %4066  ;;  %3189 = vst.msk [vmem:[%s5946_s5 + $0x54] sm:$0xf] %vm3167_vm3, %v3534_v19  ;;  %4074 = vpow2.f32 %v2633_v43  ;;  %vm2795_vm13 = vcmp.gt.f32.partialorder %v5530_v55, 0.0  ;;  %v2653_v37 = vmul.f32 1.442695, %v2471_v44  ;;  %v2519_v5 = vmul.f32 0.5, %v2471_v44 }
 0x257   :  { %v3537_v2 = vpack.c.bf16 %v2951_v27, %v2951_v27  ;;  %v2746_v14 = vmul.f32 %v4065_v36, %v2698_v48  ;;  %v2699_v57 = vadd.f32 1.0, %v4067_v10  ;;  %4076 = vtanh.f32 %v2509_v4  ;;  %v3633_v16 = vpop.f32.mrf.mxu1  ;;  %v5961_v43 = vld [vmem:[#allocation2_spill] sm:$0xff]  ;;  %v5962_v27 = vld [vmem:[#allocation9_spill] sm:$0xff] }
 0x258   :  { %v4069_v54 = vpop.eup %4068  ;;  %v2511_v62 = vmul.f32 0.5, %v2463_v15  ;;  %v2637_v35 = vmul.f32 1.442695, %v2463_v15  ;;  %4078 = vpow2.f32 %v2635_v31  ;;  %v2469_v1 = vmin.f32 %v5649_v52, 0.0 }
 0x259   :  { %3192 = vst.msk [vmem:[%s5946_s5 + $0x60] sm:$0xf] %vm3167_vm3, %v3537_v2  ;;  %v2842_v8 = vsel %vm2794_vm12, %v5519_v30, %v2746_v14  ;;  %v2747_v51 = vmul.f32 %v4069_v54, %v2699_v57  ;;  %4080 = vtanh.f32 %v2510_v50  ;;  %v2141_v47 = vadd.f32 %v5499_v3, %v5023_v41  ;;  %v2402_v44 = vpop.f32.mrf.mxu1 }
 0x25a   :  { %v2897_v61 = vmul.f32 %v5205_v46, %v2842_v8  ;;  %4082 = vpow2.f32 %v2637_v35  ;;  %v5663_v63 = vadd.f32 %v3630_v26, %v5088_v45  ;;  %v2517_v58 = vmul.f32 0.5, %v2469_v1  ;;  %v5963_v35 = vld [vmem:[#allocation7_spill] sm:$0xff] }
 0x25b   :  { %v2843_v56 = vsel %vm2795_vm13, %v5530_v55, %v2747_v51  ;;  %v4071_v30 = vpop.eup %4070  ;;  %4084 = vtanh.f32 %v2511_v62  ;;  %v2649_v33 = vmul.f32 1.442695, %v2469_v1  ;;  %v5668_v55 = vadd.f32 %v5473_v34, %v2141_v47 }
 0x25c   :  { %v2952_v29 = vadd.f32 %v5224_v40, %v2897_v61  ;;  %v2898_v11 = vmul.f32 %v5205_v46, %v2843_v56  ;;  %v2700_v42 = vadd.f32 1.0, %v4071_v30  ;;  %4086 = vpow2.f32 %v2653_v37 }
 0x25d   :  { %v4073_v13 = vpop.eup %4072  ;;  %4088 = vtanh.f32 %v2519_v5  ;;  %v2472_v45 = vmin.f32 %v5663_v63, 0.0  ;;  %v2464_v18 = vmin.f32 %v5668_v55, 0.0  ;;  %vm2796_vm14 = vcmp.gt.f32.partialorder %v5565_v9, 0.0 }
 0x25e   :  { %v3538_v21 = vpack.c.bf16 %v2952_v29, %v2952_v29  ;;  %v2953_v41 = vadd.f32 %v5224_v40, %v2898_v11  ;;  %v2748_v3 = vmul.f32 %v4073_v13, %v2700_v42  ;;  %4090 = vpow2.f32 %v2649_v33  ;;  %v5717_v11 = vld [vmem:[%s5944_s3] ss:$0 sm:$0xff] }
 0x25f   :  { %4092 = vtanh.f32 %v2517_v58  ;;  %v2639_v32 = vmul.f32 1.442695, %v2464_v18  ;;  %v2655_v25 = vmul.f32 1.442695, %v2472_v45  ;;  %v5680_v59 = vadd.f32 %v2389_v53, %v5960_v7 }
 0x260   :  { %3193 = vst.msk [vmem:[%s5946_s5 + $0x64] sm:$0xf] %vm3167_vm3, %v3538_v21  ;;  %v3539_v24 = vpack.c.bf16 %v2953_v41, %v2953_v41  ;;  %v2844_v34 = vsel %vm2796_vm14, %v5565_v9, %v2748_v3  ;;  %v2512_v4 = vmul.f32 0.5, %v2464_v18  ;;  %v2146_v36 = vadd.f32 %v5532_v39, %v5961_v43  ;;  %v5727_v3 = vld [vmem:[%s5945_s4] ss:$0 sm:$0xff] }
 0x261   :  { %v2899_v19 = vmul.f32 %v5205_v46, %v2844_v34  ;;  %v5690_v48 = vadd.f32 %v3633_v16, %v5962_v27  ;;  %vm2797_vm15 = vcmp.gt.f32.partialorder %v5612_v12, 0.0  ;;  %vm2798_vm0 = vcmp.gt.f32.partialorder %v5615_v0, 0.0  ;;  %v3634_v34 = vpop.f32.mrf.mxu1 }
 0x262   :  { %3194 = vst.msk [vmem:[%s5946_s5 + $0x68] sm:$0xf] %vm3167_vm3, %v3539_v24  ;;  %v2520_v9 = vmul.f32 0.5, %v2472_v45  ;;  %v2470_v31 = vmin.f32 %v5680_v59, 0.0  ;;  %vm2799_vm1 = vcmp.gt.f32.partialorder %v5638_v28, 0.0  ;;  %4094 = vpow2.f32 %v2639_v32 }
 0x263   :  { %v4075_v10 = vpop.eup %4074  ;;  %v2954_v50 = vadd.f32 %v5224_v40, %v2899_v19  ;;  %v5698_v46 = vadd.f32 %v5535_v17, %v2146_v36  ;;  %v2475_v39 = vmin.f32 %v5690_v48, 0.0  ;;  %4096 = vpow2.f32 %v2655_v25 }
 0x264   :  { %v4077_v15 = vpop.eup %4076  ;;  %v2701_v2 = vadd.f32 1.0, %v4075_v10  ;;  %v2518_v14 = vmul.f32 0.5, %v2470_v31  ;;  %v2651_v57 = vmul.f32 1.442695, %v2470_v31  ;;  %4098 = vtanh.f32 %v2512_v4 }
 0x265   :  { %v4079_v26 = vpop.eup %4078  ;;  %v3540_v54 = vpack.c.bf16 %v2954_v50, %v2954_v50  ;;  %v2465_v62 = vmin.f32 %v5698_v46, 0.0  ;;  %v5703_v40 = vadd.f32 %v2402_v44, %v5963_v35  ;;  %vm2807_vm2 = vcmp.gt.f32.partialorder %v5624_v23, 0.0 }
 0x266   :  { %v4081_v8 = vpop.eup %4080  ;;  %v2749_v51 = vmul.f32 %v4077_v15, %v2701_v2  ;;  %v2702_v37 = vadd.f32 1.0, %v4079_v26  ;;  %4100 = vtanh.f32 %v2520_v9  ;;  %vm2805_vm4 = vcmp.gt.f32.partialorder %v5649_v52, 0.0  ;;  %v2405_v2 = vpop.f32.mrf.mxu1 }
 0x267   :  { %v4083_v17 = vpop.eup %4082  ;;  %3195 = vst.msk [vmem:[%s5946_s5 + $0x6c] sm:$0xf] %vm3167_vm3, %v3540_v54  ;;  %4102 = vpow2.f32 %v2651_v57  ;;  %v2513_v61 = vmul.f32 0.5, %v2465_v62  ;;  %v2641_v5 = vmul.f32 1.442695, %v2465_v62  ;;  %v2523_v42 = vmul.f32 0.5, %v2475_v39 }
 0x268   :  { %v2661_v1 = vmul.f32 1.442695, %v2475_v39  ;;  %v4085_v56 = vpop.eup %4084  ;;  %v2845_v47 = vsel %vm2797_vm15, %v5612_v12, %v2749_v51  ;;  %v2750_v53 = vmul.f32 %v4081_v8, %v2702_v37  ;;  %v2703_v30 = vadd.f32 1.0, %v4083_v17  ;;  %v5965_v39 = vld [vmem:[#allocation10_spill] sm:$0xff] }
 0x269   :  { %4104 = vtanh.f32 %v2518_v14  ;;  %v4087_v29 = vpop.eup %4086  ;;  %v2900_v58 = vmul.f32 %v5717_v11, %v2845_v47  ;;  %v2473_v33 = vmin.f32 %v5703_v40, 0.0  ;;  %vm2800_vm5 = vcmp.gt.f32.partialorder %v5668_v55, 0.0 }
 0x26a   :  { %4106 = vtanh.f32 %v2513_v61  ;;  %v4089_v13 = vpop.eup %4088  ;;  %v2846_v12 = vsel %vm2798_vm0, %v5615_v0, %v2750_v53  ;;  %v2751_v21 = vmul.f32 %v4085_v56, %v2703_v30  ;;  %v2711_v41 = vadd.f32 1.0, %v4087_v29 }
 0x26b   :  { %4108 = vpow2.f32 %v2641_v5  ;;  %v4091_v45 = vpop.eup %4090  ;;  %v2955_v18 = vadd.f32 %v5727_v3, %v2900_v58  ;;  %v2901_v16 = vmul.f32 %v5717_v11, %v2846_v12  ;;  %v2521_v24 = vmul.f32 0.5, %v2473_v33 }
 0x26c   :  { %4110 = vpow2.f32 %v2661_v1  ;;  %v4093_v32 = vpop.eup %4092  ;;  %v2847_v0 = vsel %vm2799_vm1, %v5638_v28, %v2751_v21  ;;  %v2759_v25 = vmul.f32 %v4089_v13, %v2711_v41  ;;  %v2709_v7 = vadd.f32 1.0, %v4091_v45  ;;  %v5964_v28 = vld [vmem:[#allocation3_spill] sm:$0xff] }
 0x26d   :  { %v2657_v19 = vmul.f32 1.442695, %v2473_v33  ;;  %v3541_v4 = vpack.c.bf16 %v2955_v18, %v2955_v18  ;;  %v2956_v43 = vadd.f32 %v5727_v3, %v2901_v16  ;;  %v2902_v36 = vmul.f32 %v5717_v11, %v2847_v0  ;;  %v5967_v0 = vld [vmem:[#allocation4_spill] sm:$0xff] }
 0x26e   :  { %vm2808_vm6 = vcmp.gt.f32.partialorder %v5663_v63, 0.0  ;;  %4112 = vtanh.f32 %v2523_v42  ;;  %v2855_v27 = vsel %vm2807_vm2, %v5624_v23, %v2759_v25  ;;  %v2757_v9 = vmul.f32 %v4093_v32, %v2709_v7 }
 0x26f   :  { %4114 = vpow2.f32 %v2657_v19  ;;  %v2149_v31 = vadd.f32 %v5550_v49, %v5964_v28  ;;  %3196 = vst.msk [vmem:[%s5946_s5 + $0x70] sm:$0xf] %vm3167_vm3, %v3541_v4  ;;  %v3542_v44 = vpack.c.bf16 %v2956_v43, %v2956_v43  ;;  %v2957_v10 = vadd.f32 %v5727_v3, %v2902_v36  ;;  %v4095_v23 = vpop.eup %4094 }
 0x270   :  { %v2910_v50 = vmul.f32 %v5717_v11, %v2855_v27  ;;  %v5750_v15 = vadd.f32 %v3634_v34, %v5965_v39  ;;  %v2853_v14 = vsel %vm2805_vm4, %v5649_v52, %v2757_v9  ;;  %vm2806_vm7 = vcmp.gt.f32.partialorder %v5680_v59, 0.0  ;;  %v4097_v57 = vpop.eup %4096 }
 0x271   :  { %4116 = vtanh.f32 %v2521_v24  ;;  %v5757_v49 = vadd.f32 %v5578_v60, %v2149_v31  ;;  %3197 = vst.msk [vmem:[%s5946_s5 + $0x74] sm:$0xf] %vm3167_vm3, %v3542_v44  ;;  %v3543_v26 = vpack.c.bf16 %v2957_v10, %v2957_v10  ;;  %v2908_v62 = vmul.f32 %v5717_v11, %v2853_v14  ;;  %v4099_v8 = vpop.eup %4098  ;;  %v5966_v60 = vld [vmem:[#allocation8_spill] sm:$0xff]  ;;  %v3637_v24 = vpop.f32.mrf.mxu1 }
 0x272   :  { %v2965_v54 = vadd.f32 %v5727_v3, %v2910_v50  ;;  %v2704_v35 = vadd.f32 1.0, %v4095_v23  ;;  %v2712_v52 = vadd.f32 1.0, %v4097_v57  ;;  %v2476_v37 = vmin.f32 %v5750_v15, 0.0 }
 0x273   :  { %v2466_v51 = vmin.f32 %v5757_v49, 0.0  ;;  %v5768_v17 = vadd.f32 %v2405_v2, %v5966_v60  ;;  %v4101_v61 = vpop.eup %4100  ;;  %3198 = vst.msk [vmem:[%s5946_s5 + $0x78] sm:$0xf] %vm3167_vm3, %v3543_v26  ;;  %v2963_v1 = vadd.f32 %v5727_v3, %v2908_v62  ;;  %vm2801_vm8 = vcmp.gt.f32.partialorder %v5698_v46, 0.0  ;;  %v2418_v44 = vpop.f32.mrf.mxu1  ;;  %v5968_v26 = vld [vmem:[#allocation13_spill] sm:$0xff] }
 0x274   :  { %v3551_v5 = vpack.c.bf16 %v2965_v54, %v2965_v54  ;;  %v2752_v56 = vmul.f32 %v4099_v8, %v2704_v35  ;;  %v4103_v47 = vpop.eup %4102  ;;  %v2760_v53 = vmul.f32 %v4101_v61, %v2712_v52  ;;  %vm2811_vm9 = vcmp.gt.f32.partialorder %v5690_v48, 0.0 }
 0x275   :  { %v2514_v30 = vmul.f32 0.5, %v2466_v51  ;;  %v2643_v29 = vmul.f32 1.442695, %v2466_v51  ;;  %v2524_v58 = vmul.f32 0.5, %v2476_v37  ;;  %v3549_v33 = vpack.c.bf16 %v2963_v1, %v2963_v1 }
 0x276   :  { %v4105_v42 = vpop.eup %4104  ;;  %3206 = vst.msk [vmem:[%s5946_s5 + $0x98] sm:$0xf] %vm3167_vm3, %v3551_v5  ;;  %v2848_v13 = vsel %vm2800_vm5, %v5668_v55, %v2752_v56  ;;  %v2710_v12 = vadd.f32 1.0, %v4103_v47  ;;  %v2663_v21 = vmul.f32 1.442695, %v2476_v37  ;;  %v2856_v18 = vsel %vm2808_vm6, %v5663_v63, %v2760_v53  ;;  %v3638_v37 = vpop.f32.mrf.mxu1  ;;  %v5969_v47 = vld [vmem:[#allocation11_spill] sm:$0xff] }
 0x277   :  { %v4107_v41 = vpop.eup %4106  ;;  %v2903_v45 = vmul.f32 %v5717_v11, %v2848_v13  ;;  %4118 = vtanh.f32 %v2514_v30  ;;  %v2474_v16 = vmin.f32 %v5768_v17, 0.0  ;;  %3204 = vst.msk [vmem:[%s5946_s5 + $0x90] sm:$0xf] %vm3167_vm3, %v3549_v33  ;;  %v2911_v55 = vmul.f32 %v5717_v11, %v2856_v18 }
 0x278   :  { %v4109_v34 = vpop.eup %4108  ;;  %v2758_v32 = vmul.f32 %v4105_v42, %v2710_v12  ;;  %4120 = vpow2.f32 %v2643_v29  ;;  %v2154_v25 = vadd.f32 %v5571_v20, %v5967_v0  ;;  %vm2809_vm10 = vcmp.gt.f32.partialorder %v5703_v40, 0.0  ;;  %v2421_v12 = vpop.f32.mrf.mxu1 }
 0x279   :  { %v4111_v7 = vpop.eup %4110  ;;  %v2958_v63 = vadd.f32 %v5727_v3, %v2903_v45  ;;  %v2705_v19 = vadd.f32 1.0, %v4109_v34  ;;  %4122 = vtanh.f32 %v2524_v58  ;;  %v2966_v4 = vadd.f32 %v5727_v3, %v2911_v55  ;;  %v5971_v34 = vld [vmem:[#allocation14_spill] sm:$0xff] }
 0x27a   :  { %v2854_v43 = vsel %vm2806_vm7, %v5680_v59, %v2758_v32  ;;  %v2715_v36 = vadd.f32 1.0, %v4111_v7  ;;  %4124 = vpow2.f32 %v2663_v21  ;;  %v2522_v31 = vmul.f32 0.5, %v2474_v16 }
 0x27b   :  { %v4113_v27 = vpop.eup %4112  ;;  %v3544_v9 = vpack.c.bf16 %v2958_v63, %v2958_v63  ;;  %v2909_v28 = vmul.f32 %v5717_v11, %v2854_v43  ;;  %v2753_v20 = vmul.f32 %v4107_v41, %v2705_v19  ;;  %v3552_v50 = vpack.c.bf16 %v2966_v4, %v2966_v4  ;;  %v5970_v41 = vld [vmem:[#allocation5_spill] sm:$0xff]  ;;  %v5972_v63 = vld [vmem:[#allocation12_spill] sm:$0xff] }
 0x27c   :  { %v4115_v10 = vpop.eup %4114  ;;  %v2763_v39 = vmul.f32 %v4113_v27, %v2715_v36  ;;  %v2659_v2 = vmul.f32 1.442695, %v2474_v16  ;;  %v5804_v23 = vadd.f32 %v5506_v6, %v2154_v25  ;;  %v5815_v54 = vadd.f32 %v3637_v24, %v5968_v26 }
 0x27d   :  { %3199 = vst.msk [vmem:[%s5946_s5 + $0x7c] sm:$0xf] %vm3167_vm3, %v3544_v9  ;;  %v2964_v59 = vadd.f32 %v5727_v3, %v2909_v28  ;;  %v2849_v14 = vsel %vm2801_vm8, %v5698_v46, %v2753_v20  ;;  %v2713_v57 = vadd.f32 1.0, %v4115_v10  ;;  %3207 = vst.msk [vmem:[%s5946_s5 + $0x9c] sm:$0xf] %vm3167_vm3, %v3552_v50  ;;  %v5838_v53 = vadd.f32 %v2418_v44, %v5969_v47 }
 0x27e   :  { %v4117_v62 = vpop.eup %4116  ;;  %v2904_v6 = vmul.f32 %v5717_v11, %v2849_v14  ;;  %v2859_v35 = vsel %vm2811_vm9, %v5690_v48, %v2763_v39  ;;  %4126 = vpow2.f32 %v2659_v2  ;;  %v2467_v8 = vmin.f32 %v5804_v23, 0.0 }
 0x27f   :  { %v3550_v46 = vpack.c.bf16 %v2964_v59, %v2964_v59  ;;  %v2914_v52 = vmul.f32 %v5717_v11, %v2859_v35  ;;  %v2761_v51 = vmul.f32 %v4117_v62, %v2713_v57  ;;  %4128 = vtanh.f32 %v2522_v31 }
 0x280   :  { %v2959_v60 = vadd.f32 %v5727_v3, %v2904_v6  ;;  %v2515_v61 = vmul.f32 0.5, %v2467_v8  ;;  %v2645_v5 = vmul.f32 1.442695, %v2467_v8  ;;  %v2479_v1 = vmin.f32 %v5815_v54, 0.0 }
 0x281   :  { %3205 = vst.msk [vmem:[%s5946_s5 + $0x94] sm:$0xf] %vm3167_vm3, %v3550_v46  ;;  %v2969_v48 = vadd.f32 %v5727_v3, %v2914_v52  ;;  %v2857_v56 = vsel %vm2809_vm10, %v5703_v40, %v2761_v51  ;;  %v2477_v13 = vmin.f32 %v5838_v53, 0.0  ;;  %v2157_v45 = vadd.f32 %v5597_v22, %v5970_v41 }
 0x282   :  { %v3545_v30 = vpack.c.bf16 %v2959_v60, %v2959_v60  ;;  %v2912_v29 = vmul.f32 %v5717_v11, %v2857_v56  ;;  %v2527_v58 = vmul.f32 0.5, %v2479_v1  ;;  %4130 = vpow2.f32 %v2645_v5 }
 0x283   :  { %v3555_v42 = vpack.c.bf16 %v2969_v48, %v2969_v48  ;;  %v2669_v33 = vmul.f32 1.442695, %v2479_v1  ;;  %4132 = vtanh.f32 %v2515_v61  ;;  %v2525_v16 = vmul.f32 0.5, %v2477_v13 }
 0x284   :  { %v4119_v21 = vpop.eup %4118  ;;  %3200 = vst.msk [vmem:[%s5946_s5 + $0x80] sm:$0xf] %vm3167_vm3, %v3545_v30  ;;  %v2967_v40 = vadd.f32 %v5727_v3, %v2912_v29  ;;  %v2665_v24 = vmul.f32 1.442695, %v2477_v13  ;;  %v5854_v55 = vadd.f32 %v3638_v37, %v5971_v34  ;;  %v5857_v7 = vadd.f32 %v5556_v38, %v2157_v45 }
 0x285   :  { %v4121_v18 = vpop.eup %4120  ;;  %3210 = vst.msk [vmem:[%s5946_s5 + $0xa8] sm:$0xf] %vm3167_vm3, %v3555_v42  ;;  %4134 = vpow2.f32 %v2669_v33  ;;  %v5860_v22 = vadd.f32 %v2421_v12, %v5972_v63  ;;  %vm2802_vm11 = vcmp.gt.f32.partialorder %v5757_v49, 0.0  ;;  %vm2812_vm12 = vcmp.gt.f32.partialorder %v5750_v15, 0.0 }
 0x286   :  { %v4123_v32 = vpop.eup %4122  ;;  %v3553_v0 = vpack.c.bf16 %v2967_v40, %v2967_v40  ;;  %v2706_v25 = vadd.f32 1.0, %v4121_v18  ;;  %4136 = vtanh.f32 %v2527_v58  ;;  %v2480_v4 = vmin.f32 %v5854_v55, 0.0 }
 0x287   :  { %v4125_v19 = vpop.eup %4124  ;;  %4138 = vpow2.f32 %v2665_v24  ;;  %v2468_v27 = vmin.f32 %v5857_v7, 0.0  ;;  %v2478_v9 = vmin.f32 %v5860_v22, 0.0  ;;  %vm2810_vm13 = vcmp.gt.f32.partialorder %v5768_v17, 0.0 }
 0x288   :  { %3208 = vst.msk [vmem:[%s5946_s5 + $0xa0] sm:$0xf] %vm3167_vm3, %v3553_v0  ;;  %v2754_v43 = vmul.f32 %v4119_v21, %v2706_v25  ;;  %v2716_v36 = vadd.f32 1.0, %v4125_v19  ;;  %4140 = vtanh.f32 %v2525_v16  ;;  %v2528_v38 = vmul.f32 0.5, %v2480_v4 }
 0x289   :  { %v2647_v31 = vmul.f32 1.442695, %v2468_v27  ;;  %v2671_v44 = vmul.f32 1.442695, %v2480_v4  ;;  %v2516_v39 = vmul.f32 0.5, %v2468_v27  ;;  %v2526_v6 = vmul.f32 0.5, %v2478_v9 }
 0x28a   :  { %v2850_v28 = vsel %vm2802_vm11, %v5757_v49, %v2754_v43  ;;  %v2764_v20 = vmul.f32 %v4123_v32, %v2716_v36  ;;  %4142 = vtanh.f32 %v2528_v38  ;;  %v2667_v57 = vmul.f32 1.442695, %v2478_v9 }
 0x28b   :  { %v4127_v10 = vpop.eup %4126  ;;  %v2905_v50 = vmul.f32 %v5717_v11, %v2850_v28  ;;  %4144 = vpow2.f32 %v2647_v31  ;;  %vm2803_vm14 = vcmp.gt.f32.partialorder %v5804_v23, 0.0  ;;  %vm2815_vm15 = vcmp.gt.f32.partialorder %v5815_v54, 0.0 }
 0x28c   :  { %v4129_v2 = vpop.eup %4128  ;;  %v2860_v59 = vsel %vm2812_vm12, %v5750_v15, %v2764_v20  ;;  %v2714_v14 = vadd.f32 1.0, %v4127_v10  ;;  %4146 = vpow2.f32 %v2671_v44  ;;  %vm2813_vm0 = vcmp.gt.f32.partialorder %v5838_v53, 0.0 }
 0x28d   :  { %v2960_v26 = vadd.f32 %v5727_v3, %v2905_v50  ;;  %v2915_v62 = vmul.f32 %v5717_v11, %v2860_v59  ;;  %4148 = vtanh.f32 %v2516_v39  ;;  %vm2804_vm1 = vcmp.gt.f32.partialorder %v5857_v7, 0.0 }
 0x28e   :  { %v2762_v49 = vmul.f32 %v4129_v2, %v2714_v14  ;;  %4150 = vpow2.f32 %v2667_v57  ;;  %vm2816_vm2 = vcmp.gt.f32.partialorder %v5854_v55, 0.0  ;;  %vm2814_vm4 = vcmp.gt.f32.partialorder %v5860_v22, 0.0 }
 0x28f   :  { %v3546_v35 = vpack.c.bf16 %v2960_v26, %v2960_v26  ;;  %v2970_v8 = vadd.f32 %v5727_v3, %v2915_v62  ;;  %v4131_v46 = vpop.eup %4130  ;;  %4152 = vtanh.f32 %v2526_v6 }
 0x290   :  { %v2858_v15 = vsel %vm2810_vm13, %v5768_v17, %v2762_v49  ;;  %v4133_v52 = vpop.eup %4132  ;;  %v2707_v60 = vadd.f32 1.0, %v4131_v46 }
 0x291   :  { %3201 = vst.msk [vmem:[%s5946_s5 + $0x84] sm:$0xf] %vm3167_vm3, %v3546_v35  ;;  %v3556_v51 = vpack.c.bf16 %v2970_v8, %v2970_v8  ;;  %v2913_v37 = vmul.f32 %v5717_v11, %v2858_v15 }
 0x292   :  { %v4135_v61 = vpop.eup %4134  ;;  %v2755_v5 = vmul.f32 %v4133_v52, %v2707_v60 }
 0x293   :  { %3211 = vst.msk [vmem:[%s5946_s5 + $0xac] sm:$0xf] %vm3167_vm3, %v3556_v51  ;;  %v2968_v17 = vadd.f32 %v5727_v3, %v2913_v37  ;;  %v2719_v1 = vadd.f32 1.0, %v4135_v61  ;;  %v4137_v48 = vpop.eup %4136 }
 0x294   :  { %v4139_v56 = vpop.eup %4138  ;;  %v2851_v30 = vsel %vm2803_vm14, %v5804_v23, %v2755_v5 }
 0x295   :  { %v3554_v47 = vpack.c.bf16 %v2968_v17, %v2968_v17  ;;  %v2767_v29 = vmul.f32 %v4137_v48, %v2719_v1  ;;  %v4141_v58 = vpop.eup %4140  ;;  %v2906_v42 = vmul.f32 %v5717_v11, %v2851_v30  ;;  %v2717_v33 = vadd.f32 1.0, %v4139_v56 }
 0x297   :  { %3209 = vst.msk [vmem:[%s5946_s5 + $0xa4] sm:$0xf] %vm3167_vm3, %v3554_v47  ;;  %v2863_v13 = vsel %vm2815_vm15, %v5815_v54, %v2767_v29  ;;  %v2961_v12 = vadd.f32 %v5727_v3, %v2906_v42  ;;  %v2765_v40 = vmul.f32 %v4141_v58, %v2717_v33  ;;  %v4143_v23 = vpop.eup %4142 }
 0x298   :  { %v2918_v21 = vmul.f32 %v5717_v11, %v2863_v13  ;;  %v4145_v41 = vpop.eup %4144 }
 0x299   :  { %v3547_v45 = vpack.c.bf16 %v2961_v12, %v2961_v12  ;;  %v2861_v16 = vsel %vm2813_vm0, %v5838_v53, %v2765_v40  ;;  %v4147_v24 = vpop.eup %4146  ;;  %v2708_v32 = vadd.f32 1.0, %v4145_v41 }
 0x29a   :  { %v2973_v18 = vadd.f32 %v5727_v3, %v2918_v21  ;;  %v2916_v34 = vmul.f32 %v5717_v11, %v2861_v16  ;;  %v4149_v0 = vpop.eup %4148  ;;  %v2720_v25 = vadd.f32 1.0, %v4147_v24 }
 0x29b   :  { %3202 = vst.msk [vmem:[%s5946_s5 + $0x88] sm:$0xf] %vm3167_vm3, %v3547_v45  ;;  %v4151_v63 = vpop.eup %4150  ;;  %v2756_v4 = vmul.f32 %v4149_v0, %v2708_v32 }
 0x29c   :  { %v3559_v54 = vpack.c.bf16 %v2973_v18, %v2973_v18  ;;  %v2971_v19 = vadd.f32 %v5727_v3, %v2916_v34  ;;  %v2768_v53 = vmul.f32 %v4143_v23, %v2720_v25  ;;  %v2718_v43 = vadd.f32 1.0, %v4151_v63  ;;  %v4153_v36 = vpop.eup %4152 }
 0x29d   :  { %v2852_v38 = vsel %vm2804_vm1, %v5857_v7, %v2756_v4 }
 0x29e   :  { %3214 = vst.msk [vmem:[%s5946_s5 + $0xb8] sm:$0xf] %vm3167_vm3, %v3559_v54  ;;  %v3557_v27 = vpack.c.bf16 %v2971_v19, %v2971_v19  ;;  %v2907_v9 = vmul.f32 %v5717_v11, %v2852_v38  ;;  %v2864_v28 = vsel %vm2816_vm2, %v5854_v55, %v2768_v53  ;;  %v2766_v20 = vmul.f32 %v4153_v36, %v2718_v43 }
 0x29f   :  { %v2919_v31 = vmul.f32 %v5717_v11, %v2864_v28 }
 0x2a0   :  { %3212 = vst.msk [vmem:[%s5946_s5 + $0xb0] sm:$0xf] %vm3167_vm3, %v3557_v27  ;;  %v2962_v44 = vadd.f32 %v5727_v3, %v2907_v9  ;;  %v2862_v7 = vsel %vm2814_vm4, %v5860_v22, %v2766_v20 }
 0x2a1   :  { %v2974_v10 = vadd.f32 %v5727_v3, %v2919_v31  ;;  %v2917_v50 = vmul.f32 %v5717_v11, %v2862_v7 }
 0x2a2   :  { %v3548_v39 = vpack.c.bf16 %v2962_v44, %v2962_v44 }
 0x2a3   :  { %v3560_v55 = vpack.c.bf16 %v2974_v10, %v2974_v10  ;;  %v2972_v2 = vadd.f32 %v5727_v3, %v2917_v50 }
 0x2a4   :  { %3203 = vst.msk [vmem:[%s5946_s5 + $0x8c] sm:$0xf] %vm3167_vm3, %v3548_v39 }
 0x2a5   :  { %3215 = vst.msk [vmem:[%s5946_s5 + $0xbc] sm:$0xf] %vm3167_vm3, %v3560_v55  ;;  %v3558_v59 = vpack.c.bf16 %v2972_v2, %v2972_v2 }
 0x2a7   :  { %3213 = vst.msk [vmem:[%s5946_s5 + $0xb4] sm:$0xf] %vm3167_vm3, %v3558_v59 }

// kernel: net_forward.9
= control target key start
LH: loop header
LB: loop body
LE: loop exit
PB: predicated region body
PF: predicated region fallthrough
CT: control target
= control target key end

     0   :  { %vm341_vm0 = vcmask 1043456   ;;  %vm322_vm1 = vcmask 850944   ;;  %vm701_vm3 = vcmask 388096   ;;  %s1306_s1 = inlined_call_operand.vmem [shape: bf16[360,48], index: 1, kind: input, shape index: {}]   ;;  %s1307_s0 = inlined_call_operand.vmem [shape: bf16[96,360], index: 0, kind: input, shape index: {}]   ;;  %s1308_s2 = inlined_call_operand.vmem [shape: f32[1,48], index: 2, kind: input, shape index: {}]   ;;  %s1309_s3 = inlined_call_operand.vmem [shape: f32[1,48], index: 3, kind: input, shape index: {}]   ;;  %s1310_s4 = inlined_call_operand.vmem [shape: f32[1,48], index: 4, kind: input, shape index: {}]   ;;  %s1311_s5 = inlined_call_operand.vmem [shape: bf16[96,48], index: 5, kind: output, shape index: {}]  }
   0x1   :  { %v884_v0 = vld [vmem:[%s1306_s1 + $0x78] sm:$0xff]   ;;  %v886_v2 = vld [vmem:[%s1306_s1 + $0x70] sm:$0xff]   ;;  %v888_v4 = vld [vmem:[%s1306_s1 + $0x68] sm:$0xff]  }
   0x2   :  { %v885_v1 = vld [vmem:[%s1306_s1 + $0x38] sm:$0xff]   ;;  %792 = vmatprep.subr.bf16.mxu0 %v884_v0  ;;  %v887_v3 = vld [vmem:[%s1306_s1 + $0x30] sm:$0xff]   ;;  %v890_v6 = vld [vmem:[%s1306_s1 + $0x28] sm:$0xff]  }
   0x3   :  { %793 = vmatpush3.bf16.msra.mxu0 %v885_v1  ;;  %v889_v5 = vld [vmem:[%s1306_s1 + $0xb0] ss:$0 sps:$4 sm:$0xff]   ;;  %v891_v8 = vld [vmem:[%s1306_s1 + $0x60] sm:$0xff]   ;;  %v892_v9 = vld [vmem:[%s1306_s1 + $0xa8] sm:$0xff]  }
   0x4   :  { %794 = vmatprep.subr.bf16.mxu0 %v886_v2  ;;  %883 = vmatprep.subr.msk.bf16.mxu1 %vm341_vm0, %v889_v5  ;;  %v343_v7 = vsel %vm341_vm0, %v889_v5, 0  ;;  %v893_v10 = vld [vmem:[%s1306_s1 + $0x20] sm:$0xff]   ;;  %v894_v12 = vld [vmem:[%s1306_s1 + $0x58] sm:$0xff]   ;;  %v897_v15 = vld [vmem:[%s1306_s1 + $0x50] sm:$0xff]  }
   0x5   :  { %858 = vmatpush3.bf16.msra.mxu1 %v343_v7  ;;  %v895_v11 = vld [vmem:[%s1306_s1 + $0xa0] sm:$0xff]   ;;  %v898_v13 = vld [vmem:[%s1306_s1 + $0x98] sm:$0xff]   ;;  %v901_v16 = vld [vmem:[%s1306_s1 + $0x90] sm:$0xff]  }
   0x6   :  { %859 = vmatprep.subr.bf16.mxu1 %v892_v9  ;;  %v896_v14 = vld [vmem:[%s1306_s1 + $0x18] sm:$0xff]   ;;  %v899_v17 = vld [vmem:[%s1306_s1 + $0x10] sm:$0xff]   ;;  %v900_v18 = vld [vmem:[%s1306_s1 + $0x48] sm:$0xff]  }
   0x7   :  { %795 = vmatpush3.bf16.msra.mxu0 %v887_v3  ;;  %v904_v19 = vld [vmem:[%s1306_s1 + $0x88] sm:$0xff]   ;;  %v908_v21 = vld [vmem:[%s1307_s0 + $0x4] ss:$12 sps:$4 sm:$0xff]   ;;  %v915_v31 = vld [vmem:[%s1307_s0 + $0x34] ss:$12 sps:$4 sm:$0xff]  }
   0x8   :  { %796 = vmatprep.subr.bf16.mxu0 %v888_v4  ;;  %v902_v20 = vld [vmem:[%s1306_s1 + $0x8] sm:$0xff]   ;;  %v903_v22 = vld [vmem:[%s1306_s1 + $0x40] sm:$0xff]   ;;  %377 = vmatprep.mubr.bf16.mxu0 %v908_v21  ;;  %v919_v32 = vld [vmem:[%s1307_s0 + $0x50] ss:$12 sps:$4 sm:$0xff]  }
   0x9   :  { %860 = vmatpush3.bf16.msra.mxu1 %v892_v9  ;;  %v910_v23 = vld [vmem:[%s1307_s0 + $0x8] ss:$12 sps:$4 sm:$0xff]   ;;  %v909_v24 = vld [vmem:[%s1306_s1 + $0x80] sm:$0xff]   ;;  %v917_v34 = vld [vmem:[%s1307_s0 + $0x30] ss:$12 sps:$4 sm:$0xff]  }
   0xa   :  { %861 = vmatprep.subr.bf16.mxu1 %v895_v11  ;;  %871 = vmatprep.mubr.msk.bf16.mxu1 %vm322_vm1, %v910_v23  ;;  %v905_v25 = vld [vmem:[%s1306_s1] sm:$0xff]   ;;  %v912_v28 = vld [vmem:[%s1307_s0 + $0x1c] ss:$12 sps:$4 sm:$0xff]   ;;  %v920_v35 = vld [vmem:[%s1307_s0 + $0x4c] ss:$12 sps:$4 sm:$0xff]  }
   0xb   :  { %797 = vmatpush3.bf16.msra.mxu0 %v890_v6  ;;  %v906_v26 = vld [vmem:[%s1307_s0] ss:$12 sps:$4 sm:$0xff]   ;;  %v918_v29 = vld [vmem:[%s1307_s0 + $0x38] ss:$12 sps:$4 sm:$0xff]   ;;  %v926_v33 = vld [vmem:[%s1307_s0 + $0x68] ss:$12 sps:$4 sm:$0xff]  }
   0xc   :  { %798 = vmatprep.subr.bf16.mxu0 %v891_v8  ;;  %v911_v27 = vld [vmem:[%s1307_s0 + $0x20] ss:$12 sps:$4 sm:$0xff]   ;;  %v914_v30 = vld [vmem:[%s1307_s0 + $0x18] ss:$12 sps:$4 sm:$0xff]   ;;  %v922_v37 = vld [vmem:[%s1307_s0 + $0x48] ss:$12 sps:$4 sm:$0xff]  }
   0xd   :  { %862 = vmatpush3.bf16.msra.mxu1 %v895_v11  ;;  %v927_v36 = vld [vmem:[%s1307_s0 + $0x80] ss:$12 sps:$4 sm:$0xff]   ;;  %v923_v38 = vld [vmem:[%s1307_s0 + $0x64] ss:$12 sps:$4 sm:$0xff]   ;;  %v928_v40 = vld [vmem:[%s1307_s0 + $0x7c] ss:$12 sps:$4 sm:$0xff]  }
   0xe   :  { %863 = vmatprep.subr.bf16.mxu1 %v898_v13  ;;  %v925_v39 = vld [vmem:[%s1307_s0 + $0x60] ss:$12 sps:$4 sm:$0xff]   ;;  %v930_v41 = vld [vmem:[%s1307_s0 + $0x78] ss:$12 sps:$4 sm:$0xff]  }
   0xf   :  { %799 = vmatpush3.bf16.msra.mxu0 %v893_v10  ;;  %v1141_v45 = vld [vmem:[%s1308_s2] ss:$0 sm:$0xff] }
  0x10   :  { %800 = vmatprep.subr.bf16.mxu0 %v894_v12 }
  0x11   :  { %864 = vmatpush3.bf16.msra.mxu1 %v898_v13 }
  0x12   :  { %865 = vmatprep.subr.bf16.mxu1 %v901_v16 }
  0x13   :  { %801 = vmatpush3.bf16.msra.mxu0 %v896_v14 }
  0x14   :  { %802 = vmatprep.subr.bf16.mxu0 %v897_v15 }
  0x15   :  { %866 = vmatpush3.bf16.msra.mxu1 %v901_v16 }
  0x16   :  { %867 = vmatprep.subr.bf16.mxu1 %v904_v19 }
  0x17   :  { %803 = vmatpush3.bf16.msra.mxu0 %v899_v17 }
  0x18   :  { %804 = vmatprep.subr.bf16.mxu0 %v900_v18 }
  0x19   :  { %868 = vmatpush3.bf16.msra.mxu1 %v904_v19 }
  0x1a   :  { %869 = vmatprep.subr.bf16.mxu1 %v909_v24 }
  0x1b   :  { %805 = vmatpush3.bf16.msra.mxu0 %v902_v20 }
  0x1c   :  { %806 = vmatprep.subr.bf16.mxu0 %v903_v22 }
  0x1d   :  { %870 = vmatpush3.bf16.msra.mxu1 %v909_v24 }
  0x1f   :  { %807 = vmatpush3.bf16.msra.mxu0 %v905_v25 }
  0x20   :  { %872 = vmatmul.mubr.msk.bf16.vlgmr.msra.gmra.mxu1 %vm322_vm1, %v911_v27 }
  0x21   :  { %875 = vmatprep.mubr.msk.bf16.mxu1 %vm322_vm1, %v918_v29 }
  0x22   :  { %378 = vmatmul.mubr.bf16.vlgmr.msra.gmra.mxu0 %v906_v26 }
  0x23   :  { %385 = vmatprep.mubr.bf16.mxu0 %v912_v28 }
  0x28   :  { %876 = vmatmul.mubr.msk.bf16.gmra.mxu1 %vm322_vm1, %v919_v32 }
  0x29   :  { %879 = vmatprep.mubr.msk.bf16.mxu1 %vm322_vm1, %v926_v33 }
  0x2a   :  { %386 = vmatmul.mubr.bf16.gmra.mxu0 %v914_v30 }
  0x2b   :  { %393 = vmatprep.mubr.bf16.mxu0 %v915_v31 }
  0x30   :  { %880 = vmatmul.mubr.msk.bf16.gmra.mxu1 %vm322_vm1, %v927_v36 }
  0x32   :  { %394 = vmatmul.mubr.bf16.gmra.mxu0 %v917_v34 }
  0x33   :  { %401 = vmatprep.mubr.bf16.mxu0 %v920_v35 }
  0x3a   :  { %402 = vmatmul.mubr.bf16.gmra.mxu0 %v922_v37 }
  0x3b   :  { %409 = vmatprep.mubr.bf16.mxu0 %v923_v38 }
  0x42   :  { %410 = vmatmul.mubr.bf16.gmra.mxu0 %v925_v39 }
  0x43   :  { %417 = vmatprep.mubr.bf16.mxu0 %v928_v40 }
  0x4a   :  { %418 = vmatmul.mubr.bf16.gmra.mxu0 %v930_v41 }
  0xe0   :  { %v873_v43 = vpop.f32.mrf.mxu1 }
  0xe2   :  { %v808_v42 = vpop.f32.mrf.mxu0  ;;  %v460_v47 = vpop.f32.mrf.mxu1 }
  0xe4   :  { %v809_v44 = vpop.f32.mrf.mxu0  ;;  %v874_v50 = vpop.f32.mrf.mxu1 }
  0xe5   :  { %v810_v46 = vadd.f32 %v809_v44, %v808_v42 }
  0xe6   :  { %v811_v48 = vpop.f32.mrf.mxu0  ;;  %v463_v55 = vpop.f32.mrf.mxu1 }
  0xe7   :  { %v380_v49 = vadd.f32 %v810_v46, %v1141_v45 }
  0xe8   :  { %v812_v51 = vpop.f32.mrf.mxu0  ;;  %v877_v0 = vpop.f32.mrf.mxu1 }
  0xe9   :  { %v813_v52 = vadd.f32 %v812_v51, %v811_v48  ;;  %v1144_v53 = vadd.f32 %v460_v47, %v380_v49 }
  0xea   :  { %v814_v54 = vpop.f32.mrf.mxu0  ;;  %v476_v9 = vpop.f32.mrf.mxu1 }
  0xeb   :  { %v507_v56 = vmin.f32 %v1144_v53, 0.0  ;;  %v383_v57 = vadd.f32 %v813_v52, %v1141_v45  ;;  %vm591_vm2 = vcmp.gt.f32.partialorder %v1144_v53, 0.0  ;;  %v1184_v52 = vld [vmem:[%s1310_s4] ss:$0 sm:$0xff] }
  0xec   :  { %v815_v58 = vpop.f32.mrf.mxu0  ;;  %v1158_v18 = vpop.f32.mrf.mxu1 }
  0xed   :  { %v543_v59 = vmul.f32 1.442695, %v507_v56  ;;  %v816_v60 = vadd.f32 %v815_v58, %v814_v54  ;;  %v1148_v61 = vadd.f32 %v463_v55, %v383_v57  ;;  %v519_v62 = vmul.f32 0.5, %v507_v56 }
  0xee   :  { %v817_v63 = vpop.f32.mrf.mxu0  ;;  %v479_v27 = vpop.f32.mrf.mxu1 }
  0xef   :  { %v388_v1 = vadd.f32 %v816_v60, %v1141_v45  ;;  %v508_v2 = vmin.f32 %v1148_v61, 0.0  ;;  %931 = vpow2.f32 %v543_v59  ;;  %vm592_vm4 = vcmp.gt.f32.partialorder %v1148_v61, 0.0 }
  0xf0   :  { %v818_v3 = vpop.f32.mrf.mxu0  ;;  %933 = vtanh.f32 %v519_v62  ;;  %v1170_v41 = vpop.f32.mrf.mxu1 }
  0xf1   :  { %v1152_v4 = vadd.f32 %v873_v43, %v388_v1  ;;  %v545_v5 = vmul.f32 1.442695, %v508_v2  ;;  %v819_v6 = vadd.f32 %v818_v3, %v817_v63  ;;  %v520_v7 = vmul.f32 0.5, %v508_v2  ;;  %v1176_v43 = vld [vmem:[%s1309_s3] ss:$0 sm:$0xff] }
  0xf2   :  { %v820_v8 = vpop.f32.mrf.mxu0  ;;  %v492_v59 = vpop.f32.mrf.mxu1 }
  0xf3   :  { %v509_v10 = vmin.f32 %v1152_v4, 0.0  ;;  %v391_v11 = vadd.f32 %v819_v6, %v1141_v45  ;;  %935 = vpow2.f32 %v545_v5  ;;  %vm593_vm5 = vcmp.gt.f32.partialorder %v1152_v4, 0.0 }
  0xf4   :  { %v821_v12 = vpop.f32.mrf.mxu0  ;;  %937 = vtanh.f32 %v520_v7 }
  0xf5   :  { %v547_v13 = vmul.f32 1.442695, %v509_v10  ;;  %v1156_v14 = vadd.f32 %v874_v50, %v391_v11  ;;  %v822_v15 = vadd.f32 %v821_v12, %v820_v8  ;;  %v521_v16 = vmul.f32 0.5, %v509_v10 }
  0xf6   :  { %v823_v17 = vpop.f32.mrf.mxu0 }
  0xf7   :  { %v510_v19 = vmin.f32 %v1156_v14, 0.0  ;;  %v396_v20 = vadd.f32 %v822_v15, %v1141_v45  ;;  %939 = vpow2.f32 %v547_v13  ;;  %v1197_v13 = vpop.f32.mrf.mxu1  ;;  %vm594_vm6 = vcmp.gt.f32.partialorder %v1156_v14, 0.0 }
  0xf8   :  { %v824_v21 = vpop.f32.mrf.mxu0  ;;  %941 = vtanh.f32 %v521_v16 }
  0xf9   :  { %v549_v22 = vmul.f32 1.442695, %v510_v19  ;;  %v825_v23 = vadd.f32 %v824_v21, %v823_v17  ;;  %v1162_v24 = vadd.f32 %v476_v9, %v396_v20  ;;  %v522_v25 = vmul.f32 0.5, %v510_v19 }
  0xfa   :  { %v826_v26 = vpop.f32.mrf.mxu0 }
  0xfb   :  { %v511_v28 = vmin.f32 %v1162_v24, 0.0  ;;  %v399_v29 = vadd.f32 %v825_v23, %v1141_v45  ;;  %943 = vpow2.f32 %v549_v22  ;;  %vm595_vm7 = vcmp.gt.f32.partialorder %v1162_v24, 0.0 }
  0xfc   :  { %v827_v30 = vpop.f32.mrf.mxu0  ;;  %v932_v31 = vpop.eup %931  ;;  %945 = vtanh.f32 %v522_v25 }
  0xfd   :  { %v551_v32 = vmul.f32 1.442695, %v511_v28  ;;  %v828_v33 = vadd.f32 %v827_v30, %v826_v26  ;;  %v1166_v34 = vadd.f32 %v479_v27, %v399_v29  ;;  %v567_v35 = vadd.f32 1.0, %v932_v31  ;;  %v934_v38 = vpop.eup %933  ;;  %v495_v31 = vpop.f32.mrf.mxu1 }
  0xfe   :  { %v523_v36 = vmul.f32 0.5, %v511_v28  ;;  %v829_v37 = vpop.f32.mrf.mxu0 }
  0xff   :  { %v404_v39 = vadd.f32 %v828_v33, %v1141_v45  ;;  %v512_v40 = vmin.f32 %v1166_v34, 0.0  ;;  %v579_v42 = vmul.f32 %v934_v38, %v567_v35  ;;  %947 = vpow2.f32 %v551_v32 }
 0x100   :  { %v830_v44 = vpop.f32.mrf.mxu0  ;;  %v936_v46 = vpop.eup %935  ;;  %949 = vtanh.f32 %v523_v36  ;;  %vm596_vm8 = vcmp.gt.f32.partialorder %v1166_v34, 0.0 }
 0x101   :  { %v1178_v47 = vadd.f32 %v877_v0, %v404_v39  ;;  %v524_v48 = vmul.f32 0.5, %v512_v40  ;;  %v553_v49 = vmul.f32 1.442695, %v512_v40  ;;  %v831_v50 = vadd.f32 %v830_v44, %v829_v37  ;;  %v938_v56 = vpop.eup %937 }
 0x102   :  { %v603_v51 = vsel %vm591_vm2, %v1144_v53, %v579_v42  ;;  %v568_v54 = vadd.f32 1.0, %v936_v46  ;;  %v832_v55 = vpop.f32.mrf.mxu0 }
 0x103   :  { %v622_v57 = vmul.f32 %v1176_v43, %v603_v51  ;;  %v513_v58 = vmin.f32 %v1178_v47, 0.0  ;;  %951 = vpow2.f32 %v553_v49  ;;  %v407_v53 = vadd.f32 %v831_v50, %v1141_v45 }
 0x104   :  { %v580_v60 = vmul.f32 %v938_v56, %v568_v54  ;;  %v833_v62 = vpop.f32.mrf.mxu0  ;;  %v940_v63 = vpop.eup %939  ;;  %953 = vtanh.f32 %v524_v48  ;;  %vm597_vm9 = vcmp.gt.f32.partialorder %v1178_v47, 0.0 }
 0x105   :  { %v641_v0 = vadd.f32 %v1184_v52, %v622_v57  ;;  %v555_v1 = vmul.f32 1.442695, %v513_v58  ;;  %v834_v2 = vadd.f32 %v833_v62, %v832_v55  ;;  %v569_v3 = vadd.f32 1.0, %v940_v63  ;;  %v942_v9 = vpop.eup %941 }
 0x106   :  { %v604_v5 = vsel %vm592_vm4, %v1148_v61, %v580_v60  ;;  %v525_v6 = vmul.f32 0.5, %v513_v58  ;;  %v1193_v7 = vadd.f32 %v1158_v18, %v407_v53  ;;  %v835_v8 = vpop.f32.mrf.mxu0 }
 0x107   :  { %v780_v10 = vpack.c.bf16 %v641_v0, %v641_v0  ;;  %v623_v11 = vmul.f32 %v1176_v43, %v604_v5  ;;  %v412_v12 = vadd.f32 %v834_v2, %v1141_v45  ;;  %v581_v15 = vmul.f32 %v942_v9, %v569_v3 }
 0x108   :  { %955 = vpow2.f32 %v555_v1  ;;  %v514_v16 = vmin.f32 %v1193_v7, 0.0  ;;  %v836_v17 = vpop.f32.mrf.mxu0  ;;  %v944_v19 = vpop.eup %943  ;;  %vm598_vm10 = vcmp.gt.f32.partialorder %v1193_v7, 0.0 }
 0x109   :  { %702 = vst.msk [vmem:[%s1311_s5] sm:$0xf] %vm701_vm3, %v780_v10  ;;  %v642_v61 = vadd.f32 %v1184_v52, %v623_v11  ;;  %v837_v18 = vadd.f32 %v836_v17, %v835_v8  ;;  %v1206_v20 = vadd.f32 %v492_v59, %v412_v12  ;;  %v605_v21 = vsel %vm593_vm5, %v1152_v4, %v581_v15  ;;  %v946_v26 = vpop.eup %945 }
 0x10a   :  { %v570_v22 = vadd.f32 1.0, %v944_v19  ;;  %957 = vtanh.f32 %v525_v6  ;;  %v557_v23 = vmul.f32 1.442695, %v514_v16  ;;  %v838_v25 = vpop.f32.mrf.mxu0  ;;  %v624_v27 = vmul.f32 %v1176_v43, %v605_v21 }
 0x10b   :  { %v781_v28 = vpack.c.bf16 %v642_v61, %v642_v61  ;;  %v526_v29 = vmul.f32 0.5, %v514_v16  ;;  %v515_v30 = vmin.f32 %v1206_v20, 0.0  ;;  %v415_v35 = vadd.f32 %v837_v18, %v1141_v45 }
 0x10c   :  { %v582_v32 = vmul.f32 %v946_v26, %v570_v22  ;;  %v839_v33 = vpop.f32.mrf.mxu0  ;;  %v948_v36 = vpop.eup %947  ;;  %v643_v4 = vadd.f32 %v1184_v52, %v624_v27  ;;  %959 = vpow2.f32 %v557_v23  ;;  %vm599_vm11 = vcmp.gt.f32.partialorder %v1206_v20, 0.0 }
 0x10d   :  { %703 = vst.msk [vmem:[%s1311_s5 + $0x4] sm:$0xf] %vm701_vm3, %v781_v28  ;;  %v527_v37 = vmul.f32 0.5, %v515_v30  ;;  %v559_v38 = vmul.f32 1.442695, %v515_v30  ;;  %v571_v40 = vadd.f32 1.0, %v948_v36  ;;  %v840_v42 = vadd.f32 %v839_v33, %v838_v25  ;;  %v950_v48 = vpop.eup %949 }
 0x10e   :  { %v606_v39 = vsel %vm594_vm6, %v1156_v14, %v582_v32  ;;  %v1219_v44 = vadd.f32 %v495_v31, %v415_v35  ;;  %v841_v46 = vpop.f32.mrf.mxu0  ;;  %v782_v49 = vpack.c.bf16 %v643_v4, %v643_v4  ;;  %961 = vtanh.f32 %v526_v29 }
 0x10f   :  { %v625_v50 = vmul.f32 %v1176_v43, %v606_v39  ;;  %v583_v51 = vmul.f32 %v950_v48, %v571_v40  ;;  %963 = vpow2.f32 %v559_v38  ;;  %v420_v54 = vadd.f32 %v840_v42, %v1141_v45 }
 0x110   :  { %v516_v55 = vmin.f32 %v1219_v44, 0.0  ;;  %v842_v56 = vpop.f32.mrf.mxu0  ;;  %v952_v57 = vpop.eup %951  ;;  %704 = vst.msk [vmem:[%s1311_s5 + $0x8] sm:$0xf] %vm701_vm3, %v782_v49  ;;  %965 = vtanh.f32 %v527_v37  ;;  %vm600_vm12 = vcmp.gt.f32.partialorder %v1219_v44, 0.0 }
 0x111   :  { %v644_v14 = vadd.f32 %v1184_v52, %v625_v50  ;;  %v843_v58 = vadd.f32 %v842_v56, %v841_v46  ;;  %v954_v59 = vpop.eup %953  ;;  %v607_v60 = vsel %vm595_vm7, %v1162_v24, %v583_v51  ;;  %v572_v53 = vadd.f32 1.0, %v952_v57 }
 0x112   :  { %v1232_v62 = vadd.f32 %v1170_v41, %v420_v54  ;;  %v528_v63 = vmul.f32 0.5, %v516_v55  ;;  %v626_v1 = vmul.f32 %v1176_v43, %v607_v60  ;;  %v561_v2 = vmul.f32 1.442695, %v516_v55 }
 0x113   :  { %v783_v0 = vpack.c.bf16 %v644_v14, %v644_v14  ;;  %v423_v3 = vadd.f32 %v843_v58, %v1141_v45  ;;  %v584_v5 = vmul.f32 %v954_v59, %v572_v53 }
 0x114   :  { %v517_v6 = vmin.f32 %v1232_v62, 0.0  ;;  %v645_v24 = vadd.f32 %v1184_v52, %v626_v1  ;;  %967 = vpow2.f32 %v561_v2  ;;  %vm601_vm13 = vcmp.gt.f32.partialorder %v1232_v62, 0.0 }
 0x115   :  { %v956_v8 = vpop.eup %955  ;;  %705 = vst.msk [vmem:[%s1311_s5 + $0xc] sm:$0xf] %vm701_vm3, %v783_v0  ;;  %v1244_v41 = vadd.f32 %v1197_v13, %v423_v3  ;;  %v608_v45 = vsel %vm596_vm8, %v1166_v34, %v584_v5  ;;  %969 = vtanh.f32 %v528_v63 }
 0x116   :  { %v573_v9 = vadd.f32 1.0, %v956_v8  ;;  %v563_v10 = vmul.f32 1.442695, %v517_v6  ;;  %v784_v12 = vpack.c.bf16 %v645_v24, %v645_v24  ;;  %v627_v15 = vmul.f32 %v1176_v43, %v608_v45 }
 0x117   :  { %v958_v11 = vpop.eup %957  ;;  %v529_v16 = vmul.f32 0.5, %v517_v6  ;;  %v518_v17 = vmin.f32 %v1244_v41, 0.0  ;;  %vm602_vm14 = vcmp.gt.f32.partialorder %v1244_v41, 0.0 }
 0x118   :  { %v585_v19 = vmul.f32 %v958_v11, %v573_v9  ;;  %706 = vst.msk [vmem:[%s1311_s5 + $0x10] sm:$0xf] %vm701_vm3, %v784_v12  ;;  %v646_v13 = vadd.f32 %v1184_v52, %v627_v15  ;;  %971 = vpow2.f32 %v563_v10 }
 0x119   :  { %v565_v34 = vmul.f32 1.442695, %v518_v17  ;;  %v960_v61 = vpop.eup %959  ;;  %v530_v21 = vmul.f32 0.5, %v518_v17  ;;  %973 = vtanh.f32 %v529_v16 }
 0x11a   :  { %v609_v18 = vsel %vm597_vm9, %v1178_v47, %v585_v19  ;;  %v785_v23 = vpack.c.bf16 %v646_v13, %v646_v13  ;;  %v574_v25 = vadd.f32 1.0, %v960_v61 }
 0x11b   :  { %v628_v22 = vmul.f32 %v1176_v43, %v609_v18  ;;  %v962_v26 = vpop.eup %961  ;;  %975 = vpow2.f32 %v565_v34 }
 0x11c   :  { %v964_v27 = vpop.eup %963  ;;  %707 = vst.msk [vmem:[%s1311_s5 + $0x14] sm:$0xf] %vm701_vm3, %v785_v23  ;;  %v586_v29 = vmul.f32 %v962_v26, %v574_v25  ;;  %977 = vtanh.f32 %v530_v21 }
 0x11d   :  { %v647_v28 = vadd.f32 %v1184_v52, %v628_v22  ;;  %v966_v30 = vpop.eup %965  ;;  %v575_v47 = vadd.f32 1.0, %v964_v27 }
 0x11e   :  { %v610_v32 = vsel %vm598_vm10, %v1193_v7, %v586_v29 }
 0x11f   :  { %v786_v31 = vpack.c.bf16 %v647_v28, %v647_v28  ;;  %v629_v33 = vmul.f32 %v1176_v43, %v610_v32  ;;  %v587_v35 = vmul.f32 %v966_v30, %v575_v47 }
 0x121   :  { %708 = vst.msk [vmem:[%s1311_s5 + $0x18] sm:$0xf] %vm701_vm3, %v786_v31  ;;  %v968_v36 = vpop.eup %967  ;;  %v648_v4 = vadd.f32 %v1184_v52, %v629_v33  ;;  %v611_v37 = vsel %vm599_vm11, %v1206_v20, %v587_v35 }
 0x122   :  { %v970_v38 = vpop.eup %969  ;;  %v630_v39 = vmul.f32 %v1176_v43, %v611_v37  ;;  %v576_v40 = vadd.f32 1.0, %v968_v36 }
 0x123   :  { %v787_v7 = vpack.c.bf16 %v648_v4, %v648_v4 }
 0x124   :  { %v649_v42 = vadd.f32 %v1184_v52, %v630_v39  ;;  %v588_v46 = vmul.f32 %v970_v38, %v576_v40 }
 0x125   :  { %v972_v48 = vpop.eup %971  ;;  %709 = vst.msk [vmem:[%s1311_s5 + $0x1c] sm:$0xf] %vm701_vm3, %v787_v7 }
 0x126   :  { %v788_v49 = vpack.c.bf16 %v649_v42, %v649_v42  ;;  %v577_v50 = vadd.f32 1.0, %v972_v48  ;;  %v612_v20 = vsel %vm600_vm12, %v1219_v44, %v588_v46  ;;  %v974_v51 = vpop.eup %973 }
 0x127   :  { %v631_v54 = vmul.f32 %v1176_v43, %v612_v20 }
 0x128   :  { %v976_v55 = vpop.eup %975  ;;  %710 = vst.msk [vmem:[%s1311_s5 + $0x20] sm:$0xf] %vm701_vm3, %v788_v49  ;;  %v589_v56 = vmul.f32 %v974_v51, %v577_v50 }
 0x129   :  { %v650_v57 = vadd.f32 %v1184_v52, %v631_v54  ;;  %v578_v14 = vadd.f32 1.0, %v976_v55  ;;  %v978_v58 = vpop.eup %977 }
 0x12a   :  { %v613_v59 = vsel %vm601_vm13, %v1232_v62, %v589_v56 }
 0x12b   :  { %v632_v44 = vmul.f32 %v1176_v43, %v613_v59  ;;  %v789_v60 = vpack.c.bf16 %v650_v57, %v650_v57  ;;  %v590_v53 = vmul.f32 %v978_v58, %v578_v14 }
 0x12d   :  { %v651_v63 = vadd.f32 %v1184_v52, %v632_v44  ;;  %711 = vst.msk [vmem:[%s1311_s5 + $0x24] sm:$0xf] %vm701_vm3, %v789_v60  ;;  %v614_v0 = vsel %vm602_vm14, %v1244_v41, %v590_v53 }
 0x12e   :  { %v633_v1 = vmul.f32 %v1176_v43, %v614_v0 }
 0x12f   :  { %v790_v2 = vpack.c.bf16 %v651_v63, %v651_v63 }
 0x130   :  { %v652_v62 = vadd.f32 %v1184_v52, %v633_v1 }
 0x131   :  { %712 = vst.msk [vmem:[%s1311_s5 + $0x28] sm:$0xf] %vm701_vm3, %v790_v2 }
 0x132   :  { %v791_v3 = vpack.c.bf16 %v652_v62, %v652_v62 }
 0x134   :  { %713 = vst.msk [vmem:[%s1311_s5 + $0x2c] sm:$0xf] %vm701_vm3, %v791_v3 }

// kernel: net_forward.10
= control target key start
LH: loop header
LB: loop body
LE: loop exit
PB: predicated region body
PF: predicated region fallthrough
CT: control target
= control target key end

     0   :  { %v577_v0 = vmov 0   ;;  %vm282_vm0 = vcmask 392192   ;;  %vm445_vm3 = vcmask 388096   ;;  %s741_s1 = inlined_call_operand.vmem [shape: bf16[432,48], index: 1, kind: input, shape index: {}]   ;;  %s742_s0 = inlined_call_operand.vmem [shape: bf16[24,432], index: 0, kind: input, shape index: {}]   ;;  %s743_s2 = inlined_call_operand.vmem [shape: f32[1,48], index: 2, kind: input, shape index: {}]   ;;  %s744_s3 = inlined_call_operand.vmem [shape: f32[1,48], index: 3, kind: input, shape index: {}]   ;;  %s745_s4 = inlined_call_operand.vmem [shape: f32[1,48], index: 4, kind: input, shape index: {}]   ;;  %s746_s5 = inlined_call_operand.vmem [shape: bf16[24,48], index: 5, kind: output, shape index: {}]  }
   0x1   :  { %337 = vmatprep.subr.bf16.mxu1 %v577_v0  ;;  %v528_v1 = vld [vmem:[%s741_s1 + $0x78] sm:$0xff]   ;;  %v531_v4 = vld [vmem:[%s741_s1 + $0x70] sm:$0xff]   ;;  %v534_v7 = vld [vmem:[%s741_s1 + $0x68] sm:$0xff]  }
   0x2   :  { %v529_v2 = vld [vmem:[%s741_s1 + $0xb8] sm:$0xff]   ;;  %499 = vmatprep.subr.bf16.mxu0 %v528_v1  ;;  %v532_v5 = vld [vmem:[%s741_s1 + $0xb0] sm:$0xff]   ;;  %v535_v8 = vld [vmem:[%s741_s1 + $0xa8] sm:$0xff]  }
   0x3   :  { %v530_v3 = vld [vmem:[%s741_s1 + $0x38] sm:$0xff]   ;;  %338 = vmatpush1.bf16.msra.mxu1 %v529_v2  ;;  %v533_v6 = vld [vmem:[%s741_s1 + $0x30] sm:$0xff]   ;;  %v536_v9 = vld [vmem:[%s741_s1 + $0x28] sm:$0xff]  }
   0x4   :  { %500 = vmatpush3.bf16.msra.mxu0 %v530_v3  ;;  %339 = vmatprep.subr.bf16.mxu1 %v577_v0  ;;  %v537_v10 = vld [vmem:[%s741_s1 + $0x60] sm:$0xff]   ;;  %v540_v13 = vld [vmem:[%s741_s1 + $0x58] sm:$0xff]   ;;  %v543_v16 = vld [vmem:[%s741_s1 + $0x50] sm:$0xff]  }
   0x5   :  { %501 = vmatprep.subr.bf16.mxu0 %v531_v4  ;;  %v538_v11 = vld [vmem:[%s741_s1 + $0xa0] sm:$0xff]   ;;  %v541_v14 = vld [vmem:[%s741_s1 + $0x98] sm:$0xff]   ;;  %v544_v17 = vld [vmem:[%s741_s1 + $0x90] sm:$0xff]  }
   0x6   :  { %v539_v12 = vld [vmem:[%s741_s1 + $0x20] sm:$0xff]   ;;  %v542_v15 = vld [vmem:[%s741_s1 + $0x18] sm:$0xff]   ;;  %v545_v18 = vld [vmem:[%s741_s1 + $0x10] sm:$0xff]  }
   0x7   :  { %340 = vmatpush1.bf16.msra.mxu1 %v532_v5  ;;  %v546_v19 = vld [vmem:[%s741_s1 + $0x48] sm:$0xff]   ;;  %v549_v22 = vld [vmem:[%s741_s1 + $0x40] sm:$0xff]   ;;  %v555_v29 = vld [vmem:[%s741_s1 + $0xd0] sm:$0xff]  }
   0x8   :  { %502 = vmatpush3.bf16.msra.mxu0 %v533_v6  ;;  %341 = vmatprep.subr.bf16.mxu1 %v577_v0  ;;  %v547_v20 = vld [vmem:[%s741_s1 + $0x88] sm:$0xff]   ;;  %v554_v23 = vld [vmem:[%s742_s0 + $0x4] ss:$16 sps:$4 sm:$0xff]   ;;  %v552_v28 = vld [vmem:[%s742_s0] ss:$16 sps:$4 sm:$0xff]  }
   0x9   :  { %503 = vmatprep.subr.bf16.mxu0 %v534_v7  ;;  %v548_v21 = vld [vmem:[%s741_s1 + $0x8] sm:$0xff]   ;;  %v550_v24 = vld [vmem:[%s741_s1 + $0x80] sm:$0xff]   ;;  %321 = vmatprep.mubr.bf16.mxu0 %v554_v23 }
   0xa   :  { %v551_v25 = vld [vmem:[%s741_s1] sm:$0xff]   ;;  %v562_v27 = vld [vmem:[%s742_s0 + $0xc] ss:$16 sps:$4 sm:$0xff]   ;;  %v560_v35 = vld [vmem:[%s742_s0 + $0x8] ss:$16 sps:$4 sm:$0xff]  }
   0xb   :  { %342 = vmatpush1.bf16.msra.mxu1 %v535_v8  ;;  %v25_v26 = vld [vmem:[%s742_s0 + $0x20] sm:$0xff]  ;;  %489 = vmatprep.mubr.msk.bf16.mxu1 %vm282_vm0, %v562_v27  ;;  %v556_v31 = vld [vmem:[%s741_s1 + $0xc8] sm:$0xff]  }
   0xc   :  { %504 = vmatpush3.bf16.msra.mxu0 %v536_v9  ;;  %343 = vmatprep.subr.bf16.mxu1 %v577_v0  ;;  %v459_v30 = vcombine.high %v25_v26, %v25_v26  ;;  %v458_v32 = vcombine.low %v25_v26, %v25_v26  ;;  %v559_v33 = vld [vmem:[%s741_s1 + $0xc0] sm:$0xff]   ;;  %v26_v34 = vld [vmem:[%s742_s0 + $0x28] sm:$0xff] }
   0xd   :  { %505 = vmatprep.subr.bf16.mxu0 %v537_v10  ;;  %v461_v36 = vcombine.high %v26_v34, %v26_v34  ;;  %v460_v37 = vcombine.low %v26_v34, %v26_v34  ;;  %v453_v43 = vld [vmem:[%s743_s2] ss:$0 sm:$0xff] }
   0xf   :  { %344 = vmatpush1.bf16.msra.mxu1 %v538_v11 }
  0x10   :  { %506 = vmatpush3.bf16.msra.mxu0 %v539_v12  ;;  %345 = vmatprep.subr.bf16.mxu1 %v577_v0 }
  0x11   :  { %507 = vmatprep.subr.bf16.mxu0 %v540_v13  ;;  %v491_v13 = vld [vmem:[%s744_s3] ss:$0 sm:$0xff] }
  0x13   :  { %346 = vmatpush1.bf16.msra.mxu1 %v541_v14 }
  0x14   :  { %508 = vmatpush3.bf16.msra.mxu0 %v542_v15  ;;  %347 = vmatprep.subr.bf16.mxu1 %v577_v0 }
  0x15   :  { %509 = vmatprep.subr.bf16.mxu0 %v543_v16  ;;  %v492_v16 = vld [vmem:[%s745_s4] ss:$0 sm:$0xff] }
  0x17   :  { %348 = vmatpush1.bf16.msra.mxu1 %v544_v17 }
  0x18   :  { %510 = vmatpush3.bf16.msra.mxu0 %v545_v18  ;;  %349 = vmatprep.subr.bf16.mxu1 %v577_v0 }
  0x19   :  { %511 = vmatprep.subr.bf16.mxu0 %v546_v19 }
  0x1b   :  { %350 = vmatpush1.bf16.msra.mxu1 %v547_v20 }
  0x1c   :  { %512 = vmatpush3.bf16.msra.mxu0 %v548_v21  ;;  %351 = vmatprep.subr.bf16.mxu1 %v577_v0 }
  0x1d   :  { %513 = vmatprep.subr.bf16.mxu0 %v549_v22 }
  0x1f   :  { %352 = vmatpush1.bf16.msra.mxu1 %v550_v24 }
  0x20   :  { %514 = vmatpush3.bf16.msra.mxu0 %v551_v25  ;;  %363 = vmatprep.subr.bf16.mxu1 %v577_v0 }
  0x23   :  { %322 = vmatmul.mubr.bf16.vlgmr.msra.gmra.mxu0 %v552_v28  ;;  %364 = vmatpush2.bf16.msra.mxu1 %v555_v29 }
  0x24   :  { %365 = vmatprep.subr.bf16.mxu1 %v577_v0  ;;  %329 = vmatprep.mubr.bf16.mxu0 %v459_v30 }
  0x27   :  { %366 = vmatpush2.bf16.msra.mxu1 %v556_v31 }
  0x28   :  { %367 = vmatprep.subr.bf16.mxu1 %v577_v0 }
  0x2b   :  { %330 = vmatmul.mubr.bf16.gmra.mxu0 %v458_v32  ;;  %368 = vmatpush2.bf16.msra.mxu1 %v559_v33 }
  0x2e   :  { %370 = vmatmul.mubr.bf16.vlgmr.msra.gmra.mxu1 %v560_v35 }
  0x2f   :  { %490 = vmatprep.mubr.msk.bf16.mxu1 %vm282_vm0, %v461_v36 }
  0x36   :  { %378 = vmatmul.mubr.bf16.gmra.mxu1 %v460_v37 }
  0xe3   :  { %v515_v38 = vpop.f32.mrf.mxu0 }
  0xe5   :  { %v516_v39 = vpop.f32.mrf.mxu0 }
  0xe6   :  { %v517_v41 = vadd.f32 %v516_v39, %v515_v38 }
  0xe7   :  { %v518_v40 = vpop.f32.mrf.mxu0 }
  0xe8   :  { %v324_v47 = vadd.f32 %v517_v41, %v453_v43 }
  0xe9   :  { %v519_v42 = vpop.f32.mrf.mxu0 }
  0xea   :  { %v520_v45 = vadd.f32 %v519_v42, %v518_v40 }
  0xeb   :  { %v521_v44 = vpop.f32.mrf.mxu0 }
  0xec   :  { %v327_v55 = vadd.f32 %v520_v45, %v453_v43 }
  0xed   :  { %v522_v46 = vpop.f32.mrf.mxu0 }
  0xee   :  { %v371_v48 = vpop.f32.mrf.mxu1  ;;  %v523_v52 = vadd.f32 %v522_v46, %v521_v44 }
  0xef   :  { %v372_v49 = vadd.f32 %v371_v48, %v324_v47  ;;  %v524_v50 = vpop.f32.mrf.mxu0 }
  0xf0   :  { %v373_v51 = vpop.f32.mrf.mxu1  ;;  %v332_v62 = vadd.f32 %v523_v52, %v453_v43 }
  0xf1   :  { %v385_v53 = vmin.f32 %v372_v49, 0.0  ;;  %v525_v54 = vpop.f32.mrf.mxu0  ;;  %vm406_vm1 = vcmp.gt.f32.partialorder %v372_v49, 0.0 }
  0xf2   :  { %v374_v56 = vpop.f32.mrf.mxu1 }
  0xf3   :  { %v394_v57 = vmul.f32 1.442695, %v385_v53  ;;  %v375_v58 = vadd.f32 %v374_v56, %v327_v55  ;;  %v388_v59 = vmul.f32 0.5, %v385_v53 }
  0xf4   :  { %v376_v60 = vpop.f32.mrf.mxu1 }
  0xf5   :  { %v386_v61 = vmin.f32 %v375_v58, 0.0  ;;  %565 = vpow2.f32 %v394_v57  ;;  %vm407_vm2 = vcmp.gt.f32.partialorder %v375_v58, 0.0 }
  0xf6   :  { %v379_v63 = vpop.f32.mrf.mxu1  ;;  %567 = vtanh.f32 %v388_v59 }
  0xf7   :  { %v396_v0 = vmul.f32 1.442695, %v386_v61  ;;  %v380_v1 = vadd.f32 %v379_v63, %v332_v62  ;;  %v389_v2 = vmul.f32 0.5, %v386_v61 }
  0xf8   :  { %v381_v3 = vpop.f32.mrf.mxu1 }
  0xf9   :  { %v387_v4 = vmin.f32 %v380_v1, 0.0  ;;  %569 = vpow2.f32 %v396_v0  ;;  %vm408_vm4 = vcmp.gt.f32.partialorder %v380_v1, 0.0 }
  0xfa   :  { %v382_v5 = vpop.f32.mrf.mxu1  ;;  %571 = vtanh.f32 %v389_v2 }
  0xfb   :  { %v398_v6 = vmul.f32 1.442695, %v387_v4  ;;  %v390_v7 = vmul.f32 0.5, %v387_v4 }
  0xfc   :  { %v383_v8 = vpop.f32.mrf.mxu1 }
  0xfd   :  { %573 = vpow2.f32 %v398_v6 }
  0xfe   :  { %575 = vtanh.f32 %v390_v7 }
 0x102   :  { %v566_v9 = vpop.eup %565 }
 0x103   :  { %v400_v10 = vadd.f32 1.0, %v566_v9  ;;  %v568_v11 = vpop.eup %567 }
 0x105   :  { %v403_v12 = vmul.f32 %v568_v11, %v400_v10 }
 0x106   :  { %v570_v14 = vpop.eup %569 }
 0x107   :  { %v409_v15 = vsel %vm406_vm1, %v372_v49, %v403_v12  ;;  %v401_v17 = vadd.f32 1.0, %v570_v14  ;;  %v572_v18 = vpop.eup %571 }
 0x108   :  { %v419_v19 = vmul.f32 %v491_v13, %v409_v15 }
 0x109   :  { %v404_v20 = vmul.f32 %v572_v18, %v401_v17 }
 0x10a   :  { %v574_v21 = vpop.eup %573  ;;  %v429_v22 = vadd.f32 %v492_v16, %v419_v19 }
 0x10b   :  { %v410_v23 = vsel %vm407_vm2, %v375_v58, %v404_v20  ;;  %v402_v24 = vadd.f32 1.0, %v574_v21  ;;  %v576_v25 = vpop.eup %575 }
 0x10c   :  { %v496_v26 = vpack.c.bf16 %v429_v22, %v429_v22  ;;  %v420_v27 = vmul.f32 %v491_v13, %v410_v23 }
 0x10d   :  { %v405_v28 = vmul.f32 %v576_v25, %v402_v24 }
 0x10e   :  { %446 = vst.msk [vmem:[%s746_s5] sm:$0xf] %vm445_vm3, %v496_v26  ;;  %v430_v29 = vadd.f32 %v492_v16, %v420_v27 }
 0x10f   :  { %v411_v30 = vsel %vm408_vm4, %v380_v1, %v405_v28 }
 0x110   :  { %v497_v31 = vpack.c.bf16 %v430_v29, %v430_v29  ;;  %v421_v32 = vmul.f32 %v491_v13, %v411_v30 }
 0x112   :  { %447 = vst.msk [vmem:[%s746_s5 + $0x4] sm:$0xf] %vm445_vm3, %v497_v31  ;;  %v431_v33 = vadd.f32 %v492_v16, %v421_v32 }
 0x114   :  { %v498_v34 = vpack.c.bf16 %v431_v33, %v431_v33 }
 0x116   :  { %448 = vst.msk [vmem:[%s746_s5 + $0x8] sm:$0xf] %vm445_vm3, %v498_v34 }

// kernel: net_forward.11
= control target key start
LH: loop header
LB: loop body
LE: loop exit
PB: predicated region body
PF: predicated region fallthrough
CT: control target
= control target key end

     0   :  { %v107_v29 = vlaneseq  ;;  %v827_v32 = vmov 1966171168   ;;  %v828_v36 = vmov 0.0   ;;  %s1002_s0 = inlined_call_operand.vmem [shape: bf16[2,576], index: 0, kind: input, shape index: {}]   ;;  %s1003_s1 = inlined_call_operand.vmem [shape: bf16[576,100], index: 1, kind: input, shape index: {}]   ;;  %s1004_s2 = inlined_call_operand.vmem [shape: f32[1,100], index: 2, kind: input, shape index: {}]   ;;  %s1005_s3 = inlined_call_operand.vmem [shape: bf16[100,3], index: 3, kind: input, shape index: {}]   ;;  %s1006_s4 = inlined_call_operand.vmem [shape: f32[1,3], index: 4, kind: input, shape index: {}]   ;;  %s1007_s5 = inlined_call_operand.hbm [shape: f32[2,3], index: 5, kind: output, shape index: {}]  }
   0x1   :  { %v757_v0 = vld [vmem:[%s1003_s1 + $0x78] sm:$0xff]   ;;  %v761_v4 = vld [vmem:[%s1003_s1 + $0x70] sm:$0xff]   ;;  %v765_v8 = vld [vmem:[%s1003_s1 + $0x68] sm:$0xff]   ;;  %v105_v33 = vunpack.c.l.s4 %v827_v32 }
   0x2   :  { %v758_v1 = vld [vmem:[%s1003_s1 + $0x38] sm:$0xff]   ;;  %666 = vmatprep.subr.bf16.mxu0 %v757_v0  ;;  %v762_v5 = vld [vmem:[%s1003_s1 + $0x30] sm:$0xff]   ;;  %v766_v9 = vld [vmem:[%s1003_s1 + $0x28] sm:$0xff]   ;;  %v108_v34 = vshrl.u32 %v107_v29, 7 }
   0x3   :  { %v759_v2 = vld [vmem:[%s1003_s1 + $0xf8] sm:$0xff]   ;;  %667 = vmatpush3.bf16.msra.mxu0 %v758_v1  ;;  %v763_v6 = vld [vmem:[%s1003_s1 + $0xf0] sm:$0xff]   ;;  %v767_v10 = vld [vmem:[%s1003_s1 + $0xe8] sm:$0xff]   ;;  %v106_v37 = vunpack.c.0.s8 %v105_v33 }
   0x4   :  { %v760_v3 = vld [vmem:[%s1003_s1 + $0xb8] sm:$0xff]   ;;  %688 = vmatprep.subr.bf16.mxu1 %v759_v2  ;;  %668 = vmatprep.subr.bf16.mxu0 %v761_v4  ;;  %v764_v7 = vld [vmem:[%s1003_s1 + $0xb0] sm:$0xff]   ;;  %v768_v11 = vld [vmem:[%s1003_s1 + $0xa8] sm:$0xff]  }
   0x5   :  { %689 = vmatpush3.bf16.msra.mxu1 %v760_v3  ;;  %v769_v12 = vld [vmem:[%s1003_s1 + $0x60] sm:$0xff]   ;;  %v773_v16 = vld [vmem:[%s1003_s1 + $0x58] sm:$0xff]   ;;  %v777_v20 = vld [vmem:[%s1003_s1 + $0x50] sm:$0xff]   ;;  %v109_v39 = vsub.s32 %v106_v37, %v108_v34 }
   0x6   :  { %690 = vmatprep.subr.bf16.mxu1 %v763_v6  ;;  %v770_v13 = vld [vmem:[%s1003_s1 + $0x20] sm:$0xff]   ;;  %v774_v17 = vld [vmem:[%s1003_s1 + $0x18] sm:$0xff]   ;;  %v778_v21 = vld [vmem:[%s1003_s1 + $0x10] sm:$0xff]  }
   0x7   :  { %669 = vmatpush3.bf16.msra.mxu0 %v762_v5  ;;  %v771_v14 = vld [vmem:[%s1003_s1 + $0xe0] sm:$0xff]   ;;  %v775_v18 = vld [vmem:[%s1003_s1 + $0xd8] sm:$0xff]   ;;  %v779_v22 = vld [vmem:[%s1003_s1 + $0xd0] sm:$0xff]  }
   0x8   :  { %670 = vmatprep.subr.bf16.mxu0 %v765_v8  ;;  %v772_v15 = vld [vmem:[%s1003_s1 + $0xa0] sm:$0xff]   ;;  %v776_v19 = vld [vmem:[%s1003_s1 + $0x98] sm:$0xff]   ;;  %v780_v23 = vld [vmem:[%s1003_s1 + $0x90] sm:$0xff]  }
   0x9   :  { %691 = vmatpush3.bf16.msra.mxu1 %v764_v7  ;;  %v781_v24 = vld [vmem:[%s1003_s1 + $0x48] sm:$0xff]   ;;  %v785_v28 = vld [vmem:[%s1003_s1 + $0x40] sm:$0xff]  }
   0xa   :  { %692 = vmatprep.subr.bf16.mxu1 %v767_v10  ;;  %v782_v25 = vld [vmem:[%s1003_s1 + $0x8] sm:$0xff]   ;;  %v786_v30 = vld [vmem:[%s1003_s1] sm:$0xff]  }
   0xb   :  { %671 = vmatpush3.bf16.msra.mxu0 %v766_v9  ;;  %v783_v26 = vld [vmem:[%s1003_s1 + $0xc8] sm:$0xff]   ;;  %v787_v31 = vld [vmem:[%s1003_s1 + $0xc0] sm:$0xff]  }
   0xc   :  { %672 = vmatprep.subr.bf16.mxu0 %v769_v12  ;;  %v784_v27 = vld [vmem:[%s1003_s1 + $0x88] sm:$0xff]   ;;  %v789_v35 = vld [vmem:[%s1003_s1 + $0x80] sm:$0xff]  }
   0xd   :  { %693 = vmatpush3.bf16.msra.mxu1 %v768_v11  ;;  %v22_v38 = vld [vmem:[%s1002_s0] sm:$0x1f] }
   0xe   :  { %694 = vmatprep.subr.bf16.mxu1 %v771_v14  ;;  %v110_v40 = vrot.slane %v22_v38, %v109_v39 }
   0xf   :  { %673 = vmatpush3.bf16.msra.mxu0 %v770_v13 }
  0x10   :  { %674 = vmatprep.subr.bf16.mxu0 %v773_v16  ;;  %v118_v41 = vcombine.high %v110_v40, %v110_v40  ;;  %v125_v42 = vrot.slane %v110_v40, %v109_v39 }
  0x11   :  { %695 = vmatpush3.bf16.msra.mxu1 %v772_v15 }
  0x12   :  { %696 = vmatprep.subr.bf16.mxu1 %v775_v18 }
  0x13   :  { %675 = vmatpush3.bf16.msra.mxu0 %v774_v17 }
  0x14   :  { %676 = vmatprep.subr.bf16.mxu0 %v777_v20 }
  0x15   :  { %697 = vmatpush3.bf16.msra.mxu1 %v776_v19 }
  0x16   :  { %698 = vmatprep.subr.bf16.mxu1 %v779_v22 }
  0x17   :  { %677 = vmatpush3.bf16.msra.mxu0 %v778_v21 }
  0x18   :  { %678 = vmatprep.subr.bf16.mxu0 %v781_v24 }
  0x19   :  { %699 = vmatpush3.bf16.msra.mxu1 %v780_v23 }
  0x1a   :  { %700 = vmatprep.subr.bf16.mxu1 %v783_v26 }
  0x1b   :  { %679 = vmatpush3.bf16.msra.mxu0 %v782_v25 }
  0x1c   :  { %680 = vmatprep.subr.bf16.mxu0 %v785_v28 }
  0x1d   :  { %701 = vmatpush3.bf16.msra.mxu1 %v784_v27 }
  0x1e   :  { %702 = vmatprep.subr.bf16.mxu1 %v787_v31 }
  0x1f   :  { %681 = vmatpush3.bf16.msra.mxu0 %v786_v30 }
  0x20   :  { %723 = vmatprep.subr.bf16.mxu0 %v828_v36 }
  0x21   :  { %703 = vmatpush3.bf16.msra.mxu1 %v789_v35 }
  0x22   :  { %735 = vmatprep.subr.bf16.mxu1 %v828_v36 }
  0x23   :  { %10 = vsyncpa [#allocation3], 0  ;;  %v139_v43 = vrot.slane %v118_v41, %v109_v39  ;;  %v790_v44 = vld [vmem:[%s1003_s1 + $0x118] sm:$0xff]   ;;  %v140_v45 = vcombine.high %v125_v42, %v125_v42  ;;  %v791_v47 = vld [vmem:[%s1003_s1 + $0x110] sm:$0xff]   ;;  %vm829_vm0 = vmmov 0   ;;  %v103_v48 = vcombine.high %v22_v38, %v22_v38  ;;  %s830_s6 = smov [#allocation2]  }
  0x24   :  { %v792_v49 = vld [vmem:[%s1003_s1 + $0x108] sm:$0xff]   ;;  %v793_v51 = vld [vmem:[%s1003_s1 + $0x100] sm:$0xff]   ;;  %vm362_vm1 = vcmask 523264   ;;  %v794_v53 = vld [vmem:[%s1005_s3 + $0x30] ss:$0 sps:$4 sm:$0x33]  }
  0x25   :  { %398 = vmatprep.mubr.bf16.mxu0 %v139_v43  ;;  %v141_v46 = vcombine.high %v139_v43, %v139_v43  ;;  %v117_v50 = vrot.slane %v103_v48, %v109_v39  ;;  %vm559_vm2 = vcmask 1041408   ;;  %v795_v55 = vld [vmem:[%s1005_s3 + $0x28] sm:$0xff]   ;;  %v796_v56 = vld [vmem:[%s1005_s3 + $0x20] sm:$0xff]   ;;  %v797_v57 = vld [vmem:[%s1005_s3 + $0x18] sm:$0xff]   ;;  %vm555_vm4 = vcmask 818176   ;;  %s611_s7 = sshll.u32 %s830_s6, 4  ;;  %s612_s7 = int_to_ptr.vmem [resolvable:$true] %s611_s7 }
  0x26   :  { %399 = vmatmul.mubr.bf16.vlgmr.msra.gmra.mxu0 %v125_v42  ;;  %v561_v54 = vsel %vm559_vm2, %v794_v53, 0  ;;  %v798_v58 = vld [vmem:[%s1005_s3 + $0x10] sm:$0xff]   ;;  %v799_v59 = vld [vmem:[%s1005_s3 + $0x8] sm:$0xff]   ;;  %v800_v60 = vld [vmem:[%s1005_s3] sm:$0xff]   ;;  %vm603_vm5 = vcmask 17408   ;;  %s805_s8 = scalar_lea.vmem %s612_s7, 32  ;;  %p810_p1 = scmp.lt.s32.totalorder %s612_s7, %s612_s7 }
  0x27   :  { %438 = vmatprep.mubr.bf16.mxu1 %v141_v46  ;;  %724 = vmatpush3.bf16.msra.mxu0 %v790_v44  ;;  %v132_v52 = vrot.slane %v117_v50, %v109_v39  ;;  %v619_v5 = vld [vmem:[%s1004_s2] ss:$0 sm:$0xff]  ;;  %p806_p0 = scmp.ne.s32.totalorder %s612_s7, %s805_s8  ;;  %p811_p2 = scmp.lt.s32.totalorder %s805_s8, %s805_s8 }
  0x28   :  { %439 = vmatmul.mubr.bf16.vlgmr.msra.gmra.mxu1 %v140_v45  ;;  %725 = vmatprep.subr.bf16.mxu0 %v828_v36  ;;  %v657_v24 = vld [vmem:[%s1006_s4] ss:$0 sm:$0xff] }
  0x29   :  { %731 = vmatprep.mubr.msk.bf16.mxu0 %vm829_vm0, %v828_v36  ;;  %749 = vmatprep.mubr.msk.bf16.mxu1 %vm829_vm0, %v828_v36  ;;  %p812_p3 = por %p811_p2, %p810_p1 }
  0x2a   :  { %736 = vmatpush3.bf16.msra.mxu1 %v561_v54 }
  0x2b   :  { %726 = vmatpush3.bf16.msra.mxu0 %v791_v47  ;;  %737 = vmatprep.subr.bf16.mxu1 %v828_v36  ;;  %p813_p4 = pnand %p812_p3, %p806_p0 }
  0x2c   :  { %727 = vmatprep.subr.bf16.mxu0 %v828_v36 }
  0x2e   :  { %738 = vmatpush3.bf16.msra.mxu1 %v795_v55 }
  0x2f   :  { %728 = vmatpush3.bf16.msra.mxu0 %v792_v49  ;;  %739 = vmatprep.subr.bf16.mxu1 %v828_v36 }
  0x30   :  { %729 = vmatprep.subr.bf16.mxu0 %v828_v36 }
  0x32   :  { %740 = vmatpush3.bf16.msra.mxu1 %v796_v56 }
  0x33   :  { %730 = vmatpush3.bf16.msra.mxu0 %v793_v51  ;;  %741 = vmatprep.subr.bf16.mxu1 %v828_v36 }
  0x36   :  { %732 = vmatmul.mubr.msk.bf16.vlgmr.msra.gmra.mxu0 %vm362_vm1, %v132_v52  ;;  %742 = vmatpush3.bf16.msra.mxu1 %v797_v57 }
  0x37   :  { %743 = vmatprep.subr.bf16.mxu1 %v828_v36 }
  0x3a   :  { %744 = vmatpush3.bf16.msra.mxu1 %v798_v58 }
  0x3b   :  { %745 = vmatprep.subr.bf16.mxu1 %v828_v36 }
  0x3e   :  { %746 = vmatpush3.bf16.msra.mxu1 %v799_v59 }
  0x3f   :  { %747 = vmatprep.subr.bf16.mxu1 %v828_v36 }
  0x42   :  { %748 = vmatpush3.bf16.msra.mxu1 %v800_v60 }
  0xe6   :  { %v682_v61 = vpop.f32.mrf.mxu0 }
  0xe8   :  { %v683_v62 = vpop.f32.mrf.mxu0  ;;  %v704_v63 = vpop.f32.mrf.mxu1 }
  0xe9   :  { %v684_v4 = vadd.f32 %v683_v62, %v682_v61 }
  0xea   :  { %v685_v0 = vpop.f32.mrf.mxu0  ;;  %v705_v1 = vpop.f32.mrf.mxu1 }
  0xeb   :  { %v401_v7 = vadd.f32 %v684_v4, %v619_v5  ;;  %v706_v8 = vadd.f32 %v705_v1, %v704_v63 }
  0xec   :  { %v686_v2 = vpop.f32.mrf.mxu0  ;;  %v707_v3 = vpop.f32.mrf.mxu1 }
  0xed   :  { %v441_v9 = vadd.f32 %v706_v8, %v401_v7 }
  0xee   :  { %v708_v6 = vpop.f32.mrf.mxu1 }
  0xf6   :  { %v480_v10 = vpop.f32.mrf.mxu0 }
  0xf7   :  { %v481_v11 = vadd.f32 %v480_v10, %v441_v9 }
  0xf8   :  { %v733_v12 = vpop.f32.mrf.mxu0 }
  0xf9   :  { %v486_v13 = vmin.f32 %v481_v11, 0.0  ;;  %vm493_vm3 = vcmp.gt.f32.partialorder %v481_v11, 0.0 }
  0xfa   :  { %v483_v14 = vpop.f32.mrf.mxu0 }
  0xfb   :  { %v489_v15 = vmul.f32 1.442695, %v486_v13  ;;  %v487_v16 = vmul.f32 0.5, %v486_v13 }
  0xfc   :  { %v734_v17 = vpop.f32.mrf.mxu0 }
  0xfd   :  { %801 = vpow2.f32 %v489_v15 }
  0xfe   :  { %803 = vtanh.f32 %v487_v16 }
 0x10a   :  { %v802_v18 = vpop.eup %801 }
 0x10b   :  { %v491_v19 = vadd.f32 1.0, %v802_v18  ;;  %v804_v20 = vpop.eup %803 }
 0x10d   :  { %v492_v21 = vmul.f32 %v804_v20, %v491_v19 }
 0x10f   :  { %v494_v22 = vsel %vm493_vm3, %v481_v11, %v492_v21 }
 0x110   :  { %v495_v23 = vpack.c.bf16 %v494_v22, %v494_v22 }
 0x112   :  { %750 = vmatmul.mubr.msk.bf16.vlgmr.msra.gmra.mxu1 %vm555_vm4, %v495_v23 }
 0x1d2   :  { %v597_v25 = vpop.f32.mrf.mxu1 }
 0x1d3   :  { %v598_v26 = vadd.f32 %v657_v24, %v597_v25 }
 0x1d4   :  { %v751_v27 = vpop.f32.mrf.mxu1 }
 0x1d5   :  { %604 = vst.msk [vmem:[#allocation2] sm:$0x3] %vm603_vm5, %v598_v26 }
 0x1d6   :  { %v600_v28 = vpop.f32.mrf.mxu1 }
 0x1d7   :  { %816 = shalt.err (!%p813_p4)
}
 0x1d8   :  { %614 = dma.vmem_to_hbm [thread:$0]  %s612_s7, 32, %s1007_s5, [#allocation3]   ;;  %v752_v29 = vpop.f32.mrf.mxu1 }
 0x1d9   :  { %825 = dma.done.wait [#allocation3], 32  }
 0x1da   :  { %826 = vsyncadd [#allocation3], 4294967264 }
 0x1db   :  { %618 = vsyncpa [#allocation3], 1 }

</bundles_post_ra>
